<compile_context>
chip_gen: v7x
topology: tpu7x:2x2x1
jax: 0.10.0
libtpu: 0.0.40
codegen_flags: <defaults>
</compile_context>

<pallas_src>
import jax
import jax.numpy as jnp
import numpy as np
from jax import lax
from jax.experimental import pallas as pl
from jax.experimental.pallas import tpu as pltpu

COMPUTE_DTYPE = jnp.bfloat16   # matmul-input dtype (f32 accumulation).
                               # (Optional v7x-only fp8 path from the review is
                               #  not taken: not drop-in for v5e/v6e.)
X1_DTYPE = jnp.float32         # review: bf16 is fine if the consumer tolerates it
N_CLASSES = 10


# ----------------------------- Pallas kernels -----------------------------

def _conv_relu_pool_kernel(x_ref, w_ref, b_ref, o_ref):
    """Fused VALID KxK conv + bias + ReLU + 2x2/s2 max-pool for ONE image.

    x_ref : (H, W*Ci)            raw NHWC image rows flattened onto lanes
    w_ref : (K, W*Ci, 2*PW*Co)   banded weights; col = dx*(PW*Co) + pw*Co + co
                                 with conv column ow = 2*pw + dx
    b_ref : (1, PW*Co)           f32 bias tiled over pw
    o_ref : (PH, PW*Co)          pooled activations; col = pw*Co + co
    """
    kk, _, cols = w_ref.shape
    ph, half = o_ref.shape          # pooled rows / pooled row width
    oh = 2 * ph                     # conv rows before pooling

    # Valid conv: the banded RHS already holds the (kw, ci) contraction and
    # the dx/pw column split, so only the kh sum remains -> K matmuls over
    # contiguous row windows of the image.  bf16 inputs, f32 accumulation.
    xv = x_ref[...]
    acc = jnp.zeros((oh, cols), jnp.float32)
    for kh in range(kk):            # static unroll (K = 5)
        acc = acc + jnp.dot(xv[kh:kh + oh, :], w_ref[kh],
                            preferred_element_type=jnp.float32)

    # Vertical pool half: rows (2r, 2r+1) -> r via two exact 0/1 selection
    # matmuls (plain MXU work; avoids strided / reshape relayouts).
    r_i = lax.broadcasted_iota(jnp.int32, (ph, oh), 0)
    c_i = lax.broadcasted_iota(jnp.int32, (ph, oh), 1)
    even = jnp.dot((c_i == 2 * r_i).astype(jnp.float32), acc,
                   preferred_element_type=jnp.float32)
    odd = jnp.dot((c_i == 2 * r_i + 1).astype(jnp.float32), acc,
                  preferred_element_type=jnp.float32)
    m = jnp.maximum(even, odd)

    # Horizontal pool half: columns are ordered [dx, pw, co], so it is a max
    # of two contiguous lane slices.
    m = jnp.maximum(m[:, :half], m[:, half:])

    # Bias + ReLU once, on the pooled tensor (the bias is constant inside a
    # pool window and ReLU is monotone, so this commutes with the maxes).
    o_ref[...] = jnp.maximum(m + b_ref[...], 0.0).astype(o_ref.dtype)


def _fc_head_kernel(x_ref, w1_ref, b1_ref, w2_ref, b2_ref, w3_ref, b3_ref,
                    logp_ref, x1_ref):
    """Fused fc1+ReLU, fc2+ReLU, fc3 (lane-padded to 128) + log_softmax.

    fc3's pad columns carry zero weights and a -1e30 bias; the logits and the
    log_softmax math MUST stay float32 (a bf16 -1e30 would become -inf and the
    pad columns would turn into NaNs).
    """
    h1 = jnp.dot(x_ref[...], w1_ref[...], preferred_element_type=jnp.float32)
    h1 = jnp.maximum(h1 + b1_ref[...], 0.0)
    x1_ref[...] = h1.astype(x1_ref.dtype)

    h2 = jnp.dot(h1.astype(w2_ref.dtype), w2_ref[...],
                 preferred_element_type=jnp.float32)
    h2 = jnp.maximum(h2 + b2_ref[...], 0.0)

    logits = jnp.dot(h2.astype(w3_ref.dtype), w3_ref[...],
                     preferred_element_type=jnp.float32)
    logits = logits + b3_ref[...]              # f32; pad columns get -1e30
    m = jnp.max(logits, axis=1, keepdims=True)
    z = logits - m
    lse = jnp.log(jnp.sum(jnp.exp(z), axis=1, keepdims=True))
    logp_ref[...] = (z - lse).astype(logp_ref.dtype)


# ----------------------------- Pallas wrappers -----------------------------

def conv_relu_pool(x, w_band, b_pool):
    """x: (B, H, W*Ci) bf16 -> pooled activations (B, PH, PW*Co) bf16."""
    B, H, WC = x.shape
    K, WCw, cols = w_band.shape
    assert WC == WCw
    PH = (H - K + 1) // 2
    half = cols // 2
    assert b_pool.shape == (1, half)

    flops = 2 * B * cols * (K * 2 * PH * WC + 2 * (2 * PH) * PH)
    bytes_accessed = 2 * (x.size + w_band.size + B * PH * half) + 4 * b_pool.size

    return pl.pallas_call(
        _conv_relu_pool_kernel,
        out_shape=jax.ShapeDtypeStruct((B, PH, half), COMPUTE_DTYPE),
        grid=(B,),
        in_specs=[pl.BlockSpec((None, H, WC), lambda i: (i, 0, 0)),
                  pl.BlockSpec((K, WC, cols), lambda i: (0, 0, 0)),   # resident
                  pl.BlockSpec((1, half), lambda i: (0, 0))],         # resident
        out_specs=pl.BlockSpec((None, PH, half), lambda i: (i, 0, 0)),
        compiler_params=pltpu.CompilerParams(
            dimension_semantics=("parallel",),
            vmem_limit_bytes=32 * 1024 * 1024),
        cost_estimate=pl.CostEstimate(flops=flops, transcendentals=0,
                                      bytes_accessed=bytes_accessed),
    )(x, w_band, b_pool)


def _fc_tile(batch, tmax=512):
    """fc-head row block: 8-aligned with >=2 grid steps whenever the batch
    allows it (v7x megacore), capped at tmax (VMEM footprint << v5e default)."""
    if batch <= 8:
        return batch
    steps = 2 * pl.cdiv(batch, 2 * tmax)
    return min(((pl.cdiv(batch, steps) + 7) // 8) * 8, batch)


def fc_head(x, w1, b1, w2, b2, w3, b3):
    """Fused FC head.  Returns (log_softmax over the padded lane tile, x1)."""
    B, K = x.shape
    H1, H2, NP = w1.shape[1], w2.shape[1], w3.shape[1]
    # The -1e30 pad-bias trick is only valid with an f32 bias / f32 logits.
    assert b3.dtype == jnp.float32 and b1.dtype == jnp.float32

    tb = _fc_tile(B)
    grid = (pl.cdiv(B, tb),)
    flops = 2 * B * (K * H1 + H1 * H2 + H2 * NP)
    bytes_accessed = (2 * (x.size + w1.size + w2.size + w3.size)
                      + 4 * B * (NP + H1))

    logp_pad, x1 = pl.pallas_call(
        _fc_head_kernel,
        out_shape=(jax.ShapeDtypeStruct((B, NP), jnp.float32),
                   jax.ShapeDtypeStruct((B, H1), X1_DTYPE)),
        grid=grid,
        in_specs=[pl.BlockSpec((tb, K), lambda i: (i, 0)),
                  pl.BlockSpec((K, H1), lambda i: (0, 0)),
                  pl.BlockSpec((1, H1), lambda i: (0, 0)),
                  pl.BlockSpec((H1, H2), lambda i: (0, 0)),
                  pl.BlockSpec((1, H2), lambda i: (0, 0)),
                  pl.BlockSpec((H2, NP), lambda i: (0, 0)),
                  pl.BlockSpec((1, NP), lambda i: (0, 0))],
        out_specs=(pl.BlockSpec((tb, NP), lambda i: (i, 0)),
                   pl.BlockSpec((tb, H1), lambda i: (i, 0))),
        compiler_params=pltpu.CompilerParams(
            dimension_semantics=("parallel",)),
        cost_estimate=pl.CostEstimate(flops=flops, transcendentals=B * NP,
                                      bytes_accessed=bytes_accessed),
    )(x, w1, b1, w2, b2, w3, b3)
    # NOTE: if B % tb != 0 the last block's padded rows run exp/log on
    # unspecified data; that stays confined to the padded region.
    return logp_pad, x1


# ----------------------------- parameter prep -----------------------------

def init_params(key):
    """PyTorch-default-style uniform(-1/sqrt(fan_in), +1/sqrt(fan_in)) init."""
    def uni(k, shape, fan_in):
        bound = 1.0 / float(fan_in) ** 0.5
        return jax.random.uniform(k, shape, jnp.float32, -bound, bound)

    keys = jax.random.split(key, 10)
    p = {}
    p["conv1_w"] = uni(keys[0], (64, 3, 5, 5), 3 * 25)
    p["conv1_b"] = uni(keys[1], (64,), 3 * 25)
    p["conv2_w"] = uni(keys[2], (64, 64, 5, 5), 64 * 25)
    p["conv2_b"] = uni(keys[3], (64,), 64 * 25)
    p["fc1_w"]   = uni(keys[4], (384, 64 * 5 * 5), 64 * 5 * 5)
    p["fc1_b"]   = uni(keys[5], (384,), 64 * 5 * 5)
    p["fc2_w"]   = uni(keys[6], (192, 384), 384)
    p["fc2_b"]   = uni(keys[7], (192,), 384)
    p["fc3_w"]   = uni(keys[8], (10, 192), 192)
    p["fc3_b"]   = uni(keys[9], (10,), 192)
    return p


def _banded_conv_weight(w_oihw, in_w):
    """PyTorch (Co, Ci, K, K) conv weight -> (K, in_w*Ci, 2*PW*Co) band.

    Row index    : w*Ci + ci                  (a flattened NHWC input row)
    Column index : dx*(PW*Co) + pw*Co + co    with conv column ow = 2*pw + dx
    band[kh, w*Ci+ci, col] = W[co, ci, kh, w-ow] (zero outside 0 <= kw < K), so
    (input row oh+kh) @ band[kh], summed over kh, is conv-output row oh with
    its columns already split for the horizontal half of the 2x2 pool.
    """
    w = np.asarray(jax.device_get(w_oihw), np.float32)
    co, ci, kk, _ = w.shape
    ow_n = in_w - kk + 1
    pw_n = ow_n // 2
    w_hwio = w.transpose(2, 3, 1, 0)                       # (kh, kw, ci, co)
    band = np.zeros((kk, in_w * ci, 2 * pw_n * co), np.float32)
    for ow in range(ow_n):
        pw, dx = divmod(ow, 2)
        c0 = dx * pw_n * co + pw * co
        for kw in range(kk):
            r0 = (ow + kw) * ci
            band[:, r0:r0 + ci, c0:c0 + co] = w_hwio[:, kw, :, :]
    return jnp.asarray(band, COMPUTE_DTYPE)


def prepare_params(p):
    """One-time (outside jit) repack of PyTorch-layout params for the kernels."""
    q = {}
    q["c1_w"] = _banded_conv_weight(p["conv1_w"], 32)               # (5,  96, 1792)
    q["c1_b"] = jnp.tile(p["conv1_b"], 14)[None, :].astype(jnp.float32)   # (1, 896)
    q["c2_w"] = _banded_conv_weight(p["conv2_w"], 14)               # (5, 896,  640)
    q["c2_b"] = jnp.tile(p["conv2_b"], 5)[None, :].astype(jnp.float32)    # (1, 320)

    # fc1: permute K columns from PyTorch's (c, h, w) flatten order to the
    # pooled-conv2 (h, w, c) order so no activation transpose is needed.
    w1 = p["fc1_w"].reshape(384, 64, 5, 5).transpose(0, 2, 3, 1).reshape(384, 1600)
    q["f1_w"] = w1.T.astype(COMPUTE_DTYPE)
    q["f1_b"] = p["fc1_b"].reshape(1, -1).astype(jnp.float32)
    q["f2_w"] = p["fc2_w"].T.astype(COMPUTE_DTYPE)
    q["f2_b"] = p["fc2_b"].reshape(1, -1).astype(jnp.float32)

    # fc3 padded to one 128-lane tile: zero weights / -1e30 bias in the pad
    # columns.  b3 MUST stay float32 (see _fc_head_kernel).
    n_cls, h2 = p["fc3_w"].shape
    n_pad = ((n_cls + 127) // 128) * 128
    w3 = jnp.zeros((h2, n_pad), jnp.float32).at[:, :n_cls].set(p["fc3_w"].T)
    b3 = jnp.full((1, n_pad), -1e30, jnp.float32).at[:, :n_cls].set(
        p["fc3_b"].reshape(1, n_cls))
    q["f3_w"] = w3.astype(COMPUTE_DTYPE)
    q["f3_b"] = b3
    return q


# ----------------------------- forward pass -----------------------------

def lenet_forward(prep, x):
    """x: (B, 3, 32, 32) f32 NCHW (PyTorch layout). Returns (log_softmax, x1)."""
    B = x.shape[0]
    # One-time layout prep: NCHW -> flattened NHWC rows (B, 32, 32*3), bf16.
    rows = x.transpose(0, 2, 3, 1).reshape(B, 32, 32 * 3).astype(COMPUTE_DTYPE)

    # conv1 + ReLU + 2x2 pool, fully fused -> (B, 14, 14*64), lane-dense store.
    y = conv_relu_pool(rows, prep["c1_w"], prep["c1_b"])
    # conv2 + ReLU + 2x2 pool, fully fused -> (B, 5, 5*64).  Its input is
    # exactly conv1's output layout: zero glue between the conv stages.
    y = conv_relu_pool(y, prep["c2_w"], prep["c2_b"])

    # (B, 5, 5*64) -> (B, 1600) is a free row-major view in (h, w, c) order;
    # fc1's columns were permuted to this order in prepare_params.
    flat = y.reshape(B, 1600)
    logp_pad, x1 = fc_head(flat, prep["f1_w"], prep["f1_b"],
                           prep["f2_w"], prep["f2_b"],
                           prep["f3_w"], prep["f3_b"])
    return logp_pad[:, :N_CLASSES], x1


# ----------------------------- pure-JAX reference -----------------------------

def lenet_reference(p, x):
    dn = ("NCHW", "OIHW", "NCHW")
    y = lax.conv_general_dilated(x, p["conv1_w"], (1, 1), "VALID",
                                 dimension_numbers=dn)
    y = jnp.maximum(y + p["conv1_b"][None, :, None, None], 0.0)
    y = lax.reduce_window(y, -jnp.inf, lax.max, (1, 1, 2, 2), (1, 1, 2, 2), "VALID")
    y = lax.conv_general_dilated(y, p["conv2_w"], (1, 1), "VALID",
                                 dimension_numbers=dn)
    y = jnp.maximum(y + p["conv2_b"][None, :, None, None], 0.0)
    y = lax.reduce_window(y, -jnp.inf, lax.max, (1, 1, 2, 2), (1, 1, 2, 2), "VALID")
    flat = y.reshape(x.shape[0], 64 * 5 * 5)
    x1 = jnp.maximum(flat @ p["fc1_w"].T + p["fc1_b"], 0.0)
    h = jnp.maximum(x1 @ p["fc2_w"].T + p["fc2_b"], 0.0)
    logits = h @ p["fc3_w"].T + p["fc3_b"]
    return jax.nn.log_softmax(logits, axis=1), x1


# ----------------------------- main -----------------------------

if __name__ == "__main__":
    key = jax.random.PRNGKey(0)
    k_x, k_p = jax.random.split(key)

    # Input must be 32x32 so the flatten gives 64*5*5, as the module assumes.
    x = jax.random.normal(k_x, (2, 3, 32, 32), dtype=jnp.float32)
    params = init_params(k_p)
    prep = prepare_params(params)      # one-time weight repack, outside jit

    fwd = jax.jit(lenet_forward)
    logp, x1 = fwd(prep, x)
    jax.block_until_ready((logp, x1))

    assert logp.shape == (2, N_CLASSES) and x1.shape == (2, 384)
    # log_softmax rows must sum (in prob space) to ~1
    assert bool(jnp.allclose(jnp.sum(jnp.exp(logp), axis=1), 1.0, atol=1e-4))

    # Tightened checks vs rev 2 (bf16 matmul inputs, f32 accumulation).
    logp_ref, x1_ref = jax.jit(lenet_reference)(params, x)
    assert float(jnp.max(jnp.abs(logp - logp_ref))) < 5e-2
    assert float(jnp.max(jnp.abs(x1 - x1_ref))) < 5e-2
    assert float(jnp.mean(jnp.abs(logp - logp_ref))) < 1e-2
    assert float(jnp.mean(jnp.abs(x1 - x1_ref))) < 1e-2
    # Argmax must agree unless the reference's own top-2 gap is tiny.
    am_k = jnp.argmax(logp, axis=1)
    am_r = jnp.argmax(logp_ref, axis=1)
    ref_at_k = jnp.take_along_axis(logp_ref, am_k[:, None], 1)[:, 0]
    assert bool(jnp.all((am_k == am_r) |
                        (jnp.max(logp_ref, axis=1) - ref_at_k < 1e-1)))

    print("KERNEL_OK")
</pallas_src>

<mosaic_0001>
module attributes {stable_mosaic.version = 11 : i64} {
  func.func @_conv_relu_pool_kernel(%arg0: i32, %arg1: memref<1x32x96xbf16, #tpu.memory_space<vmem>>, %arg2: memref<5x96x1792xbf16, #tpu.memory_space<vmem>>, %arg3: memref<1x896xf32, #tpu.memory_space<vmem>>, %arg4: memref<1x14x896xbf16, #tpu.memory_space<vmem>>) attributes {dimension_semantics = [#tpu.dimension_semantics<parallel>], iteration_bounds = array<i64: 2>, scalar_prefetch = 0 : i64, scratch_operands = 0 : i64, tpu.core_type = #tpu.core_type<tc>, window_params = [{transform_indices = @transform_0, window_bounds = array<i64: 1, 32, 96>}, {pipeline_mode = #tpu.pipeline_mode<synchronous>, transform_indices = @transform_1, window_bounds = array<i64: 5, 96, 1792>}, {pipeline_mode = #tpu.pipeline_mode<synchronous>, transform_indices = @transform_2, window_bounds = array<i64: 1, 896>}, {transform_indices = @transform_3, window_bounds = array<i64: 1, 14, 896>}]} {
    %c0 = arith.constant 0 : index
    %c0_0 = arith.constant 0 : index
    %c0_1 = arith.constant 0 : index
    %0 = vector.load %arg1[%c0, %c0_0, %c0_1] : memref<1x32x96xbf16, #tpu.memory_space<vmem>>, vector<1x32x96xbf16>
    %1 = vector.shape_cast %0 : vector<1x32x96xbf16> to vector<32x96xbf16>
    %cst = arith.constant 0.000000e+00 : f32
    %2 = vector.broadcast %cst : f32 to vector<28x1792xf32>
    %3 = vector.extract_strided_slice %1 {offsets = [0, 0], sizes = [28, 96], strides = [1, 1]} : vector<32x96xbf16> to vector<28x96xbf16>
    %c0_2 = arith.constant 0 : index
    %c0_3 = arith.constant 0 : index
    %c0_4 = arith.constant 0 : index
    %4 = vector.load %arg2[%c0_2, %c0_3, %c0_4] : memref<5x96x1792xbf16, #tpu.memory_space<vmem>>, vector<1x96x1792xbf16>
    %5 = vector.shape_cast %4 : vector<1x96x1792xbf16> to vector<96x1792xbf16>
    %cst_5 = arith.constant dense<0.000000e+00> : vector<28x1792xf32>
    %6 = tpu.matmul %3, %5, %cst_5 {dimension_numbers = #tpu.dot_dimension_numbers<[1], [0], [0], [1], [0, 0, 1, 1], [], []>} : vector<28x96xbf16>, vector<96x1792xbf16>, vector<28x1792xf32> -> vector<28x1792xf32>
    %7 = arith.addf %2, %6 : vector<28x1792xf32>
    %8 = vector.extract_strided_slice %1 {offsets = [1, 0], sizes = [28, 96], strides = [1, 1]} : vector<32x96xbf16> to vector<28x96xbf16>
    %c1 = arith.constant 1 : index
    %c0_6 = arith.constant 0 : index
    %c0_7 = arith.constant 0 : index
    %9 = vector.load %arg2[%c1, %c0_6, %c0_7] : memref<5x96x1792xbf16, #tpu.memory_space<vmem>>, vector<1x96x1792xbf16>
    %10 = vector.shape_cast %9 : vector<1x96x1792xbf16> to vector<96x1792xbf16>
    %cst_8 = arith.constant dense<0.000000e+00> : vector<28x1792xf32>
    %11 = tpu.matmul %8, %10, %cst_8 {dimension_numbers = #tpu.dot_dimension_numbers<[1], [0], [0], [1], [0, 0, 1, 1], [], []>} : vector<28x96xbf16>, vector<96x1792xbf16>, vector<28x1792xf32> -> vector<28x1792xf32>
    %12 = arith.addf %7, %11 : vector<28x1792xf32>
    %13 = vector.extract_strided_slice %1 {offsets = [2, 0], sizes = [28, 96], strides = [1, 1]} : vector<32x96xbf16> to vector<28x96xbf16>
    %c2 = arith.constant 2 : index
    %c0_9 = arith.constant 0 : index
    %c0_10 = arith.constant 0 : index
    %14 = vector.load %arg2[%c2, %c0_9, %c0_10] : memref<5x96x1792xbf16, #tpu.memory_space<vmem>>, vector<1x96x1792xbf16>
    %15 = vector.shape_cast %14 : vector<1x96x1792xbf16> to vector<96x1792xbf16>
    %cst_11 = arith.constant dense<0.000000e+00> : vector<28x1792xf32>
    %16 = tpu.matmul %13, %15, %cst_11 {dimension_numbers = #tpu.dot_dimension_numbers<[1], [0], [0], [1], [0, 0, 1, 1], [], []>} : vector<28x96xbf16>, vector<96x1792xbf16>, vector<28x1792xf32> -> vector<28x1792xf32>
    %17 = arith.addf %12, %16 : vector<28x1792xf32>
    %18 = vector.extract_strided_slice %1 {offsets = [3, 0], sizes = [28, 96], strides = [1, 1]} : vector<32x96xbf16> to vector<28x96xbf16>
    %c3 = arith.constant 3 : index
    %c0_12 = arith.constant 0 : index
    %c0_13 = arith.constant 0 : index
    %19 = vector.load %arg2[%c3, %c0_12, %c0_13] : memref<5x96x1792xbf16, #tpu.memory_space<vmem>>, vector<1x96x1792xbf16>
    %20 = vector.shape_cast %19 : vector<1x96x1792xbf16> to vector<96x1792xbf16>
    %cst_14 = arith.constant dense<0.000000e+00> : vector<28x1792xf32>
    %21 = tpu.matmul %18, %20, %cst_14 {dimension_numbers = #tpu.dot_dimension_numbers<[1], [0], [0], [1], [0, 0, 1, 1], [], []>} : vector<28x96xbf16>, vector<96x1792xbf16>, vector<28x1792xf32> -> vector<28x1792xf32>
    %22 = arith.addf %17, %21 : vector<28x1792xf32>
    %23 = vector.extract_strided_slice %1 {offsets = [4, 0], sizes = [28, 96], strides = [1, 1]} : vector<32x96xbf16> to vector<28x96xbf16>
    %c4 = arith.constant 4 : index
    %c0_15 = arith.constant 0 : index
    %c0_16 = arith.constant 0 : index
    %24 = vector.load %arg2[%c4, %c0_15, %c0_16] : memref<5x96x1792xbf16, #tpu.memory_space<vmem>>, vector<1x96x1792xbf16>
    %25 = vector.shape_cast %24 : vector<1x96x1792xbf16> to vector<96x1792xbf16>
    %cst_17 = arith.constant dense<0.000000e+00> : vector<28x1792xf32>
    %26 = tpu.matmul %23, %25, %cst_17 {dimension_numbers = #tpu.dot_dimension_numbers<[1], [0], [0], [1], [0, 0, 1, 1], [], []>} : vector<28x96xbf16>, vector<96x1792xbf16>, vector<28x1792xf32> -> vector<28x1792xf32>
    %27 = arith.addf %22, %26 : vector<28x1792xf32>
    %28 = tpu.iota {dimensions = array<i32: 0>} : vector<14x28xi32>
    %29 = tpu.iota {dimensions = array<i32: 1>} : vector<14x28xi32>
    %c2_i32 = arith.constant 2 : i32
    %30 = vector.broadcast %c2_i32 : i32 to vector<14x28xi32>
    %31 = arith.muli %30, %28 : vector<14x28xi32>
    %32 = arith.cmpi eq, %29, %31 : vector<14x28xi32>
    %33 = arith.extui %32 : vector<14x28xi1> to vector<14x28xi32>
    %34 = arith.sitofp %33 : vector<14x28xi32> to vector<14x28xf32>
    %cst_18 = arith.constant dense<0.000000e+00> : vector<14x1792xf32>
    %35 = tpu.matmul %34, %27, %cst_18 {dimension_numbers = #tpu.dot_dimension_numbers<[1], [0], [0], [1], [0, 0, 1, 1], [], []>} : vector<14x28xf32>, vector<28x1792xf32>, vector<14x1792xf32> -> vector<14x1792xf32>
    %c2_i32_19 = arith.constant 2 : i32
    %36 = vector.broadcast %c2_i32_19 : i32 to vector<14x28xi32>
    %37 = arith.muli %36, %28 : vector<14x28xi32>
    %c1_i32 = arith.constant 1 : i32
    %38 = vector.broadcast %c1_i32 : i32 to vector<14x28xi32>
    %39 = arith.addi %37, %38 : vector<14x28xi32>
    %40 = arith.cmpi eq, %29, %39 : vector<14x28xi32>
    %41 = arith.extui %40 : vector<14x28xi1> to vector<14x28xi32>
    %42 = arith.sitofp %41 : vector<14x28xi32> to vector<14x28xf32>
    %cst_20 = arith.constant dense<0.000000e+00> : vector<14x1792xf32>
    %43 = tpu.matmul %42, %27, %cst_20 {dimension_numbers = #tpu.dot_dimension_numbers<[1], [0], [0], [1], [0, 0, 1, 1], [], []>} : vector<14x28xf32>, vector<28x1792xf32>, vector<14x1792xf32> -> vector<14x1792xf32>
    %44 = arith.maximumf %35, %43 : vector<14x1792xf32>
    %45 = vector.extract_strided_slice %44 {offsets = [0, 0], sizes = [14, 896], strides = [1, 1]} : vector<14x1792xf32> to vector<14x896xf32>
    %46 = vector.extract_strided_slice %44 {offsets = [0, 896], sizes = [14, 896], strides = [1, 1]} : vector<14x1792xf32> to vector<14x896xf32>
    %47 = arith.maximumf %45, %46 : vector<14x896xf32>
    %c0_21 = arith.constant 0 : index
    %c0_22 = arith.constant 0 : index
    %48 = vector.load %arg3[%c0_21, %c0_22] : memref<1x896xf32, #tpu.memory_space<vmem>>, vector<1x896xf32>
    %49 = vector.broadcast %48 : vector<1x896xf32> to vector<14x896xf32>
    %50 = arith.addf %47, %49 : vector<14x896xf32>
    %cst_23 = arith.constant 0.000000e+00 : f32
    %51 = vector.broadcast %cst_23 : f32 to vector<14x896xf32>
    %52 = arith.maximumf %50, %51 : vector<14x896xf32>
    %53 = arith.truncf %52 : vector<14x896xf32> to vector<14x896xbf16>
    %c0_24 = arith.constant 0 : index
    %c0_25 = arith.constant 0 : index
    %c0_26 = arith.constant 0 : index
    %54 = vector.load %arg4[%c0_24, %c0_25, %c0_26] : memref<1x14x896xbf16, #tpu.memory_space<vmem>>, vector<1x14x896xbf16>
    %55 = vector.shape_cast %54 : vector<1x14x896xbf16> to vector<14x896xbf16>
    %56 = vector.shape_cast %53 : vector<14x896xbf16> to vector<1x14x896xbf16>
    tpu.vector_store %arg4[%c0_24, %c0_25, %c0_26], %56 {strides = array<i32>} : memref<1x14x896xbf16, #tpu.memory_space<vmem>>, vector<1x14x896xbf16>,
    return
  }
  func.func @transform_0(%arg0: i32) -> (i32, i32, i32) {
    %c0_i32 = arith.constant 0 : i32
    %c0_i32_0 = arith.constant 0 : i32
    %c0_i32_1 = arith.constant 0 : i32
    return %arg0, %c0_i32, %c0_i32_0 : i32, i32, i32
  }
  func.func @transform_1(%arg0: i32) -> (i32, i32, i32) {
    %c0_i32 = arith.constant 0 : i32
    %c0_i32_0 = arith.constant 0 : i32
    %c0_i32_1 = arith.constant 0 : i32
    %c0_i32_2 = arith.constant 0 : i32
    return %c0_i32, %c0_i32_0, %c0_i32_1 : i32, i32, i32
  }
  func.func @transform_2(%arg0: i32) -> (i32, i32) {
    %c0_i32 = arith.constant 0 : i32
    %c0_i32_0 = arith.constant 0 : i32
    %c0_i32_1 = arith.constant 0 : i32
    return %c0_i32, %c0_i32_0 : i32, i32
  }
  func.func @transform_3(%arg0: i32) -> (i32, i32, i32) {
    %c0_i32 = arith.constant 0 : i32
    %c0_i32_0 = arith.constant 0 : i32
    %c0_i32_1 = arith.constant 0 : i32
    return %arg0, %c0_i32, %c0_i32_0 : i32, i32, i32
  }
}

module attributes {stable_mosaic.version = 11 : i64} {
  func.func @_conv_relu_pool_kernel(%arg0: i32, %arg1: memref<1x14x896xbf16, #tpu.memory_space<vmem>>, %arg2: memref<5x896x640xbf16, #tpu.memory_space<vmem>>, %arg3: memref<1x320xf32, #tpu.memory_space<vmem>>, %arg4: memref<1x5x320xbf16, #tpu.memory_space<vmem>>) attributes {dimension_semantics = [#tpu.dimension_semantics<parallel>], iteration_bounds = array<i64: 2>, scalar_prefetch = 0 : i64, scratch_operands = 0 : i64, tpu.core_type = #tpu.core_type<tc>, window_params = [{transform_indices = @transform_0, window_bounds = array<i64: 1, 14, 896>}, {pipeline_mode = #tpu.pipeline_mode<synchronous>, transform_indices = @transform_1, window_bounds = array<i64: 5, 896, 640>}, {pipeline_mode = #tpu.pipeline_mode<synchronous>, transform_indices = @transform_2, window_bounds = array<i64: 1, 320>}, {transform_indices = @transform_3, window_bounds = array<i64: 1, 5, 320>}]} {
    %c0 = arith.constant 0 : index
    %c0_0 = arith.constant 0 : index
    %c0_1 = arith.constant 0 : index
    %0 = vector.load %arg1[%c0, %c0_0, %c0_1] : memref<1x14x896xbf16, #tpu.memory_space<vmem>>, vector<1x14x896xbf16>
    %1 = vector.shape_cast %0 : vector<1x14x896xbf16> to vector<14x896xbf16>
    %cst = arith.constant 0.000000e+00 : f32
    %2 = vector.broadcast %cst : f32 to vector<10x640xf32>
    %3 = vector.extract_strided_slice %1 {offsets = [0, 0], sizes = [10, 896], strides = [1, 1]} : vector<14x896xbf16> to vector<10x896xbf16>
    %c0_2 = arith.constant 0 : index
    %c0_3 = arith.constant 0 : index
    %c0_4 = arith.constant 0 : index
    %4 = vector.load %arg2[%c0_2, %c0_3, %c0_4] : memref<5x896x640xbf16, #tpu.memory_space<vmem>>, vector<1x896x640xbf16>
    %5 = vector.shape_cast %4 : vector<1x896x640xbf16> to vector<896x640xbf16>
    %cst_5 = arith.constant dense<0.000000e+00> : vector<10x640xf32>
    %6 = tpu.matmul %3, %5, %cst_5 {dimension_numbers = #tpu.dot_dimension_numbers<[1], [0], [0], [1], [0, 0, 1, 1], [], []>} : vector<10x896xbf16>, vector<896x640xbf16>, vector<10x640xf32> -> vector<10x640xf32>
    %7 = arith.addf %2, %6 : vector<10x640xf32>
    %8 = vector.extract_strided_slice %1 {offsets = [1, 0], sizes = [10, 896], strides = [1, 1]} : vector<14x896xbf16> to vector<10x896xbf16>
    %c1 = arith.constant 1 : index
    %c0_6 = arith.constant 0 : index
    %c0_7 = arith.constant 0 : index
    %9 = vector.load %arg2[%c1, %c0_6, %c0_7] : memref<5x896x640xbf16, #tpu.memory_space<vmem>>, vector<1x896x640xbf16>
    %10 = vector.shape_cast %9 : vector<1x896x640xbf16> to vector<896x640xbf16>
    %cst_8 = arith.constant dense<0.000000e+00> : vector<10x640xf32>
    %11 = tpu.matmul %8, %10, %cst_8 {dimension_numbers = #tpu.dot_dimension_numbers<[1], [0], [0], [1], [0, 0, 1, 1], [], []>} : vector<10x896xbf16>, vector<896x640xbf16>, vector<10x640xf32> -> vector<10x640xf32>
    %12 = arith.addf %7, %11 : vector<10x640xf32>
    %13 = vector.extract_strided_slice %1 {offsets = [2, 0], sizes = [10, 896], strides = [1, 1]} : vector<14x896xbf16> to vector<10x896xbf16>
    %c2 = arith.constant 2 : index
    %c0_9 = arith.constant 0 : index
    %c0_10 = arith.constant 0 : index
    %14 = vector.load %arg2[%c2, %c0_9, %c0_10] : memref<5x896x640xbf16, #tpu.memory_space<vmem>>, vector<1x896x640xbf16>
    %15 = vector.shape_cast %14 : vector<1x896x640xbf16> to vector<896x640xbf16>
    %cst_11 = arith.constant dense<0.000000e+00> : vector<10x640xf32>
    %16 = tpu.matmul %13, %15, %cst_11 {dimension_numbers = #tpu.dot_dimension_numbers<[1], [0], [0], [1], [0, 0, 1, 1], [], []>} : vector<10x896xbf16>, vector<896x640xbf16>, vector<10x640xf32> -> vector<10x640xf32>
    %17 = arith.addf %12, %16 : vector<10x640xf32>
    %18 = vector.extract_strided_slice %1 {offsets = [3, 0], sizes = [10, 896], strides = [1, 1]} : vector<14x896xbf16> to vector<10x896xbf16>
    %c3 = arith.constant 3 : index
    %c0_12 = arith.constant 0 : index
    %c0_13 = arith.constant 0 : index
    %19 = vector.load %arg2[%c3, %c0_12, %c0_13] : memref<5x896x640xbf16, #tpu.memory_space<vmem>>, vector<1x896x640xbf16>
    %20 = vector.shape_cast %19 : vector<1x896x640xbf16> to vector<896x640xbf16>
    %cst_14 = arith.constant dense<0.000000e+00> : vector<10x640xf32>
    %21 = tpu.matmul %18, %20, %cst_14 {dimension_numbers = #tpu.dot_dimension_numbers<[1], [0], [0], [1], [0, 0, 1, 1], [], []>} : vector<10x896xbf16>, vector<896x640xbf16>, vector<10x640xf32> -> vector<10x640xf32>
    %22 = arith.addf %17, %21 : vector<10x640xf32>
    %23 = vector.extract_strided_slice %1 {offsets = [4, 0], sizes = [10, 896], strides = [1, 1]} : vector<14x896xbf16> to vector<10x896xbf16>
    %c4 = arith.constant 4 : index
    %c0_15 = arith.constant 0 : index
    %c0_16 = arith.constant 0 : index
    %24 = vector.load %arg2[%c4, %c0_15, %c0_16] : memref<5x896x640xbf16, #tpu.memory_space<vmem>>, vector<1x896x640xbf16>
    %25 = vector.shape_cast %24 : vector<1x896x640xbf16> to vector<896x640xbf16>
    %cst_17 = arith.constant dense<0.000000e+00> : vector<10x640xf32>
    %26 = tpu.matmul %23, %25, %cst_17 {dimension_numbers = #tpu.dot_dimension_numbers<[1], [0], [0], [1], [0, 0, 1, 1], [], []>} : vector<10x896xbf16>, vector<896x640xbf16>, vector<10x640xf32> -> vector<10x640xf32>
    %27 = arith.addf %22, %26 : vector<10x640xf32>
    %28 = tpu.iota {dimensions = array<i32: 0>} : vector<5x10xi32>
    %29 = tpu.iota {dimensions = array<i32: 1>} : vector<5x10xi32>
    %c2_i32 = arith.constant 2 : i32
    %30 = vector.broadcast %c2_i32 : i32 to vector<5x10xi32>
    %31 = arith.muli %30, %28 : vector<5x10xi32>
    %32 = arith.cmpi eq, %29, %31 : vector<5x10xi32>
    %33 = arith.extui %32 : vector<5x10xi1> to vector<5x10xi32>
    %34 = arith.sitofp %33 : vector<5x10xi32> to vector<5x10xf32>
    %cst_18 = arith.constant dense<0.000000e+00> : vector<5x640xf32>
    %35 = tpu.matmul %34, %27, %cst_18 {dimension_numbers = #tpu.dot_dimension_numbers<[1], [0], [0], [1], [0, 0, 1, 1], [], []>} : vector<5x10xf32>, vector<10x640xf32>, vector<5x640xf32> -> vector<5x640xf32>
    %c2_i32_19 = arith.constant 2 : i32
    %36 = vector.broadcast %c2_i32_19 : i32 to vector<5x10xi32>
    %37 = arith.muli %36, %28 : vector<5x10xi32>
    %c1_i32 = arith.constant 1 : i32
    %38 = vector.broadcast %c1_i32 : i32 to vector<5x10xi32>
    %39 = arith.addi %37, %38 : vector<5x10xi32>
    %40 = arith.cmpi eq, %29, %39 : vector<5x10xi32>
    %41 = arith.extui %40 : vector<5x10xi1> to vector<5x10xi32>
    %42 = arith.sitofp %41 : vector<5x10xi32> to vector<5x10xf32>
    %cst_20 = arith.constant dense<0.000000e+00> : vector<5x640xf32>
    %43 = tpu.matmul %42, %27, %cst_20 {dimension_numbers = #tpu.dot_dimension_numbers<[1], [0], [0], [1], [0, 0, 1, 1], [], []>} : vector<5x10xf32>, vector<10x640xf32>, vector<5x640xf32> -> vector<5x640xf32>
    %44 = arith.maximumf %35, %43 : vector<5x640xf32>
    %45 = vector.extract_strided_slice %44 {offsets = [0, 0], sizes = [5, 320], strides = [1, 1]} : vector<5x640xf32> to vector<5x320xf32>
    %46 = vector.extract_strided_slice %44 {offsets = [0, 320], sizes = [5, 320], strides = [1, 1]} : vector<5x640xf32> to vector<5x320xf32>
    %47 = arith.maximumf %45, %46 : vector<5x320xf32>
    %c0_21 = arith.constant 0 : index
    %c0_22 = arith.constant 0 : index
    %48 = vector.load %arg3[%c0_21, %c0_22] : memref<1x320xf32, #tpu.memory_space<vmem>>, vector<1x320xf32>
    %49 = vector.broadcast %48 : vector<1x320xf32> to vector<5x320xf32>
    %50 = arith.addf %47, %49 : vector<5x320xf32>
    %cst_23 = arith.constant 0.000000e+00 : f32
    %51 = vector.broadcast %cst_23 : f32 to vector<5x320xf32>
    %52 = arith.maximumf %50, %51 : vector<5x320xf32>
    %53 = arith.truncf %52 : vector<5x320xf32> to vector<5x320xbf16>
    %c0_24 = arith.constant 0 : index
    %c0_25 = arith.constant 0 : index
    %c0_26 = arith.constant 0 : index
    %54 = vector.load %arg4[%c0_24, %c0_25, %c0_26] : memref<1x5x320xbf16, #tpu.memory_space<vmem>>, vector<1x5x320xbf16>
    %55 = vector.shape_cast %54 : vector<1x5x320xbf16> to vector<5x320xbf16>
    %56 = vector.shape_cast %53 : vector<5x320xbf16> to vector<1x5x320xbf16>
    tpu.vector_store %arg4[%c0_24, %c0_25, %c0_26], %56 {strides = array<i32>} : memref<1x5x320xbf16, #tpu.memory_space<vmem>>, vector<1x5x320xbf16>,
    return
  }
  func.func @transform_0(%arg0: i32) -> (i32, i32, i32) {
    %c0_i32 = arith.constant 0 : i32
    %c0_i32_0 = arith.constant 0 : i32
    %c0_i32_1 = arith.constant 0 : i32
    return %arg0, %c0_i32, %c0_i32_0 : i32, i32, i32
  }
  func.func @transform_1(%arg0: i32) -> (i32, i32, i32) {
    %c0_i32 = arith.constant 0 : i32
    %c0_i32_0 = arith.constant 0 : i32
    %c0_i32_1 = arith.constant 0 : i32
    %c0_i32_2 = arith.constant 0 : i32
    return %c0_i32, %c0_i32_0, %c0_i32_1 : i32, i32, i32
  }
  func.func @transform_2(%arg0: i32) -> (i32, i32) {
    %c0_i32 = arith.constant 0 : i32
    %c0_i32_0 = arith.constant 0 : i32
    %c0_i32_1 = arith.constant 0 : i32
    return %c0_i32, %c0_i32_0 : i32, i32
  }
  func.func @transform_3(%arg0: i32) -> (i32, i32, i32) {
    %c0_i32 = arith.constant 0 : i32
    %c0_i32_0 = arith.constant 0 : i32
    %c0_i32_1 = arith.constant 0 : i32
    return %arg0, %c0_i32, %c0_i32_0 : i32, i32, i32
  }
}

module attributes {stable_mosaic.version = 11 : i64} {
  func.func @_fc_head_kernel(%arg0: i32, %arg1: memref<2x1600xbf16, #tpu.memory_space<vmem>>, %arg2: memref<1600x384xbf16, #tpu.memory_space<vmem>>, %arg3: memref<1x384xf32, #tpu.memory_space<vmem>>, %arg4: memref<384x192xbf16, #tpu.memory_space<vmem>>, %arg5: memref<1x192xf32, #tpu.memory_space<vmem>>, %arg6: memref<192x128xbf16, #tpu.memory_space<vmem>>, %arg7: memref<1x128xf32, #tpu.memory_space<vmem>>, %arg8: memref<2x128xf32, #tpu.memory_space<vmem>>, %arg9: memref<2x384xf32, #tpu.memory_space<vmem>>) attributes {dimension_semantics = [#tpu.dimension_semantics<parallel>], iteration_bounds = array<i64: 1>, scalar_prefetch = 0 : i64, scratch_operands = 0 : i64, tpu.core_type = #tpu.core_type<tc>, window_params = [{transform_indices = @transform_0, window_bounds = array<i64: 2, 1600>}, {pipeline_mode = #tpu.pipeline_mode<synchronous>, transform_indices = @transform_1, window_bounds = array<i64: 1600, 384>}, {pipeline_mode = #tpu.pipeline_mode<synchronous>, transform_indices = @transform_2, window_bounds = array<i64: 1, 384>}, {pipeline_mode = #tpu.pipeline_mode<synchronous>, transform_indices = @transform_3, window_bounds = array<i64: 384, 192>}, {pipeline_mode = #tpu.pipeline_mode<synchronous>, transform_indices = @transform_4, window_bounds = array<i64: 1, 192>}, {pipeline_mode = #tpu.pipeline_mode<synchronous>, transform_indices = @transform_5, window_bounds = array<i64: 192, 128>}, {pipeline_mode = #tpu.pipeline_mode<synchronous>, transform_indices = @transform_6, window_bounds = array<i64: 1, 128>}, {transform_indices = @transform_7, window_bounds = array<i64: 2, 128>}, {transform_indices = @transform_8, window_bounds = array<i64: 2, 384>}]} {
    %c0 = arith.constant 0 : index
    %c0_0 = arith.constant 0 : index
    %0 = vector.load %arg1[%c0, %c0_0] : memref<2x1600xbf16, #tpu.memory_space<vmem>>, vector<2x1600xbf16>
    %c0_1 = arith.constant 0 : index
    %c0_2 = arith.constant 0 : index
    %1 = vector.load %arg2[%c0_1, %c0_2] : memref<1600x384xbf16, #tpu.memory_space<vmem>>, vector<1600x384xbf16>
    %cst = arith.constant dense<0.000000e+00> : vector<2x384xf32>
    %2 = tpu.matmul %0, %1, %cst {dimension_numbers = #tpu.dot_dimension_numbers<[1], [0], [0], [1], [0, 0, 1, 1], [], []>} : vector<2x1600xbf16>, vector<1600x384xbf16>, vector<2x384xf32> -> vector<2x384xf32>
    %c0_3 = arith.constant 0 : index
    %c0_4 = arith.constant 0 : index
    %3 = vector.load %arg3[%c0_3, %c0_4] : memref<1x384xf32, #tpu.memory_space<vmem>>, vector<1x384xf32>
    %4 = vector.broadcast %3 : vector<1x384xf32> to vector<2x384xf32>
    %5 = arith.addf %2, %4 : vector<2x384xf32>
    %cst_5 = arith.constant 0.000000e+00 : f32
    %6 = vector.broadcast %cst_5 : f32 to vector<2x384xf32>
    %7 = arith.maximumf %5, %6 : vector<2x384xf32>
    %c0_6 = arith.constant 0 : index
    %c0_7 = arith.constant 0 : index
    %8 = vector.load %arg9[%c0_6, %c0_7] : memref<2x384xf32, #tpu.memory_space<vmem>>, vector<2x384xf32>
    tpu.vector_store %arg9[%c0_6, %c0_7], %7 {strides = array<i32>} : memref<2x384xf32, #tpu.memory_space<vmem>>, vector<2x384xf32>,
    %9 = arith.truncf %7 : vector<2x384xf32> to vector<2x384xbf16>
    %c0_8 = arith.constant 0 : index
    %c0_9 = arith.constant 0 : index
    %10 = vector.load %arg4[%c0_8, %c0_9] : memref<384x192xbf16, #tpu.memory_space<vmem>>, vector<384x192xbf16>
    %cst_10 = arith.constant dense<0.000000e+00> : vector<2x192xf32>
    %11 = tpu.matmul %9, %10, %cst_10 {dimension_numbers = #tpu.dot_dimension_numbers<[1], [0], [0], [1], [0, 0, 1, 1], [], []>} : vector<2x384xbf16>, vector<384x192xbf16>, vector<2x192xf32> -> vector<2x192xf32>
    %c0_11 = arith.constant 0 : index
    %c0_12 = arith.constant 0 : index
    %12 = vector.load %arg5[%c0_11, %c0_12] : memref<1x192xf32, #tpu.memory_space<vmem>>, vector<1x192xf32>
    %13 = vector.broadcast %12 : vector<1x192xf32> to vector<2x192xf32>
    %14 = arith.addf %11, %13 : vector<2x192xf32>
    %cst_13 = arith.constant 0.000000e+00 : f32
    %15 = vector.broadcast %cst_13 : f32 to vector<2x192xf32>
    %16 = arith.maximumf %14, %15 : vector<2x192xf32>
    %17 = arith.truncf %16 : vector<2x192xf32> to vector<2x192xbf16>
    %c0_14 = arith.constant 0 : index
    %c0_15 = arith.constant 0 : index
    %18 = vector.load %arg6[%c0_14, %c0_15] : memref<192x128xbf16, #tpu.memory_space<vmem>>, vector<192x128xbf16>
    %cst_16 = arith.constant dense<0.000000e+00> : vector<2x128xf32>
    %19 = tpu.matmul %17, %18, %cst_16 {dimension_numbers = #tpu.dot_dimension_numbers<[1], [0], [0], [1], [0, 0, 1, 1], [], []>} : vector<2x192xbf16>, vector<192x128xbf16>, vector<2x128xf32> -> vector<2x128xf32>
    %c0_17 = arith.constant 0 : index
    %c0_18 = arith.constant 0 : index
    %20 = vector.load %arg7[%c0_17, %c0_18] : memref<1x128xf32, #tpu.memory_space<vmem>>, vector<1x128xf32>
    %21 = vector.broadcast %20 : vector<1x128xf32> to vector<2x128xf32>
    %22 = arith.addf %19, %21 : vector<2x128xf32>
    %cst_19 = arith.constant dense<0xFF800000> : vector<2xf32>
    %23 = vector.multi_reduction <maximumf>, %22, %cst_19 [1] : vector<2x128xf32> to vector<2xf32>
    %24 = vector.shape_cast %23 : vector<2xf32> to vector<2x1xf32>
    %25 = vector.broadcast %24 : vector<2x1xf32> to vector<2x128xf32>
    %26 = arith.subf %22, %25 : vector<2x128xf32>
    %27 = math.exp %26 : vector<2x128xf32>
    %cst_20 = arith.constant dense<0.000000e+00> : vector<2xf32>
    %28 = vector.multi_reduction <add>, %27, %cst_20 [1] : vector<2x128xf32> to vector<2xf32>
    %29 = vector.shape_cast %28 : vector<2xf32> to vector<2x1xf32>
    %30 = math.log %29 : vector<2x1xf32>
    %31 = vector.broadcast %30 : vector<2x1xf32> to vector<2x128xf32>
    %32 = arith.subf %26, %31 : vector<2x128xf32>
    %c0_21 = arith.constant 0 : index
    %c0_22 = arith.constant 0 : index
    %33 = vector.load %arg8[%c0_21, %c0_22] : memref<2x128xf32, #tpu.memory_space<vmem>>, vector<2x128xf32>
    tpu.vector_store %arg8[%c0_21, %c0_22], %32 {strides = array<i32>} : memref<2x128xf32, #tpu.memory_space<vmem>>, vector<2x128xf32>,
    return
  }
  func.func @transform_0(%arg0: i32) -> (i32, i32) {
    %c0_i32 = arith.constant 0 : i32
    %c0_i32_0 = arith.constant 0 : i32
    return %arg0, %c0_i32 : i32, i32
  }
  func.func @transform_1(%arg0: i32) -> (i32, i32) {
    %c0_i32 = arith.constant 0 : i32
    %c0_i32_0 = arith.constant 0 : i32
    %c0_i32_1 = arith.constant 0 : i32
    return %c0_i32, %c0_i32_0 : i32, i32
  }
  func.func @transform_2(%arg0: i32) -> (i32, i32) {
    %c0_i32 = arith.constant 0 : i32
    %c0_i32_0 = arith.constant 0 : i32
    %c0_i32_1 = arith.constant 0 : i32
    return %c0_i32, %c0_i32_0 : i32, i32
  }
  func.func @transform_3(%arg0: i32) -> (i32, i32) {
    %c0_i32 = arith.constant 0 : i32
    %c0_i32_0 = arith.constant 0 : i32
    %c0_i32_1 = arith.constant 0 : i32
    return %c0_i32, %c0_i32_0 : i32, i32
  }
  func.func @transform_4(%arg0: i32) -> (i32, i32) {
    %c0_i32 = arith.constant 0 : i32
    %c0_i32_0 = arith.constant 0 : i32
    %c0_i32_1 = arith.constant 0 : i32
    return %c0_i32, %c0_i32_0 : i32, i32
  }
  func.func @transform_5(%arg0: i32) -> (i32, i32) {
    %c0_i32 = arith.constant 0 : i32
    %c0_i32_0 = arith.constant 0 : i32
    %c0_i32_1 = arith.constant 0 : i32
    return %c0_i32, %c0_i32_0 : i32, i32
  }
  func.func @transform_6(%arg0: i32) -> (i32, i32) {
    %c0_i32 = arith.constant 0 : i32
    %c0_i32_0 = arith.constant 0 : i32
    %c0_i32_1 = arith.constant 0 : i32
    return %c0_i32, %c0_i32_0 : i32, i32
  }
  func.func @transform_7(%arg0: i32) -> (i32, i32) {
    %c0_i32 = arith.constant 0 : i32
    %c0_i32_0 = arith.constant 0 : i32
    return %arg0, %c0_i32 : i32, i32
  }
  func.func @transform_8(%arg0: i32) -> (i32, i32) {
    %c0_i32 = arith.constant 0 : i32
    %c0_i32_0 = arith.constant 0 : i32
    return %arg0, %c0_i32 : i32, i32
  }
}

</mosaic_0001>

<bundles_post_ra>
// kernel: lenet_forward.5
= control target key start
LH: loop header
LB: loop body
LE: loop exit
PB: predicated region body
PF: predicated region fallthrough
CT: control target
= control target key end

     0   :  { %14 = vsyncpa [#allocation3], 0  ;;  %v4412_v2 = vmov 0   ;;  %v435_v13 = vlaneseq  ;;  %v4413_v14 = vmov 1966171168   ;;  %vm2152_vm0 = vcmask 523264   ;;  %s5711_s0 = inlined_call_operand.vmem [shape: bf16[2,1600], index: 0, kind: input, shape index: {}]   ;;  %s5712_s1 = inlined_call_operand.vmem [shape: bf16[1600,384], index: 1, kind: input, shape index: {}]   ;;  %s5713_s2 = inlined_call_operand.vmem [shape: f32[1,384], index: 2, kind: input, shape index: {}]   ;;  %s5714_s3 = inlined_call_operand.vmem [shape: bf16[384,192], index: 3, kind: input, shape index: {}]   ;;  %s5715_s4 = inlined_call_operand.vmem [shape: f32[1,192], index: 4, kind: input, shape index: {}]   ;;  %s5716_s5 = inlined_call_operand.vmem [shape: bf16[192,128], index: 5, kind: input, shape index: {}]   ;;  %s5717_s6 = inlined_call_operand.vmem [shape: f32[1,128], index: 6, kind: input, shape index: {}]   ;;  %s5718_s7 = inlined_call_operand.hbm [shape: f32[2,128], index: 7, kind: output, shape index: {0}]   ;;  %s5719_s8 = inlined_call_operand.hbm [shape: f32[2,384], index: 8, kind: output, shape index: {1}]  }
   0x1   :  { %v3874_v0 = vld [vmem:[%s5712_s1 + $0x4] ss:$12 sps:$4 sm:$0xff]   ;;  %v3876_v1 = vld [vmem:[%s5712_s1] ss:$12 sps:$4 sm:$0xff]   ;;  %2434 = vmatprep.mubr.bf16.mxu1 %v4412_v2  ;;  %v3877_v3 = vld [vmem:[%s5712_s1 + $0x1c] ss:$12 sps:$4 sm:$0xff]   ;;  %v454_v15 = vunpack.c.l.s4 %v4413_v14 }
   0x2   :  { %2156 = vmatprep.subr.bf16.mxu0 %v3874_v0  ;;  %v3879_v4 = vld [vmem:[%s5712_s1 + $0x18] ss:$12 sps:$4 sm:$0xff]   ;;  %v3880_v5 = vld [vmem:[%s5712_s1 + $0x34] ss:$12 sps:$4 sm:$0xff]   ;;  %v3882_v6 = vld [vmem:[%s5712_s1 + $0x30] ss:$12 sps:$4 sm:$0xff]  }
   0x3   :  { %2157 = vmatpush1.bf16.msra.mxu0 %v3876_v1  ;;  %v3883_v7 = vld [vmem:[%s5712_s1 + $0x4c] ss:$12 sps:$4 sm:$0xff]   ;;  %v3885_v8 = vld [vmem:[%s5712_s1 + $0x48] ss:$12 sps:$4 sm:$0xff]   ;;  %v3886_v9 = vld [vmem:[%s5712_s1 + $0x64] ss:$12 sps:$4 sm:$0xff]   ;;  %v455_v22 = vunpack.c.0.s8 %v454_v15 }
   0x4   :  { %2158 = vmatprep.subr.bf16.mxu0 %v3877_v3  ;;  %v3901_v10 = vld [vmem:[%s5712_s1 + $0x904] ss:$12 sps:$4 sm:$0xff]   ;;  %v3903_v11 = vld [vmem:[%s5712_s1 + $0x900] ss:$12 sps:$4 sm:$0xff]   ;;  %v3907_v16 = vld [vmem:[%s5712_s1 + $0x91c] ss:$12 sps:$4 sm:$0xff]  }
   0x5   :  { %v3888_v12 = vld [vmem:[%s5712_s1 + $0x60] ss:$12 sps:$4 sm:$0xff]   ;;  %2402 = vmatprep.subr.bf16.mxu1 %v3901_v10  ;;  %v3909_v17 = vld [vmem:[%s5712_s1 + $0x918] ss:$12 sps:$4 sm:$0xff]   ;;  %v3889_v18 = vld [vmem:[%s5712_s1 + $0x7c] ss:$12 sps:$4 sm:$0xff]  }
   0x6   :  { %2403 = vmatpush1.bf16.msra.mxu1 %v3903_v11  ;;  %v3891_v19 = vld [vmem:[%s5712_s1 + $0x78] ss:$12 sps:$4 sm:$0xff]   ;;  %v3913_v20 = vld [vmem:[%s5712_s1 + $0x934] ss:$12 sps:$4 sm:$0xff]   ;;  %v4516_v21 = vshrl.u32 %v435_v13, 7  ;;  %vm4415_vm1 = vmmov 0  }
   0x7   :  { %2159 = vmatpush1.bf16.msra.mxu0 %v3879_v4  ;;  %2404 = vmatprep.subr.bf16.mxu1 %v3907_v16  ;;  %v3892_v23 = vld [vmem:[%s5712_s1 + $0x94] ss:$12 sps:$4 sm:$0xff]   ;;  %v3915_v24 = vld [vmem:[%s5712_s1 + $0x930] ss:$12 sps:$4 sm:$0xff]   ;;  %v3919_v25 = vld [vmem:[%s5712_s1 + $0x94c] ss:$12 sps:$4 sm:$0xff]  }
   0x8   :  { %2160 = vmatprep.subr.bf16.mxu0 %v3880_v5  ;;  %v3894_v26 = vld [vmem:[%s5712_s1 + $0x90] ss:$12 sps:$4 sm:$0xff]   ;;  %v3895_v27 = vld [vmem:[%s5712_s1 + $0xac] ss:$12 sps:$4 sm:$0xff]   ;;  %v4534_v28 = vsub.s32 %v455_v22, %v4516_v21  ;;  %v3921_v29 = vld [vmem:[%s5712_s1 + $0x948] ss:$12 sps:$4 sm:$0xff]  }
   0x9   :  { %v4542_v30 = vld [vmem:[%s5711_s0 + $0x8] sm:$0x1f]  ;;  %v3898_v34 = vld [vmem:[%s5712_s1 + $0xc4] ss:$12 sps:$4 sm:$0xff]   ;;  %v3910_v46 = vld [vmem:[%s5712_s1 + $0xf4] ss:$12 sps:$4 sm:$0xff]  }
   0xa   :  { %2405 = vmatpush1.bf16.msra.mxu1 %v3909_v17  ;;  %v3925_v31 = vld [vmem:[%s5712_s1 + $0xc8] ss:$12 sps:$4 sm:$0xff]   ;;  %v501_v32 = vcombine.high %v4542_v30, %v4542_v30  ;;  %v3931_v38 = vld [vmem:[%s5712_s1 + $0xe0] ss:$12 sps:$4 sm:$0xff]   ;;  %v3936_v42 = vld [vmem:[%s5712_s1 + $0xf8] ss:$12 sps:$4 sm:$0xff]  }
   0xb   :  { %2161 = vmatpush1.bf16.msra.mxu0 %v3882_v6  ;;  %2406 = vmatprep.subr.bf16.mxu1 %v3913_v20  ;;  %v3897_v33 = vld [vmem:[%s5712_s1 + $0xa8] ss:$12 sps:$4 sm:$0xff]   ;;  %v3900_v39 = vld [vmem:[%s5712_s1 + $0xc0] ss:$12 sps:$4 sm:$0xff]   ;;  %v3906_v43 = vld [vmem:[%s5712_s1 + $0xd8] ss:$12 sps:$4 sm:$0xff]  }
   0xc   :  { %2162 = vmatprep.subr.bf16.mxu0 %v3883_v7  ;;  %v515_v35 = vrot.slane %v501_v32, %v4534_v28  ;;  %v3927_v36 = vld [vmem:[%s5712_s1 + $0x8] ss:$12 sps:$4 sm:$0xff]   ;;  %v3932_v40 = vld [vmem:[%s5712_s1 + $0x20] ss:$12 sps:$4 sm:$0xff]   ;;  %v3937_v44 = vld [vmem:[%s5712_s1 + $0x38] ss:$12 sps:$4 sm:$0xff]  }
   0xd   :  { %v3904_v41 = vld [vmem:[%s5712_s1 + $0xdc] ss:$12 sps:$4 sm:$0xff]   ;;  %v4588_v45 = vld [vmem:[%s5711_s0] sm:$0xff]  ;;  %v3916_v51 = vld [vmem:[%s5712_s1 + $0x10c] ss:$12 sps:$4 sm:$0xff]  }
   0xe   :  { %2407 = vmatpush1.bf16.msra.mxu1 %v3915_v24  ;;  %v4560_v37 = vrot.slane %v515_v35, %v4534_v28  ;;  %v3941_v47 = vld [vmem:[%s5712_s1 + $0x110] ss:$12 sps:$4 sm:$0xff]   ;;  %v459_v48 = vrot.slane %v4588_v45, %v4534_v28  ;;  %v3946_v54 = vld [vmem:[%s5712_s1 + $0x128] ss:$12 sps:$4 sm:$0xff]   ;;  %v3951_v58 = vld [vmem:[%s5712_s1 + $0x140] ss:$12 sps:$4 sm:$0xff]  }
   0xf   :  { %2163 = vmatpush1.bf16.msra.mxu0 %v3885_v8  ;;  %2408 = vmatprep.subr.bf16.mxu1 %v3919_v25  ;;  %v3912_v49 = vld [vmem:[%s5712_s1 + $0xf0] ss:$12 sps:$4 sm:$0xff]   ;;  %v3918_v55 = vld [vmem:[%s5712_s1 + $0x108] ss:$12 sps:$4 sm:$0xff]   ;;  %v3924_v59 = vld [vmem:[%s5712_s1 + $0x120] ss:$12 sps:$4 sm:$0xff]  }
  0x10   :  { %2164 = vmatprep.subr.bf16.mxu0 %v3886_v9  ;;  %v467_v50 = vcombine.high %v459_v48, %v459_v48  ;;  %v3942_v52 = vld [vmem:[%s5712_s1 + $0x50] ss:$12 sps:$4 sm:$0xff]   ;;  %v3947_v57 = vld [vmem:[%s5712_s1 + $0x68] ss:$12 sps:$4 sm:$0xff]   ;;  %v3952_v61 = vld [vmem:[%s5712_s1 + $0x80] ss:$12 sps:$4 sm:$0xff]   ;;  %v4669_v11 = vrot.slane %v459_v48, %v4534_v28 }
  0x11   :  { %v3922_v56 = vld [vmem:[%s5712_s1 + $0x124] ss:$12 sps:$4 sm:$0xff]   ;;  %v3928_v60 = vld [vmem:[%s5712_s1 + $0x13c] ss:$12 sps:$4 sm:$0xff]   ;;  %v3933_v0 = vld [vmem:[%s5712_s1 + $0x154] ss:$12 sps:$4 sm:$0xff]  }
  0x12   :  { %2409 = vmatpush1.bf16.msra.mxu1 %v3921_v29  ;;  %v489_v53 = vrot.slane %v467_v50, %v4534_v28  ;;  %v3956_v62 = vld [vmem:[%s5712_s1 + $0x158] ss:$12 sps:$4 sm:$0xff]   ;;  %v3961_v3 = vld [vmem:[%s5712_s1 + $0x170] ss:$12 sps:$4 sm:$0xff]   ;;  %v3966_v7 = vld [vmem:[%s5712_s1 + $0x248] ss:$12 sps:$4 sm:$0xff]  }
  0x13   :  { %2165 = vmatpush1.bf16.msra.mxu0 %v3888_v12  ;;  %3688 = vmatprep.subr.bf16.mxu1 %v3925_v31  ;;  %v3930_v63 = vld [vmem:[%s5712_s1 + $0x138] ss:$12 sps:$4 sm:$0xff]   ;;  %v3935_v4 = vld [vmem:[%s5712_s1 + $0x150] ss:$12 sps:$4 sm:$0xff]   ;;  %v3940_v8 = vld [vmem:[%s5712_s1 + $0x168] ss:$12 sps:$4 sm:$0xff]  }
  0x14   :  { %2166 = vmatprep.subr.bf16.mxu0 %v3889_v18  ;;  %2188 = vmatprep.mubr.bf16.mxu0 %v489_v53  ;;  %v3957_v1 = vld [vmem:[%s5712_s1 + $0x98] ss:$12 sps:$4 sm:$0xff]   ;;  %v3962_v5 = vld [vmem:[%s5712_s1 + $0xb0] ss:$12 sps:$4 sm:$0xff]   ;;  %v3967_v10 = vld [vmem:[%s5712_s1 + $0x188] ss:$12 sps:$4 sm:$0xff]   ;;  %v499_v14 = vcombine.high %v489_v53, %v489_v53 }
  0x15   :  { %3624 = vmatmul.mubr.msk.bf16.vlgmr.msra.gmra.mrb[0].mxu1 %vm2152_vm0, %v4560_v37  ;;  %v3938_v6 = vld [vmem:[%s5712_s1 + $0x16c] ss:$12 sps:$4 sm:$0xff]   ;;  %v3945_v9 = vld [vmem:[%s5712_s1 + $0x184] ss:$12 sps:$4 sm:$0xff]   ;;  %v3950_v15 = vld [vmem:[%s5712_s1 + $0x19c] ss:$12 sps:$4 sm:$0xff]  }
  0x16   :  { %3689 = vmatpush3.bf16.msra.mxu1 %v3927_v36  ;;  %2475 = vmatprep.mubr.bf16.mxu1 %v489_v53  ;;  %v3971_v12 = vld [vmem:[%s5712_s1 + $0x260] ss:$12 sps:$4 sm:$0xff]   ;;  %v3976_v17 = vld [vmem:[%s5712_s1 + $0x278] ss:$12 sps:$4 sm:$0xff]   ;;  %v3981_v22 = vld [vmem:[%s5712_s1 + $0x290] ss:$12 sps:$4 sm:$0xff]  }
  0x17   :  { %2167 = vmatpush1.bf16.msra.mxu0 %v3891_v19  ;;  %3690 = vmatprep.subr.bf16.mxu1 %v3931_v38  ;;  %v3943_v13 = vld [vmem:[%s5712_s1 + $0x180] ss:$12 sps:$4 sm:$0xff]   ;;  %v3948_v18 = vld [vmem:[%s5712_s1 + $0x198] ss:$12 sps:$4 sm:$0xff]   ;;  %v3982_v25 = vld [vmem:[%s5712_s1 + $0x1d0] ss:$12 sps:$4 sm:$0xff]  }
  0x18   :  { %2168 = vmatprep.subr.bf16.mxu0 %v3892_v23  ;;  %v3972_v16 = vld [vmem:[%s5712_s1 + $0x1a0] ss:$12 sps:$4 sm:$0xff]   ;;  %v3977_v20 = vld [vmem:[%s5712_s1 + $0x1b8] ss:$12 sps:$4 sm:$0xff]   ;;  %v3953_v23 = vld [vmem:[%s5712_s1 + $0x1b0] ss:$12 sps:$4 sm:$0xff]  }
  0x19   :  { %v3955_v19 = vld [vmem:[%s5712_s1 + $0x1b4] ss:$12 sps:$4 sm:$0xff]   ;;  %v3960_v24 = vld [vmem:[%s5712_s1 + $0x1cc] ss:$12 sps:$4 sm:$0xff]   ;;  %v3965_v31 = vld [vmem:[%s5712_s1 + $0x1e4] ss:$12 sps:$4 sm:$0xff]  }
  0x1a   :  { %3691 = vmatpush3.bf16.msra.mxu1 %v3932_v40  ;;  %v3987_v29 = vld [vmem:[%s5712_s1 + $0x1e8] ss:$12 sps:$4 sm:$0xff]   ;;  %v3991_v32 = vld [vmem:[%s5712_s1 + $0x2c0] ss:$12 sps:$4 sm:$0xff]   ;;  %v3996_v38 = vld [vmem:[%s5712_s1 + $0x2d8] ss:$12 sps:$4 sm:$0xff]   ;;  %v452_v40 = vcombine.high %v4588_v45, %v4588_v45 }
  0x1b   :  { %2169 = vmatpush1.bf16.msra.mxu0 %v3894_v26  ;;  %3692 = vmatprep.subr.bf16.mxu1 %v3936_v42  ;;  %v3986_v26 = vld [vmem:[%s5712_s1 + $0x2a8] ss:$12 sps:$4 sm:$0xff]   ;;  %v3992_v36 = vld [vmem:[%s5712_s1 + $0x200] ss:$12 sps:$4 sm:$0xff]   ;;  %v4001_v45 = vld [vmem:[%s5712_s1 + $0x2f0] ss:$12 sps:$4 sm:$0xff]  }
  0x1c   :  { %2170 = vmatprep.subr.bf16.mxu0 %v3895_v27  ;;  %v3958_v27 = vld [vmem:[%s5712_s1 + $0x1c8] ss:$12 sps:$4 sm:$0xff]   ;;  %v3980_v48 = vld [vmem:[%s5712_s1 + $0x22c] ss:$12 sps:$4 sm:$0xff]   ;;  %v3985_v53 = vld [vmem:[%s5712_s1 + $0x244] ss:$12 sps:$4 sm:$0xff]  }
  0x1d   :  { %v3970_v35 = vld [vmem:[%s5712_s1 + $0x1fc] ss:$12 sps:$4 sm:$0xff]  }
  0x1e   :  { %3693 = vmatpush3.bf16.msra.mxu1 %v3937_v44  ;;  %v4006_v50 = vld [vmem:[%s5712_s1 + $0x3c8] ss:$12 sps:$4 sm:$0xff]  }
  0x1f   :  { %2171 = vmatpush1.bf16.msra.mxu0 %v3897_v33  ;;  %3694 = vmatprep.subr.bf16.mxu1 %v3941_v47  ;;  %v3963_v33 = vld [vmem:[%s5712_s1 + $0x1e0] ss:$12 sps:$4 sm:$0xff]   ;;  %v3973_v47 = vld [vmem:[%s5712_s1 + $0x210] ss:$12 sps:$4 sm:$0xff]  }
  0x20   :  { %2172 = vmatprep.subr.bf16.mxu0 %v3898_v34  ;;  %v508_v34 = vrot.slane %v4542_v30, %v4534_v28  ;;  %v3968_v30 = vld [vmem:[%s5712_s1 + $0x1f8] ss:$12 sps:$4 sm:$0xff]  }
  0x22   :  { %3695 = vmatpush3.bf16.msra.mxu1 %v3942_v52  ;;  %v4753_v44 = vrot.slane %v508_v34, %v4534_v28 }
  0x23   :  { %2173 = vmatpush1.bf16.msra.mxu0 %v3900_v39  ;;  %3696 = vmatprep.subr.bf16.mxu1 %v3946_v54  ;;  %v516_v39 = vcombine.high %v508_v34, %v508_v34  ;;  %v4783_v54 = vcombine.high %v4669_v11, %v4669_v11  ;;  %v4057_v34 = vld [vmem:[%s5712_s1 + $0x578] ss:$12 sps:$4 sm:$0xff]  }
  0x24   :  { %2174 = vmatprep.subr.bf16.mxu0 %v3904_v41  ;;  %v3975_v41 = vld [vmem:[%s5712_s1 + $0x214] ss:$12 sps:$4 sm:$0xff]  }
  0x25   :  { %v4747_v42 = vrot.slane %v516_v39, %v4534_v28  ;;  %v4062_v39 = vld [vmem:[%s5712_s1 + $0x590] ss:$12 sps:$4 sm:$0xff]  }
  0x26   :  { %3697 = vmatpush3.bf16.msra.mxu1 %v3947_v57 }
  0x27   :  { %2175 = vmatpush1.bf16.msra.mxu0 %v3906_v43  ;;  %3698 = vmatprep.subr.bf16.mxu1 %v3951_v58  ;;  %v3997_v43 = vld [vmem:[%s5712_s1 + $0x218] ss:$12 sps:$4 sm:$0xff]   ;;  %v3983_v58 = vld [vmem:[%s5712_s1 + $0x240] ss:$12 sps:$4 sm:$0xff]  }
  0x28   :  { %2176 = vmatprep.subr.bf16.mxu0 %v3910_v46  ;;  %v4759_v46 = vrot.slane %v452_v40, %v4534_v28  ;;  %v4063_v40 = vld [vmem:[%s5712_s1 + $0x4d0] ss:$12 sps:$4 sm:$0xff]  }
  0x2a   :  { %3699 = vmatpush3.bf16.msra.mxu1 %v3952_v61  ;;  %v468_v52 = vcombine.high %v4759_v46, %v4759_v46  ;;  %v4016_v61 = vld [vmem:[%s5712_s1 + $0x3f8] ss:$12 sps:$4 sm:$0xff]  }
  0x2b   :  { %2177 = vmatpush1.bf16.msra.mxu0 %v3912_v49  ;;  %3700 = vmatprep.subr.bf16.mxu1 %v3956_v62  ;;  %v4002_v49 = vld [vmem:[%s5712_s1 + $0x230] ss:$12 sps:$4 sm:$0xff]   ;;  %v3988_v62 = vld [vmem:[%s5712_s1 + $0x258] ss:$12 sps:$4 sm:$0xff]  }
  0x2c   :  { %2178 = vmatprep.subr.bf16.mxu0 %v3916_v51  ;;  %v3978_v51 = vld [vmem:[%s5712_s1 + $0x228] ss:$12 sps:$4 sm:$0xff]   ;;  %v4792_v57 = vrot.slane %v468_v52, %v4534_v28  ;;  %v4077_v52 = vld [vmem:[%s5712_s1 + $0x5d8] ss:$12 sps:$4 sm:$0xff]  }
  0x2e   :  { %3701 = vmatpush3.bf16.msra.mxu1 %v3957_v1  ;;  %v4021_v1 = vld [vmem:[%s5712_s1 + $0x410] ss:$12 sps:$4 sm:$0xff]  }
  0x2f   :  { %2179 = vmatpush1.bf16.msra.mxu0 %v3918_v55  ;;  %3702 = vmatprep.subr.bf16.mxu1 %v3961_v3  ;;  %v4007_v55 = vld [vmem:[%s5712_s1 + $0x308] ss:$12 sps:$4 sm:$0xff]   ;;  %v3993_v3 = vld [vmem:[%s5712_s1 + $0x270] ss:$12 sps:$4 sm:$0xff]  }
  0x30   :  { %2180 = vmatprep.subr.bf16.mxu0 %v3922_v56  ;;  %v4011_v56 = vld [vmem:[%s5712_s1 + $0x3e0] ss:$12 sps:$4 sm:$0xff]  }
  0x32   :  { %3703 = vmatpush3.bf16.msra.mxu1 %v3962_v5  ;;  %v4022_v5 = vld [vmem:[%s5712_s1 + $0x350] ss:$12 sps:$4 sm:$0xff]  }
  0x33   :  { %2181 = vmatpush1.bf16.msra.mxu0 %v3924_v59  ;;  %3710 = vmatprep.subr.bf16.mxu1 %v3966_v7  ;;  %v4012_v59 = vld [vmem:[%s5712_s1 + $0x320] ss:$12 sps:$4 sm:$0xff]   ;;  %v3998_v7 = vld [vmem:[%s5712_s1 + $0x288] ss:$12 sps:$4 sm:$0xff]  }
  0x34   :  { %2182 = vmatprep.subr.bf16.mxu0 %v3928_v60  ;;  %v3990_v60 = vld [vmem:[%s5712_s1 + $0x25c] ss:$12 sps:$4 sm:$0xff]  }
  0x35   :  { %2476 = vmatmul.mubr.bf16.vlgmr.msra.gmra.mrb[4].mxu1 %v4669_v11 }
  0x36   :  { %3711 = vmatpush3.bf16.msra.mxu1 %v3967_v10  ;;  %2515 = vmatprep.mubr.bf16.mxu1 %v499_v14  ;;  %v4031_v10 = vld [vmem:[%s5712_s1 + $0x440] ss:$12 sps:$4 sm:$0xff]  }
  0x37   :  { %2183 = vmatpush1.bf16.msra.mxu0 %v3930_v63  ;;  %3712 = vmatprep.subr.bf16.mxu1 %v3971_v12  ;;  %v3995_v63 = vld [vmem:[%s5712_s1 + $0x274] ss:$12 sps:$4 sm:$0xff]   ;;  %v4010_v12 = vld [vmem:[%s5712_s1 + $0x2bc] ss:$12 sps:$4 sm:$0xff]  }
  0x38   :  { %2184 = vmatprep.subr.bf16.mxu0 %v3933_v0  ;;  %v4017_v0 = vld [vmem:[%s5712_s1 + $0x338] ss:$12 sps:$4 sm:$0xff]  }
  0x3a   :  { %3713 = vmatpush3.bf16.msra.mxu1 %v3972_v16  ;;  %v4037_v16 = vld [vmem:[%s5712_s1 + $0x398] ss:$12 sps:$4 sm:$0xff]  }
  0x3b   :  { %2185 = vmatpush1.bf16.msra.mxu0 %v3935_v4  ;;  %3714 = vmatprep.subr.bf16.mxu1 %v3976_v17  ;;  %v4000_v4 = vld [vmem:[%s5712_s1 + $0x28c] ss:$12 sps:$4 sm:$0xff]   ;;  %v4015_v17 = vld [vmem:[%s5712_s1 + $0x2d4] ss:$12 sps:$4 sm:$0xff]  }
  0x3c   :  { %2186 = vmatprep.subr.bf16.mxu0 %v3938_v6  ;;  %v4026_v6 = vld [vmem:[%s5712_s1 + $0x428] ss:$12 sps:$4 sm:$0xff]  }
  0x3e   :  { %3715 = vmatpush3.bf16.msra.mxu1 %v3977_v20  ;;  %v4020_v20 = vld [vmem:[%s5712_s1 + $0x2ec] ss:$12 sps:$4 sm:$0xff]  }
  0x3f   :  { %2187 = vmatpush1.bf16.msra.mxu0 %v3940_v8  ;;  %3716 = vmatprep.subr.bf16.mxu1 %v3981_v22  ;;  %v4005_v8 = vld [vmem:[%s5712_s1 + $0x2a4] ss:$12 sps:$4 sm:$0xff]  }
  0x40   :  { %2197 = vmatprep.subr.bf16.mxu0 %v3945_v9  ;;  %v4027_v9 = vld [vmem:[%s5712_s1 + $0x368] ss:$12 sps:$4 sm:$0xff]   ;;  %v4042_v22 = vld [vmem:[%s5712_s1 + $0x3b0] ss:$12 sps:$4 sm:$0xff]  }
  0x42   :  { %2189 = vmatmul.mubr.bf16.vlgmr.msra.gmra.mrb[0].mxu0 %v4669_v11  ;;  %3717 = vmatpush3.bf16.msra.mxu1 %v3982_v25  ;;  %v4003_v11 = vld [vmem:[%s5712_s1 + $0x2a0] ss:$12 sps:$4 sm:$0xff]   ;;  %v4025_v25 = vld [vmem:[%s5712_s1 + $0x304] ss:$12 sps:$4 sm:$0xff]  }
  0x43   :  { %2198 = vmatpush1.bf16.msra.mxu0 %v3943_v13  ;;  %2229 = vmatprep.mubr.bf16.mxu0 %v499_v14  ;;  %v4032_v13 = vld [vmem:[%s5712_s1 + $0x380] ss:$12 sps:$4 sm:$0xff]   ;;  %v4036_v14 = vld [vmem:[%s5712_s1 + $0x458] ss:$12 sps:$4 sm:$0xff]  }
  0x44   :  { %2199 = vmatprep.subr.bf16.mxu0 %v3950_v15  ;;  %3718 = vmatprep.subr.bf16.mxu1 %v3986_v26  ;;  %v4008_v15 = vld [vmem:[%s5712_s1 + $0x2b8] ss:$12 sps:$4 sm:$0xff]   ;;  %v4888_v26 = vrot.slane %v4759_v46, %v4534_v28  ;;  %v4023_v28 = vld [vmem:[%s5712_s1 + $0x300] ss:$12 sps:$4 sm:$0xff]  }
  0x45   :  { %v4045_v46 = vld [vmem:[%s5712_s1 + $0x364] ss:$12 sps:$4 sm:$0xff]  }
  0x46   :  { %3719 = vmatpush3.bf16.msra.mxu1 %v3987_v29  ;;  %v4052_v29 = vld [vmem:[%s5712_s1 + $0x560] ss:$12 sps:$4 sm:$0xff]  }
  0x47   :  { %2200 = vmatpush1.bf16.msra.mxu0 %v3948_v18  ;;  %3720 = vmatprep.subr.bf16.mxu1 %v3991_v32  ;;  %v4041_v18 = vld [vmem:[%s5712_s1 + $0x470] ss:$12 sps:$4 sm:$0xff]  }
  0x48   :  { %2201 = vmatprep.subr.bf16.mxu0 %v3955_v19  ;;  %v4013_v19 = vld [vmem:[%s5712_s1 + $0x2d0] ss:$12 sps:$4 sm:$0xff]  }
  0x49   :  { %v4030_v32 = vld [vmem:[%s5712_s1 + $0x31c] ss:$12 sps:$4 sm:$0xff]  }
  0x4a   :  { %3721 = vmatpush3.bf16.msra.mxu1 %v3992_v36  ;;  %v4035_v36 = vld [vmem:[%s5712_s1 + $0x334] ss:$12 sps:$4 sm:$0xff]  }
  0x4b   :  { %2202 = vmatpush1.bf16.msra.mxu0 %v3953_v23  ;;  %3722 = vmatprep.subr.bf16.mxu1 %v3996_v38  ;;  %v4047_v23 = vld [vmem:[%s5712_s1 + $0x548] ss:$12 sps:$4 sm:$0xff]   ;;  %v4058_v38 = vld [vmem:[%s5712_s1 + $0x4b8] ss:$12 sps:$4 sm:$0xff]  }
  0x4c   :  { %2203 = vmatprep.subr.bf16.mxu0 %v3960_v24  ;;  %v4018_v24 = vld [vmem:[%s5712_s1 + $0x2e8] ss:$12 sps:$4 sm:$0xff]  }
  0x4e   :  { %3723 = vmatpush3.bf16.msra.mxu1 %v3997_v43  ;;  %v4067_v43 = vld [vmem:[%s5712_s1 + $0x5a8] ss:$12 sps:$4 sm:$0xff]  }
  0x4f   :  { %2204 = vmatpush1.bf16.msra.mxu0 %v3958_v27  ;;  %3724 = vmatprep.subr.bf16.mxu1 %v4001_v45  ;;  %v4048_v27 = vld [vmem:[%s5712_s1 + $0x488] ss:$12 sps:$4 sm:$0xff]  }
  0x50   :  { %2205 = vmatprep.subr.bf16.mxu0 %v3965_v31  ;;  %v4898_v31 = vcombine.high %v4792_v57, %v4792_v57  ;;  %v4038_v45 = vld [vmem:[%s5712_s1 + $0x348] ss:$12 sps:$4 sm:$0xff]  }
  0x52   :  { %3725 = vmatpush3.bf16.msra.mxu1 %v4002_v49  ;;  %v4043_v49 = vld [vmem:[%s5712_s1 + $0x360] ss:$12 sps:$4 sm:$0xff]  }
  0x53   :  { %2206 = vmatpush1.bf16.msra.mxu0 %v3963_v33  ;;  %3732 = vmatprep.subr.bf16.mxu1 %v4006_v50  ;;  %v4053_v33 = vld [vmem:[%s5712_s1 + $0x4a0] ss:$12 sps:$4 sm:$0xff]   ;;  %v4051_v50 = vld [vmem:[%s5712_s1 + $0x37c] ss:$12 sps:$4 sm:$0xff]  }
  0x54   :  { %2207 = vmatprep.subr.bf16.mxu0 %v3970_v35  ;;  %v4028_v35 = vld [vmem:[%s5712_s1 + $0x318] ss:$12 sps:$4 sm:$0xff]  }
  0x55   :  { %2516 = vmatmul.mubr.bf16.vlgmr.msra.gmra.mrb[8].mxu1 %v4783_v54 }
  0x56   :  { %3733 = vmatpush3.bf16.msra.mxu1 %v4007_v55  ;;  %2555 = vmatprep.mubr.bf16.mxu1 %v4792_v57  ;;  %v4078_v55 = vld [vmem:[%s5712_s1 + $0x518] ss:$12 sps:$4 sm:$0xff]  }
  0x57   :  { %2208 = vmatpush1.bf16.msra.mxu0 %v3968_v30  ;;  %3734 = vmatprep.subr.bf16.mxu1 %v4011_v56  ;;  %v4033_v30 = vld [vmem:[%s5712_s1 + $0x330] ss:$12 sps:$4 sm:$0xff]  }
  0x58   :  { %2209 = vmatprep.subr.bf16.mxu0 %v3975_v41  ;;  %v4040_v41 = vld [vmem:[%s5712_s1 + $0x34c] ss:$12 sps:$4 sm:$0xff]   ;;  %v4082_v56 = vld [vmem:[%s5712_s1 + $0x5f0] ss:$12 sps:$4 sm:$0xff]  }
  0x5a   :  { %3735 = vmatpush3.bf16.msra.mxu1 %v4012_v59  ;;  %v4083_v59 = vld [vmem:[%s5712_s1 + $0x530] ss:$12 sps:$4 sm:$0xff]  }
  0x5b   :  { %2210 = vmatpush1.bf16.msra.mxu0 %v3973_v47  ;;  %3736 = vmatprep.subr.bf16.mxu1 %v4016_v61  ;;  %v4068_v47 = vld [vmem:[%s5712_s1 + $0x4e8] ss:$12 sps:$4 sm:$0xff]  }
  0x5c   :  { %2211 = vmatprep.subr.bf16.mxu0 %v3980_v48  ;;  %v4072_v48 = vld [vmem:[%s5712_s1 + $0x5c0] ss:$12 sps:$4 sm:$0xff]   ;;  %v4059_v61 = vld [vmem:[%s5712_s1 + $0x3a8] ss:$12 sps:$4 sm:$0xff]  }
  0x5e   :  { %3737 = vmatpush3.bf16.msra.mxu1 %v4017_v0  ;;  %v4066_v0 = vld [vmem:[%s5712_s1 + $0x3c4] ss:$12 sps:$4 sm:$0xff]  }
  0x5f   :  { %2212 = vmatpush1.bf16.msra.mxu0 %v3978_v51  ;;  %3738 = vmatprep.subr.bf16.mxu1 %v4021_v1  ;;  %v4073_v51 = vld [vmem:[%s5712_s1 + $0x500] ss:$12 sps:$4 sm:$0xff]  }
  0x60   :  { %2213 = vmatprep.subr.bf16.mxu0 %v3985_v53  ;;  %v4049_v53 = vld [vmem:[%s5712_s1 + $0x378] ss:$12 sps:$4 sm:$0xff]   ;;  %v4092_v1 = vld [vmem:[%s5712_s1 + $0x6e0] ss:$12 sps:$4 sm:$0xff]  }
  0x62   :  { %3739 = vmatpush3.bf16.msra.mxu1 %v4022_v5  ;;  %v4093_v5 = vld [vmem:[%s5712_s1 + $0x620] ss:$12 sps:$4 sm:$0xff]  }
  0x63   :  { %2214 = vmatpush1.bf16.msra.mxu0 %v3983_v58  ;;  %3740 = vmatprep.subr.bf16.mxu1 %v4026_v6  ;;  %v4061_v58 = vld [vmem:[%s5712_s1 + $0x3ac] ss:$12 sps:$4 sm:$0xff]  }
  0x64   :  { %2215 = vmatprep.subr.bf16.mxu0 %v3990_v60  ;;  %v4087_v60 = vld [vmem:[%s5712_s1 + $0x6c8] ss:$12 sps:$4 sm:$0xff]   ;;  %v4097_v6 = vld [vmem:[%s5712_s1 + $0x6f8] ss:$12 sps:$4 sm:$0xff]  }
  0x66   :  { %3741 = vmatpush3.bf16.msra.mxu1 %v4027_v9  ;;  %v4098_v9 = vld [vmem:[%s5712_s1 + $0x638] ss:$12 sps:$4 sm:$0xff]  }
  0x67   :  { %2216 = vmatpush1.bf16.msra.mxu0 %v3988_v62  ;;  %3742 = vmatprep.subr.bf16.mxu1 %v4031_v10  ;;  %v4993_v62 = vcombine.high %v4888_v26, %v4888_v26  ;;  %v4102_v10 = vld [vmem:[%s5712_s1 + $0x710] ss:$12 sps:$4 sm:$0xff]  }
  0x68   :  { %2217 = vmatprep.subr.bf16.mxu0 %v3995_v63  ;;  %v4088_v63 = vld [vmem:[%s5712_s1 + $0x608] ss:$12 sps:$4 sm:$0xff]  }
  0x6a   :  { %3743 = vmatpush3.bf16.msra.mxu1 %v4032_v13  ;;  %v4103_v13 = vld [vmem:[%s5712_s1 + $0x650] ss:$12 sps:$4 sm:$0xff]  }
  0x6b   :  { %2218 = vmatpush1.bf16.msra.mxu0 %v3993_v3  ;;  %3744 = vmatprep.subr.bf16.mxu1 %v4036_v14  ;;  %v4064_v3 = vld [vmem:[%s5712_s1 + $0x3c0] ss:$12 sps:$4 sm:$0xff]   ;;  %v4107_v14 = vld [vmem:[%s5712_s1 + $0x728] ss:$12 sps:$4 sm:$0xff]  }
  0x6c   :  { %2219 = vmatprep.subr.bf16.mxu0 %v4000_v4  ;;  %v4071_v4 = vld [vmem:[%s5712_s1 + $0x3dc] ss:$12 sps:$4 sm:$0xff]  }
  0x6e   :  { %3745 = vmatpush3.bf16.msra.mxu1 %v4037_v16  ;;  %v4086_v16 = vld [vmem:[%s5712_s1 + $0x424] ss:$12 sps:$4 sm:$0xff]  }
  0x6f   :  { %2220 = vmatpush1.bf16.msra.mxu0 %v3998_v7  ;;  %3746 = vmatprep.subr.bf16.mxu1 %v4041_v18  ;;  %v4069_v7 = vld [vmem:[%s5712_s1 + $0x3d8] ss:$12 sps:$4 sm:$0xff]   ;;  %v4112_v18 = vld [vmem:[%s5712_s1 + $0x740] ss:$12 sps:$4 sm:$0xff]  }
  0x70   :  { %2221 = vmatprep.subr.bf16.mxu0 %v4005_v8  ;;  %v4076_v8 = vld [vmem:[%s5712_s1 + $0x3f4] ss:$12 sps:$4 sm:$0xff]  }
  0x72   :  { %3747 = vmatpush3.bf16.msra.mxu1 %v4042_v22  ;;  %v4091_v22 = vld [vmem:[%s5712_s1 + $0x43c] ss:$12 sps:$4 sm:$0xff]  }
  0x73   :  { %2222 = vmatpush1.bf16.msra.mxu0 %v4003_v11  ;;  %3754 = vmatprep.subr.bf16.mxu1 %v4047_v23  ;;  %v4074_v11 = vld [vmem:[%s5712_s1 + $0x3f0] ss:$12 sps:$4 sm:$0xff]   ;;  %v4117_v23 = vld [vmem:[%s5712_s1 + $0x758] ss:$12 sps:$4 sm:$0xff]  }
  0x74   :  { %2223 = vmatprep.subr.bf16.mxu0 %v4010_v12  ;;  %v4081_v12 = vld [vmem:[%s5712_s1 + $0x40c] ss:$12 sps:$4 sm:$0xff]  }
  0x75   :  { %2556 = vmatmul.mubr.bf16.vlgmr.msra.gmra.mrb[12].mxu1 %v4888_v26 }
  0x76   :  { %3755 = vmatpush3.bf16.msra.mxu1 %v4048_v27  ;;  %2595 = vmatprep.mubr.bf16.mxu1 %v4898_v31  ;;  %v4118_v27 = vld [vmem:[%s5712_s1 + $0x698] ss:$12 sps:$4 sm:$0xff]  }
  0x77   :  { %2224 = vmatpush1.bf16.msra.mxu0 %v4008_v15  ;;  %3756 = vmatprep.subr.bf16.mxu1 %v4052_v29  ;;  %v4079_v15 = vld [vmem:[%s5712_s1 + $0x408] ss:$12 sps:$4 sm:$0xff]   ;;  %v4122_v29 = vld [vmem:[%s5712_s1 + $0x770] ss:$12 sps:$4 sm:$0xff]  }
  0x78   :  { %2225 = vmatprep.subr.bf16.mxu0 %v4015_v17  ;;  %v4108_v17 = vld [vmem:[%s5712_s1 + $0x668] ss:$12 sps:$4 sm:$0xff]  }
  0x7a   :  { %3757 = vmatpush3.bf16.msra.mxu1 %v4053_v33  ;;  %v4123_v33 = vld [vmem:[%s5712_s1 + $0x6b0] ss:$12 sps:$4 sm:$0xff]  }
  0x7b   :  { %2226 = vmatpush1.bf16.msra.mxu0 %v4013_v19  ;;  %3758 = vmatprep.subr.bf16.mxu1 %v4057_v34  ;;  %v4084_v19 = vld [vmem:[%s5712_s1 + $0x420] ss:$12 sps:$4 sm:$0xff]   ;;  %v4127_v34 = vld [vmem:[%s5712_s1 + $0x848] ss:$12 sps:$4 sm:$0xff]  }
  0x7c   :  { %2227 = vmatprep.subr.bf16.mxu0 %v4020_v20  ;;  %v4113_v20 = vld [vmem:[%s5712_s1 + $0x680] ss:$12 sps:$4 sm:$0xff]  }
  0x7e   :  { %3759 = vmatpush3.bf16.msra.mxu1 %v4058_v38  ;;  %v4128_v38 = vld [vmem:[%s5712_s1 + $0x788] ss:$12 sps:$4 sm:$0xff]  }
  0x7f   :  { %2228 = vmatpush1.bf16.msra.mxu0 %v4018_v24  ;;  %3760 = vmatprep.subr.bf16.mxu1 %v4062_v39  ;;  %v4089_v24 = vld [vmem:[%s5712_s1 + $0x438] ss:$12 sps:$4 sm:$0xff]   ;;  %v4132_v39 = vld [vmem:[%s5712_s1 + $0x860] ss:$12 sps:$4 sm:$0xff]  }
  0x80   :  { %2238 = vmatprep.subr.bf16.mxu0 %v4025_v25  ;;  %v4096_v25 = vld [vmem:[%s5712_s1 + $0x454] ss:$12 sps:$4 sm:$0xff]  }
  0x82   :  { %2230 = vmatmul.mubr.bf16.vlgmr.msra.gmra.mrb[0].mxu0 %v4783_v54  ;;  %3761 = vmatpush3.bf16.msra.mxu1 %v4063_v40  ;;  %v4056_v54 = vld [vmem:[%s5712_s1 + $0x394] ss:$12 sps:$4 sm:$0xff]  }
  0x83   :  { %2239 = vmatpush1.bf16.msra.mxu0 %v4023_v28  ;;  %2270 = vmatprep.mubr.bf16.mxu0 %v4792_v57  ;;  %v4054_v57 = vld [vmem:[%s5712_s1 + $0x390] ss:$12 sps:$4 sm:$0xff]   ;;  %v4104_v40 = vld [vmem:[%s5712_s1 + $0x480] ss:$12 sps:$4 sm:$0xff]  }
  0x84   :  { %2240 = vmatprep.subr.bf16.mxu0 %v4030_v32  ;;  %3762 = vmatprep.subr.bf16.mxu1 %v4067_v43  ;;  %v4094_v28 = vld [vmem:[%s5712_s1 + $0x450] ss:$12 sps:$4 sm:$0xff]   ;;  %v4101_v32 = vld [vmem:[%s5712_s1 + $0x46c] ss:$12 sps:$4 sm:$0xff]  }
  0x85   :  { %v4111_v43 = vld [vmem:[%s5712_s1 + $0x49c] ss:$12 sps:$4 sm:$0xff]  }
  0x86   :  { %3763 = vmatpush3.bf16.msra.mxu1 %v4068_v47  ;;  %v4138_v47 = vld [vmem:[%s5712_s1 + $0x7b8] ss:$12 sps:$4 sm:$0xff]  }
  0x87   :  { %2241 = vmatpush1.bf16.msra.mxu0 %v4028_v35  ;;  %3764 = vmatprep.subr.bf16.mxu1 %v4072_v48  ;;  %v4099_v35 = vld [vmem:[%s5712_s1 + $0x468] ss:$12 sps:$4 sm:$0xff]  }
  0x88   :  { %2242 = vmatprep.subr.bf16.mxu0 %v4035_v36  ;;  %v4106_v36 = vld [vmem:[%s5712_s1 + $0x484] ss:$12 sps:$4 sm:$0xff]   ;;  %v4116_v48 = vld [vmem:[%s5712_s1 + $0x4b4] ss:$12 sps:$4 sm:$0xff]  }
  0x8a   :  { %3765 = vmatpush3.bf16.msra.mxu1 %v4073_v51  ;;  %v4121_v51 = vld [vmem:[%s5712_s1 + $0x4cc] ss:$12 sps:$4 sm:$0xff]  }
  0x8b   :  { %2243 = vmatpush1.bf16.msra.mxu0 %v4033_v30  ;;  %3766 = vmatprep.subr.bf16.mxu1 %v4077_v52  ;;  %v5104_v30 = vcombine.high %v4747_v42, %v4747_v42  ;;  %v4119_v52 = vld [vmem:[%s5712_s1 + $0x4c8] ss:$12 sps:$4 sm:$0xff]  }
  0x8c   :  { %2244 = vmatprep.subr.bf16.mxu0 %v4040_v41  ;;  %v4133_v41 = vld [vmem:[%s5712_s1 + $0x7a0] ss:$12 sps:$4 sm:$0xff]  }
  0x8e   :  { %3767 = vmatpush3.bf16.msra.mxu1 %v4078_v55  ;;  %v4152_v55 = vld [vmem:[%s5712_s1 + $0x8c0] ss:$12 sps:$4 sm:$0xff]  }
  0x8f   :  { %2245 = vmatpush1.bf16.msra.mxu0 %v4038_v45  ;;  %3768 = vmatprep.subr.bf16.mxu1 %v4082_v56  ;;  %v4137_v45 = vld [vmem:[%s5712_s1 + $0x878] ss:$12 sps:$4 sm:$0xff]   ;;  %v4124_v56 = vld [vmem:[%s5712_s1 + $0x4e0] ss:$12 sps:$4 sm:$0xff]  }
  0x90   :  { %2246 = vmatprep.subr.bf16.mxu0 %v4045_v46  ;;  %v4109_v46 = vld [vmem:[%s5712_s1 + $0x498] ss:$12 sps:$4 sm:$0xff]  }
  0x92   :  { %3769 = vmatpush3.bf16.msra.mxu1 %v4083_v59  ;;  %v4157_v59 = vld [vmem:[%s5712_s1 + $0x8d8] ss:$12 sps:$4 sm:$0xff]  }
  0x93   :  { %2247 = vmatpush1.bf16.msra.mxu0 %v4043_v49  ;;  %3776 = vmatprep.subr.bf16.mxu1 %v4087_v60  ;;  %v4114_v49 = vld [vmem:[%s5712_s1 + $0x4b0] ss:$12 sps:$4 sm:$0xff]   ;;  %v4129_v60 = vld [vmem:[%s5712_s1 + $0x4f8] ss:$12 sps:$4 sm:$0xff]  }
  0x94   :  { %2248 = vmatprep.subr.bf16.mxu0 %v4051_v50  ;;  %v4143_v50 = vld [vmem:[%s5712_s1 + $0x7d0] ss:$12 sps:$4 sm:$0xff]  }
  0x95   :  { %2596 = vmatmul.mubr.bf16.vlgmr.msra.gmra.mrb[16].mxu1 %v4993_v62 }
  0x96   :  { %3777 = vmatpush3.bf16.msra.mxu1 %v4088_v63  ;;  %2635 = vmatprep.mubr.bf16.mxu1 %v4747_v42  ;;  %v4136_v63 = vld [vmem:[%s5712_s1 + $0x514] ss:$12 sps:$4 sm:$0xff]  }
  0x97   :  { %2249 = vmatpush1.bf16.msra.mxu0 %v4049_v53  ;;  %3778 = vmatprep.subr.bf16.mxu1 %v4092_v1  ;;  %v4148_v53 = vld [vmem:[%s5712_s1 + $0x7e8] ss:$12 sps:$4 sm:$0xff]   ;;  %v4134_v1 = vld [vmem:[%s5712_s1 + $0x510] ss:$12 sps:$4 sm:$0xff]  }
  0x98   :  { %2250 = vmatprep.subr.bf16.mxu0 %v4056_v54  ;;  %v4126_v54 = vld [vmem:[%s5712_s1 + $0x4e4] ss:$12 sps:$4 sm:$0xff]  }
  0x9a   :  { %3779 = vmatpush3.bf16.msra.mxu1 %v4093_v5  ;;  %v4139_v5 = vld [vmem:[%s5712_s1 + $0x528] ss:$12 sps:$4 sm:$0xff]  }
  0x9b   :  { %2251 = vmatpush1.bf16.msra.mxu0 %v4054_v57  ;;  %3780 = vmatprep.subr.bf16.mxu1 %v4097_v6  ;;  %v4153_v57 = vld [vmem:[%s5712_s1 + $0x800] ss:$12 sps:$4 sm:$0xff]   ;;  %v5196_v6 = vcombine.high %v4753_v44, %v4753_v44 }
  0x9c   :  { %2252 = vmatprep.subr.bf16.mxu0 %v4061_v58  ;;  %v4131_v58 = vld [vmem:[%s5712_s1 + $0x4fc] ss:$12 sps:$4 sm:$0xff]  }
  0x9e   :  { %3781 = vmatpush3.bf16.msra.mxu1 %v4098_v9  ;;  %v4414_v9 = vmov 0.0  }
  0x9f   :  { %2253 = vmatpush1.bf16.msra.mxu0 %v4059_v61  ;;  %3782 = vmatprep.subr.bf16.mxu1 %v4102_v10  ;;  %v4158_v61 = vld [vmem:[%s5712_s1 + $0x818] ss:$12 sps:$4 sm:$0xff]   ;;  %v4144_v10 = vld [vmem:[%s5712_s1 + $0x540] ss:$12 sps:$4 sm:$0xff]  }
  0xa0   :  { %2254 = vmatprep.subr.bf16.mxu0 %v4066_v0  ;;  %v4162_v0 = vld [vmem:[%s5712_s1 + $0x8f0] ss:$12 sps:$4 sm:$0xff]  }
  0xa2   :  { %3783 = vmatpush3.bf16.msra.mxu1 %v4103_v13  ;;  %v4149_v13 = vld [vmem:[%s5712_s1 + $0x558] ss:$12 sps:$4 sm:$0xff]  }
  0xa3   :  { %2255 = vmatpush1.bf16.msra.mxu0 %v4064_v3  ;;  %3784 = vmatprep.subr.bf16.mxu1 %v4107_v14  ;;  %v4163_v3 = vld [vmem:[%s5712_s1 + $0x830] ss:$12 sps:$4 sm:$0xff]   ;;  %v4156_v14 = vld [vmem:[%s5712_s1 + $0x574] ss:$12 sps:$4 sm:$0xff]  }
  0xa4   :  { %2256 = vmatprep.subr.bf16.mxu0 %v4071_v4  ;;  %v4141_v4 = vld [vmem:[%s5712_s1 + $0x52c] ss:$12 sps:$4 sm:$0xff]  }
  0xa6   :  { %3785 = vmatpush3.bf16.msra.mxu1 %v4108_v17  ;;  %v4161_v17 = vld [vmem:[%s5712_s1 + $0x58c] ss:$12 sps:$4 sm:$0xff]  }
  0xa7   :  { %2257 = vmatpush1.bf16.msra.mxu0 %v4069_v7  ;;  %3786 = vmatprep.subr.bf16.mxu1 %v4112_v18  ;;  %v4167_v7 = vld [vmem:[%s5712_s1 + $0x908] ss:$12 sps:$4 sm:$0xff]   ;;  %v4179_v18 = vld [vmem:[%s5712_s1 + $0x950] ss:$12 sps:$4 sm:$0xff]  }
  0xa8   :  { %2258 = vmatprep.subr.bf16.mxu0 %v4076_v8  ;;  %v4146_v8 = vld [vmem:[%s5712_s1 + $0x544] ss:$12 sps:$4 sm:$0xff]  }
  0xaa   :  { %3787 = vmatpush3.bf16.msra.mxu1 %v4113_v20  ;;  %v4166_v20 = vld [vmem:[%s5712_s1 + $0x5a4] ss:$12 sps:$4 sm:$0xff]  }
  0xab   :  { %2259 = vmatpush1.bf16.msra.mxu0 %v4074_v11  ;;  %3788 = vmatprep.subr.bf16.mxu1 %v4117_v23  ;;  %v4171_v11 = vld [vmem:[%s5712_s1 + $0x920] ss:$12 sps:$4 sm:$0xff]   ;;  %v4170_v23 = vld [vmem:[%s5712_s1 + $0x5bc] ss:$12 sps:$4 sm:$0xff]  }
  0xac   :  { %2260 = vmatprep.subr.bf16.mxu0 %v4081_v12  ;;  %v4151_v12 = vld [vmem:[%s5712_s1 + $0x55c] ss:$12 sps:$4 sm:$0xff]  }
  0xae   :  { %3789 = vmatpush3.bf16.msra.mxu1 %v4118_v27  ;;  %v4178_v27 = vld [vmem:[%s5712_s1 + $0x5ec] ss:$12 sps:$4 sm:$0xff]  }
  0xaf   :  { %2261 = vmatpush1.bf16.msra.mxu0 %v4079_v15  ;;  %3790 = vmatprep.subr.bf16.mxu1 %v4122_v29  ;;  %v4175_v15 = vld [vmem:[%s5712_s1 + $0x938] ss:$12 sps:$4 sm:$0xff]   ;;  %v4176_v29 = vld [vmem:[%s5712_s1 + $0x5e8] ss:$12 sps:$4 sm:$0xff]  }
  0xb0   :  { %2262 = vmatprep.subr.bf16.mxu0 %v4086_v16  ;;  %v4154_v16 = vld [vmem:[%s5712_s1 + $0x570] ss:$12 sps:$4 sm:$0xff]  }
  0xb2   :  { %3791 = vmatpush3.bf16.msra.mxu1 %v4123_v33  ;;  %v4185_v33 = vld [vmem:[%s5712_s1 + $0x61c] ss:$12 sps:$4 sm:$0xff]  }
  0xb3   :  { %2263 = vmatpush1.bf16.msra.mxu0 %v4084_v19  ;;  %3798 = vmatprep.subr.bf16.mxu1 %v4127_v34  ;;  %v4159_v19 = vld [vmem:[%s5712_s1 + $0x588] ss:$12 sps:$4 sm:$0xff]  }
  0xb4   :  { %2264 = vmatprep.subr.bf16.mxu0 %v4091_v22  ;;  %v4164_v22 = vld [vmem:[%s5712_s1 + $0x5a0] ss:$12 sps:$4 sm:$0xff]  }
  0xb5   :  { %2636 = vmatmul.mubr.bf16.vlgmr.msra.gmra.mrb[20].mxu1 %v4753_v44 }
  0xb6   :  { %3799 = vmatpush3.bf16.msra.mxu1 %v4128_v38  ;;  %2675 = vmatprep.mubr.bf16.mxu1 %v5104_v30 }
  0xb7   :  { %2265 = vmatpush1.bf16.msra.mxu0 %v4089_v24  ;;  %3800 = vmatprep.subr.bf16.mxu1 %v4132_v39  ;;  %v4168_v24 = vld [vmem:[%s5712_s1 + $0x5b8] ss:$12 sps:$4 sm:$0xff]  }
  0xb8   :  { %2266 = vmatprep.subr.bf16.mxu0 %v4096_v25  ;;  %v4174_v25 = vld [vmem:[%s5712_s1 + $0x5d4] ss:$12 sps:$4 sm:$0xff]  }
  0xba   :  { %3801 = vmatpush3.bf16.msra.mxu1 %v4133_v41 }
  0xbb   :  { %2267 = vmatpush1.bf16.msra.mxu0 %v4094_v28  ;;  %3802 = vmatprep.subr.bf16.mxu1 %v4137_v45  ;;  %v4182_v28 = vld [vmem:[%s5712_s1 + $0x604] ss:$12 sps:$4 sm:$0xff]  }
  0xbc   :  { %2268 = vmatprep.subr.bf16.mxu0 %v4101_v32  ;;  %v4180_v32 = vld [vmem:[%s5712_s1 + $0x600] ss:$12 sps:$4 sm:$0xff]  }
  0xbe   :  { %3803 = vmatpush3.bf16.msra.mxu1 %v4138_v47 }
  0xbf   :  { %2269 = vmatpush1.bf16.msra.mxu0 %v4099_v35 }
  0xc0   :  { %2279 = vmatprep.subr.bf16.mxu0 %v4106_v36 }
  0xc2   :  { %2271 = vmatmul.mubr.bf16.vlgmr.msra.gmra.mrb[0].mxu0 %v4888_v26  ;;  %v4142_v26 = vld [vmem:[%s5712_s1 + $0x890] ss:$12 sps:$4 sm:$0xff]  }
  0xc3   :  { %2280 = vmatpush1.bf16.msra.mxu0 %v4104_v40  ;;  %2311 = vmatprep.mubr.bf16.mxu0 %v4898_v31  ;;  %v4147_v31 = vld [vmem:[%s5712_s1 + $0x8a8] ss:$12 sps:$4 sm:$0xff]  }
  0xc4   :  { %2281 = vmatprep.subr.bf16.mxu0 %v4111_v43  ;;  %3804 = vmatprep.subr.bf16.mxu1 %v4142_v26 }
  0xc5   :  { %3805 = vmatpush3.bf16.msra.mxu1 %v4143_v50 }
  0xc6   :  { %3806 = vmatprep.subr.bf16.mxu1 %v4147_v31 }
  0xc7   :  { %2282 = vmatpush1.bf16.msra.mxu0 %v4109_v46 }
  0xc8   :  { %2283 = vmatprep.subr.bf16.mxu0 %v4116_v48 }
  0xc9   :  { %3807 = vmatpush3.bf16.msra.mxu1 %v4148_v53 }
  0xca   :  { %3808 = vmatprep.subr.bf16.mxu1 %v4152_v55 }
  0xcb   :  { %2284 = vmatpush1.bf16.msra.mxu0 %v4114_v49 }
  0xcc   :  { %2285 = vmatprep.subr.bf16.mxu0 %v4121_v51 }
  0xcd   :  { %3809 = vmatpush3.bf16.msra.mxu1 %v4153_v57 }
  0xce   :  { %3810 = vmatprep.subr.bf16.mxu1 %v4157_v59 }
  0xcf   :  { %2286 = vmatpush1.bf16.msra.mxu0 %v4119_v52 }
  0xd0   :  { %2287 = vmatprep.subr.bf16.mxu0 %v4126_v54 }
  0xd1   :  { %3811 = vmatpush3.bf16.msra.mxu1 %v4158_v61 }
  0xd2   :  { %3812 = vmatprep.subr.bf16.mxu1 %v4162_v0 }
  0xd3   :  { %2288 = vmatpush1.bf16.msra.mxu0 %v4124_v56 }
  0xd4   :  { %2289 = vmatprep.subr.bf16.mxu0 %v4131_v58 }
  0xd5   :  { %3813 = vmatpush3.bf16.msra.mxu1 %v4163_v3 }
  0xd6   :  { %3825 = vmatprep.subr.bf16.mxu1 %v4414_v9 }
  0xd7   :  { %2290 = vmatpush1.bf16.msra.mxu0 %v4129_v60 }
  0xd8   :  { %2291 = vmatprep.subr.bf16.mxu0 %v4136_v63  ;;  %2676 = vmatmul.mubr.bf16.vlgmr.msra.gmra.mrb[24].mxu1 %v5196_v6 }
  0xd9   :  { %3826 = vmatpush3.bf16.msra.mxu1 %v4167_v7  ;;  %3833 = vmatprep.mubr.msk.bf16.mxu1 %vm4415_vm1, %v4414_v9 }
  0xda   :  { %3827 = vmatprep.subr.bf16.mxu1 %v4414_v9 }
  0xdb   :  { %2292 = vmatpush1.bf16.msra.mxu0 %v4134_v1 }
  0xdc   :  { %2293 = vmatprep.subr.bf16.mxu0 %v4141_v4 }
  0xdd   :  { %3828 = vmatpush3.bf16.msra.mxu1 %v4171_v11 }
  0xde   :  { %3829 = vmatprep.subr.bf16.mxu1 %v4414_v9 }
  0xdf   :  { %2294 = vmatpush1.bf16.msra.mxu0 %v4139_v5 }
  0xe0   :  { %2295 = vmatprep.subr.bf16.mxu0 %v4146_v8 }
  0xe1   :  { %3830 = vmatpush3.bf16.msra.mxu1 %v4175_v15 }
  0xe2   :  { %3831 = vmatprep.subr.bf16.mxu1 %v4414_v9 }
  0xe3   :  { %2296 = vmatpush1.bf16.msra.mxu0 %v4144_v10 }
  0xe4   :  { %2297 = vmatprep.subr.bf16.mxu0 %v4151_v12 }
  0xe5   :  { %3832 = vmatpush3.bf16.msra.mxu1 %v4179_v18 }
  0xe7   :  { %2298 = vmatpush1.bf16.msra.mxu0 %v4149_v13 }
  0xe8   :  { %2299 = vmatprep.subr.bf16.mxu0 %v4156_v14  ;;  %3834 = vmatmul.mubr.msk.bf16.vlgmr.msra.gmra.mrb[28].mxu1 %vm2152_vm0, %v4560_v37  ;;  %v4172_v37 = vld [vmem:[%s5712_s1 + $0x5d0] ss:$12 sps:$4 sm:$0xff]   ;;  %v5271_v34 = vpop.f32.mrb[0].mxu1 }
  0xeb   :  { %2300 = vmatpush1.bf16.msra.mxu0 %v4154_v16 }
  0xec   :  { %2301 = vmatprep.subr.bf16.mxu0 %v4161_v17 }
  0xef   :  { %2302 = vmatpush1.bf16.msra.mxu0 %v4159_v19 }
  0xf0   :  { %2303 = vmatprep.subr.bf16.mxu0 %v4166_v20 }
  0xf3   :  { %2304 = vmatpush1.bf16.msra.mxu0 %v4164_v22 }
  0xf4   :  { %2305 = vmatprep.subr.bf16.mxu0 %v4170_v23 }
  0xf7   :  { %2306 = vmatpush1.bf16.msra.mxu0 %v4168_v24 }
  0xf8   :  { %2307 = vmatprep.subr.bf16.mxu0 %v4174_v25 }
  0xfb   :  { %2308 = vmatpush1.bf16.msra.mxu0 %v4172_v37 }
  0xfc   :  { %2309 = vmatprep.subr.bf16.mxu0 %v4178_v27 }
  0xff   :  { %2310 = vmatpush1.bf16.msra.mxu0 %v4176_v29 }
 0x100   :  { %2320 = vmatprep.subr.bf16.mxu0 %v4182_v28 }
 0x102   :  { %2312 = vmatmul.mubr.bf16.vlgmr.msra.gmra.mrb[0].mxu0 %v4993_v62 }
 0x103   :  { %15 = vsyncpa [#allocation5], 0  ;;  %2321 = vmatpush1.bf16.msra.mxu0 %v4180_v32  ;;  %v4183_v35 = vld [vmem:[%s5712_s1 + $0x618] ss:$12 sps:$4 sm:$0xff]   ;;  %2352 = vmatprep.mubr.bf16.mxu0 %v4747_v42  ;;  %v5277_v36 = vpop.f32.mrb[1].mxu1  ;;  %v445_v63 = vsub.s32 2, %v4516_v21 }
 0x104   :  { %2322 = vmatprep.subr.bf16.mxu0 %v4185_v33  ;;  %v4188_v38 = vld [vmem:[%s5712_s1 + $0x634] ss:$12 sps:$4 sm:$0xff]   ;;  %v2440_v39 = vpop.f32.mrb[2].mxu1  ;;  %v4186_v62 = vld [vmem:[%s5712_s1 + $0x630] ss:$12 sps:$4 sm:$0xff]   ;;  %vm3282_vm2 = vcmask 1041408  }
 0x105   :  { %v2441_v40 = vpop.f32.mrb[3].mxu1  ;;  %v4191_v41 = vld [vmem:[%s5712_s1 + $0x64c] ss:$12 sps:$4 sm:$0xff]   ;;  %v4189_v42 = vld [vmem:[%s5712_s1 + $0x648] ss:$12 sps:$4 sm:$0xff]   ;;  %s4417_s10 = smov [#allocation4]  }
 0x106   :  { %v4194_v43 = vld [vmem:[%s5712_s1 + $0x664] ss:$12 sps:$4 sm:$0xff]   ;;  %v4192_v45 = vld [vmem:[%s5712_s1 + $0x660] ss:$12 sps:$4 sm:$0xff]   ;;  %v4197_v46 = vld [vmem:[%s5712_s1 + $0x67c] ss:$12 sps:$4 sm:$0xff]  }
 0x107   :  { %2323 = vmatpush1.bf16.msra.mxu0 %v4183_v35  ;;  %v4195_v26 = vld [vmem:[%s5712_s1 + $0x678] ss:$12 sps:$4 sm:$0xff]   ;;  %v4200_v51 = vld [vmem:[%s5712_s1 + $0x694] ss:$12 sps:$4 sm:$0xff]   ;;  %v4198_v52 = vld [vmem:[%s5712_s1 + $0x690] ss:$12 sps:$4 sm:$0xff]  }
 0x108   :  { %2324 = vmatprep.subr.bf16.mxu0 %v4188_v38  ;;  %v3704_v47 = vpop.f32.mrb[4].mxu1  ;;  %v4203_v53 = vld [vmem:[%s5712_s1 + $0x6ac] ss:$12 sps:$4 sm:$0xff]   ;;  %v4201_v54 = vld [vmem:[%s5712_s1 + $0x6a8] ss:$12 sps:$4 sm:$0xff]   ;;  %s3312_s11 = sshll.u32 %s4417_s10, 4  ;;  %s3313_s11 = int_to_ptr.vmem [resolvable:$true] %s3312_s11 }
 0x109   :  { %v3705_v48 = vpop.f32.mrb[5].mxu1  ;;  %v4206_v55 = vld [vmem:[%s5712_s1 + $0x6c4] ss:$12 sps:$4 sm:$0xff]   ;;  %v4204_v56 = vld [vmem:[%s5712_s1 + $0x6c0] ss:$12 sps:$4 sm:$0xff]   ;;  %s4364_s12 = scalar_lea.vmem %s3313_s11, 96  ;;  %p4369_p1 = scmp.lt.s32.totalorder %s3313_s11, %s3313_s11 }
 0x10a   :  { %v3706_v49 = vadd.f32 %v3705_v48, %v3704_v47  ;;  %v3707_v50 = vpop.f32.mrb[6].mxu1  ;;  %v4209_v57 = vld [vmem:[%s5712_s1 + $0x6dc] ss:$12 sps:$4 sm:$0xff]   ;;  %v4207_v58 = vld [vmem:[%s5712_s1 + $0x6d8] ss:$12 sps:$4 sm:$0xff]   ;;  %p4365_p0 = scmp.ne.s32.totalorder %s3313_s11, %s4364_s12  ;;  %p4370_p2 = scmp.lt.s32.totalorder %s4364_s12, %s4364_s12 }
 0x10b   :  { %2325 = vmatpush1.bf16.msra.mxu0 %v4186_v62  ;;  %v3708_v31 = vpop.f32.mrb[7].mxu1  ;;  %v4212_v59 = vld [vmem:[%s5712_s1 + $0x6f4] ss:$12 sps:$4 sm:$0xff]   ;;  %v4210_v60 = vld [vmem:[%s5712_s1 + $0x6f0] ss:$12 sps:$4 sm:$0xff]  }
 0x10c   :  { %2326 = vmatprep.subr.bf16.mxu0 %v4191_v41  ;;  %v4215_v61 = vld [vmem:[%s5712_s1 + $0x70c] ss:$12 sps:$4 sm:$0xff]   ;;  %v5340_v0 = vld [vmem:[%s5713_s2] sm:$0x7]  ;;  %v4213_v1 = vld [vmem:[%s5712_s1 + $0x708] ss:$12 sps:$4 sm:$0xff]   ;;  %p4371_p3 = por %p4370_p2, %p4369_p1 }
 0x10d   :  { %v4218_v3 = vld [vmem:[%s5712_s1 + $0x724] ss:$12 sps:$4 sm:$0xff]   ;;  %v446_v4 = vrot.slane %v5340_v0, %v445_v63  ;;  %v4216_v5 = vld [vmem:[%s5712_s1 + $0x720] ss:$12 sps:$4 sm:$0xff]   ;;  %v4221_v7 = vld [vmem:[%s5712_s1 + $0x73c] ss:$12 sps:$4 sm:$0xff]  }
 0x10e   :  { %v4219_v11 = vld [vmem:[%s5712_s1 + $0x738] ss:$12 sps:$4 sm:$0xff]   ;;  %v4224_v14 = vld [vmem:[%s5712_s1 + $0x754] ss:$12 sps:$4 sm:$0xff]   ;;  %v4222_v17 = vld [vmem:[%s5712_s1 + $0x750] ss:$12 sps:$4 sm:$0xff]   ;;  %p4372_p4 = pnand %p4371_p3, %p4365_p0 }
 0x10f   :  { %2327 = vmatpush1.bf16.msra.mxu0 %v4189_v42  ;;  %v2478_v8 = vadd.f32 %v3706_v49, %v446_v4  ;;  %v4227_v18 = vld [vmem:[%s5712_s1 + $0x76c] ss:$12 sps:$4 sm:$0xff]   ;;  %v4225_v19 = vld [vmem:[%s5712_s1 + $0x768] ss:$12 sps:$4 sm:$0xff]   ;;  %v4230_v20 = vld [vmem:[%s5712_s1 + $0x784] ss:$12 sps:$4 sm:$0xff]  }
 0x110   :  { %2328 = vmatprep.subr.bf16.mxu0 %v4194_v43  ;;  %v4228_v22 = vld [vmem:[%s5712_s1 + $0x780] ss:$12 sps:$4 sm:$0xff]   ;;  %v4233_v23 = vld [vmem:[%s5712_s1 + $0x79c] ss:$12 sps:$4 sm:$0xff]   ;;  %v4231_v24 = vld [vmem:[%s5712_s1 + $0x798] ss:$12 sps:$4 sm:$0xff]  }
 0x111   :  { %v4236_v25 = vld [vmem:[%s5712_s1 + $0x7b4] ss:$12 sps:$4 sm:$0xff]   ;;  %v4234_v27 = vld [vmem:[%s5712_s1 + $0x7b0] ss:$12 sps:$4 sm:$0xff]   ;;  %v4239_v29 = vld [vmem:[%s5712_s1 + $0x7cc] ss:$12 sps:$4 sm:$0xff]  }
 0x112   :  { %v4276_v37 = vld [vmem:[%s5714_s3] ss:$8 sps:$4 sm:$0xff]   ;;  %v4279_v28 = vld [vmem:[%s5714_s3 + $0x10] ss:$8 sps:$4 sm:$0xff]   ;;  %v4284_v32 = vld [vmem:[%s5714_s3 + $0x24] ss:$8 sps:$4 sm:$0xff]  }
 0x113   :  { %2329 = vmatpush1.bf16.msra.mxu0 %v4192_v45  ;;  %v4237_v33 = vld [vmem:[%s5712_s1 + $0x7c8] ss:$12 sps:$4 sm:$0xff]   ;;  %v4242_v35 = vld [vmem:[%s5712_s1 + $0x7e4] ss:$12 sps:$4 sm:$0xff]   ;;  %v4240_v40 = vld [vmem:[%s5712_s1 + $0x7e0] ss:$12 sps:$4 sm:$0xff]  }
 0x114   :  { %2330 = vmatprep.subr.bf16.mxu0 %v4197_v46  ;;  %v4282_v38 = vld [vmem:[%s5714_s3 + $0x20] ss:$8 sps:$4 sm:$0xff]   ;;  %v4287_v39 = vld [vmem:[%s5714_s3 + $0x34] ss:$8 sps:$4 sm:$0xff]   ;;  %v4285_v42 = vld [vmem:[%s5714_s3 + $0x30] ss:$8 sps:$4 sm:$0xff]  }
 0x115   :  { %v4245_v62 = vld [vmem:[%s5712_s1 + $0x7fc] ss:$12 sps:$4 sm:$0xff]   ;;  %v4290_v45 = vld [vmem:[%s5714_s3 + $0x44] ss:$8 sps:$4 sm:$0xff]   ;;  %v4297_v63 = vld [vmem:[%s5714_s3 + $0x70] ss:$8 sps:$4 sm:$0xff]  }
 0x116   :  { %v4243_v46 = vld [vmem:[%s5712_s1 + $0x7f8] ss:$12 sps:$4 sm:$0xff]   ;;  %v4293_v31 = vld [vmem:[%s5714_s3 + $0x54] ss:$8 sps:$4 sm:$0xff]  }
 0x117   :  { %2331 = vmatpush1.bf16.msra.mxu0 %v4195_v26  ;;  %v4248_v26 = vld [vmem:[%s5712_s1 + $0x814] ss:$12 sps:$4 sm:$0xff]  }
 0x118   :  { %2332 = vmatprep.subr.bf16.mxu0 %v4200_v51  ;;  %v4288_v51 = vld [vmem:[%s5714_s3 + $0x40] ss:$8 sps:$4 sm:$0xff]  }
 0x119   :  { %v4260_v4 = vld [vmem:[%s5712_s1 + $0x874] ss:$12 sps:$4 sm:$0xff]  }
 0x11b   :  { %2333 = vmatpush1.bf16.msra.mxu0 %v4198_v52  ;;  %v4246_v52 = vld [vmem:[%s5712_s1 + $0x810] ss:$12 sps:$4 sm:$0xff]  }
 0x11c   :  { %2334 = vmatprep.subr.bf16.mxu0 %v4203_v53  ;;  %v4251_v53 = vld [vmem:[%s5712_s1 + $0x82c] ss:$12 sps:$4 sm:$0xff]  }
 0x11f   :  { %2335 = vmatpush1.bf16.msra.mxu0 %v4201_v54  ;;  %v4291_v54 = vld [vmem:[%s5714_s3 + $0x50] ss:$8 sps:$4 sm:$0xff]  }
 0x120   :  { %2336 = vmatprep.subr.bf16.mxu0 %v4206_v55  ;;  %v4296_v55 = vld [vmem:[%s5714_s3 + $0x64] ss:$8 sps:$4 sm:$0xff]  }
 0x123   :  { %2337 = vmatpush1.bf16.msra.mxu0 %v4204_v56  ;;  %v4249_v56 = vld [vmem:[%s5712_s1 + $0x828] ss:$12 sps:$4 sm:$0xff]  }
 0x124   :  { %2338 = vmatprep.subr.bf16.mxu0 %v4209_v57  ;;  %v4254_v57 = vld [vmem:[%s5712_s1 + $0x844] ss:$12 sps:$4 sm:$0xff]  }
 0x127   :  { %2339 = vmatpush1.bf16.msra.mxu0 %v4207_v58  ;;  %v4294_v58 = vld [vmem:[%s5714_s3 + $0x60] ss:$8 sps:$4 sm:$0xff]  }
 0x128   :  { %2340 = vmatprep.subr.bf16.mxu0 %v4212_v59  ;;  %v3726_v9 = vpop.f32.mrb[8].mxu1  ;;  %v4299_v59 = vld [vmem:[%s5714_s3 + $0x74] ss:$8 sps:$4 sm:$0xff]  }
 0x129   :  { %v3727_v10 = vpop.f32.mrb[9].mxu1 }
 0x12a   :  { %v3728_v12 = vadd.f32 %v3727_v10, %v3726_v9  ;;  %v3729_v13 = vpop.f32.mrb[10].mxu1  ;;  %v4263_v9 = vld [vmem:[%s5712_s1 + $0x88c] ss:$12 sps:$4 sm:$0xff]  }
 0x12b   :  { %2341 = vmatpush1.bf16.msra.mxu0 %v4210_v60  ;;  %v3730_v15 = vpop.f32.mrb[11].mxu1  ;;  %v4252_v60 = vld [vmem:[%s5712_s1 + $0x840] ss:$12 sps:$4 sm:$0xff]   ;;  %v4303_v10 = vld [vmem:[%s5714_s3 + $0x90] ss:$8 sps:$4 sm:$0xff]  }
 0x12c   :  { %2342 = vmatprep.subr.bf16.mxu0 %v4215_v61  ;;  %v2518_v16 = vadd.f32 %v3728_v12, %v2478_v8  ;;  %v4257_v61 = vld [vmem:[%s5712_s1 + $0x85c] ss:$12 sps:$4 sm:$0xff]   ;;  %v4266_v13 = vld [vmem:[%s5712_s1 + $0x8a4] ss:$12 sps:$4 sm:$0xff]  }
 0x12d   :  { %v4258_v8 = vld [vmem:[%s5712_s1 + $0x870] ss:$12 sps:$4 sm:$0xff]   ;;  %v4261_v12 = vld [vmem:[%s5712_s1 + $0x888] ss:$12 sps:$4 sm:$0xff]  }
 0x12e   :  { %v4311_v15 = vld [vmem:[%s5714_s3 + $0xb4] ss:$8 sps:$4 sm:$0xff]  }
 0x12f   :  { %2343 = vmatpush1.bf16.msra.mxu0 %v4213_v1  ;;  %v4302_v1 = vld [vmem:[%s5714_s3 + $0x84] ss:$8 sps:$4 sm:$0xff]  }
 0x130   :  { %2344 = vmatprep.subr.bf16.mxu0 %v4218_v3  ;;  %v4255_v3 = vld [vmem:[%s5712_s1 + $0x858] ss:$12 sps:$4 sm:$0xff]  }
 0x133   :  { %2345 = vmatpush1.bf16.msra.mxu0 %v4216_v5  ;;  %v4300_v5 = vld [vmem:[%s5714_s3 + $0x80] ss:$8 sps:$4 sm:$0xff]  }
 0x134   :  { %2346 = vmatprep.subr.bf16.mxu0 %v4221_v7  ;;  %v4305_v7 = vld [vmem:[%s5714_s3 + $0x94] ss:$8 sps:$4 sm:$0xff]  }
 0x137   :  { %2347 = vmatpush1.bf16.msra.mxu0 %v4219_v11  ;;  %v4308_v11 = vld [vmem:[%s5714_s3 + $0xa4] ss:$8 sps:$4 sm:$0xff]  }
 0x138   :  { %2348 = vmatprep.subr.bf16.mxu0 %v4224_v14  ;;  %v4306_v14 = vld [vmem:[%s5714_s3 + $0xa0] ss:$8 sps:$4 sm:$0xff]  }
 0x13b   :  { %2349 = vmatpush1.bf16.msra.mxu0 %v4222_v17  ;;  %v4269_v17 = vld [vmem:[%s5712_s1 + $0x8bc] ss:$12 sps:$4 sm:$0xff]  }
 0x13c   :  { %2350 = vmatprep.subr.bf16.mxu0 %v4227_v18 }
 0x13f   :  { %2351 = vmatpush1.bf16.msra.mxu0 %v4225_v19  ;;  %v4309_v19 = vld [vmem:[%s5714_s3 + $0xb0] ss:$8 sps:$4 sm:$0xff]  }
 0x140   :  { %2361 = vmatprep.subr.bf16.mxu0 %v4230_v20 }
 0x142   :  { %2353 = vmatmul.mubr.bf16.vlgmr.msra.gmra.mrb[0].mxu0 %v4753_v44  ;;  %v4278_v44 = vld [vmem:[%s5714_s3 + $0x4] ss:$8 sps:$4 sm:$0xff]  }
 0x143   :  { %2362 = vmatpush1.bf16.msra.mxu0 %v4228_v22  ;;  %2393 = vmatprep.mubr.bf16.mxu0 %v5104_v30  ;;  %v4281_v30 = vld [vmem:[%s5714_s3 + $0x14] ss:$8 sps:$4 sm:$0xff]   ;;  %v4314_v22 = vld [vmem:[%s5714_s3 + $0xc4] ss:$8 sps:$4 sm:$0xff]  }
 0x144   :  { %2363 = vmatprep.subr.bf16.mxu0 %v4233_v23  ;;  %3050 = vmatprep.subr.bf16.mxu1 %v4278_v44  ;;  %v4267_v23 = vld [vmem:[%s5712_s1 + $0x8b8] ss:$12 sps:$4 sm:$0xff]  }
 0x145   :  { %3051 = vmatpush1.bf16.msra.mxu1 %v4276_v37  ;;  %v4272_v37 = vld [vmem:[%s5712_s1 + $0x8d4] ss:$12 sps:$4 sm:$0xff]  }
 0x146   :  { %3052 = vmatprep.subr.bf16.mxu1 %v4281_v30  ;;  %v4312_v30 = vld [vmem:[%s5714_s3 + $0xc0] ss:$8 sps:$4 sm:$0xff]  }
 0x147   :  { %2364 = vmatpush1.bf16.msra.mxu0 %v4231_v24 }
 0x148   :  { %2365 = vmatprep.subr.bf16.mxu0 %v4236_v25  ;;  %v3748_v41 = vpop.f32.mrb[12].mxu1 }
 0x149   :  { %3053 = vmatpush1.bf16.msra.mxu1 %v4279_v28  ;;  %v3749_v43 = vpop.f32.mrb[13].mxu1  ;;  %v4270_v28 = vld [vmem:[%s5712_s1 + $0x8d0] ss:$12 sps:$4 sm:$0xff]  }
 0x14a   :  { %3054 = vmatprep.subr.bf16.mxu1 %v4284_v32  ;;  %v3750_v47 = vadd.f32 %v3749_v43, %v3748_v41  ;;  %v3751_v48 = vpop.f32.mrb[14].mxu1  ;;  %v4275_v32 = vld [vmem:[%s5712_s1 + $0x8ec] ss:$12 sps:$4 sm:$0xff]  }
 0x14b   :  { %2366 = vmatpush1.bf16.msra.mxu0 %v4234_v27  ;;  %v3752_v49 = vpop.f32.mrb[15].mxu1 }
 0x14c   :  { %2367 = vmatprep.subr.bf16.mxu0 %v4239_v29  ;;  %v5438_v50 = vadd.f32 %v3750_v47, %v2518_v16  ;;  %v4264_v16 = vld [vmem:[%s5712_s1 + $0x8a0] ss:$12 sps:$4 sm:$0xff]   ;;  %v4317_v29 = vld [vmem:[%s5714_s3 + $0xd4] ss:$8 sps:$4 sm:$0xff]  }
 0x14d   :  { %3055 = vmatpush1.bf16.msra.mxu1 %v4282_v38 }
 0x14e   :  { %3056 = vmatprep.subr.bf16.mxu1 %v4287_v39 }
 0x14f   :  { %2368 = vmatpush1.bf16.msra.mxu0 %v4237_v33  ;;  %v4315_v33 = vld [vmem:[%s5714_s3 + $0xd0] ss:$8 sps:$4 sm:$0xff]  }
 0x150   :  { %2369 = vmatprep.subr.bf16.mxu0 %v4242_v35  ;;  %v4273_v35 = vld [vmem:[%s5712_s1 + $0x8e8] ss:$12 sps:$4 sm:$0xff]  }
 0x151   :  { %3057 = vmatpush1.bf16.msra.mxu1 %v4285_v42 }
 0x152   :  { %3058 = vmatprep.subr.bf16.mxu1 %v4290_v45 }
 0x153   :  { %2370 = vmatpush1.bf16.msra.mxu0 %v4240_v40 }
 0x154   :  { %2371 = vmatprep.subr.bf16.mxu0 %v4245_v62 }
 0x155   :  { %3059 = vmatpush1.bf16.msra.mxu1 %v4288_v51 }
 0x156   :  { %3060 = vmatprep.subr.bf16.mxu1 %v4293_v31 }
 0x157   :  { %2372 = vmatpush1.bf16.msra.mxu0 %v4243_v46 }
 0x158   :  { %2373 = vmatprep.subr.bf16.mxu0 %v4248_v26 }
 0x159   :  { %3061 = vmatpush1.bf16.msra.mxu1 %v4291_v54  ;;  %v4323_v54 = vld [vmem:[%s5714_s3 + $0xf4] ss:$8 sps:$4 sm:$0xff]  }
 0x15a   :  { %3062 = vmatprep.subr.bf16.mxu1 %v4296_v55  ;;  %v4321_v55 = vld [vmem:[%s5714_s3 + $0xf0] ss:$8 sps:$4 sm:$0xff]  }
 0x15b   :  { %2374 = vmatpush1.bf16.msra.mxu0 %v4246_v52 }
 0x15c   :  { %2375 = vmatprep.subr.bf16.mxu0 %v4251_v53  ;;  %v4318_v53 = vld [vmem:[%s5714_s3 + $0xe0] ss:$8 sps:$4 sm:$0xff]  }
 0x15d   :  { %3063 = vmatpush1.bf16.msra.mxu1 %v4294_v58  ;;  %v441_v58 = vsub.s32 1, %v4516_v21 }
 0x15e   :  { %3064 = vmatprep.subr.bf16.mxu1 %v4299_v59 }
 0x15f   :  { %2376 = vmatpush1.bf16.msra.mxu0 %v4249_v56  ;;  %v4326_v56 = vld [vmem:[%s5714_s3 + $0x104] ss:$8 sps:$4 sm:$0xff]  }
 0x160   :  { %2377 = vmatprep.subr.bf16.mxu0 %v4254_v57  ;;  %v437_v57 = vsub.s32 0, %v4516_v21 }
 0x161   :  { %3065 = vmatpush1.bf16.msra.mxu1 %v4297_v63  ;;  %v442_v63 = vrot.slane %v5340_v0, %v441_v58 }
 0x162   :  { %3066 = vmatprep.subr.bf16.mxu1 %v4302_v1  ;;  %v438_v59 = vrot.slane %v5340_v0, %v437_v57  ;;  %v4324_v0 = vld [vmem:[%s5714_s3 + $0x100] ss:$8 sps:$4 sm:$0xff]  }
 0x163   :  { %2378 = vmatpush1.bf16.msra.mxu0 %v4252_v60  ;;  %v4416_v60 = vmov 1983009808  }
 0x164   :  { %2379 = vmatprep.subr.bf16.mxu0 %v4257_v61  ;;  %v2731_v61 = vunpack.c.l.s4 %v4416_v60 }
 0x165   :  { %3067 = vmatpush1.bf16.msra.mxu1 %v4300_v5 }
 0x166   :  { %3068 = vmatprep.subr.bf16.mxu1 %v4305_v7  ;;  %v2732_v5 = vunpack.c.0.s8 %v2731_v61 }
 0x167   :  { %2380 = vmatpush1.bf16.msra.mxu0 %v4255_v3 }
 0x168   :  { %2381 = vmatprep.subr.bf16.mxu0 %v4260_v4  ;;  %v3770_v18 = vpop.f32.mrb[16].mxu1 }
 0x169   :  { %3069 = vmatpush1.bf16.msra.mxu1 %v4303_v10  ;;  %v3771_v20 = vpop.f32.mrb[17].mxu1 }
 0x16a   :  { %3070 = vmatprep.subr.bf16.mxu1 %v4308_v11  ;;  %v3772_v24 = vadd.f32 %v3771_v20, %v3770_v18  ;;  %v3773_v25 = vpop.f32.mrb[18].mxu1 }
 0x16b   :  { %2382 = vmatpush1.bf16.msra.mxu0 %v4258_v8  ;;  %v3774_v44 = vpop.f32.mrb[19].mxu1  ;;  %v4335_v25 = vld [vmem:[%s5714_s3 + $0x134] ss:$8 sps:$4 sm:$0xff]  }
 0x16c   :  { %2383 = vmatprep.subr.bf16.mxu0 %v4263_v9  ;;  %v2598_v27 = vadd.f32 %v3772_v24, %v5438_v50  ;;  %v4330_v24 = vld [vmem:[%s5714_s3 + $0x120] ss:$8 sps:$4 sm:$0xff]   ;;  %v4338_v44 = vld [vmem:[%s5714_s3 + $0x144] ss:$8 sps:$4 sm:$0xff]  }
 0x16d   :  { %3071 = vmatpush1.bf16.msra.mxu1 %v4306_v14  ;;  %v2735_v14 = vsub.s32 %v2732_v5, %v4516_v21 }
 0x16e   :  { %3072 = vmatprep.subr.bf16.mxu1 %v4311_v15 }
 0x16f   :  { %2384 = vmatpush1.bf16.msra.mxu0 %v4261_v12 }
 0x170   :  { %2385 = vmatprep.subr.bf16.mxu0 %v4266_v13 }
 0x171   :  { %3073 = vmatpush1.bf16.msra.mxu1 %v4309_v19  ;;  %v4329_v19 = vld [vmem:[%s5714_s3 + $0x114] ss:$8 sps:$4 sm:$0xff]  }
 0x172   :  { %3074 = vmatprep.subr.bf16.mxu1 %v4314_v22 }
 0x173   :  { %2386 = vmatpush1.bf16.msra.mxu0 %v4264_v16 }
 0x174   :  { %2387 = vmatprep.subr.bf16.mxu0 %v4269_v17 }
 0x175   :  { %3075 = vmatpush1.bf16.msra.mxu1 %v4312_v30  ;;  %v4341_v30 = vld [vmem:[%s5714_s3 + $0x154] ss:$8 sps:$4 sm:$0xff]  }
 0x176   :  { %3076 = vmatprep.subr.bf16.mxu1 %v4317_v29  ;;  %v4339_v29 = vld [vmem:[%s5714_s3 + $0x150] ss:$8 sps:$4 sm:$0xff]  }
 0x177   :  { %2388 = vmatpush1.bf16.msra.mxu0 %v4267_v23  ;;  %v4332_v23 = vld [vmem:[%s5714_s3 + $0x124] ss:$8 sps:$4 sm:$0xff]  }
 0x178   :  { %2389 = vmatprep.subr.bf16.mxu0 %v4272_v37  ;;  %v4333_v37 = vld [vmem:[%s5714_s3 + $0x130] ss:$8 sps:$4 sm:$0xff]  }
 0x179   :  { %3077 = vmatpush1.bf16.msra.mxu1 %v4315_v33  ;;  %v4347_v33 = vld [vmem:[%s5714_s3 + $0x174] ss:$8 sps:$4 sm:$0xff]  }
 0x17b   :  { %2390 = vmatpush1.bf16.msra.mxu0 %v4270_v28  ;;  %v4344_v28 = vld [vmem:[%s5714_s3 + $0x164] ss:$8 sps:$4 sm:$0xff]  }
 0x17c   :  { %2391 = vmatprep.subr.bf16.mxu0 %v4275_v32  ;;  %v4342_v32 = vld [vmem:[%s5714_s3 + $0x160] ss:$8 sps:$4 sm:$0xff]  }
 0x17f   :  { %2392 = vmatpush1.bf16.msra.mxu0 %v4273_v35  ;;  %v4345_v35 = vld [vmem:[%s5714_s3 + $0x170] ss:$8 sps:$4 sm:$0xff]  }
 0x182   :  { %2394 = vmatmul.mubr.bf16.vlgmr.msra.gmra.mrb[0].mxu0 %v5196_v6  ;;  %v4320_v6 = vld [vmem:[%s5714_s3 + $0xe4] ss:$8 sps:$4 sm:$0xff]  }
 0x183   :  { %3078 = vmatprep.subr.bf16.mxu1 %v4320_v6 }
 0x184   :  { %3079 = vmatpush1.bf16.msra.mxu1 %v4318_v53 }
 0x185   :  { %3080 = vmatprep.subr.bf16.mxu1 %v4323_v54 }
 0x188   :  { %v3792_v38 = vpop.f32.mrb[20].mxu1  ;;  %3081 = vmatpush1.bf16.msra.mxu1 %v4321_v55 }
 0x189   :  { %v3793_v39 = vpop.f32.mrb[21].mxu1  ;;  %3091 = vmatprep.subr.bf16.mxu1 %v4326_v56 }
 0x18a   :  { %v3794_v40 = vadd.f32 %v3793_v39, %v3792_v38  ;;  %v3795_v62 = vpop.f32.mrb[22].mxu1  ;;  %v4348_v38 = vld [vmem:[%s5716_s5] sm:$0xff]  }
 0x18b   :  { %v3796_v41 = vpop.f32.mrb[23].mxu1  ;;  %v4350_v62 = vld [vmem:[%s5716_s5 + $0x10] sm:$0xff]  }
 0x18c   :  { %v2638_v42 = vadd.f32 %v3794_v40, %v2598_v27  ;;  %v4336_v27 = vld [vmem:[%s5714_s3 + $0x140] ss:$8 sps:$4 sm:$0xff]   ;;  %v4351_v41 = vld [vmem:[%s5716_s5 + $0x18] sm:$0xff]  }
 0x18d   :  { %v4349_v40 = vld [vmem:[%s5716_s5 + $0x8] sm:$0xff]  }
 0x1ab   :  { %v3814_v43 = vpop.f32.mrb[24].mxu1 }
 0x1ac   :  { %v3815_v45 = vpop.f32.mrb[25].mxu1 }
 0x1ad   :  { %v3816_v46 = vadd.f32 %v3815_v45, %v3814_v43  ;;  %v3817_v47 = vpop.f32.mrb[26].mxu1  ;;  %v4353_v43 = vld [vmem:[%s5716_s5 + $0x28] sm:$0xff]   ;;  %v4354_v45 = vld [vmem:[%s5716_s5 + $0x30] sm:$0xff]  }
 0x1ae   :  { %v3818_v48 = vpop.f32.mrb[27].mxu1  ;;  %v4356_v47 = vld [vmem:[%s5716_s5 + $0x40] sm:$0xff]  }
 0x1af   :  { %v2678_v26 = vadd.f32 %v3816_v46, %v2638_v42  ;;  %v4352_v42 = vld [vmem:[%s5716_s5 + $0x20] sm:$0xff]   ;;  %v4355_v46 = vld [vmem:[%s5716_s5 + $0x38] sm:$0xff]   ;;  %v4357_v48 = vld [vmem:[%s5716_s5 + $0x48] sm:$0xff]  }
 0x1bb   :  { %v2717_v49 = vpop.f32.mrb[28].mxu1 }
 0x1bc   :  { %v2718_v50 = vadd.f32 %v2717_v49, %v2678_v26  ;;  %v3835_v51 = vpop.f32.mrb[29].mxu1  ;;  %v4358_v26 = vld [vmem:[%s5716_s5 + $0x50] sm:$0xff]   ;;  %v4359_v49 = vld [vmem:[%s5716_s5 + $0x58] sm:$0xff]  }
 0x1bd   :  { %v2720_v31 = vpop.f32.mrb[30].mxu1 }
 0x1be   :  { %v3836_v52 = vpop.f32.mrb[31].mxu1  ;;  %v2725_v13 = vmax.f32 %v2718_v50, 0.0  ;;  %v2798_v50 = vld [vmem:[%s5715_s4] sm:$0x3] }
 0x1bf   :  { %v2803_v51 = vrot.slane %v2798_v50, %v437_v57  ;;  %v2807_v31 = vrot.slane %v2798_v50, %v441_v58  ;;  %v3674_v57 = vld [vmem:[%s5717_s6] ss:$0 sm:$0xff] }
 0x1c0   :  { %v2749_v39 = vpack.c.bf16 %v2725_v13, %v2725_v13 }
 0x255   :  { %v2395_v1 = vpop.f32.mrb[0].mxu0 }
 0x256   :  { %v3837_v3 = vadd.f32 %v2395_v1, %v438_v59  ;;  %v2397_v4 = vpop.f32.mrb[1].mxu0 }
 0x257   :  { %v3839_v7 = vadd.f32 %v2397_v4, %v442_v63  ;;  %v2399_v8 = vpop.f32.mrb[2].mxu0 }
 0x258   :  { %v3838_v9 = vadd.f32 %v3837_v3, %v5271_v34  ;;  %v2400_v10 = vpop.f32.mrb[3].mxu0  ;;  %v2743_v34 = vrot.slane %v2725_v13, %v2735_v14 }
 0x259   :  { %v3840_v11 = vadd.f32 %v3839_v7, %v5277_v36  ;;  %v4327_v36 = vld [vmem:[%s5714_s3 + $0x110] ss:$8 sps:$4 sm:$0xff]  }
 0x25a   :  { %v2723_v12 = vmax.f32 %v3838_v9, 0.0 }
 0x25b   :  { %v2724_v15 = vmax.f32 %v3840_v11, 0.0 }
 0x25c   :  { %v2747_v18 = vpack.c.bf16 %v2723_v12, %v2723_v12 }
 0x25d   :  { %v2729_v16 = vcombine.low %v2723_v12, %v2724_v15  ;;  %v2748_v17 = vpack.c.bf16 %v2724_v15, %v2724_v15 }
 0x25f   :  { %3082 = vmatprep.mubr.bf16.mxu1 %v2748_v17  ;;  %v2736_v20 = vrot.slane %v2729_v16, %v2735_v14 }
 0x260   :  { %3083 = vmatmul.mubr.bf16.vlgmr.msra.gmra.mrb[32].mxu1 %v2747_v18 }
 0x261   :  { %3092 = vmatpush1.bf16.msra.mxu1 %v4324_v0  ;;  %3123 = vmatprep.mubr.bf16.mxu1 %v4412_v2  ;;  %v2744_v22 = vcombine.low %v2736_v20, %v2743_v34 }
 0x262   :  { %3093 = vmatprep.subr.bf16.mxu1 %v4329_v19 }
 0x263   :  { %2746 = vst [vmem:[#allocation4] sm:$0x3f] %v2744_v22 }
 0x265   :  { %3094 = vmatpush1.bf16.msra.mxu1 %v4327_v36 }
 0x266   :  { %3095 = vmatprep.subr.bf16.mxu1 %v4332_v23 }
 0x269   :  { %3096 = vmatpush1.bf16.msra.mxu1 %v4330_v24 }
 0x26a   :  { %3097 = vmatprep.subr.bf16.mxu1 %v4335_v25 }
 0x26d   :  { %3098 = vmatpush1.bf16.msra.mxu1 %v4333_v37 }
 0x26e   :  { %3099 = vmatprep.subr.bf16.mxu1 %v4338_v44 }
 0x271   :  { %3100 = vmatpush1.bf16.msra.mxu1 %v4336_v27 }
 0x272   :  { %3101 = vmatprep.subr.bf16.mxu1 %v4341_v30 }
 0x275   :  { %3102 = vmatpush1.bf16.msra.mxu1 %v4339_v29 }
 0x276   :  { %3103 = vmatprep.subr.bf16.mxu1 %v4344_v28 }
 0x279   :  { %3104 = vmatpush1.bf16.msra.mxu1 %v4342_v32 }
 0x27a   :  { %3105 = vmatprep.subr.bf16.mxu1 %v4347_v33 }
 0x27d   :  { %3106 = vmatpush1.bf16.msra.mxu1 %v4345_v35 }
 0x27e   :  { %3242 = vmatprep.subr.bf16.mxu1 %v4412_v2 }
 0x280   :  { %3124 = vmatmul.mubr.bf16.vlgmr.msra.gmra.mrb[32].mxu1 %v2749_v39 }
 0x281   :  { %3243 = vmatpush1.bf16.msra.mxu1 %v4348_v38 }
 0x282   :  { %3244 = vmatprep.subr.bf16.mxu1 %v4412_v2 }
 0x285   :  { %3245 = vmatpush1.bf16.msra.mxu1 %v4349_v40 }
 0x286   :  { %3246 = vmatprep.subr.bf16.mxu1 %v4412_v2 }
 0x289   :  { %3247 = vmatpush1.bf16.msra.mxu1 %v4350_v62 }
 0x28a   :  { %3248 = vmatprep.subr.bf16.mxu1 %v4412_v2 }
 0x28d   :  { %3249 = vmatpush1.bf16.msra.mxu1 %v4351_v41 }
 0x28e   :  { %3250 = vmatprep.subr.bf16.mxu1 %v4412_v2 }
 0x291   :  { %3251 = vmatpush1.bf16.msra.mxu1 %v4352_v42 }
 0x292   :  { %3252 = vmatprep.subr.bf16.mxu1 %v4412_v2 }
 0x295   :  { %3253 = vmatpush1.bf16.msra.mxu1 %v4353_v43 }
 0x296   :  { %3254 = vmatprep.subr.bf16.mxu1 %v4412_v2 }
 0x299   :  { %3255 = vmatpush1.bf16.msra.mxu1 %v4354_v45 }
 0x29a   :  { %3256 = vmatprep.subr.bf16.mxu1 %v4412_v2 }
 0x29d   :  { %3257 = vmatpush1.bf16.msra.mxu1 %v4355_v46 }
 0x29e   :  { %3258 = vmatprep.subr.bf16.mxu1 %v4412_v2 }
 0x2a1   :  { %3259 = vmatpush1.bf16.msra.mxu1 %v4356_v47 }
 0x2a2   :  { %3260 = vmatprep.subr.bf16.mxu1 %v4412_v2 }
 0x2a5   :  { %3261 = vmatpush1.bf16.msra.mxu1 %v4357_v48 }
 0x2a6   :  { %3262 = vmatprep.subr.bf16.mxu1 %v4412_v2 }
 0x2a9   :  { %3263 = vmatpush1.bf16.msra.mxu1 %v4358_v26 }
 0x2aa   :  { %3264 = vmatprep.subr.bf16.mxu1 %v4412_v2 }
 0x2ad   :  { %3265 = vmatpush1.bf16.msra.mxu1 %v4359_v49 }
 0x353   :  { %v3125_v52 = vpop.f32.mrb[32].mxu1 }
 0x354   :  { %v3841_v6 = vadd.f32 %v3125_v52, %v2803_v51  ;;  %v3127_v53 = vpop.f32.mrb[33].mxu1 }
 0x355   :  { %v3842_v54 = vadd.f32 %v3127_v53, %v2807_v31  ;;  %v3129_v2 = vpop.f32.mrb[34].mxu1 }
 0x356   :  { %v3132_v55 = vmax.f32 %v3841_v6, 0.0  ;;  %v3130_v56 = vpop.f32.mrb[35].mxu1 }
 0x357   :  { %v3133_v59 = vmax.f32 %v3842_v54, 0.0 }
 0x358   :  { %v3134_v61 = vpack.c.bf16 %v3132_v55, %v3132_v55 }
 0x359   :  { %v3135_v60 = vpack.c.bf16 %v3133_v59, %v3133_v59 }
 0x35b   :  { %3687 = vmatprep.mubr.msk.bf16.mxu1 %vm2152_vm0, %v3135_v60 }
 0x35c   :  { %3275 = vmatmul.mubr.bf16.vlgmr.msra.gmra.mrb[36].mxu1 %v3134_v61 }
 0x42f   :  { %v3276_v63 = vpop.f32.mrb[36].mxu1 }
 0x430   :  { %v3277_v21 = vadd.f32 %v3674_v57, %v3276_v63  ;;  %v3278_v58 = vpop.f32.mrb[37].mxu1 }
 0x431   :  { %v3279_v1 = vpop.f32.mrb[38].mxu1 }
 0x432   :  { %v3280_v3 = vpop.f32.mrb[39].mxu1  ;;  %v3283_v4 = vsel %vm3282_vm2, %v3277_v21, -inf }
 0x433   :  { %3284 = vmax.xlane.f32.xlu0 %v3283_v4 }
 0x4c0   :  { %v3285_v5 = vpop.xlane.xlu0 %3284 }
 0x4c1   :  { %v3286_v7 = vsub.f32 %v3277_v21, %v3285_v5 }
 0x4c3   :  { %v3287_v8 = vmul.f32 1.442695, %v3286_v7 }
 0x4c5   :  { %4360 = vpow2.f32 %v3287_v8 }
 0x4cf   :  { %v4361_v9 = vpop.eup %4360 }
 0x4d0   :  { %v3289_v10 = vsel %vm3282_vm2, %v4361_v9, 0.0 }
 0x4d1   :  { %3290 = vadd.xlane.f32.xlu0 %v3289_v10 }
 0x4d2   :  { %4375 = shalt.err (!%p4372_p4)
}
 0x4d3   :  { %s4376_s14 = scalar_lea.hbm %s5719_s8, 96 }
 0x4d4   :  { %p4377_p5 = scmp.ne.s32.totalorder %s5719_s8, %s4376_s14  ;;  %p4380_p6 = scmp.lt.u32.totalorder %s4376_s14, %s5719_s8 }
 0x4d6   :  { %p4382_p7 = pnand %p4380_p6, %p4377_p5 }
 0x4d8   :  { %4385 = shalt.err (!%p4382_p7)
}
 0x4d9   :  { %3315 = dma.vmem_to_hbm [thread:$0]  %s3313_s11, 96, %s5719_s8, [#allocation5]  }
 0x4da   :  { %s4418_s1 = smov [#allocation2]  }
 0x4db   :  { %s3302_s19 = sshll.u32 %s4418_s1, 4  ;;  %s3303_s19 = int_to_ptr.vmem [resolvable:$true] %s3302_s19 }
 0x4dc   :  { %s4386_s20 = scalar_lea.vmem %s3303_s19, 32  ;;  %p4391_p9 = scmp.lt.s32.totalorder %s3303_s19, %s3303_s19 }
 0x4dd   :  { %p4387_p8 = scmp.ne.s32.totalorder %s3303_s19, %s4386_s20  ;;  %p4392_p10 = scmp.lt.s32.totalorder %s4386_s20, %s4386_s20 }
 0x4df   :  { %p4393_p11 = por %p4392_p10, %p4391_p9 }
 0x4e1   :  { %p4394_p12 = pnand %p4393_p11, %p4387_p8 }
 0x55e   :  { %v3291_v11 = vpop.xlane.xlu0 %3290 }
 0x55f   :  { %4362 = vlog2.f32 %v3291_v11 }
 0x569   :  { %v4363_v12 = vpop.eup %4362 }
 0x56a   :  { %v3293_v13 = vmul.f32 0.6931472, %v4363_v12 }
 0x56c   :  { %v3294_v14 = vsub.f32 %v3286_v7, %v3293_v13 }
 0x56e   :  { %3295 = vst [vmem:[#allocation2] sm:$0x3] %v3294_v14 }
 0x56f   :  { %4397 = shalt.err (!%p4394_p12)
}
 0x570   :  { %s4398_s8 = scalar_lea.hbm %s5718_s7, 32 }
 0x571   :  { %p4399_p13 = scmp.ne.s32.totalorder %s5718_s7, %s4398_s8  ;;  %p4402_p0 = scmp.lt.u32.totalorder %s4398_s8, %s5718_s7 }
 0x573   :  { %p4404_p1 = pnand %p4402_p0, %p4399_p13 }
 0x575   :  { %4407 = shalt.err (!%p4404_p1)
}
 0x576   :  { %3305 = dma.vmem_to_hbm [thread:$0]  %s3303_s19, 32, %s5718_s7, [#allocation3]  }
 0x577   :  { %4408 = dma.done.wait [#allocation3], 32  }
 0x578   :  { %4409 = vsyncadd [#allocation3], 4294967264 }
 0x579   :  { %4410 = dma.done.wait [#allocation5], 96  }
 0x57a   :  { %4411 = vsyncadd [#allocation5], 4294967200 }
 0x57b   :  { %3322 = vsyncpa [#allocation3], 1 }
 0x57c   :  { %3323 = vsyncpa [#allocation5], 1 }

// kernel: lenet_forward.3
= control target key start
LH: loop header
LB: loop body
LE: loop exit
PB: predicated region body
PF: predicated region fallthrough
CT: control target
= control target key end

     0   :  { %8 = vsyncpa [#allocation3], 0  ;;  %s8688_s0 = inlined_call_operand.vmem [shape: bf16[2,32,96], index: 0, kind: input, shape index: {}]   ;;  %s8689_s1 = inlined_call_operand.hbm [shape: bf16[5,96,1792], index: 1, kind: input, shape index: {}]   ;;  %s8690_s2 = inlined_call_operand.hbm [shape: f32[1,896], index: 2, kind: input, shape index: {}]   ;;  %s8691_s3 = inlined_call_operand.vmem [shape: bf16[2,14,896], index: 3, kind: output, shape index: {}]  }
   0x1   :  { %9 = vsyncpa [#allocation5], 0  ;;  %s7930_s12 = smov 0  }
   0x2 LB: > { %s7936_s13 = sadd.s32 4294967295, %s7901_s12   ;;  %p6215_p0 = scmp.ge.s32.totalorder %s7901_s12, 1  ;;  %s7901_s12 = sphi %s7930_s12, %s15_s12  }
   0x3   : > { %p114_p1 = scmp.lt.s32.totalorder %s7901_s12, 3  ;;  %s7903_s14 = smov [#allocation2]  }
   0x4   : > { %s126_s15 = sshll.u32 %s7903_s14, 4  ;;  %p8692_p3 = scmp.eq.s32.totalorder %s7936_s13, 0  ;;  %s127_s15 = int_to_ptr.vmem [resolvable:$true] %s126_s15 }
   0x5   : > { %p7940_p2 = pnand %p6215_p0, %p114_p1  ;;  %s7904_s17 = smov [#allocation4]  }
   0x6   : > { %s140_s18 = sshll.u32 %s7904_s17, 4  ;;  %s7831_s22 = scalar_lea.hbm %s8689_s1, 53760  ;;  %s7953_s18 = int_to_ptr.vmem [resolvable:$true] %s140_s18 }
   0x7   : > { %s8694_s16 = scalar_select %p7940_p2, 1, 0 }
   0x8   : > { %p7169_p4 = pneg %p7940_p2  ;;  %p7832_p6 = scmp.ne.s32.totalorder %s8689_s1, %s7831_s22 }
   0x9   : > { %p7838_p10 = scmp.lt.u32.totalorder %s7831_s22, %s8689_s1 }
   0xa   : > { %p7949_p5 = pnand %p8692_p3, %p7169_p4 }
   0xc   : > { %p7833_p7 = pneg %p7949_p5 }
   0xe   : > { %p7834_p8 = pnand %p7833_p7, %p7832_p6 }
  0x10   : > { %p7835_p9 = pneg %p7834_p8 }
  0x12   : > { %p7840_p11 = pnand %p7838_p10, %p7835_p9 }
  0x14   : > { %7843 = shalt.err (!%p7840_p11)
}
  0x15   : > { %s7844_s27 = scalar_lea.vmem %s127_s15, 53760  ;;  %p7852_p1 = scmp.lt.s32.totalorder %s127_s15, %s127_s15 }
  0x16   : > { %p7845_p12 = scmp.ne.s32.totalorder %s127_s15, %s7844_s27  ;;  %p7853_p4 = scmp.lt.s32.totalorder %s7844_s27, %s7844_s27 }
  0x18   : > { %p7847_p13 = pnand %p7845_p12, %p7833_p7  ;;  %p7854_p3 = por %p7853_p4, %p7852_p1 }
  0x1a   : > { %p7848_p0 = pneg %p7847_p13 }
  0x1c   : > { %p7855_p2 = pnand %p7854_p3, %p7848_p0 }
  0x1e   : > { %7858 = shalt.err (!%p7855_p2)
}
  0x1f   : > { %s7905_s28 = smov 896   ;;  %s7906_s29 = smov 56  }
  0x20   : > { %7172 = dma.hbm_to_vmem [thread:$0]  (!%p7949_p5), %s8689_s1, 53760, %s127_s15, [#allocation3], %s7905_s28, %s7905_s28, %s7906_s29  }
  0x21   : > { %s7859_s7 = scalar_lea.hbm %s8690_s2, 112 }
  0x22   : > { %p7860_p6 = scmp.ne.s32.totalorder %s8690_s2, %s7859_s7  ;;  %p7866_p8 = scmp.lt.u32.totalorder %s7859_s7, %s8690_s2 }
  0x24   : > { %p7862_p2 = pnand %p7860_p6, %p7833_p7 }
  0x26   : > { %p7863_p3 = pneg %p7862_p2 }
  0x28   : > { %p7868_p9 = pnand %p7866_p8, %p7863_p3 }
  0x2a   : > { %7871 = shalt.err (!%p7868_p9)
}
  0x2b   : > { %s7872_s14 = scalar_lea.vmem %s7953_s18, 112  ;;  %s7879_s15 = scalar_lea.vmem %s7953_s18, 128 }
  0x2c   : > { %p7873_p10 = scmp.ne.s32.totalorder %s7953_s18, %s7872_s14  ;;  %p7880_p13 = scmp.lt.s32.totalorder %s7953_s18, %s7953_s18 }
  0x2d   : > { %p7881_p0 = scmp.lt.s32.totalorder %s7879_s15, %s7872_s14 }
  0x2e   : > { %p7875_p11 = pnand %p7873_p10, %p7833_p7 }
  0x2f   : > { %p7882_p1 = por %p7881_p0, %p7880_p13 }
  0x30   : > { %p7876_p12 = pneg %p7875_p11 }
  0x32   : > { %p7883_p4 = pnand %p7882_p1, %p7876_p12 }
  0x34   : > { %7886 = shalt.err (!%p7883_p4)
}
  0x35   : > { %7175 = dma.hbm_to_vmem [thread:$0]  (!%p7949_p5), %s8690_s2, 112, %s7953_s18, [#allocation5]  }
  0x36   : > { %p8696_p6 = scmp.ne.s32.totalorder %s8694_s16, 0 }
  0x37   : > { %p8697_p7 = scmp.eq.s32.totalorder (!%p8696_p6), %s7936_s13, 0 }
  0x38   : > { %161 = sbr.rel (%p8696_p6) target bundleno = 1063 (0x427), region = 32 }
  0x3f   : > { %7892 = dma.done.wait (%p8697_p7), [#allocation3], 53760   ;;  %p8698_p2 = pmov %p8697_p7 }
  0x41   : > { %7894 = vsyncadd (%p8698_p2), [#allocation3], 4294913536  ;;  %p8699_p3 = pmov %p8698_p2 }
  0x42   : > { %p8700_p8 = pmov %p8698_p2 }
  0x43   : > { %7896 = dma.done.wait (%p8699_p3), [#allocation5], 112  }
  0x44   : > { %7898 = vsyncadd (%p8700_p8), [#allocation5], 4294967184  ;;  %v7907_v0 = vmov 0   ;;  %v7195_v1 = vld [vmem:[#allocation2 + $0x2a4] ss:$56 sps:$4 sm:$0xff]   ;;  %p189_p5 = scmp.lt.s32.totalorder %s7936_s13, 1 }
  0x45   : > { %858 = vmatprep.mubr.bf16.mxu0 %v7907_v0  ;;  %911 = vmatprep.mubr.bf16.mxu1 %v7907_v0  ;;  %v7197_v2 = vld [vmem:[#allocation2 + $0x2ac] ss:$56 sps:$4 sm:$0xff]   ;;  %v7199_v3 = vld [vmem:[#allocation2 + $0x2a0] ss:$56 sps:$4 sm:$0xff]   ;;  %v7203_v6 = vld [vmem:[#allocation2 + $0x31c] ss:$56 sps:$4 sm:$0xff]  }
  0x46   : > { %826 = vmatprep.subr.bf16.mxu0 %v7195_v1  ;;  %v7200_v4 = vld [vmem:[#allocation2 + $0x2a8] ss:$56 sps:$4 sm:$0xff]   ;;  %879 = vmatprep.subr.bf16.mxu1 %v7197_v2  ;;  %v7201_v5 = vld [vmem:[#allocation2 + $0x314] ss:$56 sps:$4 sm:$0xff]   ;;  %v7206_v8 = vld [vmem:[#allocation2 + $0x318] ss:$56 sps:$4 sm:$0xff]  }
  0x47   : > { %827 = vmatpush1.bf16.msra.mxu0 %v7199_v3  ;;  %880 = vmatpush1.bf16.msra.mxu1 %v7200_v4  ;;  %v7205_v7 = vld [vmem:[#allocation2 + $0x310] ss:$56 sps:$4 sm:$0xff]   ;;  %v7207_v9 = vld [vmem:[#allocation2 + $0x384] ss:$56 sps:$4 sm:$0xff]   ;;  %v7211_v11 = vld [vmem:[#allocation2 + $0x380] ss:$56 sps:$4 sm:$0xff]  }
  0x48   : > { %828 = vmatprep.subr.bf16.mxu0 %v7201_v5  ;;  %881 = vmatprep.subr.bf16.mxu1 %v7203_v6  ;;  %v7209_v10 = vld [vmem:[#allocation2 + $0x38c] ss:$56 sps:$4 sm:$0xff]   ;;  %v7212_v12 = vld [vmem:[#allocation2 + $0x388] ss:$56 sps:$4 sm:$0xff]   ;;  %v7215_v14 = vld [vmem:[#allocation2 + $0x3fc] ss:$56 sps:$4 sm:$0xff]  }
  0x49   : > { %v7213_v13 = vld [vmem:[#allocation2 + $0x3f4] ss:$56 sps:$4 sm:$0xff]   ;;  %s8704_s13 = smov (!%p189_p5, %s7936_s13), 1  ;;  %v7217_v15 = vld [vmem:[#allocation2 + $0x3f0] ss:$56 sps:$4 sm:$0xff]   ;;  %vm819_vm1 = vcmask 785408  }
  0x4a   : > { %v7218_v16 = vld [vmem:[#allocation2 + $0x3f8] ss:$56 sps:$4 sm:$0xff]   ;;  %v7219_v17 = vld [vmem:[#allocation2 + $0x464] ss:$56 sps:$4 sm:$0xff]   ;;  %s6787_s16 = sshll.u32 %s8704_s13, 4  ;;  %vm2077_vm2 = vcmask 1046528  }
  0x4b   : > { %829 = vmatpush1.bf16.msra.mxu0 %v7205_v7  ;;  %882 = vmatpush1.bf16.msra.mxu1 %v7206_v8  ;;  %v7221_v18 = vld [vmem:[#allocation2 + $0x46c] ss:$56 sps:$4 sm:$0xff]   ;;  %v7223_v19 = vld [vmem:[#allocation2 + $0x460] ss:$56 sps:$4 sm:$0xff]   ;;  %v7227_v22 = vld [vmem:[#allocation2 + $0x4dc] ss:$56 sps:$4 sm:$0xff]   ;;  %s8023_s21 = scalar_lea.vmem %s8688_s0, %s6787_s16 }
  0x4c   : > { %830 = vmatprep.subr.bf16.mxu0 %v7207_v9  ;;  %883 = vmatprep.subr.bf16.mxu1 %v7209_v10  ;;  %v7224_v20 = vld [vmem:[#allocation2 + $0x468] ss:$56 sps:$4 sm:$0xff]   ;;  %v7225_v21 = vld [vmem:[#allocation2 + $0x4d4] ss:$56 sps:$4 sm:$0xff]   ;;  %v7230_v24 = vld [vmem:[#allocation2 + $0x4d8] ss:$56 sps:$4 sm:$0xff]  }
  0x4d   : > { %v7229_v23 = vld [vmem:[#allocation2 + $0x4d0] ss:$56 sps:$4 sm:$0xff]   ;;  %v8026_v25 = vld [vmem:[%s8023_s21] sm:$0xff]   ;;  %v7233_v27 = vld [vmem:[#allocation2 + $0x2b4] ss:$56 sps:$4 sm:$0xff]   ;;  %vm3965_vm4 = vcmask 1045504  }
  0x4e   : > { %v8029_v26 = vld [vmem:[%s8023_s21 + $0x8] sm:$0xff]   ;;  %v7236_v28 = vld [vmem:[#allocation2 + $0x2bc] ss:$56 sps:$4 sm:$0xff]   ;;  %v385_v29 = vshrl.u32 %v8026_v25, 16  ;;  %v387_v30 = vshll.u32 %v8026_v25, 16  ;;  %vm4842_vm5 = vcmask 1043456  }
  0x4f   : > { %831 = vmatpush1.bf16.msra.mxu0 %v7211_v11  ;;  %884 = vmatpush1.bf16.msra.mxu1 %v7212_v12  ;;  %v392_v31 = vshll.u32 %v8029_v26, 16  ;;  %v396_v32 = vshrl.u32 %v8029_v26, 16  ;;  %vm383_vm0 = vsmask.f32 7424  ;;  %v7231_v37 = vld [vmem:[#allocation2 + $0x2b0] ss:$56 sps:$4 sm:$0xff]  }
  0x50   : > { %832 = vmatprep.subr.bf16.mxu0 %v7213_v13  ;;  %885 = vmatprep.subr.bf16.mxu1 %v7215_v14  ;;  %v389_v33 = vrot.slane %v387_v30, 1  ;;  %v7234_v38 = vld [vmem:[#allocation2 + $0x2b8] ss:$56 sps:$4 sm:$0xff]   ;;  %v7241_v41 = vld [vmem:[#allocation2 + $0x324] ss:$56 sps:$4 sm:$0xff]   ;;  %vm7909_vm6 = vmmov 1  }
  0x51   : > { %v394_v34 = vrot.slane %v392_v31, 1  ;;  %v3023_v35 = vrot.slane %v396_v32, 1  ;;  %v3024_v36 = vrot.slane %v392_v31, 2  ;;  %v7244_v42 = vld [vmem:[#allocation2 + $0x32c] ss:$56 sps:$4 sm:$0xff]   ;;  %vm8321_vm7 = vmpackc.low %vm4842_vm5, %vm7909_vm6  ;;  %vm4835_vm9 = vcmask 228352  }
  0x52   : > { %v390_v39 = vor.u32 %v389_v33, %v385_v29  ;;  %v7239_v44 = vld [vmem:[#allocation2 + $0x320] ss:$56 sps:$4 sm:$0xff]   ;;  %v7247_v46 = vld [vmem:[#allocation2 + $0x394] ss:$56 sps:$4 sm:$0xff]   ;;  %v7245_v49 = vld [vmem:[#allocation2 + $0x390] ss:$56 sps:$4 sm:$0xff]  }
  0x53   : > { %833 = vmatpush1.bf16.msra.mxu0 %v7217_v15  ;;  %886 = vmatpush1.bf16.msra.mxu1 %v7218_v16  ;;  %v8039_v40 = vor.u32 %v3024_v36, %v3023_v35  ;;  %v7242_v45 = vld [vmem:[#allocation2 + $0x328] ss:$56 sps:$4 sm:$0xff]   ;;  %v7250_v47 = vld [vmem:[#allocation2 + $0x39c] ss:$56 sps:$4 sm:$0xff]   ;;  %v8049_v48 = vor.u32 %v396_v32, %v394_v34  ;;  %v7248_v50 = vld [vmem:[#allocation2 + $0x398] ss:$56 sps:$4 sm:$0xff]  }
  0x54   : > { %834 = vmatprep.subr.bf16.mxu0 %v7219_v17  ;;  %887 = vmatprep.subr.bf16.mxu1 %v7221_v18  ;;  %v8041_v43 = vsel %vm383_vm0, %v390_v39, %v394_v34  ;;  %v7253_v51 = vld [vmem:[#allocation2 + $0x404] ss:$56 sps:$4 sm:$0xff]   ;;  %v7251_v53 = vld [vmem:[#allocation2 + $0x400] ss:$56 sps:$4 sm:$0xff]   ;;  %v7259_v55 = vld [vmem:[#allocation2 + $0x474] ss:$56 sps:$4 sm:$0xff]  }
  0x55   : > { %v7256_v52 = vld [vmem:[#allocation2 + $0x40c] ss:$56 sps:$4 sm:$0xff]   ;;  %v7254_v54 = vld [vmem:[#allocation2 + $0x408] ss:$56 sps:$4 sm:$0xff]   ;;  %v7262_v56 = vld [vmem:[#allocation2 + $0x47c] ss:$56 sps:$4 sm:$0xff]  }
  0x56   : > { %v7257_v57 = vld [vmem:[#allocation2 + $0x470] ss:$56 sps:$4 sm:$0xff]   ;;  %v7265_v59 = vld [vmem:[#allocation2 + $0x4e4] ss:$56 sps:$4 sm:$0xff]   ;;  %v7263_v61 = vld [vmem:[#allocation2 + $0x4e0] ss:$56 sps:$4 sm:$0xff]  }
  0x57   : > { %835 = vmatpush1.bf16.msra.mxu0 %v7223_v19  ;;  %888 = vmatpush1.bf16.msra.mxu1 %v7224_v20  ;;  %v7260_v58 = vld [vmem:[#allocation2 + $0x478] ss:$56 sps:$4 sm:$0xff]   ;;  %v7268_v60 = vld [vmem:[#allocation2 + $0x4ec] ss:$56 sps:$4 sm:$0xff]   ;;  %v7266_v62 = vld [vmem:[#allocation2 + $0x4e8] ss:$56 sps:$4 sm:$0xff]  }
  0x58   : > { %836 = vmatprep.subr.bf16.mxu0 %v7225_v21  ;;  %889 = vmatprep.subr.bf16.mxu1 %v7227_v22  ;;  %v7271_v63 = vld [vmem:[#allocation2 + $0x2c4] ss:$56 sps:$4 sm:$0xff]   ;;  %v7269_v2 = vld [vmem:[#allocation2 + $0x2c0] ss:$56 sps:$4 sm:$0xff]   ;;  %v7277_v4 = vld [vmem:[#allocation2 + $0x334] ss:$56 sps:$4 sm:$0xff]  }
  0x59   : > { %v7274_v1 = vld [vmem:[#allocation2 + $0x2cc] ss:$56 sps:$4 sm:$0xff]   ;;  %v7272_v3 = vld [vmem:[#allocation2 + $0x2c8] ss:$56 sps:$4 sm:$0xff]   ;;  %v7280_v5 = vld [vmem:[#allocation2 + $0x33c] ss:$56 sps:$4 sm:$0xff]  }
  0x5a   : > { %v7275_v6 = vld [vmem:[#allocation2 + $0x330] ss:$56 sps:$4 sm:$0xff]   ;;  %v7283_v8 = vld [vmem:[#allocation2 + $0x3a4] ss:$56 sps:$4 sm:$0xff]   ;;  %v7281_v10 = vld [vmem:[#allocation2 + $0x3a0] ss:$56 sps:$4 sm:$0xff]  }
  0x5b   : > { %837 = vmatpush1.bf16.msra.mxu0 %v7229_v23  ;;  %890 = vmatpush1.bf16.msra.mxu1 %v7230_v24  ;;  %v7278_v7 = vld [vmem:[#allocation2 + $0x338] ss:$56 sps:$4 sm:$0xff]   ;;  %v7286_v9 = vld [vmem:[#allocation2 + $0x3ac] ss:$56 sps:$4 sm:$0xff]   ;;  %v7284_v11 = vld [vmem:[#allocation2 + $0x3a8] ss:$56 sps:$4 sm:$0xff]  }
  0x5c   : > { %932 = vmatprep.subr.bf16.mxu0 %v7233_v27  ;;  %985 = vmatprep.subr.bf16.mxu1 %v7236_v28  ;;  %v7289_v12 = vld [vmem:[#allocation2 + $0x414] ss:$56 sps:$4 sm:$0xff]   ;;  %v7287_v14 = vld [vmem:[#allocation2 + $0x410] ss:$56 sps:$4 sm:$0xff]   ;;  %v7295_v16 = vld [vmem:[#allocation2 + $0x484] ss:$56 sps:$4 sm:$0xff]  }
  0x5d   : > { %v7292_v13 = vld [vmem:[#allocation2 + $0x41c] ss:$56 sps:$4 sm:$0xff]   ;;  %v7290_v15 = vld [vmem:[#allocation2 + $0x418] ss:$56 sps:$4 sm:$0xff]   ;;  %v7298_v17 = vld [vmem:[#allocation2 + $0x48c] ss:$56 sps:$4 sm:$0xff]  }
  0x5e   : > { %6311 = vmatmul.mubr.msk.bf16.vlgmr.msra.gmra.mrb[0].mxu0 %vm819_vm1, %v8041_v43  ;;  %6313 = vmatmul.mubr.msk.bf16.vlgmr.msra.gmra.mrb[0].mxu1 %vm819_vm1, %v8041_v43  ;;  %v7293_v18 = vld [vmem:[#allocation2 + $0x480] ss:$56 sps:$4 sm:$0xff]   ;;  %v7301_v20 = vld [vmem:[#allocation2 + $0x4f4] ss:$56 sps:$4 sm:$0xff]   ;;  %v7299_v22 = vld [vmem:[#allocation2 + $0x4f0] ss:$56 sps:$4 sm:$0xff]  }
  0x5f   : > { %933 = vmatpush1.bf16.msra.mxu0 %v7231_v37  ;;  %986 = vmatpush1.bf16.msra.mxu1 %v7234_v38  ;;  %v7296_v19 = vld [vmem:[#allocation2 + $0x488] ss:$56 sps:$4 sm:$0xff]   ;;  %v7304_v21 = vld [vmem:[#allocation2 + $0x4fc] ss:$56 sps:$4 sm:$0xff]   ;;  %v7302_v23 = vld [vmem:[#allocation2 + $0x4f8] ss:$56 sps:$4 sm:$0xff]  }
  0x60   : > { %934 = vmatprep.subr.bf16.mxu0 %v7241_v41  ;;  %987 = vmatprep.subr.bf16.mxu1 %v7244_v42  ;;  %v7307_v24 = vld [vmem:[#allocation2 + $0x2d4] ss:$56 sps:$4 sm:$0xff]   ;;  %v7305_v28 = vld [vmem:[#allocation2 + $0x2d0] ss:$56 sps:$4 sm:$0xff]   ;;  %v7313_v32 = vld [vmem:[#allocation2 + $0x344] ss:$56 sps:$4 sm:$0xff]  }
  0x61   : > { %868 = vmatprep.mubr.bf16.mxu0 %v7907_v0  ;;  %921 = vmatprep.mubr.bf16.mxu1 %v7907_v0  ;;  %v7310_v27 = vld [vmem:[#allocation2 + $0xc] ss:$56 sps:$4 sm:$0xff]   ;;  %v7308_v31 = vld [vmem:[#allocation2 + $0x8] ss:$56 sps:$4 sm:$0xff]   ;;  %v7316_v33 = vld [vmem:[#allocation2 + $0x7c] ss:$56 sps:$4 sm:$0xff]  }
  0x62   : > { %v7311_v34 = vld [vmem:[#allocation2 + $0x340] ss:$56 sps:$4 sm:$0xff]   ;;  %v7319_v36 = vld [vmem:[#allocation2 + $0x3b4] ss:$56 sps:$4 sm:$0xff]   ;;  %v7317_v38 = vld [vmem:[#allocation2 + $0x3b0] ss:$56 sps:$4 sm:$0xff]  }
  0x63   : > { %935 = vmatpush1.bf16.msra.mxu0 %v7239_v44  ;;  %988 = vmatpush1.bf16.msra.mxu1 %v7242_v45  ;;  %v7314_v35 = vld [vmem:[#allocation2 + $0x78] ss:$56 sps:$4 sm:$0xff]   ;;  %v7322_v37 = vld [vmem:[#allocation2 + $0xec] ss:$56 sps:$4 sm:$0xff]   ;;  %v7320_v39 = vld [vmem:[#allocation2 + $0xe8] ss:$56 sps:$4 sm:$0xff]  }
  0x64   : > { %936 = vmatprep.subr.bf16.mxu0 %v7247_v46  ;;  %989 = vmatprep.subr.bf16.mxu1 %v7250_v47  ;;  %v7325_v41 = vld [vmem:[#allocation2 + $0x424] ss:$56 sps:$4 sm:$0xff]   ;;  %v7323_v44 = vld [vmem:[#allocation2 + $0x420] ss:$56 sps:$4 sm:$0xff]   ;;  %v7331_v46 = vld [vmem:[#allocation2 + $0x494] ss:$56 sps:$4 sm:$0xff]  }
  0x65   : > { %v7328_v42 = vld [vmem:[#allocation2 + $0x15c] ss:$56 sps:$4 sm:$0xff]   ;;  %v7326_v45 = vld [vmem:[#allocation2 + $0x158] ss:$56 sps:$4 sm:$0xff]   ;;  %v7334_v47 = vld [vmem:[#allocation2 + $0x1cc] ss:$56 sps:$4 sm:$0xff]  }
  0x66   : > { %6312 = vmatmul.mubr.msk.bf16.gmra.mrb[4].mxu0 %vm819_vm1, %v8049_v48  ;;  %6314 = vmatmul.mubr.msk.bf16.gmra.mrb[4].mxu1 %vm819_vm1, %v8049_v48  ;;  %vm3019_vm3 = vsmask.f32 6400  ;;  %s7160_s22 = smul.u32 56, %s8704_s13 }
  0x67   : > { %937 = vmatpush1.bf16.msra.mxu0 %v7245_v49  ;;  %990 = vmatpush1.bf16.msra.mxu1 %v7248_v50  ;;  %v7329_v49 = vld [vmem:[#allocation2 + $0x490] ss:$56 sps:$4 sm:$0xff]  }
  0x68   : > { %938 = vmatprep.subr.bf16.mxu0 %v7253_v51  ;;  %991 = vmatprep.subr.bf16.mxu1 %v7256_v52  ;;  %v7332_v50 = vld [vmem:[#allocation2 + $0x1c8] ss:$56 sps:$4 sm:$0xff]   ;;  %v7337_v51 = vld [vmem:[#allocation2 + $0x504] ss:$56 sps:$4 sm:$0xff]   ;;  %s8642_s13 = scalar_lea.vmem %s8691_s3, %s7160_s22 }
  0x69   : > { %964 = vmatprep.mubr.bf16.mxu0 %v7907_v0  ;;  %1017 = vmatprep.mubr.bf16.mxu1 %v7907_v0  ;;  %v7340_v52 = vld [vmem:[#allocation2 + $0x23c] ss:$56 sps:$4 sm:$0xff]  }
  0x6b   : > { %939 = vmatpush1.bf16.msra.mxu0 %v7251_v53  ;;  %992 = vmatpush1.bf16.msra.mxu1 %v7254_v54  ;;  %v7335_v53 = vld [vmem:[#allocation2 + $0x500] ss:$56 sps:$4 sm:$0xff]  }
  0x6c   : > { %940 = vmatprep.subr.bf16.mxu0 %v7259_v55  ;;  %993 = vmatprep.subr.bf16.mxu1 %v7262_v56  ;;  %v7338_v54 = vld [vmem:[#allocation2 + $0x238] ss:$56 sps:$4 sm:$0xff]   ;;  %v7343_v55 = vld [vmem:[#allocation2 + $0x4] ss:$56 sps:$4 sm:$0xff]  }
  0x6d   : > { %v7346_v56 = vld [vmem:[#allocation2 + $0x1c] ss:$56 sps:$4 sm:$0xff]  }
  0x6f   : > { %941 = vmatpush1.bf16.msra.mxu0 %v7257_v57  ;;  %994 = vmatpush1.bf16.msra.mxu1 %v7260_v58  ;;  %v7341_v57 = vld [vmem:[#allocation2] ss:$56 sps:$4 sm:$0xff]  }
  0x70   : > { %942 = vmatprep.subr.bf16.mxu0 %v7265_v59  ;;  %995 = vmatprep.subr.bf16.mxu1 %v7268_v60  ;;  %v7344_v58 = vld [vmem:[#allocation2 + $0x18] ss:$56 sps:$4 sm:$0xff]   ;;  %v7349_v59 = vld [vmem:[#allocation2 + $0x74] ss:$56 sps:$4 sm:$0xff]  }
  0x71   : > { %v7352_v60 = vld [vmem:[#allocation2 + $0x8c] ss:$56 sps:$4 sm:$0xff]  }
  0x73   : > { %943 = vmatpush1.bf16.msra.mxu0 %v7263_v61  ;;  %996 = vmatpush1.bf16.msra.mxu1 %v7266_v62  ;;  %v7347_v61 = vld [vmem:[#allocation2 + $0x70] ss:$56 sps:$4 sm:$0xff]  }
  0x74   : > { %1038 = vmatprep.subr.bf16.mxu0 %v7271_v63  ;;  %1091 = vmatprep.subr.bf16.mxu1 %v7274_v1  ;;  %v7350_v62 = vld [vmem:[#allocation2 + $0x88] ss:$56 sps:$4 sm:$0xff]   ;;  %v7355_v63 = vld [vmem:[#allocation2 + $0xe4] ss:$56 sps:$4 sm:$0xff]  }
  0x75   : > { %v7358_v1 = vld [vmem:[#allocation2 + $0xfc] ss:$56 sps:$4 sm:$0xff]  }
  0x76   : > { %6315 = vmatmul.mubr.msk.bf16.vlgmr.msra.gmra.mrb[8].mxu0 %vm819_vm1, %v8041_v43  ;;  %6317 = vmatmul.mubr.msk.bf16.vlgmr.msra.gmra.mrb[8].mxu1 %vm819_vm1, %v8041_v43 }
  0x77   : > { %1039 = vmatpush1.bf16.msra.mxu0 %v7269_v2  ;;  %1092 = vmatpush1.bf16.msra.mxu1 %v7272_v3  ;;  %v7353_v2 = vld [vmem:[#allocation2 + $0xe0] ss:$56 sps:$4 sm:$0xff]  }
  0x78   : > { %1040 = vmatprep.subr.bf16.mxu0 %v7277_v4  ;;  %1093 = vmatprep.subr.bf16.mxu1 %v7280_v5  ;;  %v7356_v3 = vld [vmem:[#allocation2 + $0xf8] ss:$56 sps:$4 sm:$0xff]   ;;  %v7364_v4 = vld [vmem:[#allocation2 + $0x16c] ss:$56 sps:$4 sm:$0xff]  }
  0x79   : > { %974 = vmatprep.mubr.bf16.mxu0 %v7907_v0  ;;  %1027 = vmatprep.mubr.bf16.mxu1 %v7907_v0  ;;  %v7359_v5 = vld [vmem:[#allocation2 + $0x150] ss:$56 sps:$4 sm:$0xff]  }
  0x7b   : > { %1041 = vmatpush1.bf16.msra.mxu0 %v7275_v6  ;;  %1094 = vmatpush1.bf16.msra.mxu1 %v7278_v7  ;;  %v7362_v6 = vld [vmem:[#allocation2 + $0x168] ss:$56 sps:$4 sm:$0xff]   ;;  %v7367_v7 = vld [vmem:[#allocation2 + $0x1c4] ss:$56 sps:$4 sm:$0xff]  }
  0x7c   : > { %1042 = vmatprep.subr.bf16.mxu0 %v7283_v8  ;;  %1095 = vmatprep.subr.bf16.mxu1 %v7286_v9  ;;  %v7370_v8 = vld [vmem:[#allocation2 + $0x1dc] ss:$56 sps:$4 sm:$0xff]   ;;  %v7365_v9 = vld [vmem:[#allocation2 + $0x1c0] ss:$56 sps:$4 sm:$0xff]  }
  0x7e   : > { %6316 = vmatmul.mubr.msk.bf16.gmra.mrb[12].mxu0 %vm819_vm1, %v8049_v48  ;;  %6318 = vmatmul.mubr.msk.bf16.gmra.mrb[12].mxu1 %vm819_vm1, %v8049_v48 }
  0x7f   : > { %1043 = vmatpush1.bf16.msra.mxu0 %v7281_v10  ;;  %1096 = vmatpush1.bf16.msra.mxu1 %v7284_v11  ;;  %v7368_v10 = vld [vmem:[#allocation2 + $0x1d8] ss:$56 sps:$4 sm:$0xff]   ;;  %v7376_v11 = vld [vmem:[#allocation2 + $0x24c] ss:$56 sps:$4 sm:$0xff]  }
  0x80   : > { %1044 = vmatprep.subr.bf16.mxu0 %v7289_v12  ;;  %1097 = vmatprep.subr.bf16.mxu1 %v7292_v13  ;;  %v7371_v12 = vld [vmem:[#allocation2 + $0x230] ss:$56 sps:$4 sm:$0xff]  }
  0x81   : > { %1070 = vmatprep.mubr.bf16.mxu0 %v7907_v0  ;;  %1123 = vmatprep.mubr.bf16.mxu1 %v7907_v0  ;;  %v7374_v13 = vld [vmem:[#allocation2 + $0x248] ss:$56 sps:$4 sm:$0xff]  }
  0x83   : > { %1045 = vmatpush1.bf16.msra.mxu0 %v7287_v14  ;;  %1098 = vmatpush1.bf16.msra.mxu1 %v7290_v15  ;;  %v7379_v14 = vld [vmem:[#allocation2 + $0x14] ss:$56 sps:$4 sm:$0xff]  }
  0x84   : > { %1046 = vmatprep.subr.bf16.mxu0 %v7295_v16  ;;  %1099 = vmatprep.subr.bf16.mxu1 %v7298_v17  ;;  %v7382_v15 = vld [vmem:[#allocation2 + $0x2c] ss:$56 sps:$4 sm:$0xff]   ;;  %v7377_v16 = vld [vmem:[#allocation2 + $0x10] ss:$56 sps:$4 sm:$0xff]  }
  0x85   : > { %v7380_v17 = vld [vmem:[#allocation2 + $0x28] ss:$56 sps:$4 sm:$0xff]  }
  0x87   : > { %1047 = vmatpush1.bf16.msra.mxu0 %v7293_v18  ;;  %1100 = vmatpush1.bf16.msra.mxu1 %v7296_v19  ;;  %v7385_v18 = vld [vmem:[#allocation2 + $0x84] ss:$56 sps:$4 sm:$0xff]  }
  0x88   : > { %1048 = vmatprep.subr.bf16.mxu0 %v7301_v20  ;;  %1101 = vmatprep.subr.bf16.mxu1 %v7304_v21  ;;  %v7388_v19 = vld [vmem:[#allocation2 + $0x9c] ss:$56 sps:$4 sm:$0xff]   ;;  %v7383_v20 = vld [vmem:[#allocation2 + $0x80] ss:$56 sps:$4 sm:$0xff]  }
  0x89   : > { %v7386_v21 = vld [vmem:[#allocation2 + $0x98] ss:$56 sps:$4 sm:$0xff]  }
  0x8b   : > { %1049 = vmatpush1.bf16.msra.mxu0 %v7299_v22  ;;  %1102 = vmatpush1.bf16.msra.mxu1 %v7302_v23  ;;  %v7391_v22 = vld [vmem:[#allocation2 + $0xf4] ss:$56 sps:$4 sm:$0xff]  }
  0x8c   : > { %1144 = vmatprep.subr.bf16.mxu0 %v7307_v24  ;;  %1674 = vmatprep.subr.bf16.mxu1 %v7310_v27  ;;  %v7394_v23 = vld [vmem:[#allocation2 + $0x10c] ss:$56 sps:$4 sm:$0xff]   ;;  %v7389_v24 = vld [vmem:[#allocation2 + $0xf0] ss:$56 sps:$4 sm:$0xff]  }
  0x8d   : > { %v7392_v27 = vld [vmem:[#allocation2 + $0x108] ss:$56 sps:$4 sm:$0xff]  }
  0x8e   : > { %6319 = vmatmul.mubr.msk.bf16.vlgmr.msra.gmra.mrb[16].mxu0 %vm819_vm1, %v8041_v43  ;;  %6321 = vmatmul.mubr.msk.bf16.vlgmr.msra.gmra.mrb[16].mxu1 %vm819_vm1, %v8041_v43 }
  0x8f   : > { %1145 = vmatpush1.bf16.msra.mxu0 %v7305_v28  ;;  %1675 = vmatpush1.bf16.msra.mxu1 %v7308_v31  ;;  %v7397_v28 = vld [vmem:[#allocation2 + $0x164] ss:$56 sps:$4 sm:$0xff]  }
  0x90   : > { %1146 = vmatprep.subr.bf16.mxu0 %v7313_v32  ;;  %1676 = vmatprep.subr.bf16.mxu1 %v7316_v33  ;;  %v7400_v31 = vld [vmem:[#allocation2 + $0x17c] ss:$56 sps:$4 sm:$0xff]   ;;  %v7395_v32 = vld [vmem:[#allocation2 + $0x160] ss:$56 sps:$4 sm:$0xff]  }
  0x91   : > { %1080 = vmatprep.mubr.bf16.mxu0 %v7907_v0  ;;  %1133 = vmatprep.mubr.bf16.mxu1 %v7907_v0  ;;  %v7398_v33 = vld [vmem:[#allocation2 + $0x178] ss:$56 sps:$4 sm:$0xff]  }
  0x93   : > { %1147 = vmatpush1.bf16.msra.mxu0 %v7311_v34  ;;  %1677 = vmatpush1.bf16.msra.mxu1 %v7314_v35  ;;  %v7403_v34 = vld [vmem:[#allocation2 + $0x1d4] ss:$56 sps:$4 sm:$0xff]  }
  0x94   : > { %1148 = vmatprep.subr.bf16.mxu0 %v7319_v36  ;;  %1678 = vmatprep.subr.bf16.mxu1 %v7322_v37  ;;  %v7406_v35 = vld [vmem:[#allocation2 + $0x1ec] ss:$56 sps:$4 sm:$0xff]   ;;  %v7401_v36 = vld [vmem:[#allocation2 + $0x1d0] ss:$56 sps:$4 sm:$0xff]  }
  0x95   : > { %v7404_v37 = vld [vmem:[#allocation2 + $0x1e8] ss:$56 sps:$4 sm:$0xff]  }
  0x96   : > { %6320 = vmatmul.mubr.msk.bf16.gmra.mrb[20].mxu0 %vm819_vm1, %v8049_v48  ;;  %6322 = vmatmul.mubr.msk.bf16.gmra.mrb[20].mxu1 %vm819_vm1, %v8049_v48 }
  0x97   : > { %1149 = vmatpush1.bf16.msra.mxu0 %v7317_v38  ;;  %1679 = vmatpush1.bf16.msra.mxu1 %v7320_v39  ;;  %v7409_v38 = vld [vmem:[#allocation2 + $0x244] ss:$56 sps:$4 sm:$0xff]   ;;  %v7407_v39 = vld [vmem:[#allocation2 + $0x240] ss:$56 sps:$4 sm:$0xff]  }
  0x98   : > { %1150 = vmatprep.subr.bf16.mxu0 %v7325_v41  ;;  %1680 = vmatprep.subr.bf16.mxu1 %v7328_v42  ;;  %v7410_v41 = vld [vmem:[#allocation2 + $0x258] ss:$56 sps:$4 sm:$0xff]   ;;  %v7415_v42 = vld [vmem:[#allocation2 + $0x24] ss:$56 sps:$4 sm:$0xff]  }
  0x99   : > { %1176 = vmatprep.mubr.bf16.mxu0 %v7907_v0  ;;  %1706 = vmatprep.mubr.bf16.mxu1 %v7907_v0 }
  0x9b   : > { %1151 = vmatpush1.bf16.msra.mxu0 %v7323_v44  ;;  %1681 = vmatpush1.bf16.msra.mxu1 %v7326_v45  ;;  %v7418_v44 = vld [vmem:[#allocation2 + $0x54c] ss:$56 sps:$4 sm:$0xff]   ;;  %v7413_v45 = vld [vmem:[#allocation2 + $0x20] ss:$56 sps:$4 sm:$0xff]  }
  0x9c   : > { %1152 = vmatprep.subr.bf16.mxu0 %v7331_v46  ;;  %1682 = vmatprep.subr.bf16.mxu1 %v7334_v47  ;;  %v7416_v46 = vld [vmem:[#allocation2 + $0x548] ss:$56 sps:$4 sm:$0xff]   ;;  %v7421_v47 = vld [vmem:[#allocation2 + $0x94] ss:$56 sps:$4 sm:$0xff]  }
  0x9f   : > { %1153 = vmatpush1.bf16.msra.mxu0 %v7329_v49  ;;  %1683 = vmatpush1.bf16.msra.mxu1 %v7332_v50  ;;  %v7424_v49 = vld [vmem:[#allocation2 + $0x5bc] ss:$56 sps:$4 sm:$0xff]   ;;  %v7419_v50 = vld [vmem:[#allocation2 + $0x90] ss:$56 sps:$4 sm:$0xff]  }
  0xa0   : > { %1154 = vmatprep.subr.bf16.mxu0 %v7337_v51  ;;  %1684 = vmatprep.subr.bf16.mxu1 %v7340_v52  ;;  %v7422_v51 = vld [vmem:[#allocation2 + $0x5b8] ss:$56 sps:$4 sm:$0xff]   ;;  %v7427_v52 = vld [vmem:[#allocation2 + $0x104] ss:$56 sps:$4 sm:$0xff]  }
  0xa3   : > { %1155 = vmatpush1.bf16.msra.mxu0 %v7335_v53  ;;  %1685 = vmatpush1.bf16.msra.mxu1 %v7338_v54  ;;  %v7430_v53 = vld [vmem:[#allocation2 + $0x62c] ss:$56 sps:$4 sm:$0xff]   ;;  %v7425_v54 = vld [vmem:[#allocation2 + $0x100] ss:$56 sps:$4 sm:$0xff]  }
  0xa4   : > { %1621 = vmatprep.subr.bf16.mxu0 %v7343_v55  ;;  %1780 = vmatprep.subr.bf16.mxu1 %v7346_v56  ;;  %v7428_v55 = vld [vmem:[#allocation2 + $0x628] ss:$56 sps:$4 sm:$0xff]   ;;  %v7433_v56 = vld [vmem:[#allocation2 + $0x174] ss:$56 sps:$4 sm:$0xff]  }
  0xa6   : > { %6323 = vmatmul.mubr.msk.bf16.vlgmr.msra.gmra.mrb[24].mxu0 %vm819_vm1, %v8041_v43  ;;  %6411 = vmatmul.mubr.msk.bf16.vlgmr.msra.gmra.mrb[0].mxu1 %vm819_vm1, %v8026_v25  ;;  %v7361_v43 = vld [vmem:[#allocation2 + $0x154] ss:$56 sps:$4 sm:$0xff]  }
  0xa7   : > { %1622 = vmatpush1.bf16.msra.mxu0 %v7341_v57  ;;  %1781 = vmatpush1.bf16.msra.mxu1 %v7344_v58  ;;  %v7436_v57 = vld [vmem:[#allocation2 + $0x69c] ss:$56 sps:$4 sm:$0xff]   ;;  %v8112_v58 = vld [vmem:[%s8023_s21 + $0x8] sm:$0xff]  }
  0xa8   : > { %1623 = vmatprep.subr.bf16.mxu0 %v7349_v59  ;;  %1782 = vmatprep.subr.bf16.mxu1 %v7352_v60  ;;  %v7431_v59 = vld [vmem:[#allocation2 + $0x170] ss:$56 sps:$4 sm:$0xff]  }
  0xa9   : > { %1186 = vmatprep.mubr.bf16.mxu0 %v7907_v0  ;;  %1716 = vmatprep.mubr.bf16.mxu1 %v7907_v0  ;;  %v7434_v60 = vld [vmem:[#allocation2 + $0x698] ss:$56 sps:$4 sm:$0xff]  }
  0xab   : > { %1624 = vmatpush1.bf16.msra.mxu0 %v7347_v61  ;;  %1783 = vmatpush1.bf16.msra.mxu1 %v7350_v62  ;;  %v7439_v61 = vld [vmem:[#allocation2 + $0x1e4] ss:$56 sps:$4 sm:$0xff]  }
  0xac   : > { %1625 = vmatprep.subr.bf16.mxu0 %v7355_v63  ;;  %1784 = vmatprep.subr.bf16.mxu1 %v7358_v1  ;;  %v7442_v62 = vld [vmem:[#allocation2 + $0x70c] ss:$56 sps:$4 sm:$0xff]   ;;  %v7437_v63 = vld [vmem:[#allocation2 + $0x1e0] ss:$56 sps:$4 sm:$0xff]  }
  0xad   : > { %v7440_v1 = vld [vmem:[#allocation2 + $0x708] ss:$56 sps:$4 sm:$0xff]  }
  0xae   : > { %6324 = vmatmul.mubr.msk.bf16.gmra.mrb[28].mxu0 %vm819_vm1, %v8049_v48  ;;  %6412 = vmatmul.mubr.msk.bf16.gmra.mrb[4].mxu1 %vm819_vm1, %v8029_v26  ;;  %v7373_v48 = vld [vmem:[#allocation2 + $0x234] ss:$56 sps:$4 sm:$0xff]  }
  0xaf   : > { %1626 = vmatpush1.bf16.msra.mxu0 %v7353_v2  ;;  %1785 = vmatpush1.bf16.msra.mxu1 %v7356_v3  ;;  %v7445_v2 = vld [vmem:[#allocation2 + $0x254] ss:$56 sps:$4 sm:$0xff]  }
  0xb0   : > { %1627 = vmatprep.subr.bf16.mxu0 %v7361_v43  ;;  %1786 = vmatprep.subr.bf16.mxu1 %v7364_v4  ;;  %v7448_v3 = vld [vmem:[#allocation2 + $0x77c] ss:$56 sps:$4 sm:$0xff]   ;;  %v8121_v43 = vld [vmem:[%s8023_s21] sm:$0xff]  }
  0xb1   : > { %1653 = vmatprep.mubr.bf16.mxu0 %v7907_v0  ;;  %1812 = vmatprep.mubr.bf16.mxu1 %v7907_v0  ;;  %v2078_v4 = vrot.slane %v8121_v43, 1 }
  0xb3   : > { %1628 = vmatpush1.bf16.msra.mxu0 %v7359_v5  ;;  %1787 = vmatpush1.bf16.msra.mxu1 %v7362_v6  ;;  %v7443_v5 = vld [vmem:[#allocation2 + $0x250] ss:$56 sps:$4 sm:$0xff]  }
  0xb4   : > { %1629 = vmatprep.subr.bf16.mxu0 %v7367_v7  ;;  %1788 = vmatprep.subr.bf16.mxu1 %v7370_v8  ;;  %v7446_v6 = vld [vmem:[#allocation2 + $0x778] ss:$56 sps:$4 sm:$0xff]   ;;  %v8125_v7 = vrot.slane %v8112_v58, 1  ;;  %v7451_v8 = vld [vmem:[#allocation2 + $0x34] ss:$56 sps:$4 sm:$0xff]  }
  0xb7   : > { %1630 = vmatpush1.bf16.msra.mxu0 %v7365_v9  ;;  %1789 = vmatpush1.bf16.msra.mxu1 %v7368_v10  ;;  %v7454_v9 = vld [vmem:[#allocation2 + $0x55c] ss:$56 sps:$4 sm:$0xff]   ;;  %v7449_v10 = vld [vmem:[#allocation2 + $0x30] ss:$56 sps:$4 sm:$0xff]  }
  0xb8   : > { %1631 = vmatprep.subr.bf16.mxu0 %v7373_v48  ;;  %1790 = vmatprep.subr.bf16.mxu1 %v7376_v11  ;;  %v7452_v48 = vld [vmem:[#allocation2 + $0x558] ss:$56 sps:$4 sm:$0xff]   ;;  %v8128_v11 = vsel %vm2077_vm2, %v2078_v4, %v8125_v7 }
  0xb9   : > { %v7527_v4 = vld [vmem:[#allocation2 + $0x5c0] ss:$56 sps:$4 sm:$0xff]  }
  0xbb   : > { %1632 = vmatpush1.bf16.msra.mxu0 %v7371_v12  ;;  %1791 = vmatpush1.bf16.msra.mxu1 %v7374_v13  ;;  %v7457_v12 = vld [vmem:[#allocation2 + $0xa4] ss:$56 sps:$4 sm:$0xff]  }
  0xbc   : > { %1727 = vmatprep.subr.bf16.mxu0 %v7379_v14  ;;  %1886 = vmatprep.subr.bf16.mxu1 %v7382_v15  ;;  %v7460_v13 = vld [vmem:[#allocation2 + $0x5cc] ss:$56 sps:$4 sm:$0xff]   ;;  %v7455_v14 = vld [vmem:[#allocation2 + $0xa0] ss:$56 sps:$4 sm:$0xff]  }
  0xbd   : > { %v7458_v15 = vld [vmem:[#allocation2 + $0x5c8] ss:$56 sps:$4 sm:$0xff]  }
  0xbe   : > { %6409 = vmatmul.mubr.msk.bf16.vlgmr.msra.gmra.mrb[0].mxu0 %vm819_vm1, %v8026_v25  ;;  %6415 = vmatmul.mubr.msk.bf16.vlgmr.msra.gmra.mrb[8].mxu1 %vm819_vm1, %v8026_v25 }
  0xbf   : > { %1728 = vmatpush1.bf16.msra.mxu0 %v7377_v16  ;;  %1887 = vmatpush1.bf16.msra.mxu1 %v7380_v17  ;;  %v7463_v16 = vld [vmem:[#allocation2 + $0x114] ss:$56 sps:$4 sm:$0xff]  }
  0xc0   : > { %1729 = vmatprep.subr.bf16.mxu0 %v7385_v18  ;;  %1888 = vmatprep.subr.bf16.mxu1 %v7388_v19  ;;  %v7466_v17 = vld [vmem:[#allocation2 + $0x63c] ss:$56 sps:$4 sm:$0xff]   ;;  %v7461_v18 = vld [vmem:[#allocation2 + $0x110] ss:$56 sps:$4 sm:$0xff]  }
  0xc1   : > { %1663 = vmatprep.mubr.bf16.mxu0 %v7907_v0  ;;  %1822 = vmatprep.mubr.bf16.mxu1 %v7907_v0  ;;  %v7464_v19 = vld [vmem:[#allocation2 + $0x638] ss:$56 sps:$4 sm:$0xff]  }
  0xc3   : > { %1730 = vmatpush1.bf16.msra.mxu0 %v7383_v20  ;;  %1889 = vmatpush1.bf16.msra.mxu1 %v7386_v21  ;;  %v7469_v20 = vld [vmem:[#allocation2 + $0x184] ss:$56 sps:$4 sm:$0xff]  }
  0xc4   : > { %1731 = vmatprep.subr.bf16.mxu0 %v7391_v22  ;;  %1890 = vmatprep.subr.bf16.mxu1 %v7394_v23  ;;  %v7472_v21 = vld [vmem:[#allocation2 + $0x6ac] ss:$56 sps:$4 sm:$0xff]   ;;  %v7467_v22 = vld [vmem:[#allocation2 + $0x180] ss:$56 sps:$4 sm:$0xff]  }
  0xc5   : > { %v7470_v23 = vld [vmem:[#allocation2 + $0x6a8] ss:$56 sps:$4 sm:$0xff]  }
  0xc6   : > { %6410 = vmatmul.mubr.msk.bf16.gmra.mrb[4].mxu0 %vm819_vm1, %v8029_v26  ;;  %6416 = vmatmul.mubr.msk.bf16.gmra.mrb[12].mxu1 %vm819_vm1, %v8029_v26  ;;  %v7412_v26 = vld [vmem:[#allocation2 + $0x25c] ss:$56 sps:$4 sm:$0xff]  }
  0xc7   : > { %1732 = vmatpush1.bf16.msra.mxu0 %v7389_v24  ;;  %1891 = vmatpush1.bf16.msra.mxu1 %v7392_v27  ;;  %v7475_v24 = vld [vmem:[#allocation2 + $0x1f4] ss:$56 sps:$4 sm:$0xff]  }
  0xc8   : > { %1733 = vmatprep.subr.bf16.mxu0 %v7397_v28  ;;  %1892 = vmatprep.subr.bf16.mxu1 %v7400_v31  ;;  %v7478_v27 = vld [vmem:[#allocation2 + $0x71c] ss:$56 sps:$4 sm:$0xff]   ;;  %v7473_v28 = vld [vmem:[#allocation2 + $0x1f0] ss:$56 sps:$4 sm:$0xff]  }
  0xc9   : > { %1759 = vmatprep.mubr.bf16.mxu0 %v7907_v0  ;;  %1918 = vmatprep.mubr.bf16.mxu1 %v7907_v0  ;;  %v7476_v31 = vld [vmem:[#allocation2 + $0x718] ss:$56 sps:$4 sm:$0xff]  }
  0xcb   : > { %1734 = vmatpush1.bf16.msra.mxu0 %v7395_v32  ;;  %1893 = vmatpush1.bf16.msra.mxu1 %v7398_v33  ;;  %v7481_v32 = vld [vmem:[#allocation2 + $0x264] ss:$56 sps:$4 sm:$0xff]  }
  0xcc   : > { %1735 = vmatprep.subr.bf16.mxu0 %v7403_v34  ;;  %1894 = vmatprep.subr.bf16.mxu1 %v7406_v35  ;;  %v7484_v33 = vld [vmem:[#allocation2 + $0x78c] ss:$56 sps:$4 sm:$0xff]   ;;  %v7479_v34 = vld [vmem:[#allocation2 + $0x260] ss:$56 sps:$4 sm:$0xff]  }
  0xcd   : > { %v7482_v35 = vld [vmem:[#allocation2 + $0x788] ss:$56 sps:$4 sm:$0xff]  }
  0xcf   : > { %1736 = vmatpush1.bf16.msra.mxu0 %v7401_v36  ;;  %1895 = vmatpush1.bf16.msra.mxu1 %v7404_v37  ;;  %v7487_v36 = vld [vmem:[#allocation2 + $0x544] ss:$56 sps:$4 sm:$0xff]  }
  0xd0   : > { %1737 = vmatprep.subr.bf16.mxu0 %v7409_v38  ;;  %1896 = vmatprep.subr.bf16.mxu1 %v7412_v26  ;;  %v7490_v37 = vld [vmem:[#allocation2 + $0x56c] ss:$56 sps:$4 sm:$0xff]   ;;  %v7485_v38 = vld [vmem:[#allocation2 + $0x540] ss:$56 sps:$4 sm:$0xff]  }
  0xd1   : > { %v7488_v26 = vld [vmem:[#allocation2 + $0x568] ss:$56 sps:$4 sm:$0xff]  }
  0xd3   : > { %1738 = vmatpush1.bf16.msra.mxu0 %v7407_v39  ;;  %1897 = vmatpush1.bf16.msra.mxu1 %v7410_v41  ;;  %v7493_v39 = vld [vmem:[#allocation2 + $0x5b4] ss:$56 sps:$4 sm:$0xff]  }
  0xd4   : > { %1833 = vmatprep.subr.bf16.mxu0 %v7415_v42  ;;  %2560 = vmatprep.subr.bf16.mxu1 %v7418_v44  ;;  %v7496_v41 = vld [vmem:[#allocation2 + $0x5dc] ss:$56 sps:$4 sm:$0xff]   ;;  %v7491_v42 = vld [vmem:[#allocation2 + $0x5b0] ss:$56 sps:$4 sm:$0xff]  }
  0xd5   : > { %v7494_v44 = vld [vmem:[#allocation2 + $0x5d8] ss:$56 sps:$4 sm:$0xff]  }
  0xd6   : > { %6413 = vmatmul.mubr.msk.bf16.vlgmr.msra.gmra.mrb[8].mxu0 %vm819_vm1, %v8026_v25  ;;  %6419 = vmatmul.mubr.msk.bf16.vlgmr.msra.gmra.mrb[16].mxu1 %vm819_vm1, %v8026_v25 }
  0xd7   : > { %1834 = vmatpush1.bf16.msra.mxu0 %v7413_v45  ;;  %2561 = vmatpush1.bf16.msra.mxu1 %v7416_v46  ;;  %v7499_v45 = vld [vmem:[#allocation2 + $0x624] ss:$56 sps:$4 sm:$0xff]  }
  0xd8   : > { %1835 = vmatprep.subr.bf16.mxu0 %v7421_v47  ;;  %2562 = vmatprep.subr.bf16.mxu1 %v7424_v49  ;;  %v7502_v46 = vld [vmem:[#allocation2 + $0x64c] ss:$56 sps:$4 sm:$0xff]   ;;  %v7497_v47 = vld [vmem:[#allocation2 + $0x620] ss:$56 sps:$4 sm:$0xff]  }
  0xd9   : > { %1769 = vmatprep.mubr.bf16.mxu0 %v7907_v0  ;;  %1928 = vmatprep.mubr.bf16.mxu1 %v7907_v0  ;;  %v7500_v49 = vld [vmem:[#allocation2 + $0x648] ss:$56 sps:$4 sm:$0xff]  }
  0xdb   : > { %1836 = vmatpush1.bf16.msra.mxu0 %v7419_v50  ;;  %2563 = vmatpush1.bf16.msra.mxu1 %v7422_v51  ;;  %v7505_v50 = vld [vmem:[#allocation2 + $0x694] ss:$56 sps:$4 sm:$0xff]  }
  0xdc   : > { %1837 = vmatprep.subr.bf16.mxu0 %v7427_v52  ;;  %2564 = vmatprep.subr.bf16.mxu1 %v7430_v53  ;;  %v7508_v51 = vld [vmem:[#allocation2 + $0x6bc] ss:$56 sps:$4 sm:$0xff]   ;;  %v7503_v52 = vld [vmem:[#allocation2 + $0x690] ss:$56 sps:$4 sm:$0xff]  }
  0xdd   : > { %v7506_v53 = vld [vmem:[#allocation2 + $0x6b8] ss:$56 sps:$4 sm:$0xff]  }
  0xde   : > { %6414 = vmatmul.mubr.msk.bf16.gmra.mrb[12].mxu0 %vm819_vm1, %v8112_v58  ;;  %6420 = vmatmul.mubr.msk.bf16.gmra.mrb[20].mxu1 %vm819_vm1, %v8112_v58 }
  0xdf   : > { %1838 = vmatpush1.bf16.msra.mxu0 %v7425_v54  ;;  %2565 = vmatpush1.bf16.msra.mxu1 %v7428_v55  ;;  %v7511_v54 = vld [vmem:[#allocation2 + $0x704] ss:$56 sps:$4 sm:$0xff]  }
  0xe0   : > { %1839 = vmatprep.subr.bf16.mxu0 %v7433_v56  ;;  %2566 = vmatprep.subr.bf16.mxu1 %v7436_v57  ;;  %v7514_v55 = vld [vmem:[#allocation2 + $0x72c] ss:$56 sps:$4 sm:$0xff]   ;;  %v7509_v56 = vld [vmem:[#allocation2 + $0x700] ss:$56 sps:$4 sm:$0xff]  }
  0xe1   : > { %1865 = vmatprep.mubr.bf16.mxu0 %v7907_v0  ;;  %2592 = vmatprep.mubr.bf16.mxu1 %v7907_v0  ;;  %v7512_v57 = vld [vmem:[#allocation2 + $0x728] ss:$56 sps:$4 sm:$0xff]  }
  0xe3   : > { %1840 = vmatpush1.bf16.msra.mxu0 %v7431_v59  ;;  %2567 = vmatpush1.bf16.msra.mxu1 %v7434_v60  ;;  %v7520_v59 = vld [vmem:[#allocation2 + $0x79c] ss:$56 sps:$4 sm:$0xff]   ;;  %v7515_v60 = vld [vmem:[#allocation2 + $0x770] ss:$56 sps:$4 sm:$0xff]  }
  0xe4   : > { %1841 = vmatprep.subr.bf16.mxu0 %v7439_v61  ;;  %2568 = vmatprep.subr.bf16.mxu1 %v7442_v62  ;;  %v7518_v61 = vld [vmem:[#allocation2 + $0x798] ss:$56 sps:$4 sm:$0xff]   ;;  %v7523_v62 = vld [vmem:[#allocation2 + $0x554] ss:$56 sps:$4 sm:$0xff]  }
  0xe7   : > { %1842 = vmatpush1.bf16.msra.mxu0 %v7437_v63  ;;  %2569 = vmatpush1.bf16.msra.mxu1 %v7440_v1  ;;  %v7526_v63 = vld [vmem:[#allocation2 + $0x7ec] ss:$56 sps:$4 sm:$0xff]   ;;  %v7521_v1 = vld [vmem:[#allocation2 + $0x550] ss:$56 sps:$4 sm:$0xff]  }
  0xe8   : > { %1843 = vmatprep.subr.bf16.mxu0 %v7445_v2  ;;  %2570 = vmatprep.subr.bf16.mxu1 %v7448_v3  ;;  %v7524_v2 = vld [vmem:[#allocation2 + $0x7e8] ss:$56 sps:$4 sm:$0xff]   ;;  %v7529_v3 = vld [vmem:[#allocation2 + $0x5c4] ss:$56 sps:$4 sm:$0xff]  }
  0xeb   : > { %1844 = vmatpush1.bf16.msra.mxu0 %v7443_v5  ;;  %2571 = vmatpush1.bf16.msra.mxu1 %v7446_v6  ;;  %v7530_v5 = vld [vmem:[#allocation2 + $0x858] ss:$56 sps:$4 sm:$0xff]   ;;  %v7535_v6 = vld [vmem:[#allocation2 + $0x634] ss:$56 sps:$4 sm:$0xff]  }
  0xec   : > { %1939 = vmatprep.subr.bf16.mxu0 %v7451_v8  ;;  %2666 = vmatprep.subr.bf16.mxu1 %v7454_v9  ;;  %v7538_v8 = vld [vmem:[#allocation2 + $0x8cc] ss:$56 sps:$4 sm:$0xff]   ;;  %v7533_v9 = vld [vmem:[#allocation2 + $0x630] ss:$56 sps:$4 sm:$0xff]  }
  0xee   : > { %6417 = vmatmul.mubr.msk.bf16.vlgmr.msra.gmra.mrb[16].mxu0 %vm819_vm1, %v8121_v43  ;;  %6509 = vmatmul.mubr.msk.bf16.vlgmr.msra.gmra.mrb[0].mxu1 %vm819_vm1, %v8128_v11 }
  0xef   : > { %1940 = vmatpush1.bf16.msra.mxu0 %v7449_v10  ;;  %2667 = vmatpush1.bf16.msra.mxu1 %v7452_v48  ;;  %v7536_v10 = vld [vmem:[#allocation2 + $0x8c8] ss:$56 sps:$4 sm:$0xff]   ;;  %v7541_v48 = vld [vmem:[#allocation2 + $0x6a4] ss:$56 sps:$4 sm:$0xff]  }
  0xf0   : > { %1941 = vmatprep.subr.bf16.mxu0 %v7457_v12  ;;  %2668 = vmatprep.subr.bf16.mxu1 %v7460_v13  ;;  %v7544_v12 = vld [vmem:[#allocation2 + $0x93c] ss:$56 sps:$4 sm:$0xff]   ;;  %v7539_v13 = vld [vmem:[#allocation2 + $0x6a0] ss:$56 sps:$4 sm:$0xff]  }
  0xf1   : > { %1875 = vmatprep.mubr.bf16.mxu0 %v7907_v0  ;;  %2602 = vmatprep.mubr.bf16.mxu1 %v7907_v0 }
  0xf3   : > { %1942 = vmatpush1.bf16.msra.mxu0 %v7455_v14  ;;  %2669 = vmatpush1.bf16.msra.mxu1 %v7458_v15  ;;  %v7542_v14 = vld [vmem:[#allocation2 + $0x938] ss:$56 sps:$4 sm:$0xff]   ;;  %v7547_v15 = vld [vmem:[#allocation2 + $0x714] ss:$56 sps:$4 sm:$0xff]  }
  0xf4   : > { %1943 = vmatprep.subr.bf16.mxu0 %v7463_v16  ;;  %2670 = vmatprep.subr.bf16.mxu1 %v7466_v17  ;;  %v7550_v16 = vld [vmem:[#allocation2 + $0x9ac] ss:$56 sps:$4 sm:$0xff]   ;;  %v3020_v17 = vrot.slane %v385_v29, 1 }
  0xf5   : > { %v7559_v29 = vld [vmem:[#allocation2 + $0x564] ss:$56 sps:$4 sm:$0xff]  }
  0xf6   : > { %6418 = vmatmul.mubr.msk.bf16.gmra.mrb[20].mxu0 %vm819_vm1, %v8112_v58  ;;  %6510 = vmatmul.mubr.msk.bf16.gmra.mrb[4].mxu1 %vm819_vm1, %v8125_v7 }
  0xf7   : > { %1944 = vmatpush1.bf16.msra.mxu0 %v7461_v18  ;;  %2671 = vmatpush1.bf16.msra.mxu1 %v7464_v19  ;;  %v7545_v18 = vld [vmem:[#allocation2 + $0x710] ss:$56 sps:$4 sm:$0xff]  }
  0xf8   : > { %1945 = vmatprep.subr.bf16.mxu0 %v7469_v20  ;;  %2672 = vmatprep.subr.bf16.mxu1 %v7472_v21  ;;  %v7548_v19 = vld [vmem:[#allocation2 + $0x9a8] ss:$56 sps:$4 sm:$0xff]   ;;  %v3021_v20 = vrot.slane %v387_v30, 2  ;;  %v7553_v21 = vld [vmem:[#allocation2 + $0x784] ss:$56 sps:$4 sm:$0xff]  }
  0xf9   : > { %1971 = vmatprep.mubr.bf16.mxu0 %v7907_v0  ;;  %2698 = vmatprep.mubr.bf16.mxu1 %v7907_v0  ;;  %v7565_v30 = vld [vmem:[#allocation2 + $0x5d4] ss:$56 sps:$4 sm:$0xff]  }
  0xfb   : > { %1946 = vmatpush1.bf16.msra.mxu0 %v7467_v22  ;;  %2673 = vmatpush1.bf16.msra.mxu1 %v7470_v23  ;;  %v7556_v22 = vld [vmem:[#allocation2 + $0xa1c] ss:$56 sps:$4 sm:$0xff]   ;;  %v7551_v23 = vld [vmem:[#allocation2 + $0x780] ss:$56 sps:$4 sm:$0xff]  }
  0xfc   : > { %1947 = vmatprep.subr.bf16.mxu0 %v7475_v24  ;;  %2674 = vmatprep.subr.bf16.mxu1 %v7478_v27  ;;  %v7554_v24 = vld [vmem:[#allocation2 + $0xa18] ss:$56 sps:$4 sm:$0xff]   ;;  %v3022_v27 = vor.u32 %v3021_v20, %v3020_v17  ;;  %v7640_v20 = vld [vmem:[#allocation2 + $0xafc] ss:$56 sps:$4 sm:$0xff]  }
  0xfd   : > { %v7629_v17 = vld [vmem:[#allocation2 + $0x7e0] ss:$56 sps:$4 sm:$0xff]  }
  0xfe   : > { %v8171_v25 = vsel %vm3019_vm3, %v3022_v27, %v8039_v40  ;;  %v7641_v27 = vld [vmem:[#allocation2 + $0x8c0] ss:$56 sps:$4 sm:$0xff]  }
  0xff   : > { %1948 = vmatpush1.bf16.msra.mxu0 %v7473_v28  ;;  %2675 = vmatpush1.bf16.msra.mxu1 %v7476_v31  ;;  %v7562_v28 = vld [vmem:[#allocation2 + $0x7fc] ss:$56 sps:$4 sm:$0xff]   ;;  %v7557_v31 = vld [vmem:[#allocation2 + $0x560] ss:$56 sps:$4 sm:$0xff]  }
 0x100   : > { %1949 = vmatprep.subr.bf16.mxu0 %v7481_v32  ;;  %2676 = vmatprep.subr.bf16.mxu1 %v7484_v33  ;;  %v7560_v32 = vld [vmem:[#allocation2 + $0x7f8] ss:$56 sps:$4 sm:$0xff]   ;;  %v7568_v33 = vld [vmem:[#allocation2 + $0x86c] ss:$56 sps:$4 sm:$0xff]  }
 0x103   : > { %1950 = vmatpush1.bf16.msra.mxu0 %v7479_v34  ;;  %2677 = vmatpush1.bf16.msra.mxu1 %v7482_v35  ;;  %v7563_v34 = vld [vmem:[#allocation2 + $0x5d0] ss:$56 sps:$4 sm:$0xff]  }
 0x104   : > { %2507 = vmatprep.subr.bf16.mxu0 %v7487_v36  ;;  %2772 = vmatprep.subr.bf16.mxu1 %v7490_v37  ;;  %v7566_v35 = vld [vmem:[#allocation2 + $0x868] ss:$56 sps:$4 sm:$0xff]   ;;  %v7571_v36 = vld [vmem:[#allocation2 + $0x644] ss:$56 sps:$4 sm:$0xff]  }
 0x105   : > { %v7574_v37 = vld [vmem:[#allocation2 + $0x8dc] ss:$56 sps:$4 sm:$0xff]  }
 0x106   : > { %6421 = vmatmul.mubr.msk.bf16.vlgmr.msra.gmra.mrb[24].mxu0 %vm819_vm1, %v8121_v43  ;;  %6513 = vmatmul.mubr.msk.bf16.vlgmr.msra.gmra.mrb[8].mxu1 %vm819_vm1, %v8128_v11  ;;  %v7532_v43 = vld [vmem:[#allocation2 + $0x85c] ss:$56 sps:$4 sm:$0xff]  }
 0x107   : > { %2508 = vmatpush1.bf16.msra.mxu0 %v7485_v38  ;;  %2773 = vmatpush1.bf16.msra.mxu1 %v7488_v26  ;;  %v7569_v38 = vld [vmem:[#allocation2 + $0x640] ss:$56 sps:$4 sm:$0xff]  }
 0x108   : > { %2509 = vmatprep.subr.bf16.mxu0 %v7493_v39  ;;  %2774 = vmatprep.subr.bf16.mxu1 %v7496_v41  ;;  %v7572_v26 = vld [vmem:[#allocation2 + $0x8d8] ss:$56 sps:$4 sm:$0xff]   ;;  %v7577_v39 = vld [vmem:[#allocation2 + $0x6b4] ss:$56 sps:$4 sm:$0xff]  }
 0x109   : > { %1981 = vmatprep.mubr.bf16.mxu0 %v7907_v0  ;;  %2708 = vmatprep.mubr.bf16.mxu1 %v7907_v0  ;;  %v7580_v41 = vld [vmem:[#allocation2 + $0x94c] ss:$56 sps:$4 sm:$0xff]  }
 0x10b   : > { %2510 = vmatpush1.bf16.msra.mxu0 %v7491_v42  ;;  %2775 = vmatpush1.bf16.msra.mxu1 %v7494_v44  ;;  %v7575_v42 = vld [vmem:[#allocation2 + $0x6b0] ss:$56 sps:$4 sm:$0xff]  }
 0x10c   : > { %2511 = vmatprep.subr.bf16.mxu0 %v7499_v45  ;;  %2776 = vmatprep.subr.bf16.mxu1 %v7502_v46  ;;  %v7578_v44 = vld [vmem:[#allocation2 + $0x948] ss:$56 sps:$4 sm:$0xff]   ;;  %v7583_v45 = vld [vmem:[#allocation2 + $0x724] ss:$56 sps:$4 sm:$0xff]  }
 0x10d   : > { %v7586_v46 = vld [vmem:[#allocation2 + $0x9bc] ss:$56 sps:$4 sm:$0xff]  }
 0x10e   : > { %6422 = vmatmul.mubr.msk.bf16.gmra.mrb[28].mxu0 %vm819_vm1, %v8112_v58  ;;  %6514 = vmatmul.mubr.msk.bf16.gmra.mrb[12].mxu1 %vm819_vm1, %v8125_v7  ;;  %v7517_v58 = vld [vmem:[#allocation2 + $0x774] ss:$56 sps:$4 sm:$0xff]  }
 0x10f   : > { %2512 = vmatpush1.bf16.msra.mxu0 %v7497_v47  ;;  %2777 = vmatpush1.bf16.msra.mxu1 %v7500_v49  ;;  %v7581_v47 = vld [vmem:[#allocation2 + $0x720] ss:$56 sps:$4 sm:$0xff]  }
 0x110   : > { %2513 = vmatprep.subr.bf16.mxu0 %v7505_v50  ;;  %2778 = vmatprep.subr.bf16.mxu1 %v7508_v51  ;;  %v7584_v49 = vld [vmem:[#allocation2 + $0x9b8] ss:$56 sps:$4 sm:$0xff]   ;;  %v7589_v50 = vld [vmem:[#allocation2 + $0x794] ss:$56 sps:$4 sm:$0xff]  }
 0x111   : > { %2539 = vmatprep.mubr.bf16.mxu0 %v7907_v0  ;;  %2804 = vmatprep.mubr.bf16.mxu1 %v7907_v0  ;;  %v7592_v51 = vld [vmem:[#allocation2 + $0xa2c] ss:$56 sps:$4 sm:$0xff]  }
 0x113   : > { %2514 = vmatpush1.bf16.msra.mxu0 %v7503_v52  ;;  %2779 = vmatpush1.bf16.msra.mxu1 %v7506_v53  ;;  %v7587_v52 = vld [vmem:[#allocation2 + $0x790] ss:$56 sps:$4 sm:$0xff]  }
 0x114   : > { %2515 = vmatprep.subr.bf16.mxu0 %v7511_v54  ;;  %2780 = vmatprep.subr.bf16.mxu1 %v7514_v55  ;;  %v7590_v53 = vld [vmem:[#allocation2 + $0xa28] ss:$56 sps:$4 sm:$0xff]   ;;  %v7595_v54 = vld [vmem:[#allocation2 + $0x574] ss:$56 sps:$4 sm:$0xff]  }
 0x115   : > { %v7598_v55 = vld [vmem:[#allocation2 + $0x80c] ss:$56 sps:$4 sm:$0xff]  }
 0x117   : > { %2516 = vmatpush1.bf16.msra.mxu0 %v7509_v56  ;;  %2781 = vmatpush1.bf16.msra.mxu1 %v7512_v57  ;;  %v7593_v56 = vld [vmem:[#allocation2 + $0x570] ss:$56 sps:$4 sm:$0xff]  }
 0x118   : > { %2517 = vmatprep.subr.bf16.mxu0 %v7517_v58  ;;  %2782 = vmatprep.subr.bf16.mxu1 %v7520_v59  ;;  %v7596_v57 = vld [vmem:[#allocation2 + $0x808] ss:$56 sps:$4 sm:$0xff]   ;;  %v7601_v58 = vld [vmem:[#allocation2 + $0x5e4] ss:$56 sps:$4 sm:$0xff]  }
 0x119   : > { %v7604_v59 = vld [vmem:[#allocation2 + $0x87c] ss:$56 sps:$4 sm:$0xff]  }
 0x11b   : > { %2518 = vmatpush1.bf16.msra.mxu0 %v7515_v60  ;;  %2783 = vmatpush1.bf16.msra.mxu1 %v7518_v61  ;;  %v7599_v60 = vld [vmem:[#allocation2 + $0x5e0] ss:$56 sps:$4 sm:$0xff]  }
 0x11c   : > { %2613 = vmatprep.subr.bf16.mxu0 %v7523_v62  ;;  %3506 = vmatprep.subr.bf16.mxu1 %v7526_v63  ;;  %v7602_v61 = vld [vmem:[#allocation2 + $0x878] ss:$56 sps:$4 sm:$0xff]   ;;  %v7607_v62 = vld [vmem:[#allocation2 + $0x654] ss:$56 sps:$4 sm:$0xff]  }
 0x11d   : > { %v7610_v63 = vld [vmem:[#allocation2 + $0x8ec] ss:$56 sps:$4 sm:$0xff]  }
 0x11e   : > { %6507 = vmatmul.mubr.msk.bf16.vlgmr.msra.gmra.mrb[0].mxu0 %vm819_vm1, %v8128_v11  ;;  %6517 = vmatmul.mubr.msk.bf16.vlgmr.msra.gmra.mrb[16].mxu1 %vm819_vm1, %v8128_v11 }
 0x11f   : > { %2614 = vmatpush1.bf16.msra.mxu0 %v7521_v1  ;;  %3507 = vmatpush1.bf16.msra.mxu1 %v7524_v2  ;;  %v7605_v1 = vld [vmem:[#allocation2 + $0x650] ss:$56 sps:$4 sm:$0xff]  }
 0x120   : > { %2615 = vmatprep.subr.bf16.mxu0 %v7529_v3  ;;  %3508 = vmatprep.subr.bf16.mxu1 %v7532_v43  ;;  %v7608_v2 = vld [vmem:[#allocation2 + $0x8e8] ss:$56 sps:$4 sm:$0xff]   ;;  %v7613_v3 = vld [vmem:[#allocation2 + $0x6c4] ss:$56 sps:$4 sm:$0xff]  }
 0x121   : > { %2549 = vmatprep.mubr.bf16.mxu0 %v7907_v0  ;;  %2814 = vmatprep.mubr.bf16.mxu1 %v7907_v0  ;;  %v7616_v43 = vld [vmem:[#allocation2 + $0x95c] ss:$56 sps:$4 sm:$0xff]  }
 0x123   : > { %2616 = vmatpush1.bf16.msra.mxu0 %v7527_v4  ;;  %3509 = vmatpush1.bf16.msra.mxu1 %v7530_v5  ;;  %v7611_v4 = vld [vmem:[#allocation2 + $0x6c0] ss:$56 sps:$4 sm:$0xff]  }
 0x124   : > { %2617 = vmatprep.subr.bf16.mxu0 %v7535_v6  ;;  %3510 = vmatprep.subr.bf16.mxu1 %v7538_v8  ;;  %v7614_v5 = vld [vmem:[#allocation2 + $0x958] ss:$56 sps:$4 sm:$0xff]   ;;  %v7619_v6 = vld [vmem:[#allocation2 + $0x734] ss:$56 sps:$4 sm:$0xff]  }
 0x125   : > { %v7622_v8 = vld [vmem:[#allocation2 + $0x9cc] ss:$56 sps:$4 sm:$0xff]  }
 0x126   : > { %6508 = vmatmul.mubr.msk.bf16.gmra.mrb[4].mxu0 %vm819_vm1, %v8125_v7  ;;  %6518 = vmatmul.mubr.msk.bf16.gmra.mrb[20].mxu1 %vm819_vm1, %v8125_v7 }
 0x127   : > { %2618 = vmatpush1.bf16.msra.mxu0 %v7533_v9  ;;  %3511 = vmatpush1.bf16.msra.mxu1 %v7536_v10  ;;  %v7617_v9 = vld [vmem:[#allocation2 + $0x730] ss:$56 sps:$4 sm:$0xff]  }
 0x128   : > { %2619 = vmatprep.subr.bf16.mxu0 %v7541_v48  ;;  %3512 = vmatprep.subr.bf16.mxu1 %v7544_v12  ;;  %v7620_v10 = vld [vmem:[#allocation2 + $0x9c8] ss:$56 sps:$4 sm:$0xff]   ;;  %v7625_v48 = vld [vmem:[#allocation2 + $0x7a4] ss:$56 sps:$4 sm:$0xff]  }
 0x129   : > { %2645 = vmatprep.mubr.bf16.mxu0 %v7907_v0  ;;  %3538 = vmatprep.mubr.bf16.mxu1 %v7907_v0  ;;  %v7628_v12 = vld [vmem:[#allocation2 + $0xa3c] ss:$56 sps:$4 sm:$0xff]  }
 0x12b   : > { %2620 = vmatpush1.bf16.msra.mxu0 %v7539_v13  ;;  %3513 = vmatpush1.bf16.msra.mxu1 %v7542_v14  ;;  %v7623_v13 = vld [vmem:[#allocation2 + $0x7a0] ss:$56 sps:$4 sm:$0xff]  }
 0x12c   : > { %2621 = vmatprep.subr.bf16.mxu0 %v7547_v15  ;;  %3514 = vmatprep.subr.bf16.mxu1 %v7550_v16  ;;  %v7626_v14 = vld [vmem:[#allocation2 + $0xa38] ss:$56 sps:$4 sm:$0xff]   ;;  %v7631_v15 = vld [vmem:[#allocation2 + $0x7e4] ss:$56 sps:$4 sm:$0xff]  }
 0x12d   : > { %v7634_v16 = vld [vmem:[#allocation2 + $0xa8c] ss:$56 sps:$4 sm:$0xff]  }
 0x12f   : > { %2622 = vmatpush1.bf16.msra.mxu0 %v7545_v18  ;;  %3515 = vmatpush1.bf16.msra.mxu1 %v7548_v19  ;;  %v7632_v18 = vld [vmem:[#allocation2 + $0xa88] ss:$56 sps:$4 sm:$0xff]   ;;  %v7637_v19 = vld [vmem:[#allocation2 + $0x854] ss:$56 sps:$4 sm:$0xff]  }
 0x130   : > { %2623 = vmatprep.subr.bf16.mxu0 %v7553_v21  ;;  %3516 = vmatprep.subr.bf16.mxu1 %v7556_v22  ;;  %v7635_v21 = vld [vmem:[#allocation2 + $0x850] ss:$56 sps:$4 sm:$0xff]  }
 0x131   : > { %v7638_v22 = vld [vmem:[#allocation2 + $0xaf8] ss:$56 sps:$4 sm:$0xff]  }
 0x133   : > { %2624 = vmatpush1.bf16.msra.mxu0 %v7551_v23  ;;  %3517 = vmatpush1.bf16.msra.mxu1 %v7554_v24  ;;  %v7643_v23 = vld [vmem:[#allocation2 + $0x8c4] ss:$56 sps:$4 sm:$0xff]  }
 0x134   : > { %2719 = vmatprep.subr.bf16.mxu0 %v7559_v29  ;;  %3612 = vmatprep.subr.bf16.mxu1 %v7562_v28  ;;  %v7646_v24 = vld [vmem:[#allocation2 + $0xb6c] ss:$56 sps:$4 sm:$0xff]   ;;  %v7644_v29 = vld [vmem:[#allocation2 + $0xb68] ss:$56 sps:$4 sm:$0xff]   ;;  %v7652_v28 = vld [vmem:[#allocation2 + $0xbdc] ss:$56 sps:$4 sm:$0xff]  }
 0x136   : > { %6511 = vmatmul.mubr.msk.bf16.vlgmr.msra.gmra.mrb[8].mxu0 %vm819_vm1, %v8128_v11  ;;  %6607 = vmatmul.mubr.msk.bf16.vlgmr.msra.gmra.mrb[0].mxu1 %vm819_vm1, %v8171_v25 }
 0x137   : > { %2720 = vmatpush1.bf16.msra.mxu0 %v7557_v31  ;;  %3613 = vmatpush1.bf16.msra.mxu1 %v7560_v32  ;;  %v7647_v31 = vld [vmem:[#allocation2 + $0x930] ss:$56 sps:$4 sm:$0xff]  }
 0x138   : > { %2721 = vmatprep.subr.bf16.mxu0 %v7565_v30  ;;  %3614 = vmatprep.subr.bf16.mxu1 %v7568_v33  ;;  %v7650_v32 = vld [vmem:[#allocation2 + $0xbd8] ss:$56 sps:$4 sm:$0xff]   ;;  %v7655_v30 = vld [vmem:[#allocation2 + $0x9a4] ss:$56 sps:$4 sm:$0xff]  }
 0x139   : > { %2655 = vmatprep.mubr.bf16.mxu0 %v7907_v0  ;;  %3548 = vmatprep.mubr.bf16.mxu1 %v7907_v0  ;;  %v7658_v33 = vld [vmem:[#allocation2 + $0xc4c] ss:$56 sps:$4 sm:$0xff]  }
 0x13b   : > { %2722 = vmatpush1.bf16.msra.mxu0 %v7563_v34  ;;  %3615 = vmatpush1.bf16.msra.mxu1 %v7566_v35  ;;  %v7653_v34 = vld [vmem:[#allocation2 + $0x9a0] ss:$56 sps:$4 sm:$0xff]  }
 0x13c   : > { %2723 = vmatprep.subr.bf16.mxu0 %v7571_v36  ;;  %3616 = vmatprep.subr.bf16.mxu1 %v7574_v37  ;;  %v7656_v35 = vld [vmem:[#allocation2 + $0xc48] ss:$56 sps:$4 sm:$0xff]   ;;  %v7664_v36 = vld [vmem:[#allocation2 + $0xcbc] ss:$56 sps:$4 sm:$0xff]  }
 0x13d   : > { %v7659_v37 = vld [vmem:[#allocation2 + $0xa10] ss:$56 sps:$4 sm:$0xff]  }
 0x13e   : > { %6512 = vmatmul.mubr.msk.bf16.gmra.mrb[12].mxu0 %vm819_vm1, %v8125_v7  ;;  %6608 = vmatmul.mubr.msk.bf16.gmra.mrb[4].mxu1 %vm819_vm1, %v8039_v40 }
 0x13f   : > { %2724 = vmatpush1.bf16.msra.mxu0 %v7569_v38  ;;  %3617 = vmatpush1.bf16.msra.mxu1 %v7572_v26  ;;  %v7662_v38 = vld [vmem:[#allocation2 + $0xcb8] ss:$56 sps:$4 sm:$0xff]   ;;  %v7829_v26 = vld [vmem:[%s8023_s21] sm:$0xff]  }
 0x140   : > { %2725 = vmatprep.subr.bf16.mxu0 %v7577_v39  ;;  %3618 = vmatprep.subr.bf16.mxu1 %v7580_v41  ;;  %v3966_v39 = vrot.slane %v7829_v26, 2  ;;  %v7830_v41 = vld [vmem:[%s8023_s21 + $0x8] sm:$0xff]  }
 0x141   : > { %2751 = vmatprep.mubr.bf16.mxu0 %v7907_v0  ;;  %3644 = vmatprep.mubr.bf16.mxu1 %v7907_v0  ;;  %v7751_v26 = vld [vmem:[#allocation2 + $0x9d4] ss:$56 sps:$4 sm:$0xff]  }
 0x143   : > { %2726 = vmatpush1.bf16.msra.mxu0 %v7575_v42  ;;  %3619 = vmatpush1.bf16.msra.mxu1 %v7578_v44  ;;  %v8211_v42 = vrot.slane %v7830_v41, 2  ;;  %v7667_v44 = vld [vmem:[#allocation2 + $0x7f4] ss:$56 sps:$4 sm:$0xff]   ;;  %v7754_v41 = vld [vmem:[#allocation2 + $0xa44] ss:$56 sps:$4 sm:$0xff]  }
 0x144   : > { %2727 = vmatprep.subr.bf16.mxu0 %v7583_v45  ;;  %3620 = vmatprep.subr.bf16.mxu1 %v7586_v46  ;;  %v7670_v45 = vld [vmem:[#allocation2 + $0xa9c] ss:$56 sps:$4 sm:$0xff]   ;;  %v7665_v46 = vld [vmem:[#allocation2 + $0x7f0] ss:$56 sps:$4 sm:$0xff]  }
 0x147   : > { %2728 = vmatpush1.bf16.msra.mxu0 %v7581_v47  ;;  %3621 = vmatpush1.bf16.msra.mxu1 %v7584_v49  ;;  %v8214_v47 = vsel %vm3965_vm4, %v3966_v39, %v8211_v42  ;;  %v7668_v49 = vld [vmem:[#allocation2 + $0xa98] ss:$56 sps:$4 sm:$0xff]  }
 0x148   : > { %2729 = vmatprep.subr.bf16.mxu0 %v7589_v50  ;;  %3622 = vmatprep.subr.bf16.mxu1 %v7592_v51  ;;  %v7673_v50 = vld [vmem:[#allocation2 + $0x864] ss:$56 sps:$4 sm:$0xff]   ;;  %v7749_v39 = vld [vmem:[#allocation2 + $0x9d0] ss:$56 sps:$4 sm:$0xff]  }
 0x149   : > { %v7676_v51 = vld [vmem:[#allocation2 + $0xb0c] ss:$56 sps:$4 sm:$0xff]  }
 0x14b   : > { %2730 = vmatpush1.bf16.msra.mxu0 %v7587_v52  ;;  %3623 = vmatpush1.bf16.msra.mxu1 %v7590_v53  ;;  %v7671_v52 = vld [vmem:[#allocation2 + $0x860] ss:$56 sps:$4 sm:$0xff]  }
 0x14c   : > { %2825 = vmatprep.subr.bf16.mxu0 %v7595_v54  ;;  %3718 = vmatprep.subr.bf16.mxu1 %v7598_v55  ;;  %v7674_v53 = vld [vmem:[#allocation2 + $0xb08] ss:$56 sps:$4 sm:$0xff]   ;;  %v7679_v54 = vld [vmem:[#allocation2 + $0x8d4] ss:$56 sps:$4 sm:$0xff]  }
 0x14d   : > { %v7682_v55 = vld [vmem:[#allocation2 + $0xb7c] ss:$56 sps:$4 sm:$0xff]  }
 0x14e   : > { %6515 = vmatmul.mubr.msk.bf16.vlgmr.msra.gmra.mrb[16].mxu0 %vm819_vm1, %v8128_v11  ;;  %6611 = vmatmul.mubr.msk.bf16.vlgmr.msra.gmra.mrb[8].mxu1 %vm819_vm1, %v8171_v25 }
 0x14f   : > { %2826 = vmatpush1.bf16.msra.mxu0 %v7593_v56  ;;  %3719 = vmatpush1.bf16.msra.mxu1 %v7596_v57  ;;  %v7677_v56 = vld [vmem:[#allocation2 + $0x8d0] ss:$56 sps:$4 sm:$0xff]  }
 0x150   : > { %2827 = vmatprep.subr.bf16.mxu0 %v7601_v58  ;;  %3720 = vmatprep.subr.bf16.mxu1 %v7604_v59  ;;  %v7680_v57 = vld [vmem:[#allocation2 + $0xb78] ss:$56 sps:$4 sm:$0xff]   ;;  %v7685_v58 = vld [vmem:[#allocation2 + $0x944] ss:$56 sps:$4 sm:$0xff]  }
 0x151   : > { %2761 = vmatprep.mubr.bf16.mxu0 %v7907_v0  ;;  %3654 = vmatprep.mubr.bf16.mxu1 %v7907_v0  ;;  %v7688_v59 = vld [vmem:[#allocation2 + $0xbec] ss:$56 sps:$4 sm:$0xff]  }
 0x153   : > { %2828 = vmatpush1.bf16.msra.mxu0 %v7599_v60  ;;  %3721 = vmatpush1.bf16.msra.mxu1 %v7602_v61  ;;  %v7683_v60 = vld [vmem:[#allocation2 + $0x940] ss:$56 sps:$4 sm:$0xff]  }
 0x154   : > { %2829 = vmatprep.subr.bf16.mxu0 %v7607_v62  ;;  %3722 = vmatprep.subr.bf16.mxu1 %v7610_v63  ;;  %v7686_v61 = vld [vmem:[#allocation2 + $0xbe8] ss:$56 sps:$4 sm:$0xff]   ;;  %v7691_v62 = vld [vmem:[#allocation2 + $0x9b4] ss:$56 sps:$4 sm:$0xff]  }
 0x155   : > { %v7694_v63 = vld [vmem:[#allocation2 + $0xc5c] ss:$56 sps:$4 sm:$0xff]  }
 0x156   : > { %6516 = vmatmul.mubr.msk.bf16.gmra.mrb[20].mxu0 %vm819_vm1, %v8125_v7  ;;  %6612 = vmatmul.mubr.msk.bf16.gmra.mrb[12].mxu1 %vm819_vm1, %v8039_v40 }
 0x157   : > { %2830 = vmatpush1.bf16.msra.mxu0 %v7605_v1  ;;  %3723 = vmatpush1.bf16.msra.mxu1 %v7608_v2  ;;  %v7689_v1 = vld [vmem:[#allocation2 + $0x9b0] ss:$56 sps:$4 sm:$0xff]  }
 0x158   : > { %2831 = vmatprep.subr.bf16.mxu0 %v7613_v3  ;;  %3724 = vmatprep.subr.bf16.mxu1 %v7616_v43  ;;  %v7692_v2 = vld [vmem:[#allocation2 + $0xc58] ss:$56 sps:$4 sm:$0xff]   ;;  %v7697_v3 = vld [vmem:[#allocation2 + $0xa24] ss:$56 sps:$4 sm:$0xff]  }
 0x159   : > { %2857 = vmatprep.mubr.bf16.mxu0 %v7907_v0  ;;  %3750 = vmatprep.mubr.bf16.mxu1 %v7907_v0  ;;  %v7700_v43 = vld [vmem:[#allocation2 + $0xccc] ss:$56 sps:$4 sm:$0xff]  }
 0x15b   : > { %2832 = vmatpush1.bf16.msra.mxu0 %v7611_v4  ;;  %3725 = vmatpush1.bf16.msra.mxu1 %v7614_v5  ;;  %v7695_v4 = vld [vmem:[#allocation2 + $0xa20] ss:$56 sps:$4 sm:$0xff]  }
 0x15c   : > { %2833 = vmatprep.subr.bf16.mxu0 %v7619_v6  ;;  %3726 = vmatprep.subr.bf16.mxu1 %v7622_v8  ;;  %v7698_v5 = vld [vmem:[#allocation2 + $0xcc8] ss:$56 sps:$4 sm:$0xff]   ;;  %v7703_v6 = vld [vmem:[#allocation2 + $0x804] ss:$56 sps:$4 sm:$0xff]  }
 0x15d   : > { %v7706_v8 = vld [vmem:[#allocation2 + $0xaac] ss:$56 sps:$4 sm:$0xff]  }
 0x15f   : > { %2834 = vmatpush1.bf16.msra.mxu0 %v7617_v9  ;;  %3727 = vmatpush1.bf16.msra.mxu1 %v7620_v10  ;;  %v7701_v9 = vld [vmem:[#allocation2 + $0x800] ss:$56 sps:$4 sm:$0xff]  }
 0x160   : > { %2835 = vmatprep.subr.bf16.mxu0 %v7625_v48  ;;  %3728 = vmatprep.subr.bf16.mxu1 %v7628_v12  ;;  %v7704_v10 = vld [vmem:[#allocation2 + $0xaa8] ss:$56 sps:$4 sm:$0xff]   ;;  %v7709_v48 = vld [vmem:[#allocation2 + $0x874] ss:$56 sps:$4 sm:$0xff]  }
 0x161   : > { %v7712_v12 = vld [vmem:[#allocation2 + $0xb1c] ss:$56 sps:$4 sm:$0xff]  }
 0x163   : > { %2836 = vmatpush1.bf16.msra.mxu0 %v7623_v13  ;;  %3729 = vmatpush1.bf16.msra.mxu1 %v7626_v14  ;;  %v7707_v13 = vld [vmem:[#allocation2 + $0x870] ss:$56 sps:$4 sm:$0xff]  }
 0x164   : > { %3453 = vmatprep.subr.bf16.mxu0 %v7631_v15  ;;  %4448 = vmatprep.subr.bf16.mxu1 %v7634_v16  ;;  %v7710_v14 = vld [vmem:[#allocation2 + $0xb18] ss:$56 sps:$4 sm:$0xff]   ;;  %v7715_v15 = vld [vmem:[#allocation2 + $0x8e4] ss:$56 sps:$4 sm:$0xff]  }
 0x165   : > { %v7718_v16 = vld [vmem:[#allocation2 + $0xb8c] ss:$56 sps:$4 sm:$0xff]  }
 0x166   : > { %6519 = vmatmul.mubr.msk.bf16.vlgmr.msra.gmra.mrb[24].mxu0 %vm819_vm1, %v8128_v11  ;;  %6615 = vmatmul.mubr.msk.bf16.vlgmr.msra.gmra.mrb[16].mxu1 %vm819_vm1, %v8171_v25  ;;  %v7649_v11 = vld [vmem:[#allocation2 + $0x934] ss:$56 sps:$4 sm:$0xff]  }
 0x167   : > { %3454 = vmatpush1.bf16.msra.mxu0 %v7629_v17  ;;  %4449 = vmatpush1.bf16.msra.mxu1 %v7632_v18  ;;  %v7713_v17 = vld [vmem:[#allocation2 + $0x8e0] ss:$56 sps:$4 sm:$0xff]  }
 0x168   : > { %3455 = vmatprep.subr.bf16.mxu0 %v7637_v19  ;;  %4450 = vmatprep.subr.bf16.mxu1 %v7640_v20  ;;  %v7716_v18 = vld [vmem:[#allocation2 + $0xb88] ss:$56 sps:$4 sm:$0xff]   ;;  %v7721_v19 = vld [vmem:[#allocation2 + $0x954] ss:$56 sps:$4 sm:$0xff]  }
 0x169   : > { %3760 = vmatprep.mubr.bf16.mxu1 %v7907_v0  ;;  %2867 = vmatprep.mubr.bf16.mxu0 %v7907_v0  ;;  %v7724_v20 = vld [vmem:[#allocation2 + $0xbfc] ss:$56 sps:$4 sm:$0xff]  }
 0x16b   : > { %3456 = vmatpush1.bf16.msra.mxu0 %v7635_v21  ;;  %4451 = vmatpush1.bf16.msra.mxu1 %v7638_v22  ;;  %v7719_v21 = vld [vmem:[#allocation2 + $0x950] ss:$56 sps:$4 sm:$0xff]  }
 0x16c   : > { %3457 = vmatprep.subr.bf16.mxu0 %v7643_v23  ;;  %4452 = vmatprep.subr.bf16.mxu1 %v7646_v24  ;;  %v7722_v22 = vld [vmem:[#allocation2 + $0xbf8] ss:$56 sps:$4 sm:$0xff]   ;;  %v7727_v23 = vld [vmem:[#allocation2 + $0x9c4] ss:$56 sps:$4 sm:$0xff]  }
 0x16d   : > { %v7730_v24 = vld [vmem:[#allocation2 + $0xc6c] ss:$56 sps:$4 sm:$0xff]  }
 0x16e   : > { %6616 = vmatmul.mubr.msk.bf16.gmra.mrb[20].mxu1 %vm819_vm1, %v8039_v40  ;;  %6520 = vmatmul.mubr.msk.bf16.gmra.mrb[28].mxu0 %vm819_vm1, %v8125_v7  ;;  %v7661_v7 = vld [vmem:[#allocation2 + $0xa14] ss:$56 sps:$4 sm:$0xff]  }
 0x16f   : > { %3458 = vmatpush1.bf16.msra.mxu0 %v7641_v27  ;;  %4453 = vmatpush1.bf16.msra.mxu1 %v7644_v29  ;;  %v7725_v27 = vld [vmem:[#allocation2 + $0x9c0] ss:$56 sps:$4 sm:$0xff]  }
 0x170   : > { %3459 = vmatprep.subr.bf16.mxu0 %v7649_v11  ;;  %4454 = vmatprep.subr.bf16.mxu1 %v7652_v28  ;;  %v7728_v29 = vld [vmem:[#allocation2 + $0xc68] ss:$56 sps:$4 sm:$0xff]   ;;  %v7733_v11 = vld [vmem:[#allocation2 + $0xa34] ss:$56 sps:$4 sm:$0xff]  }
 0x171   : > { %4480 = vmatprep.mubr.bf16.mxu1 %v7907_v0  ;;  %3485 = vmatprep.mubr.bf16.mxu0 %v7907_v0  ;;  %v7736_v28 = vld [vmem:[#allocation2 + $0xcdc] ss:$56 sps:$4 sm:$0xff]  }
 0x173   : > { %3460 = vmatpush1.bf16.msra.mxu0 %v7647_v31  ;;  %4455 = vmatpush1.bf16.msra.mxu1 %v7650_v32  ;;  %v7731_v31 = vld [vmem:[#allocation2 + $0xa30] ss:$56 sps:$4 sm:$0xff]  }
 0x174   : > { %3461 = vmatprep.subr.bf16.mxu0 %v7655_v30  ;;  %4456 = vmatprep.subr.bf16.mxu1 %v7658_v33  ;;  %v7734_v32 = vld [vmem:[#allocation2 + $0xcd8] ss:$56 sps:$4 sm:$0xff]   ;;  %v7739_v30 = vld [vmem:[#allocation2 + $0x814] ss:$56 sps:$4 sm:$0xff]  }
 0x175   : > { %v7737_v33 = vld [vmem:[#allocation2 + $0x810] ss:$56 sps:$4 sm:$0xff]  }
 0x177   : > { %3462 = vmatpush1.bf16.msra.mxu0 %v7653_v34  ;;  %4457 = vmatpush1.bf16.msra.mxu1 %v7656_v35  ;;  %v7742_v34 = vld [vmem:[#allocation2 + $0x884] ss:$56 sps:$4 sm:$0xff]   ;;  %v7740_v35 = vld [vmem:[#allocation2 + $0x880] ss:$56 sps:$4 sm:$0xff]  }
 0x178   : > { %3463 = vmatprep.subr.bf16.mxu0 %v7661_v7  ;;  %4458 = vmatprep.subr.bf16.mxu1 %v7664_v36  ;;  %v7745_v7 = vld [vmem:[#allocation2 + $0x8f4] ss:$56 sps:$4 sm:$0xff]   ;;  %v7743_v36 = vld [vmem:[#allocation2 + $0x8f0] ss:$56 sps:$4 sm:$0xff]  }
 0x17b   : > { %3464 = vmatpush1.bf16.msra.mxu0 %v7659_v37  ;;  %4459 = vmatpush1.bf16.msra.mxu1 %v7662_v38  ;;  %v7748_v37 = vld [vmem:[#allocation2 + $0x964] ss:$56 sps:$4 sm:$0xff]   ;;  %v7746_v38 = vld [vmem:[#allocation2 + $0x960] ss:$56 sps:$4 sm:$0xff]  }
 0x17c   : > { %3559 = vmatprep.subr.bf16.mxu0 %v7667_v44  ;;  %4554 = vmatprep.subr.bf16.mxu1 %v7670_v45  ;;  %v7752_v44 = vld [vmem:[#allocation2 + $0xa40] ss:$56 sps:$4 sm:$0xff]   ;;  %v7757_v45 = vld [vmem:[#allocation2 + $0xa84] ss:$56 sps:$4 sm:$0xff]  }
 0x17e   : > { %6705 = vmatmul.mubr.msk.bf16.vlgmr.msra.gmra.mrb[0].mxu1 %vm819_vm1, %v8214_v47  ;;  %6605 = vmatmul.mubr.msk.bf16.vlgmr.msra.gmra.mrb[0].mxu0 %vm819_vm1, %v8171_v25 }
 0x17f   : > { %3560 = vmatpush1.bf16.msra.mxu0 %v7665_v46  ;;  %4555 = vmatpush1.bf16.msra.mxu1 %v7668_v49  ;;  %v7755_v46 = vld [vmem:[#allocation2 + $0xa80] ss:$56 sps:$4 sm:$0xff]   ;;  %v7760_v49 = vld [vmem:[#allocation2 + $0xaf4] ss:$56 sps:$4 sm:$0xff]  }
 0x180   : > { %3561 = vmatprep.subr.bf16.mxu0 %v7673_v50  ;;  %4556 = vmatprep.subr.bf16.mxu1 %v7676_v51  ;;  %v7758_v50 = vld [vmem:[#allocation2 + $0xaf0] ss:$56 sps:$4 sm:$0xff]   ;;  %v7763_v51 = vld [vmem:[#allocation2 + $0xb64] ss:$56 sps:$4 sm:$0xff]  }
 0x181   : > { %4490 = vmatprep.mubr.bf16.mxu1 %v7907_v0  ;;  %3495 = vmatprep.mubr.bf16.mxu0 %v7907_v0 }
 0x183   : > { %3562 = vmatpush1.bf16.msra.mxu0 %v7671_v52  ;;  %4557 = vmatpush1.bf16.msra.mxu1 %v7674_v53  ;;  %v7761_v52 = vld [vmem:[#allocation2 + $0xb60] ss:$56 sps:$4 sm:$0xff]   ;;  %v7766_v53 = vld [vmem:[#allocation2 + $0xbd4] ss:$56 sps:$4 sm:$0xff]  }
 0x184   : > { %3563 = vmatprep.subr.bf16.mxu0 %v7679_v54  ;;  %4558 = vmatprep.subr.bf16.mxu1 %v7682_v55  ;;  %v7764_v54 = vld [vmem:[#allocation2 + $0xbd0] ss:$56 sps:$4 sm:$0xff]   ;;  %v7769_v55 = vld [vmem:[#allocation2 + $0xc44] ss:$56 sps:$4 sm:$0xff]  }
 0x186   : > { %6706 = vmatmul.mubr.msk.bf16.gmra.mrb[4].mxu1 %vm819_vm1, %v8211_v42  ;;  %6606 = vmatmul.mubr.msk.bf16.gmra.mrb[4].mxu0 %vm819_vm1, %v8039_v40 }
 0x187   : > { %3564 = vmatpush1.bf16.msra.mxu0 %v7677_v56  ;;  %4559 = vmatpush1.bf16.msra.mxu1 %v7680_v57  ;;  %v7772_v56 = vld [vmem:[#allocation2 + $0xcb4] ss:$56 sps:$4 sm:$0xff]   ;;  %v7770_v57 = vld [vmem:[#allocation2 + $0xcb0] ss:$56 sps:$4 sm:$0xff]  }
 0x188   : > { %3565 = vmatprep.subr.bf16.mxu0 %v7685_v58  ;;  %4560 = vmatprep.subr.bf16.mxu1 %v7688_v59  ;;  %v7775_v58 = vld [vmem:[#allocation2 + $0xa94] ss:$56 sps:$4 sm:$0xff]   ;;  %v7773_v59 = vld [vmem:[#allocation2 + $0xa90] ss:$56 sps:$4 sm:$0xff]  }
 0x189   : > { %4586 = vmatprep.mubr.bf16.mxu1 %v7907_v0  ;;  %3591 = vmatprep.mubr.bf16.mxu0 %v7907_v0 }
 0x18b   : > { %3566 = vmatpush1.bf16.msra.mxu0 %v7683_v60  ;;  %4561 = vmatpush1.bf16.msra.mxu1 %v7686_v61  ;;  %v7778_v60 = vld [vmem:[#allocation2 + $0xb04] ss:$56 sps:$4 sm:$0xff]   ;;  %v7781_v61 = vld [vmem:[#allocation2 + $0xb74] ss:$56 sps:$4 sm:$0xff]  }
 0x18c   : > { %3567 = vmatprep.subr.bf16.mxu0 %v7691_v62  ;;  %4562 = vmatprep.subr.bf16.mxu1 %v7694_v63  ;;  %v7779_v62 = vld [vmem:[#allocation2 + $0xb70] ss:$56 sps:$4 sm:$0xff]   ;;  %v7784_v63 = vld [vmem:[#allocation2 + $0xbe4] ss:$56 sps:$4 sm:$0xff]  }
 0x18f   : > { %3568 = vmatpush1.bf16.msra.mxu0 %v7689_v1  ;;  %4563 = vmatpush1.bf16.msra.mxu1 %v7692_v2  ;;  %v7782_v1 = vld [vmem:[#allocation2 + $0xbe0] ss:$56 sps:$4 sm:$0xff]   ;;  %v7787_v2 = vld [vmem:[#allocation2 + $0xc54] ss:$56 sps:$4 sm:$0xff]  }
 0x190   : > { %3569 = vmatprep.subr.bf16.mxu0 %v7697_v3  ;;  %4564 = vmatprep.subr.bf16.mxu1 %v7700_v43  ;;  %v7785_v3 = vld [vmem:[#allocation2 + $0xc50] ss:$56 sps:$4 sm:$0xff]   ;;  %v7790_v43 = vld [vmem:[#allocation2 + $0xcc4] ss:$56 sps:$4 sm:$0xff]  }
 0x193   : > { %3570 = vmatpush1.bf16.msra.mxu0 %v7695_v4  ;;  %4565 = vmatpush1.bf16.msra.mxu1 %v7698_v5  ;;  %v7788_v4 = vld [vmem:[#allocation2 + $0xcc0] ss:$56 sps:$4 sm:$0xff]   ;;  %v7793_v5 = vld [vmem:[#allocation2 + $0xaa4] ss:$56 sps:$4 sm:$0xff]  }
 0x194   : > { %3665 = vmatprep.subr.bf16.mxu0 %v7703_v6  ;;  %4660 = vmatprep.subr.bf16.mxu1 %v7706_v8  ;;  %v7791_v6 = vld [vmem:[#allocation2 + $0xaa0] ss:$56 sps:$4 sm:$0xff]   ;;  %v7796_v8 = vld [vmem:[#allocation2 + $0xb14] ss:$56 sps:$4 sm:$0xff]  }
 0x196   : > { %6709 = vmatmul.mubr.msk.bf16.vlgmr.msra.gmra.mrb[8].mxu1 %vm819_vm1, %v8214_v47  ;;  %6609 = vmatmul.mubr.msk.bf16.vlgmr.msra.gmra.mrb[8].mxu0 %vm819_vm1, %v8171_v25 }
 0x197   : > { %3666 = vmatpush1.bf16.msra.mxu0 %v7701_v9  ;;  %4661 = vmatpush1.bf16.msra.mxu1 %v7704_v10  ;;  %v7794_v9 = vld [vmem:[#allocation2 + $0xb10] ss:$56 sps:$4 sm:$0xff]   ;;  %v7799_v10 = vld [vmem:[#allocation2 + $0xb84] ss:$56 sps:$4 sm:$0xff]  }
 0x198   : > { %3667 = vmatprep.subr.bf16.mxu0 %v7709_v48  ;;  %4662 = vmatprep.subr.bf16.mxu1 %v7712_v12  ;;  %v7797_v48 = vld [vmem:[#allocation2 + $0xb80] ss:$56 sps:$4 sm:$0xff]   ;;  %v7802_v12 = vld [vmem:[#allocation2 + $0xbf4] ss:$56 sps:$4 sm:$0xff]  }
 0x199   : > { %4596 = vmatprep.mubr.bf16.mxu1 %v7907_v0  ;;  %3601 = vmatprep.mubr.bf16.mxu0 %v7907_v0 }
 0x19b   : > { %3668 = vmatpush1.bf16.msra.mxu0 %v7707_v13  ;;  %4663 = vmatpush1.bf16.msra.mxu1 %v7710_v14  ;;  %v7800_v13 = vld [vmem:[#allocation2 + $0xbf0] ss:$56 sps:$4 sm:$0xff]   ;;  %v7805_v14 = vld [vmem:[#allocation2 + $0xc64] ss:$56 sps:$4 sm:$0xff]  }
 0x19c   : > { %3669 = vmatprep.subr.bf16.mxu0 %v7715_v15  ;;  %4664 = vmatprep.subr.bf16.mxu1 %v7718_v16  ;;  %v7803_v15 = vld [vmem:[#allocation2 + $0xc60] ss:$56 sps:$4 sm:$0xff]   ;;  %v7808_v16 = vld [vmem:[#allocation2 + $0xcd4] ss:$56 sps:$4 sm:$0xff]  }
 0x19e   : > { %6710 = vmatmul.mubr.msk.bf16.gmra.mrb[12].mxu1 %vm819_vm1, %v8211_v42  ;;  %6610 = vmatmul.mubr.msk.bf16.gmra.mrb[12].mxu0 %vm819_vm1, %v8039_v40 }
 0x19f   : > { %3670 = vmatpush1.bf16.msra.mxu0 %v7713_v17  ;;  %4665 = vmatpush1.bf16.msra.mxu1 %v7716_v18  ;;  %v7806_v17 = vld [vmem:[#allocation2 + $0xcd0] ss:$56 sps:$4 sm:$0xff]   ;;  %v7811_v18 = vld [vmem:[#allocation2 + $0xab4] ss:$56 sps:$4 sm:$0xff]  }
 0x1a0   : > { %3671 = vmatprep.subr.bf16.mxu0 %v7721_v19  ;;  %4666 = vmatprep.subr.bf16.mxu1 %v7724_v20  ;;  %v7809_v19 = vld [vmem:[#allocation2 + $0xab0] ss:$56 sps:$4 sm:$0xff]   ;;  %v7814_v20 = vld [vmem:[#allocation2 + $0xb24] ss:$56 sps:$4 sm:$0xff]  }
 0x1a1   : > { %4692 = vmatprep.mubr.bf16.mxu1 %v7907_v0  ;;  %3697 = vmatprep.mubr.bf16.mxu0 %v7907_v0 }
 0x1a3   : > { %3672 = vmatpush1.bf16.msra.mxu0 %v7719_v21  ;;  %4667 = vmatpush1.bf16.msra.mxu1 %v7722_v22  ;;  %v7812_v21 = vld [vmem:[#allocation2 + $0xb20] ss:$56 sps:$4 sm:$0xff]   ;;  %v7817_v22 = vld [vmem:[#allocation2 + $0xb94] ss:$56 sps:$4 sm:$0xff]  }
 0x1a4   : > { %3673 = vmatprep.subr.bf16.mxu0 %v7727_v23  ;;  %4668 = vmatprep.subr.bf16.mxu1 %v7730_v24  ;;  %v7815_v23 = vld [vmem:[#allocation2 + $0xb90] ss:$56 sps:$4 sm:$0xff]   ;;  %v7820_v24 = vld [vmem:[#allocation2 + $0xc04] ss:$56 sps:$4 sm:$0xff]  }
 0x1a7   : > { %3674 = vmatpush1.bf16.msra.mxu0 %v7725_v27  ;;  %4669 = vmatpush1.bf16.msra.mxu1 %v7728_v29  ;;  %v7818_v27 = vld [vmem:[#allocation2 + $0xc00] ss:$56 sps:$4 sm:$0xff]   ;;  %v7823_v29 = vld [vmem:[#allocation2 + $0xc74] ss:$56 sps:$4 sm:$0xff]  }
 0x1a8   : > { %3675 = vmatprep.subr.bf16.mxu0 %v7733_v11  ;;  %4670 = vmatprep.subr.bf16.mxu1 %v7736_v28  ;;  %v7821_v11 = vld [vmem:[#allocation2 + $0xc70] ss:$56 sps:$4 sm:$0xff]   ;;  %v7826_v28 = vld [vmem:[#allocation2 + $0xce4] ss:$56 sps:$4 sm:$0xff]  }
 0x1ab   : > { %3676 = vmatpush1.bf16.msra.mxu0 %v7731_v31  ;;  %4671 = vmatpush1.bf16.msra.mxu1 %v7734_v32  ;;  %v7824_v31 = vld [vmem:[#allocation2 + $0xce0] ss:$56 sps:$4 sm:$0xff]   ;;  %v7908_v32 = vmov 0.0  }
 0x1ac   : > { %3771 = vmatprep.subr.bf16.mxu0 %v7739_v30 }
 0x1ae   : > { %6713 = vmatmul.mubr.msk.bf16.vlgmr.msra.gmra.mrb[16].mxu1 %vm819_vm1, %v8214_v47  ;;  %6613 = vmatmul.mubr.msk.bf16.vlgmr.msra.gmra.mrb[16].mxu0 %vm819_vm1, %v8171_v25 }
 0x1af   : > { %3772 = vmatpush1.bf16.msra.mxu0 %v7737_v33  ;;  %4702 = vmatprep.mubr.bf16.mxu1 %v7907_v0 }
 0x1b0   : > { %3773 = vmatprep.subr.bf16.mxu0 %v7742_v34  ;;  %3707 = vmatprep.mubr.bf16.mxu0 %v7907_v0 }
 0x1b3   : > { %3774 = vmatpush1.bf16.msra.mxu0 %v7740_v35 }
 0x1b4   : > { %3775 = vmatprep.subr.bf16.mxu0 %v7745_v7 }
 0x1b6   : > { %6714 = vmatmul.mubr.msk.bf16.gmra.mrb[20].mxu1 %vm819_vm1, %v8211_v42  ;;  %6614 = vmatmul.mubr.msk.bf16.gmra.mrb[20].mxu0 %vm819_vm1, %v8039_v40 }
 0x1b7   : > { %3776 = vmatpush1.bf16.msra.mxu0 %v7743_v36  ;;  %3803 = vmatprep.mubr.bf16.mxu0 %v7907_v0 }
 0x1b8   : > { %3777 = vmatprep.subr.bf16.mxu0 %v7748_v37  ;;  %4949 = vmatprep.mubr.f32.mxu1 %v7908_v32 }
 0x1bb   : > { %3778 = vmatpush1.bf16.msra.mxu0 %v7746_v38 }
 0x1bc   : > { %3779 = vmatprep.subr.bf16.mxu0 %v7751_v26 }
 0x1bf   : > { %3780 = vmatpush1.bf16.msra.mxu0 %v7749_v39 }
 0x1c0   : > { %3781 = vmatprep.subr.bf16.mxu0 %v7754_v41 }
 0x1c3   : > { %3782 = vmatpush1.bf16.msra.mxu0 %v7752_v44 }
 0x1c4   : > { %4395 = vmatprep.subr.bf16.mxu0 %v7757_v45 }
 0x1c6   : > { %6617 = vmatmul.mubr.msk.bf16.vlgmr.msra.gmra.mrb[24].mxu0 %vm819_vm1, %v8171_v25  ;;  %v7767_v25 = vld [vmem:[#allocation2 + $0xc40] ss:$56 sps:$4 sm:$0xff]  }
 0x1c7   : > { %4396 = vmatpush1.bf16.msra.mxu0 %v7755_v46  ;;  %3813 = vmatprep.mubr.bf16.mxu0 %v7907_v0 }
 0x1c8   : > { %4397 = vmatprep.subr.bf16.mxu0 %v7760_v49 }
 0x1cb   : > { %4398 = vmatpush1.bf16.msra.mxu0 %v7758_v50 }
 0x1cc   : > { %4399 = vmatprep.subr.bf16.mxu0 %v7763_v51 }
 0x1ce   : > { %6618 = vmatmul.mubr.msk.bf16.gmra.mrb[28].mxu0 %vm819_vm1, %v8039_v40  ;;  %v7776_v40 = vld [vmem:[#allocation2 + $0xb00] ss:$56 sps:$4 sm:$0xff]  }
 0x1cf   : > { %4400 = vmatpush1.bf16.msra.mxu0 %v7761_v52  ;;  %4427 = vmatprep.mubr.bf16.mxu0 %v7907_v0 }
 0x1d0   : > { %4401 = vmatprep.subr.bf16.mxu0 %v7766_v53 }
 0x1d3   : > { %4402 = vmatpush1.bf16.msra.mxu0 %v7764_v54 }
 0x1d4   : > { %4403 = vmatprep.subr.bf16.mxu0 %v7769_v55 }
 0x1d7   : > { %4404 = vmatpush1.bf16.msra.mxu0 %v7767_v25 }
 0x1d8   : > { %4405 = vmatprep.subr.bf16.mxu0 %v7772_v56 }
 0x1db   : > { %4406 = vmatpush1.bf16.msra.mxu0 %v7770_v57 }
 0x1dc   : > { %4501 = vmatprep.subr.bf16.mxu0 %v7775_v58 }
 0x1de   : > { %6703 = vmatmul.mubr.msk.bf16.vlgmr.msra.gmra.mrb[0].mxu0 %vm819_vm1, %v8214_v47 }
 0x1df   : > { %4502 = vmatpush1.bf16.msra.mxu0 %v7773_v59  ;;  %4437 = vmatprep.mubr.bf16.mxu0 %v7907_v0 }
 0x1e0   : > { %4503 = vmatprep.subr.bf16.mxu0 %v7778_v60 }
 0x1e3   : > { %4504 = vmatpush1.bf16.msra.mxu0 %v7776_v40 }
 0x1e4   : > { %4505 = vmatprep.subr.bf16.mxu0 %v7781_v61 }
 0x1e6   : > { %6704 = vmatmul.mubr.msk.bf16.gmra.mrb[4].mxu0 %vm819_vm1, %v8211_v42 }
 0x1e7   : > { %4506 = vmatpush1.bf16.msra.mxu0 %v7779_v62  ;;  %4533 = vmatprep.mubr.bf16.mxu0 %v7907_v0 }
 0x1e8   : > { %4507 = vmatprep.subr.bf16.mxu0 %v7784_v63 }
 0x1eb   : > { %4508 = vmatpush1.bf16.msra.mxu0 %v7782_v1 }
 0x1ec   : > { %4509 = vmatprep.subr.bf16.mxu0 %v7787_v2 }
 0x1ef   : > { %4510 = vmatpush1.bf16.msra.mxu0 %v7785_v3 }
 0x1f0   : > { %4511 = vmatprep.subr.bf16.mxu0 %v7790_v43  ;;  %v4822_v43 = vlaneseq }
 0x1f3   : > { %4512 = vmatpush1.bf16.msra.mxu0 %v7788_v4 }
 0x1f4   : > { %4607 = vmatprep.subr.bf16.mxu0 %v7793_v5 }
 0x1f6   : > { %6707 = vmatmul.mubr.msk.bf16.vlgmr.msra.gmra.mrb[8].mxu0 %vm819_vm1, %v8214_v47 }
 0x1f7   : > { %4608 = vmatpush1.bf16.msra.mxu0 %v7791_v6  ;;  %4543 = vmatprep.mubr.bf16.mxu0 %v7907_v0 }
 0x1f8   : > { %4609 = vmatprep.subr.bf16.mxu0 %v7796_v8 }
 0x1fb   : > { %4610 = vmatpush1.bf16.msra.mxu0 %v7794_v9 }
 0x1fc   : > { %4611 = vmatprep.subr.bf16.mxu0 %v7799_v10  ;;  %v8309_v10 = vshrl.u32 %v4822_v43, 7 }
 0x1fe   : > { %6708 = vmatmul.mubr.msk.bf16.gmra.mrb[12].mxu0 %vm819_vm1, %v8211_v42 }
 0x1ff   : > { %4612 = vmatpush1.bf16.msra.mxu0 %v7797_v48  ;;  %4639 = vmatprep.mubr.bf16.mxu0 %v7907_v0 }
 0x200   : > { %4613 = vmatprep.subr.bf16.mxu0 %v7802_v12  ;;  %v8313_v12 = vand.u32 127, %v4822_v43 }
 0x203   : > { %4614 = vmatpush1.bf16.msra.mxu0 %v7800_v13  ;;  %v4827_v13 = vmul.u32 2, %v8309_v10 }
 0x204   : > { %4615 = vmatprep.subr.bf16.mxu0 %v7805_v14  ;;  %v8317_v14 = vadd.s32 8, %v8309_v10 }
 0x205   : > { %vm4829_vm8 = vcmp.eq.s32.totalorder %v8313_v12, %v4827_v13 }
 0x207   : > { %4616 = vmatpush1.bf16.msra.mxu0 %v7803_v15 }
 0x208   : > { %4617 = vmatprep.subr.bf16.mxu0 %v7808_v16 }
 0x20b   : > { %4618 = vmatpush1.bf16.msra.mxu0 %v7806_v17 }
 0x20c   : > { %4713 = vmatprep.subr.bf16.mxu0 %v7811_v18 }
 0x20e   : > { %6711 = vmatmul.mubr.msk.bf16.vlgmr.msra.gmra.mrb[16].mxu0 %vm819_vm1, %v8214_v47 }
 0x20f   : > { %4714 = vmatpush1.bf16.msra.mxu0 %v7809_v19  ;;  %4649 = vmatprep.mubr.bf16.mxu0 %v7907_v0 }
 0x210   : > { %4715 = vmatprep.subr.bf16.mxu0 %v7814_v20 }
 0x213   : > { %4716 = vmatpush1.bf16.msra.mxu0 %v7812_v21  ;;  %v4828_v21 = vmul.u32 2, %v8317_v14 }
 0x214   : > { %4717 = vmatprep.subr.bf16.mxu0 %v7817_v22  ;;  %v8338_v22 = vsel %vm4829_vm8, 1.0, %v7908_v32 }
 0x215   : > { %vm4830_vm10 = vcmp.eq.s32.totalorder %v8313_v12, %v4828_v21 }
 0x216   : > { %6712 = vmatmul.mubr.msk.bf16.gmra.mrb[20].mxu0 %vm819_vm1, %v8211_v42 }
 0x217   : > { %4718 = vmatpush1.bf16.msra.mxu0 %v7815_v23  ;;  %4745 = vmatprep.mubr.bf16.mxu0 %v7907_v0  ;;  %v8349_v23 = vsel %vm4830_vm10, 1.0, %v7908_v32 }
 0x218   : > { %4719 = vmatprep.subr.bf16.mxu0 %v7820_v24 }
 0x21b   : > { %4720 = vmatpush1.bf16.msra.mxu0 %v7818_v27 }
 0x21c   : > { %4721 = vmatprep.subr.bf16.mxu0 %v7823_v29 }
 0x21f   : > { %4722 = vmatpush1.bf16.msra.mxu0 %v7821_v11 }
 0x220   : > { %4723 = vmatprep.subr.bf16.mxu0 %v7826_v28 }
 0x223   : > { %4724 = vmatpush1.bf16.msra.mxu0 %v7824_v31 }
 0x226   : > { %6715 = vmatmul.mubr.msk.bf16.vlgmr.msra.gmra.mrb[24].mxu0 %vm819_vm1, %v8214_v47 }
 0x227   : > { %4755 = vmatprep.mubr.bf16.mxu0 %v7907_v0 }
 0x22e   : > { %6716 = vmatmul.mubr.msk.bf16.gmra.mrb[28].mxu0 %vm819_vm1, %v8211_v42 }
 0x251   : > { %v4482_v30 = vpop.f32.mrb[0].mxu1 }
 0x252   : > { %v4484_v33 = vpop.f32.mrb[1].mxu1 }
 0x253   : > { %v4486_v34 = vpop.f32.mrb[2].mxu1 }
 0x254   : > { %v8281_v35 = vpack.c.bf16 %v4486_v34, %v4482_v30  ;;  %v4488_v7 = vpop.f32.mrb[3].mxu1 }
 0x255   : > { %v8283_v36 = vpack.c.bf16 %v4488_v7, %v4484_v33 }
 0x259   : > { %v4492_v37 = vpop.f32.mrb[4].mxu1 }
 0x25a   : > { %v4494_v38 = vpop.f32.mrb[5].mxu1 }
 0x25b   : > { %v4496_v26 = vpop.f32.mrb[6].mxu1 }
 0x25c   : > { %v8285_v47 = vpack.c.bf16 %v4496_v26, %v4492_v37  ;;  %v4498_v0 = vpop.f32.mrb[7].mxu1 }
 0x25d   : > { %v8287_v39 = vpack.c.bf16 %v4498_v0, %v4494_v38 }
 0x269   : > { %v4588_v42 = vpop.f32.mrb[8].mxu1 }
 0x26a   : > { %v4590_v41 = vpop.f32.mrb[9].mxu1 }
 0x26b   : > { %v4592_v44 = vpop.f32.mrb[10].mxu1 }
 0x26c   : > { %v8289_v45 = vpack.c.bf16 %v4592_v44, %v4588_v42  ;;  %v4594_v46 = vpop.f32.mrb[11].mxu1 }
 0x26d   : > { %v8291_v49 = vpack.c.bf16 %v4594_v46, %v4590_v41 }
 0x271   : > { %v4598_v50 = vpop.f32.mrb[12].mxu1 }
 0x272   : > { %v4600_v51 = vpop.f32.mrb[13].mxu1 }
 0x273   : > { %v4602_v52 = vpop.f32.mrb[14].mxu1 }
 0x274   : > { %v8293_v53 = vpack.c.bf16 %v4602_v52, %v4598_v50  ;;  %v4604_v54 = vpop.f32.mrb[15].mxu1 }
 0x275   : > { %v8295_v55 = vpack.c.bf16 %v4604_v54, %v4600_v51 }
 0x281   : > { %v4694_v25 = vpop.f32.mrb[16].mxu1 }
 0x282   : > { %v4696_v56 = vpop.f32.mrb[17].mxu1 }
 0x283   : > { %v4698_v57 = vpop.f32.mrb[18].mxu1 }
 0x284   : > { %v8297_v58 = vpack.c.bf16 %v4698_v57, %v4694_v25  ;;  %v4700_v59 = vpop.f32.mrb[19].mxu1 }
 0x285   : > { %v8299_v60 = vpack.c.bf16 %v4700_v59, %v4696_v56 }
 0x289   : > { %v4704_v40 = vpop.f32.mrb[20].mxu1 }
 0x28a   : > { %v4706_v61 = vpop.f32.mrb[21].mxu1 }
 0x28b   : > { %v4708_v62 = vpop.f32.mrb[22].mxu1 }
 0x28c   : > { %v8301_v63 = vpack.c.bf16 %v4708_v62, %v4704_v40  ;;  %v4710_v1 = vpop.f32.mrb[23].mxu1 }
 0x28d   : > { %v8303_v2 = vpack.c.bf16 %v4710_v1, %v4706_v61 }
 0x2b1   : > { %v4429_v3 = vpop.f32.mrb[0].mxu0 }
 0x2b2   : > { %v4431_v4 = vpop.f32.mrb[1].mxu0 }
 0x2b3   : > { %v4433_v5 = vpop.f32.mrb[2].mxu0 }
 0x2b4   : > { %v8305_v6 = vpack.c.bf16 %v4433_v5, %v4429_v3  ;;  %v4435_v8 = vpop.f32.mrb[3].mxu0 }
 0x2b5   : > { %v8307_v9 = vpack.c.bf16 %v4435_v8, %v4431_v4 }
 0x2b7   : > { %6797 = vmatprep.subr.bf16.mxu1 %v8307_v9 }
 0x2b8   : > { %6799 = vmatpush1.bf16.msra.mxu1 %v8305_v6 }
 0x2b9   : > { %v4439_v48 = vpop.f32.mrb[4].mxu0 }
 0x2ba   : > { %v4441_v15 = vpop.f32.mrb[5].mxu0 }
 0x2bb   : > { %v4443_v16 = vpop.f32.mrb[6].mxu0 }
 0x2bc   : > { %v8319_v17 = vpack.c.bf16 %v4443_v16, %v4439_v48  ;;  %v4445_v18 = vpop.f32.mrb[7].mxu0  ;;  %v5425_v16 = vadd.s32 1, %v4828_v21 }
 0x2bd   : > { %v8325_v20 = vpack.c.bf16 %v4445_v18, %v4441_v15  ;;  %v5424_v15 = vadd.s32 1, %v4827_v13 }
 0x2be   : > { %vm5427_vm12 = vcmp.eq.s32.totalorder %v8313_v12, %v5425_v16 }
 0x2bf   : > { %6802 = vmatprep.subr.msk.bf16.mxu1 %vm8321_vm7, %v8325_v20  ;;  %vm5426_vm11 = vcmp.eq.s32.totalorder %v8313_v12, %v5424_v15 }
 0x2c0   : > { %6805 = vmatpush1.bf16.msk.msra.mxu1 %vm8321_vm7, %v8319_v17 }
 0x2c1   : > { %6807 = vmatprep.subr.bf16.mxu1 %v8283_v36 }
 0x2c3   : > { %6721 = vmatmul.mubr.msk.f32.vlgmr.msra.gmra.mrb[24].mxu1 %vm4835_vm9, %v8338_v22 }
 0x2c4   : > { %6809 = vmatpush1.bf16.msra.mxu1 %v8281_v35  ;;  %4955 = vmatprep.mubr.f32.mxu1 %v7908_v32 }
 0x2c5   : > { %6812 = vmatprep.subr.msk.bf16.mxu1 %vm8321_vm7, %v8287_v39 }
 0x2c7   : > { %6722 = vmatmul.mubr.msk.f32.gmra.mrb[26].mxu1 %vm4835_vm9, %v8349_v23 }
 0x2c8   : > { %6815 = vmatpush1.bf16.msk.msra.mxu1 %vm8321_vm7, %v8285_v47  ;;  %5026 = vmatprep.mubr.f32.mxu1 %v7908_v32 }
 0x2c9   : > { %v4535_v24 = vpop.f32.mrb[8].mxu0 }
 0x2ca   : > { %v4537_v27 = vpop.f32.mrb[9].mxu0 }
 0x2cb   : > { %v4539_v29 = vpop.f32.mrb[10].mxu0  ;;  %6725 = vmatmul.mubr.msk.f32.vlgmr.msra.gmra.mrb[28].mxu1 %vm4835_vm9, %v8338_v22 }
 0x2cc   : > { %v8362_v11 = vpack.c.bf16 %v4539_v29, %v4535_v24  ;;  %v4541_v28 = vpop.f32.mrb[11].mxu0  ;;  %5032 = vmatprep.mubr.f32.mxu1 %v7908_v32 }
 0x2cd   : > { %v8365_v31 = vpack.c.bf16 %v4541_v28, %v4537_v27 }
 0x2cf   : > { %6817 = vmatprep.subr.bf16.mxu1 %v8365_v31  ;;  %6726 = vmatmul.mubr.msk.f32.gmra.mrb[30].mxu1 %vm4835_vm9, %v8349_v23 }
 0x2d0   : > { %6819 = vmatpush1.bf16.msra.mxu1 %v8362_v11  ;;  %5103 = vmatprep.mubr.f32.mxu1 %v7908_v32 }
 0x2d1   : > { %v4545_v30 = vpop.f32.mrb[12].mxu0 }
 0x2d2   : > { %v4547_v33 = vpop.f32.mrb[13].mxu0 }
 0x2d3   : > { %v4549_v34 = vpop.f32.mrb[14].mxu0 }
 0x2d4   : > { %v8372_v7 = vpack.c.bf16 %v4549_v34, %v4545_v30  ;;  %v4551_v37 = vpop.f32.mrb[15].mxu0 }
 0x2d5   : > { %v8374_v38 = vpack.c.bf16 %v4551_v37, %v4547_v33 }
 0x2d7   : > { %6822 = vmatprep.subr.msk.bf16.mxu1 %vm8321_vm7, %v8374_v38 }
 0x2d8   : > { %6825 = vmatpush1.bf16.msk.msra.mxu1 %vm8321_vm7, %v8372_v7 }
 0x2d9   : > { %6827 = vmatprep.subr.bf16.mxu1 %v8291_v49 }
 0x2db   : > { %6729 = vmatmul.mubr.msk.f32.vlgmr.msra.gmra.mrb[32].mxu1 %vm4835_vm9, %v8338_v22 }
 0x2dc   : > { %6829 = vmatpush1.bf16.msra.mxu1 %v8289_v45  ;;  %5109 = vmatprep.mubr.f32.mxu1 %v7908_v32 }
 0x2dd   : > { %6832 = vmatprep.subr.msk.bf16.mxu1 %vm8321_vm7, %v8295_v55 }
 0x2df   : > { %6730 = vmatmul.mubr.msk.f32.gmra.mrb[34].mxu1 %vm4835_vm9, %v8349_v23 }
 0x2e0   : > { %6835 = vmatpush1.bf16.msk.msra.mxu1 %vm8321_vm7, %v8293_v53  ;;  %5180 = vmatprep.mubr.f32.mxu1 %v7908_v32 }
 0x2e1   : > { %v4641_v26 = vpop.f32.mrb[16].mxu0 }
 0x2e2   : > { %v4643_v0 = vpop.f32.mrb[17].mxu0 }
 0x2e3   : > { %v4645_v42 = vpop.f32.mrb[18].mxu0  ;;  %6733 = vmatmul.mubr.msk.f32.vlgmr.msra.gmra.mrb[36].mxu1 %vm4835_vm9, %v8338_v22 }
 0x2e4   : > { %v8398_v41 = vpack.c.bf16 %v4645_v42, %v4641_v26  ;;  %v4647_v44 = vpop.f32.mrb[19].mxu0  ;;  %5186 = vmatprep.mubr.f32.mxu1 %v7908_v32 }
 0x2e5   : > { %v8401_v46 = vpack.c.bf16 %v4647_v44, %v4643_v0 }
 0x2e7   : > { %6837 = vmatprep.subr.bf16.mxu1 %v8401_v46  ;;  %6734 = vmatmul.mubr.msk.f32.gmra.mrb[38].mxu1 %vm4835_vm9, %v8349_v23 }
 0x2e8   : > { %6839 = vmatpush1.bf16.msra.mxu1 %v8398_v41  ;;  %5257 = vmatprep.mubr.f32.mxu1 %v7908_v32 }
 0x2e9   : > { %v4651_v50 = vpop.f32.mrb[20].mxu0 }
 0x2ea   : > { %v4653_v51 = vpop.f32.mrb[21].mxu0 }
 0x2eb   : > { %v4655_v52 = vpop.f32.mrb[22].mxu0 }
 0x2ec   : > { %v8408_v54 = vpack.c.bf16 %v4655_v52, %v4651_v50  ;;  %v4657_v25 = vpop.f32.mrb[23].mxu0 }
 0x2ed   : > { %v8410_v56 = vpack.c.bf16 %v4657_v25, %v4653_v51 }
 0x2ef   : > { %6842 = vmatprep.subr.msk.bf16.mxu1 %vm8321_vm7, %v8410_v56 }
 0x2f0   : > { %6845 = vmatpush1.bf16.msk.msra.mxu1 %vm8321_vm7, %v8408_v54 }
 0x2f1   : > { %6847 = vmatprep.subr.bf16.mxu1 %v8299_v60 }
 0x2f3   : > { %6737 = vmatmul.mubr.msk.f32.vlgmr.msra.gmra.mrb[40].mxu1 %vm4835_vm9, %v8338_v22 }
 0x2f4   : > { %6849 = vmatpush1.bf16.msra.mxu1 %v8297_v58  ;;  %5263 = vmatprep.mubr.f32.mxu1 %v7908_v32 }
 0x2f5   : > { %6852 = vmatprep.subr.msk.bf16.mxu1 %vm8321_vm7, %v8303_v2 }
 0x2f7   : > { %6738 = vmatmul.mubr.msk.f32.gmra.mrb[42].mxu1 %vm4835_vm9, %v8349_v23 }
 0x2f8   : > { %6855 = vmatpush1.bf16.msk.msra.mxu1 %vm8321_vm7, %v8301_v63  ;;  %5334 = vmatprep.mubr.f32.mxu1 %v7908_v32 }
 0x2f9   : > { %v4747_v57 = vpop.f32.mrb[24].mxu0 }
 0x2fa   : > { %v4749_v59 = vpop.f32.mrb[25].mxu0 }
 0x2fb   : > { %v4751_v40 = vpop.f32.mrb[26].mxu0  ;;  %6741 = vmatmul.mubr.msk.f32.vlgmr.msra.gmra.mrb[44].mxu1 %vm4835_vm9, %v8338_v22 }
 0x2fc   : > { %v8434_v61 = vpack.c.bf16 %v4751_v40, %v4747_v57  ;;  %v4753_v62 = vpop.f32.mrb[27].mxu0  ;;  %5340 = vmatprep.mubr.f32.mxu1 %v7908_v32 }
 0x2fd   : > { %v8437_v1 = vpack.c.bf16 %v4753_v62, %v4749_v59 }
 0x2ff   : > { %6857 = vmatprep.subr.bf16.mxu1 %v8437_v1  ;;  %6742 = vmatmul.mubr.msk.f32.gmra.mrb[46].mxu1 %vm4835_vm9, %v8349_v23 }
 0x300   : > { %6859 = vmatpush1.bf16.msra.mxu1 %v8434_v61  ;;  %5411 = vmatprep.mubr.f32.mxu1 %v7908_v32 }
 0x301   : > { %v4757_v3 = vpop.f32.mrb[28].mxu0 }
 0x302   : > { %v4759_v43 = vpop.f32.mrb[29].mxu0 }
 0x303   : > { %v4761_v4 = vpop.f32.mrb[30].mxu0 }
 0x304   : > { %v8444_v5 = vpack.c.bf16 %v4761_v4, %v4757_v3  ;;  %v4763_v8 = vpop.f32.mrb[31].mxu0 }
 0x305   : > { %v6860_v48 = vpack.c.bf16 %v4763_v8, %v4759_v43 }
 0x307   : > { %6862 = vmatprep.subr.msk.bf16.mxu1 %vm8321_vm7, %v6860_v48 }
 0x308   : > { %6865 = vmatpush1.bf16.msk.msra.mxu1 %vm8321_vm7, %v8444_v5 }
 0x309   : > { %6867 = vmatprep.subr.bf16.mxu1 %v8307_v9  ;;  %v6748_v9 = vsel %vm5427_vm12, 1.0, %v7908_v32 }
 0x30b   : > { %6745 = vmatmul.mubr.msk.f32.vlgmr.msra.gmra.mrb[48].mxu1 %vm4835_vm9, %v8338_v22 }
 0x30c   : > { %6869 = vmatpush1.bf16.msra.mxu1 %v8305_v6  ;;  %5417 = vmatprep.mubr.f32.mxu1 %v7908_v32  ;;  %v6747_v6 = vsel %vm5426_vm11, 1.0, %v7908_v32 }
 0x30d   : > { %6872 = vmatprep.subr.msk.bf16.mxu1 %vm8321_vm7, %v8325_v20 }
 0x30f   : > { %6746 = vmatmul.mubr.msk.f32.gmra.mrb[50].mxu1 %vm4835_vm9, %v8349_v23 }
 0x310   : > { %6875 = vmatpush1.bf16.msk.msra.mxu1 %vm8321_vm7, %v8319_v17  ;;  %5502 = vmatprep.mubr.f32.mxu1 %v7908_v32 }
 0x311   : > { %6877 = vmatprep.subr.bf16.mxu1 %v8283_v36 }
 0x313   : > { %6751 = vmatmul.mubr.msk.f32.vlgmr.msra.gmra.mrb[52].mxu1 %vm4835_vm9, %v6747_v6 }
 0x314   : > { %6879 = vmatpush1.bf16.msra.mxu1 %v8281_v35  ;;  %5508 = vmatprep.mubr.f32.mxu1 %v7908_v32 }
 0x315   : > { %6882 = vmatprep.subr.msk.bf16.mxu1 %vm8321_vm7, %v8287_v39 }
 0x317   : > { %6752 = vmatmul.mubr.msk.f32.gmra.mrb[54].mxu1 %vm4835_vm9, %v6748_v9 }
 0x318   : > { %6885 = vmatpush1.bf16.msk.msra.mxu1 %vm8321_vm7, %v8285_v47  ;;  %5579 = vmatprep.mubr.f32.mxu1 %v7908_v32 }
 0x319   : > { %6887 = vmatprep.subr.bf16.mxu1 %v8365_v31 }
 0x31b   : > { %6755 = vmatmul.mubr.msk.f32.vlgmr.msra.gmra.mrb[56].mxu1 %vm4835_vm9, %v6747_v6 }
 0x31c   : > { %6889 = vmatpush1.bf16.msra.mxu1 %v8362_v11  ;;  %5585 = vmatprep.mubr.f32.mxu1 %v7908_v32 }
 0x31d   : > { %6892 = vmatprep.subr.msk.bf16.mxu1 %vm8321_vm7, %v8374_v38 }
 0x31f   : > { %6756 = vmatmul.mubr.msk.f32.gmra.mrb[58].mxu1 %vm4835_vm9, %v6748_v9 }
 0x320   : > { %6895 = vmatpush1.bf16.msk.msra.mxu1 %vm8321_vm7, %v8372_v7  ;;  %5656 = vmatprep.mubr.f32.mxu1 %v7908_v32 }
 0x321   : > { %6897 = vmatprep.subr.bf16.mxu1 %v8291_v49 }
 0x323   : > { %6759 = vmatmul.mubr.msk.f32.vlgmr.msra.gmra.mrb[60].mxu1 %vm4835_vm9, %v6747_v6 }
 0x324   : > { %6899 = vmatpush1.bf16.msra.mxu1 %v8289_v45  ;;  %5662 = vmatprep.mubr.f32.mxu1 %v7908_v32 }
 0x325   : > { %6902 = vmatprep.subr.msk.bf16.mxu1 %vm8321_vm7, %v8295_v55 }
 0x327   : > { %6760 = vmatmul.mubr.msk.f32.gmra.mrb[62].mxu1 %vm4835_vm9, %v6748_v9 }
 0x328   : > { %6905 = vmatpush1.bf16.msk.msra.mxu1 %vm8321_vm7, %v8293_v53  ;;  %5733 = vmatprep.mubr.f32.mxu1 %v7908_v32 }
 0x329   : > { %6907 = vmatprep.subr.bf16.mxu1 %v8401_v46 }
 0x32b   : > { %6763 = vmatmul.mubr.msk.f32.vlgmr.msra.gmra.mrb[64].mxu1 %vm4835_vm9, %v6747_v6 }
 0x32c   : > { %6909 = vmatpush1.bf16.msra.mxu1 %v8398_v41  ;;  %5739 = vmatprep.mubr.f32.mxu1 %v7908_v32 }
 0x32d   : > { %6912 = vmatprep.subr.msk.bf16.mxu1 %vm8321_vm7, %v8410_v56 }
 0x32f   : > { %6764 = vmatmul.mubr.msk.f32.gmra.mrb[66].mxu1 %vm4835_vm9, %v6748_v9 }
 0x330   : > { %6915 = vmatpush1.bf16.msk.msra.mxu1 %vm8321_vm7, %v8408_v54  ;;  %5810 = vmatprep.mubr.f32.mxu1 %v7908_v32 }
 0x331   : > { %6917 = vmatprep.subr.bf16.mxu1 %v8299_v60 }
 0x333   : > { %6767 = vmatmul.mubr.msk.f32.vlgmr.msra.gmra.mrb[68].mxu1 %vm4835_vm9, %v6747_v6 }
 0x334   : > { %6919 = vmatpush1.bf16.msra.mxu1 %v8297_v58  ;;  %5816 = vmatprep.mubr.f32.mxu1 %v7908_v32 }
 0x335   : > { %6922 = vmatprep.subr.msk.bf16.mxu1 %vm8321_vm7, %v8303_v2 }
 0x337   : > { %6768 = vmatmul.mubr.msk.f32.gmra.mrb[70].mxu1 %vm4835_vm9, %v6748_v9 }
 0x338   : > { %6925 = vmatpush1.bf16.msk.msra.mxu1 %vm8321_vm7, %v8301_v63  ;;  %5887 = vmatprep.mubr.f32.mxu1 %v7908_v32 }
 0x339   : > { %6927 = vmatprep.subr.bf16.mxu1 %v8437_v1 }
 0x33b   : > { %6771 = vmatmul.mubr.msk.f32.vlgmr.msra.gmra.mrb[72].mxu1 %vm4835_vm9, %v6747_v6 }
 0x33c   : > { %6929 = vmatpush1.bf16.msra.mxu1 %v8434_v61  ;;  %5893 = vmatprep.mubr.f32.mxu1 %v7908_v32 }
 0x33d   : > { %6932 = vmatprep.subr.msk.bf16.mxu1 %vm8321_vm7, %v6860_v48  ;;  %v8624_v48 = vld [vmem:[#allocation4] sm:$0xff] }
 0x33f   : > { %6772 = vmatmul.mubr.msk.f32.gmra.mrb[74].mxu1 %vm4835_vm9, %v6748_v9 }
 0x340   : > { %6935 = vmatpush1.bf16.msk.msra.mxu1 %vm8321_vm7, %v8444_v5  ;;  %5964 = vmatprep.mubr.f32.mxu1 %v7908_v32  ;;  %v6023_v5 = vsub.s32 0, %v8309_v10 }
 0x343   : > { %6775 = vmatmul.mubr.msk.f32.vlgmr.msra.gmra.mrb[76].mxu1 %vm4835_vm9, %v6747_v6 }
 0x344   : > { %5970 = vmatprep.mubr.f32.mxu1 %v7908_v32 }
 0x347   : > { %6776 = vmatmul.mubr.msk.f32.gmra.mrb[78].mxu1 %vm4835_vm9, %v6748_v9  ;;  %v6027_v9 = vsub.s32 1, %v8309_v10 }
 0x396   : > { %v4951_v35 = vpop.f32.mrb[24].mxu1 }
 0x397   : > { %v8547_v36 = vpop.f32.mrb[25].mxu1 }
 0x39a   : > { %v8549_v47 = vpop.f32.mrb[26].mxu1 }
 0x39b   : > { %v8551_v39 = vpop.f32.mrb[27].mxu1 }
 0x39e   : > { %v8553_v45 = vpop.f32.mrb[28].mxu1 }
 0x39f   : > { %v8555_v49 = vpop.f32.mrb[29].mxu1 }
 0x3a2   : > { %v8557_v53 = vpop.f32.mrb[30].mxu1 }
 0x3a3   : > { %v8559_v55 = vpop.f32.mrb[31].mxu1 }
 0x3ae   : > { %v8561_v58 = vpop.f32.mrb[32].mxu1 }
 0x3af   : > { %v8563_v32 = vpop.f32.mrb[33].mxu1 }
 0x3b2   : > { %v8565_v60 = vpop.f32.mrb[34].mxu1 }
 0x3b3   : > { %v8567_v63 = vpop.f32.mrb[35].mxu1 }
 0x3b6   : > { %v8569_v2 = vpop.f32.mrb[36].mxu1 }
 0x3b7   : > { %v5184_v12 = vpop.f32.mrb[37].mxu1 }
 0x3ba   : > { %v8571_v13 = vpop.f32.mrb[38].mxu1 }
 0x3bb   : > { %v5190_v14 = vpop.f32.mrb[39].mxu1 }
 0x3c6   : > { %v5259_v17 = vpop.f32.mrb[40].mxu1 }
 0x3c7   : > { %v5261_v18 = vpop.f32.mrb[41].mxu1 }
 0x3ca   : > { %v8573_v19 = vpop.f32.mrb[42].mxu1 }
 0x3cb   : > { %v8575_v20 = vpop.f32.mrb[43].mxu1 }
 0x3ce   : > { %v8577_v21 = vpop.f32.mrb[44].mxu1 }
 0x3cf   : > { %v8579_v22 = vpop.f32.mrb[45].mxu1 }
 0x3d2   : > { %v8581_v23 = vpop.f32.mrb[46].mxu1 }
 0x3d3   : > { %v8583_v24 = vpop.f32.mrb[47].mxu1 }
 0x3de   : > { %v8585_v27 = vpop.f32.mrb[48].mxu1 }
 0x3df   : > { %v8587_v29 = vpop.f32.mrb[49].mxu1 }
 0x3e2   : > { %v8589_v11 = vpop.f32.mrb[50].mxu1 }
 0x3e3   : > { %v8591_v28 = vpop.f32.mrb[51].mxu1 }
 0x3e6   : > { %v5504_v31 = vpop.f32.mrb[52].mxu1 }
 0x3e7   : > { %v5977_v30 = vmax.f32 %v4951_v35, %v5504_v31  ;;  %v5506_v33 = vpop.f32.mrb[53].mxu1 }
 0x3e8   : > { %v5978_v34 = vmax.f32 %v8547_v36, %v5506_v33  ;;  %v6024_v36 = vrot.slane %v8624_v48, %v6023_v5 }
 0x3ea   : > { %v5510_v7 = vpop.f32.mrb[54].mxu1 }
 0x3eb   : > { %v5991_v37 = vmax.f32 %v8549_v47, %v5510_v7  ;;  %v5512_v38 = vpop.f32.mrb[55].mxu1 }
 0x3ec   : > { %v5992_v26 = vmax.f32 %v8551_v39, %v5512_v38 }
 0x3ee   : > { %v5581_v0 = vpop.f32.mrb[56].mxu1 }
 0x3ef   : > { %v5979_v42 = vmax.f32 %v8553_v45, %v5581_v0  ;;  %v8597_v41 = vpop.f32.mrb[57].mxu1 }
 0x3f0   : > { %v5980_v44 = vmax.f32 %v8555_v49, %v8597_v41  ;;  %v6028_v49 = vrot.slane %v8624_v48, %v6027_v9  ;;  %v6035_v41 = vsub.s32 3, %v8309_v10  ;;  %v6039_v9 = vsub.s32 4, %v8309_v10 }
 0x3f2   : > { %v5587_v46 = vpop.f32.mrb[58].mxu1 }
 0x3f3   : > { %v5993_v50 = vmax.f32 %v8557_v53, %v5587_v46  ;;  %v8602_v51 = vpop.f32.mrb[59].mxu1 }
 0x3f4   : > { %v5994_v52 = vmax.f32 %v8559_v55, %v8602_v51 }
 0x3f6   : > { %v5658_v54 = vpop.f32.mrb[60].mxu1 }
 0x3f7   : > { %v5981_v25 = vmax.f32 %v8561_v58, %v5658_v54  ;;  %v8607_v56 = vpop.f32.mrb[61].mxu1 }
 0x3f8   : > { %v5982_v57 = vmax.f32 %v8563_v32, %v8607_v56 }
 0x3fa   : > { %v8611_v59 = vpop.f32.mrb[62].mxu1 }
 0x3fb   : > { %v5995_v40 = vmax.f32 %v8565_v60, %v8611_v59  ;;  %v8615_v61 = vpop.f32.mrb[63].mxu1 }
 0x3fc   : > { %v5996_v62 = vmax.f32 %v8567_v63, %v8615_v61 }
 0x3fe   : > { %v8619_v1 = vpop.f32.mrb[64].mxu1 }
 0x3ff   : > { %v5983_v3 = vmax.f32 %v8569_v2, %v8619_v1  ;;  %v5737_v43 = vpop.f32.mrb[65].mxu1 }
 0x400   : > { %v5984_v4 = vmax.f32 %v5184_v12, %v5737_v43  ;;  %v6031_v12 = vsub.s32 2, %v8309_v10 }
 0x402   : > { %v6005_v8 = vmax.f32 %v5977_v30, %v5984_v4  ;;  %v8626_v15 = vpop.f32.mrb[66].mxu1 }
 0x403   : > { %v5997_v16 = vmax.f32 %v8571_v13, %v8626_v15  ;;  %v5743_v6 = vpop.f32.mrb[67].mxu1 }
 0x404   : > { %v5998_v35 = vmax.f32 %v5190_v14, %v5743_v6  ;;  %v6056_v31 = vadd.f32 %v6024_v36, %v6005_v8  ;;  %v6036_v8 = vrot.slane %v8624_v48, %v6035_v41 }
 0x406   : > { %v6012_v47 = vmax.f32 %v5991_v37, %v5998_v35  ;;  %v5812_v39 = vpop.f32.mrb[68].mxu1  ;;  %v6032_v37 = vrot.slane %v8624_v48, %v6031_v12  ;;  %v6070_v46 = vmax.f32 %v6056_v31, 0.0  ;;  %v6040_v12 = vrot.slane %v8624_v48, %v6039_v9 }
 0x407   : > { %v5985_v45 = vmax.f32 %v5259_v17, %v5812_v39  ;;  %v5814_v53 = vpop.f32.mrb[69].mxu1  ;;  %v6047_v31 = vsub.s32 6, %v8309_v10 }
 0x408   : > { %v5986_v58 = vmax.f32 %v5261_v18, %v5814_v53  ;;  %v6063_v54 = vadd.f32 %v6024_v36, %v6012_v47 }
 0x409   : > { %v6006_v30 = vmax.f32 %v5978_v34, %v5985_v45 }
 0x40a   : > { %v6007_v33 = vmax.f32 %v5979_v42, %v5986_v58  ;;  %v5818_v7 = vpop.f32.mrb[70].mxu1  ;;  %v6043_v58 = vsub.s32 5, %v8309_v10 }
 0x40b   : > { %v6057_v38 = vadd.f32 %v6028_v49, %v6006_v30  ;;  %v5999_v0 = vmax.f32 %v8573_v19, %v5818_v7  ;;  %v5820_v14 = vpop.f32.mrb[71].mxu1 }
 0x40c   : > { %v6000_v17 = vmax.f32 %v8575_v20, %v5820_v14  ;;  %v6058_v35 = vadd.f32 %v6032_v37, %v6007_v33  ;;  %v6044_v10 = vrot.slane %v8624_v48, %v6043_v58 }
 0x40d   : > { %v6071_v18 = vmax.f32 %v6057_v38, 0.0  ;;  %v6013_v43 = vmax.f32 %v5992_v26, %v5999_v0  ;;  %v6077_v26 = vmax.f32 %v6063_v54, 0.0 }
 0x40e   : > { %v6014_v34 = vmax.f32 %v5993_v50, %v6000_v17  ;;  %v5889_v42 = vpop.f32.mrb[72].mxu1  ;;  %v6072_v30 = vmax.f32 %v6058_v35, 0.0 }
 0x40f   : > { %v6788_v19 = vpack.c.bf16 %v6071_v18, %v6070_v46  ;;  %v6064_v4 = vadd.f32 %v6028_v49, %v6013_v43  ;;  %v5987_v5 = vmax.f32 %v8577_v21, %v5889_v42  ;;  %v5891_v6 = vpop.f32.mrb[73].mxu1 }
 0x410   : > { %v5988_v20 = vmax.f32 %v8579_v22, %v5891_v6  ;;  %v6065_v33 = vadd.f32 %v6032_v37, %v6014_v34  ;;  %v6048_v37 = vrot.slane %v8624_v48, %v6047_v31 }
 0x411   : > { %6128 = vst [vmem:[%s8642_s13] sm:$0xff] %v6788_v19  ;;  %v6078_v36 = vmax.f32 %v6064_v4, 0.0  ;;  %v6008_v47 = vmax.f32 %v5980_v44, %v5987_v5 }
 0x412   : > { %v6009_v39 = vmax.f32 %v5981_v25, %v5988_v20  ;;  %v5895_v50 = vpop.f32.mrb[74].mxu1  ;;  %v6079_v17 = vmax.f32 %v6065_v33, 0.0 }
 0x413   : > { %v6792_v45 = vpack.c.bf16 %v6078_v36, %v6077_v26  ;;  %v6059_v53 = vadd.f32 %v6036_v8, %v6008_v47  ;;  %v6001_v49 = vmax.f32 %v8581_v23, %v5895_v50  ;;  %v5897_v21 = vpop.f32.mrb[75].mxu1 }
 0x414   : > { %v6002_v22 = vmax.f32 %v8583_v24, %v5897_v21  ;;  %v6060_v55 = vadd.f32 %v6040_v12, %v6009_v39 }
 0x415   : > { %6132 = vst [vmem:[%s8642_s13 + $0x1c] sm:$0x77] %v6792_v45  ;;  %v6073_v44 = vmax.f32 %v6059_v53, 0.0  ;;  %v6015_v25 = vmax.f32 %v5994_v52, %v6001_v49 }
 0x416   : > { %v6016_v23 = vmax.f32 %v5995_v40, %v6002_v22  ;;  %v5966_v7 = vpop.f32.mrb[76].mxu1  ;;  %v6074_v18 = vmax.f32 %v6060_v55, 0.0 }
 0x417   : > { %v6789_v38 = vpack.c.bf16 %v6073_v44, %v6072_v30  ;;  %v6066_v0 = vadd.f32 %v6036_v8, %v6015_v25  ;;  %v5989_v24 = vmax.f32 %v8585_v27, %v5966_v7  ;;  %v5968_v14 = vpop.f32.mrb[77].mxu1 }
 0x418   : > { %v5990_v41 = vmax.f32 %v8587_v29, %v5968_v14  ;;  %v6067_v43 = vadd.f32 %v6040_v12, %v6016_v23 }
 0x419   : > { %6129 = vst [vmem:[%s8642_s13 + $0x8] sm:$0xff] %v6789_v38  ;;  %v6080_v51 = vmax.f32 %v6066_v0, 0.0  ;;  %v6010_v60 = vmax.f32 %v5982_v57, %v5989_v24 }
 0x41a   : > { %v6011_v27 = vmax.f32 %v5983_v3, %v5990_v41  ;;  %v5972_v52 = vpop.f32.mrb[78].mxu1 }
 0x41b   : > { %v6793_v59 = vpack.c.bf16 %v6080_v51, %v6079_v17  ;;  %v6061_v40 = vadd.f32 %v6044_v10, %v6010_v60  ;;  %v6003_v29 = vmax.f32 %v8589_v11, %v5972_v52  ;;  %v5974_v46 = vpop.f32.mrb[79].mxu1 }
 0x41c   : > { %v6062_v48 = vadd.f32 %v6048_v37, %v6011_v27  ;;  %v6004_v54 = vmax.f32 %v8591_v28, %v5974_v46  ;;  %v6081_v28 = vmax.f32 %v6067_v43, 0.0 }
 0x41d   : > { %6133 = vst [vmem:[%s8642_s13 + $0x24] sm:$0x77] %v6793_v59  ;;  %v6075_v32 = vmax.f32 %v6061_v40, 0.0  ;;  %v6017_v2 = vmax.f32 %v5996_v62, %v6003_v29 }
 0x41e   : > { %v6076_v56 = vmax.f32 %v6062_v48, 0.0  ;;  %v6018_v11 = vmax.f32 %v5997_v16, %v6004_v54 }
 0x41f   : > { %v6790_v57 = vpack.c.bf16 %v6075_v32, %v6074_v18  ;;  %v6068_v1 = vadd.f32 %v6044_v10, %v6017_v2 }
 0x420   : > { %v6791_v3 = vpack.c.bf16 %v6076_v56, %v6076_v56  ;;  %v6069_v34 = vadd.f32 %v6048_v37, %v6018_v11 }
 0x421   : > { %6130 = vst [vmem:[%s8642_s13 + $0x10] sm:$0xff] %v6790_v57  ;;  %v6082_v42 = vmax.f32 %v6068_v1, 0.0 }
 0x422   : > { %6131 = vst [vmem:[%s8642_s13 + $0x18] sm:$0xf] %v6791_v3  ;;  %v6083_v19 = vmax.f32 %v6069_v34, 0.0 }
 0x423   : > { %v6794_v4 = vpack.c.bf16 %v6082_v42, %v6081_v28 }
 0x424   : > { %v6795_v5 = vpack.c.bf16 %v6083_v19, %v6083_v19 }
 0x425   : > { %6134 = vst [vmem:[%s8642_s13 + $0x2c] sm:$0x77] %v6794_v4 }
 0x426   : > { %6135 = vst [vmem:[%s8642_s13 + $0x34] sm:$0x7] %v6795_v5 }
 0x427 PF: > { %s15_s12 = sadd.s32 1, %s7901_s12  }
 0x428   : > { %p12_p9 = scmp.ge.s32.totalorder %s15_s12, 4  }
 0x42a   :  { %14 = sbr.rel (!%p12_p9) target bundleno = 2 (0x2), region = 75 }
 0x431   :  { %6157 = vsyncpa [#allocation3], 1 }
 0x432   :  { %6159 = vsyncpa [#allocation3 + $0x1], 1 }
 0x433   :  { %6160 = vsyncpa [#allocation5], 1 }

// kernel: lenet_forward.4
= control target key start
LH: loop header
LB: loop body
LE: loop exit
PB: predicated region body
PF: predicated region fallthrough
CT: control target
= control target key end

     0   :  { %8 = vsyncpa [#allocation3], 0  ;;  %s16717_s12 = smov 0   ;;  %s17224_s0 = inlined_call_operand.vmem [shape: bf16[2,14,896], index: 0, kind: input, shape index: {}]   ;;  %s17225_s1 = inlined_call_operand.hbm [shape: bf16[5,896,640], index: 1, kind: input, shape index: {}]   ;;  %s17226_s2 = inlined_call_operand.vmem [shape: f32[1,320], index: 2, kind: input, shape index: {}]   ;;  %s17227_s3 = inlined_call_operand.vmem [shape: bf16[2,5,320], index: 3, kind: output, shape index: {}]  }
   0x1 LB: > { %s16723_s13 = sadd.s32 4294967295, %s16686_s12   ;;  %p12479_p0 = scmp.ge.s32.totalorder %s16686_s12, 1  ;;  %s16686_s12 = sphi %s16717_s12, %s14_s12  }
   0x2   : > { %p113_p1 = scmp.lt.s32.totalorder %s16686_s12, 3  ;;  %s16688_s14 = smov [#allocation2]  }
   0x3   : > { %s125_s15 = sshll.u32 %s16688_s14, 4  ;;  %p17228_p3 = scmp.eq.s32.totalorder %s16723_s13, 0  ;;  %s126_s15 = int_to_ptr.vmem [resolvable:$true] %s125_s15 }
   0x4   : > { %p16727_p2 = pnand %p12479_p0, %p113_p1  ;;  %s16648_s20 = scalar_lea.hbm %s17225_s1, 179200 }
   0x5   : > { %p16649_p6 = scmp.ne.s32.totalorder %s17225_s1, %s16648_s20  ;;  %p16655_p10 = scmp.lt.u32.totalorder %s16648_s20, %s17225_s1 }
   0x6   : > { %s17230_s16 = scalar_select %p16727_p2, 1, 0 }
   0x7   : > { %p14632_p4 = pneg %p16727_p2 }
   0x9   : > { %p16736_p5 = pnand %p17228_p3, %p14632_p4 }
   0xb   : > { %p16650_p7 = pneg %p16736_p5 }
   0xd   : > { %p16651_p8 = pnand %p16650_p7, %p16649_p6 }
   0xf   : > { %p16652_p9 = pneg %p16651_p8 }
  0x11   : > { %p16657_p11 = pnand %p16655_p10, %p16652_p9 }
  0x13   : > { %16660 = shalt.err (!%p16657_p11)
}
  0x14   : > { %s16661_s25 = scalar_lea.vmem %s126_s15, 179200  ;;  %p16669_p1 = scmp.lt.s32.totalorder %s126_s15, %s126_s15 }
  0x15   : > { %p16662_p12 = scmp.ne.s32.totalorder %s126_s15, %s16661_s25  ;;  %p16670_p4 = scmp.lt.s32.totalorder %s16661_s25, %s16661_s25 }
  0x17   : > { %p16664_p13 = pnand %p16662_p12, %p16650_p7  ;;  %p16671_p3 = por %p16670_p4, %p16669_p1 }
  0x19   : > { %p16665_p0 = pneg %p16664_p13 }
  0x1b   : > { %p16672_p2 = pnand %p16671_p3, %p16665_p0 }
  0x1d   : > { %16675 = shalt.err (!%p16672_p2)
}
  0x1e   : > { %s16689_s26 = smov 320   ;;  %s16690_s27 = smov 20  }
  0x1f   : > { %14635 = dma.hbm_to_vmem [thread:$0]  (!%p16736_p5), %s17225_s1, 179200, %s126_s15, [#allocation3], %s16689_s26, %s16689_s26, %s16690_s27  }
  0x20   : > { %p17232_p6 = scmp.ne.s32.totalorder %s17230_s16, 0 }
  0x21   : > { %p17233_p8 = scmp.eq.s32.totalorder (!%p17232_p6), %s16723_s13, 0 }
  0x22   : > { %152 = sbr.rel (%p17232_p6) target bundleno = 2059 (0x80b), region = 32 }
  0x29   : > { %16681 = dma.done.wait (%p17233_p8), [#allocation3], 179200   ;;  %p17234_p7 = pmov %p17233_p8 }
  0x2a   : > { %v14655_v0 = vld [vmem:[#allocation2 + $0x8c4] ss:$20 sps:$4 sm:$0xff]   ;;  %v14657_v1 = vld [vmem:[#allocation2 + $0x8cc] ss:$20 sps:$4 sm:$0xff]   ;;  %v14660_v3 = vld [vmem:[#allocation2 + $0x8c8] ss:$20 sps:$4 sm:$0xff]  }
  0x2b   : > { %16683 = vsyncadd (%p17234_p7), [#allocation3], 4294788096  ;;  %2409 = vmatprep.subr.bf16.mxu0 %v14655_v0  ;;  %v14659_v2 = vld [vmem:[#allocation2 + $0x8c0] ss:$20 sps:$4 sm:$0xff]   ;;  %2581 = vmatprep.subr.bf16.mxu1 %v14657_v1  ;;  %v14665_v6 = vld [vmem:[#allocation2 + $0x8e8] ss:$20 sps:$4 sm:$0xff]  }
  0x2c   : > { %v14661_v4 = vld [vmem:[#allocation2 + $0x8ec] ss:$20 sps:$4 sm:$0xff]   ;;  %2410 = vmatpush1.bf16.msra.mxu0 %v14659_v2  ;;  %2582 = vmatpush1.bf16.msra.mxu1 %v14660_v3  ;;  %v14663_v5 = vld [vmem:[#allocation2 + $0x8f4] ss:$20 sps:$4 sm:$0xff]   ;;  %v14666_v7 = vld [vmem:[#allocation2 + $0x8f0] ss:$20 sps:$4 sm:$0xff]  }
  0x2d   : > { %2411 = vmatprep.subr.bf16.mxu0 %v14661_v4  ;;  %2583 = vmatprep.subr.bf16.mxu1 %v14663_v5  ;;  %v14667_v8 = vld [vmem:[#allocation2 + $0x914] ss:$20 sps:$4 sm:$0xff]   ;;  %v14669_v9 = vld [vmem:[#allocation2 + $0x91c] ss:$20 sps:$4 sm:$0xff]   ;;  %v14672_v11 = vld [vmem:[#allocation2 + $0x918] ss:$20 sps:$4 sm:$0xff]  }
  0x2e   : > { %v14671_v10 = vld [vmem:[#allocation2 + $0x910] ss:$20 sps:$4 sm:$0xff]   ;;  %v14677_v14 = vld [vmem:[#allocation2 + $0x938] ss:$20 sps:$4 sm:$0xff]   ;;  %v14678_v15 = vld [vmem:[#allocation2 + $0x940] ss:$20 sps:$4 sm:$0xff]  }
  0x2f   : > { %v14673_v12 = vld [vmem:[#allocation2 + $0x93c] ss:$20 sps:$4 sm:$0xff]   ;;  %v14675_v13 = vld [vmem:[#allocation2 + $0x944] ss:$20 sps:$4 sm:$0xff]   ;;  %v14681_v17 = vld [vmem:[#allocation2 + $0x96c] ss:$20 sps:$4 sm:$0xff]  }
  0x30   : > { %2412 = vmatpush1.bf16.msra.mxu0 %v14665_v6  ;;  %2584 = vmatpush1.bf16.msra.mxu1 %v14666_v7  ;;  %v14679_v16 = vld [vmem:[#allocation2 + $0x964] ss:$20 sps:$4 sm:$0xff]   ;;  %v14683_v18 = vld [vmem:[#allocation2 + $0x960] ss:$20 sps:$4 sm:$0xff]   ;;  %v14684_v19 = vld [vmem:[#allocation2 + $0x968] ss:$20 sps:$4 sm:$0xff]  }
  0x31   : > { %2413 = vmatprep.subr.bf16.mxu0 %v14667_v8  ;;  %2585 = vmatprep.subr.bf16.mxu1 %v14669_v9  ;;  %v14685_v20 = vld [vmem:[#allocation2 + $0x98c] ss:$20 sps:$4 sm:$0xff]   ;;  %v14687_v21 = vld [vmem:[#allocation2 + $0x994] ss:$20 sps:$4 sm:$0xff]   ;;  %v14690_v23 = vld [vmem:[#allocation2 + $0x990] ss:$20 sps:$4 sm:$0xff]  }
  0x32   : > { %v14689_v22 = vld [vmem:[#allocation2 + $0x988] ss:$20 sps:$4 sm:$0xff]   ;;  %v14695_v26 = vld [vmem:[#allocation2 + $0x9b0] ss:$20 sps:$4 sm:$0xff]   ;;  %v14696_v27 = vld [vmem:[#allocation2 + $0x9b8] ss:$20 sps:$4 sm:$0xff]  }
  0x33   : > { %v14691_v24 = vld [vmem:[#allocation2 + $0x9b4] ss:$20 sps:$4 sm:$0xff]   ;;  %v14693_v25 = vld [vmem:[#allocation2 + $0x9bc] ss:$20 sps:$4 sm:$0xff]   ;;  %v14699_v29 = vld [vmem:[#allocation2 + $0x9e4] ss:$20 sps:$4 sm:$0xff]  }
  0x34   : > { %2414 = vmatpush1.bf16.msra.mxu0 %v14671_v10  ;;  %2586 = vmatpush1.bf16.msra.mxu1 %v14672_v11  ;;  %v14697_v28 = vld [vmem:[#allocation2 + $0x9dc] ss:$20 sps:$4 sm:$0xff]   ;;  %v14701_v30 = vld [vmem:[#allocation2 + $0x9d8] ss:$20 sps:$4 sm:$0xff]   ;;  %v14702_v31 = vld [vmem:[#allocation2 + $0x9e0] ss:$20 sps:$4 sm:$0xff]  }
  0x35   : > { %2415 = vmatprep.subr.bf16.mxu0 %v14673_v12  ;;  %2587 = vmatprep.subr.bf16.mxu1 %v14675_v13  ;;  %v14703_v32 = vld [vmem:[#allocation2 + $0xa04] ss:$20 sps:$4 sm:$0xff]   ;;  %p176_p2 = scmp.lt.s32.totalorder %s16723_s13, 1  ;;  %v14705_v33 = vld [vmem:[#allocation2 + $0xa0c] ss:$20 sps:$4 sm:$0xff]   ;;  %vm16693_vm0 = vmmov 0  }
  0x36   : > { %v14707_v34 = vld [vmem:[#allocation2 + $0xa00] ss:$20 sps:$4 sm:$0xff]   ;;  %v14708_v35 = vld [vmem:[#allocation2 + $0xa08] ss:$20 sps:$4 sm:$0xff]   ;;  %v14714_v39 = vld [vmem:[#allocation2 + $0xa30] ss:$20 sps:$4 sm:$0xff]  }
  0x37   : > { %v14709_v36 = vld [vmem:[#allocation2 + $0xa2c] ss:$20 sps:$4 sm:$0xff]   ;;  %s17238_s13 = smov (!%p176_p2, %s16723_s13), 1  ;;  %v14711_v37 = vld [vmem:[#allocation2 + $0xa34] ss:$20 sps:$4 sm:$0xff]   ;;  %vm11889_vm1 = vcmask 1041408  }
  0x38   : > { %2416 = vmatpush1.bf16.msra.mxu0 %v14677_v14  ;;  %2588 = vmatpush1.bf16.msra.mxu1 %v14678_v15  ;;  %v14713_v38 = vld [vmem:[#allocation2 + $0xa28] ss:$20 sps:$4 sm:$0xff]   ;;  %s14626_s30 = smul.u32 56, %s17238_s13  ;;  %v14719_v42 = vld [vmem:[#allocation2 + $0xa50] ss:$20 sps:$4 sm:$0xff]   ;;  %vm16694_vm2 = vmmov 1  }
  0x39   : > { %2417 = vmatprep.subr.bf16.mxu0 %v14679_v16  ;;  %2589 = vmatprep.subr.bf16.mxu1 %v14681_v17  ;;  %v14715_v40 = vld [vmem:[#allocation2 + $0xa54] ss:$20 sps:$4 sm:$0xff]   ;;  %v14717_v41 = vld [vmem:[#allocation2 + $0xa5c] ss:$20 sps:$4 sm:$0xff]   ;;  %v14720_v43 = vld [vmem:[#allocation2 + $0xa58] ss:$20 sps:$4 sm:$0xff]  }
  0x3a   : > { %v14721_v44 = vld [vmem:[#allocation2 + $0xa7c] ss:$20 sps:$4 sm:$0xff]   ;;  %s16770_s6 = scalar_lea.vmem %s17224_s0, %s14626_s30  ;;  %v14723_v45 = vld [vmem:[#allocation2 + $0xa84] ss:$20 sps:$4 sm:$0xff]   ;;  %v14726_v48 = vld [vmem:[#allocation2 + $0xa80] ss:$20 sps:$4 sm:$0xff]  }
  0x3b   : > { %v14725_v46 = vld [vmem:[#allocation2 + $0xa78] ss:$20 sps:$4 sm:$0xff]   ;;  %v16773_v47 = vld [vmem:[%s16770_s6 + $0x4] ss:$28 sps:$4 sm:$0x7f]   ;;  %vm17161_vm3 = vmpackc.low %vm11889_vm1, %vm16694_vm2  ;;  %vm11885_vm5 = vcmask 80896  }
  0x3c   : > { %2418 = vmatpush1.bf16.msra.mxu0 %v14683_v18  ;;  %2590 = vmatpush1.bf16.msra.mxu1 %v14684_v19  ;;  %v14727_v49 = vld [vmem:[#allocation2 + $0xaa4] ss:$20 sps:$4 sm:$0xff]   ;;  %v14729_v50 = vld [vmem:[#allocation2 + $0xaac] ss:$20 sps:$4 sm:$0xff]   ;;  %v905_v51 = vshrl.u32 %v16773_v47, 16  ;;  %v907_v52 = vshll.u32 %v16773_v47, 16 }
  0x3d   : > { %2419 = vmatprep.subr.bf16.mxu0 %v14685_v20  ;;  %2591 = vmatprep.subr.bf16.mxu1 %v14687_v21  ;;  %v14731_v53 = vld [vmem:[#allocation2 + $0xaa0] ss:$20 sps:$4 sm:$0xff]   ;;  %v14732_v54 = vld [vmem:[#allocation2 + $0xaa8] ss:$20 sps:$4 sm:$0xff]   ;;  %v14738_v61 = vld [vmem:[#allocation2 + $0xad0] ss:$20 sps:$4 sm:$0xff]  }
  0x3e   : > { %v909_v55 = vrot.slane %v907_v52, 1  ;;  %v14733_v56 = vld [vmem:[#allocation2 + $0xacc] ss:$20 sps:$4 sm:$0xff]   ;;  %v14735_v57 = vld [vmem:[#allocation2 + $0xad4] ss:$20 sps:$4 sm:$0xff]   ;;  %s16696_s7 = smov 64  }
  0x3f   : > { %v14737_v59 = vld [vmem:[#allocation2 + $0xac8] ss:$20 sps:$4 sm:$0xff]   ;;  %v14743_v0 = vld [vmem:[#allocation2 + $0xaf0] ss:$20 sps:$4 sm:$0xff]   ;;  %v14744_v2 = vld [vmem:[#allocation2 + $0xaf8] ss:$20 sps:$4 sm:$0xff]  }
  0x40   : > { %2420 = vmatpush1.bf16.msra.mxu0 %v14689_v22  ;;  %2592 = vmatpush1.bf16.msra.mxu1 %v14690_v23  ;;  %v16781_v58 = vor.u32 %v909_v55, %v905_v51  ;;  %v16786_v60 = vld [vmem:[%s16770_s6] ss:$28 sps:$4 sm:$0x7f]   ;;  %v14739_v62 = vld [vmem:[#allocation2 + $0xaf4] ss:$20 sps:$4 sm:$0xff]   ;;  %s14627_s10 = smul.u32 12, %s17238_s13 }
  0x41   : > { %2421 = vmatprep.subr.bf16.mxu0 %v14691_v24  ;;  %2593 = vmatprep.subr.bf16.mxu1 %v14693_v25  ;;  %v14741_v63 = vld [vmem:[#allocation2 + $0xafc] ss:$20 sps:$4 sm:$0xff]   ;;  %v900_v1 = vshll.u32 %v16786_v60, 16  ;;  %v14747_v4 = vld [vmem:[#allocation2 + $0xb24] ss:$20 sps:$4 sm:$0xff]   ;;  %v898_v6 = vshrl.u32 %v16786_v60, 16 }
  0x42   : > { %2441 = vmatprep.mubr.bf16.mxu0 %v16781_v58  ;;  %2613 = vmatprep.mubr.bf16.mxu1 %v16781_v58  ;;  %v14745_v3 = vld [vmem:[#allocation2 + $0xb1c] ss:$20 sps:$4 sm:$0xff]   ;;  %v14749_v5 = vld [vmem:[#allocation2 + $0xb18] ss:$20 sps:$4 sm:$0xff]   ;;  %v14750_v8 = vld [vmem:[#allocation2 + $0xb20] ss:$20 sps:$4 sm:$0xff]   ;;  %s17211_s15 = scalar_lea.vmem %s17227_s3, %s14627_s10 }
  0x43   : > { %v902_v7 = vrot.slane %v900_v1, 1  ;;  %v14755_v9 = vld [vmem:[#allocation2 + $0xb44] ss:$20 sps:$4 sm:$0xff]   ;;  %v14758_v10 = vld [vmem:[#allocation2 + $0xb4c] ss:$20 sps:$4 sm:$0xff]   ;;  %vm12405_vm8 = vcmask 518144  }
  0x44   : > { %2422 = vmatpush1.bf16.msra.mxu0 %v14695_v26  ;;  %2594 = vmatpush1.bf16.msra.mxu1 %v14696_v27  ;;  %v14753_v11 = vld [vmem:[#allocation2 + $0xb40] ss:$20 sps:$4 sm:$0xff]   ;;  %v14756_v13 = vld [vmem:[#allocation2 + $0xb48] ss:$20 sps:$4 sm:$0xff]   ;;  %v14763_v17 = vld [vmem:[#allocation2 + $0xb70] ss:$20 sps:$4 sm:$0xff]  }
  0x45   : > { %2423 = vmatprep.subr.bf16.mxu0 %v14697_v28  ;;  %2595 = vmatprep.subr.bf16.mxu1 %v14699_v29  ;;  %v16794_v12 = vor.u32 %v902_v7, %v898_v6  ;;  %v14762_v14 = vld [vmem:[#allocation2 + $0xb6c] ss:$20 sps:$4 sm:$0xff]   ;;  %v14765_v15 = vld [vmem:[#allocation2 + $0xb74] ss:$20 sps:$4 sm:$0xff]   ;;  %v14771_v19 = vld [vmem:[#allocation2 + $0xb9c] ss:$20 sps:$4 sm:$0xff]  }
  0x46   : > { %v14760_v16 = vld [vmem:[#allocation2 + $0xb68] ss:$20 sps:$4 sm:$0xff]   ;;  %v14766_v20 = vld [vmem:[#allocation2 + $0xb90] ss:$20 sps:$4 sm:$0xff]   ;;  %v14769_v21 = vld [vmem:[#allocation2 + $0xb98] ss:$20 sps:$4 sm:$0xff]  }
  0x47   : > { %v14768_v18 = vld [vmem:[#allocation2 + $0xb94] ss:$20 sps:$4 sm:$0xff]   ;;  %v14774_v22 = vld [vmem:[#allocation2 + $0xbbc] ss:$20 sps:$4 sm:$0xff]   ;;  %v14777_v23 = vld [vmem:[#allocation2 + $0xbc4] ss:$20 sps:$4 sm:$0xff]  }
  0x48   : > { %2424 = vmatpush1.bf16.msra.mxu0 %v14701_v30  ;;  %2596 = vmatpush1.bf16.msra.mxu1 %v14702_v31  ;;  %v14772_v24 = vld [vmem:[#allocation2 + $0xbb8] ss:$20 sps:$4 sm:$0xff]   ;;  %v14775_v25 = vld [vmem:[#allocation2 + $0xbc0] ss:$20 sps:$4 sm:$0xff]   ;;  %v14781_v29 = vld [vmem:[#allocation2 + $0xbe8] ss:$20 sps:$4 sm:$0xff]  }
  0x49   : > { %2425 = vmatprep.subr.bf16.mxu0 %v14703_v32  ;;  %2597 = vmatprep.subr.bf16.mxu1 %v14705_v33  ;;  %v14780_v26 = vld [vmem:[#allocation2 + $0xbe4] ss:$20 sps:$4 sm:$0xff]   ;;  %v14783_v27 = vld [vmem:[#allocation2 + $0xbec] ss:$20 sps:$4 sm:$0xff]   ;;  %v14789_v31 = vld [vmem:[#allocation2 + $0xc14] ss:$20 sps:$4 sm:$0xff]  }
  0x4a   : > { %v14778_v28 = vld [vmem:[#allocation2 + $0xbe0] ss:$20 sps:$4 sm:$0xff]   ;;  %v14784_v32 = vld [vmem:[#allocation2 + $0xc08] ss:$20 sps:$4 sm:$0xff]   ;;  %v14787_v33 = vld [vmem:[#allocation2 + $0xc10] ss:$20 sps:$4 sm:$0xff]  }
  0x4b   : > { %v14786_v30 = vld [vmem:[#allocation2 + $0xc0c] ss:$20 sps:$4 sm:$0xff]   ;;  %v14813_v55 = vld [vmem:[#allocation2 + $0xcb4] ss:$20 sps:$4 sm:$0xff]   ;;  %vm12396_vm7 = vsmask.f32 2304 }
  0x4c   : > { %2426 = vmatpush1.bf16.msra.mxu0 %v14707_v34  ;;  %2598 = vmatpush1.bf16.msra.mxu1 %v14708_v35  ;;  %v14792_v34 = vld [vmem:[#allocation2 + $0xc34] ss:$20 sps:$4 sm:$0xff]   ;;  %v14795_v35 = vld [vmem:[#allocation2 + $0xc3c] ss:$20 sps:$4 sm:$0xff]   ;;  %v14831_v7 = vld [vmem:[#allocation2 + $0xd2c] ss:$20 sps:$4 sm:$0xff]  }
  0x4d   : > { %2427 = vmatprep.subr.bf16.mxu0 %v14709_v36  ;;  %2599 = vmatprep.subr.bf16.mxu1 %v14711_v37  ;;  %v14790_v36 = vld [vmem:[#allocation2 + $0xc30] ss:$20 sps:$4 sm:$0xff]   ;;  %v14793_v37 = vld [vmem:[#allocation2 + $0xc38] ss:$20 sps:$4 sm:$0xff]   ;;  %v15855_v47 = vld [vmem:[#allocation2 + $0x1a94] ss:$20 sps:$4 sm:$0xff]  }
  0x4e   : > { %v15937_v60 = vld [vmem:[#allocation2 + $0x1cc0] ss:$20 sps:$4 sm:$0xff]   ;;  %vm12406_vm9 = vmand %vm12405_vm8, %vm12396_vm7  ;;  %vm12350_vm10 = vcmask 523264   ;;  %vm12395_vm11 = vcmask 1042432   ;;  %vm12398_vm12 = vcmask 1046532  }
  0x4f   : > { %vm12399_vm13 = vsmask.f32 6400  ;;  %vm12397_vm14 = vmand %vm12395_vm11, %vm12396_vm7 }
  0x50   : > { %2428 = vmatpush1.bf16.msra.mxu0 %v14713_v38  ;;  %2600 = vmatpush1.bf16.msra.mxu1 %v14714_v39  ;;  %v16799_v38 = vld [vmem:[%s16770_s6 + $0xc] ss:$28 sps:$4 sm:$0x7f]   ;;  %v14798_v39 = vld [vmem:[#allocation2 + $0xc5c] ss:$20 sps:$4 sm:$0xff]   ;;  %vm12400_vm15 = vmand %vm12398_vm12, %vm12399_vm13 }
  0x51   : > { %2429 = vmatprep.subr.bf16.mxu0 %v14715_v40  ;;  %2601 = vmatprep.subr.bf16.mxu1 %v14717_v41  ;;  %v14801_v40 = vld [vmem:[#allocation2 + $0xc64] ss:$20 sps:$4 sm:$0xff]   ;;  %v919_v41 = vshrl.u32 %v16799_v38, 16 }
  0x54   : > { %2430 = vmatpush1.bf16.msra.mxu0 %v14719_v42  ;;  %2602 = vmatpush1.bf16.msra.mxu1 %v14720_v43  ;;  %v921_v42 = vshll.u32 %v16799_v38, 16  ;;  %v14796_v43 = vld [vmem:[#allocation2 + $0xc58] ss:$20 sps:$4 sm:$0xff]   ;;  %v15943_v38 = vld [vmem:[#allocation2 + $0x1ce8] ss:$20 sps:$4 sm:$0xff]  }
  0x55   : > { %2431 = vmatprep.subr.bf16.mxu0 %v14721_v44  ;;  %2603 = vmatprep.subr.bf16.mxu1 %v14723_v45  ;;  %v14799_v44 = vld [vmem:[#allocation2 + $0xc60] ss:$20 sps:$4 sm:$0xff]   ;;  %v14804_v45 = vld [vmem:[#allocation2 + $0xc84] ss:$20 sps:$4 sm:$0xff]  }
  0x58   : > { %2432 = vmatpush1.bf16.msra.mxu0 %v14725_v46  ;;  %2604 = vmatpush1.bf16.msra.mxu1 %v14726_v48  ;;  %v923_v46 = vrot.slane %v921_v42, 1  ;;  %v14807_v48 = vld [vmem:[#allocation2 + $0xc8c] ss:$20 sps:$4 sm:$0xff]  }
  0x59   : > { %2433 = vmatprep.subr.bf16.mxu0 %v14727_v49  ;;  %2605 = vmatprep.subr.bf16.mxu1 %v14729_v50  ;;  %v14802_v50 = vld [vmem:[#allocation2 + $0xc80] ss:$20 sps:$4 sm:$0xff]  }
  0x5a   : > { %v16807_v49 = vor.u32 %v923_v46, %v919_v41  ;;  %v14873_v46 = vld [vmem:[#allocation2 + $0xe3c] ss:$20 sps:$4 sm:$0xff]  }
  0x5c   : > { %2434 = vmatpush1.bf16.msra.mxu0 %v14731_v53  ;;  %2606 = vmatpush1.bf16.msra.mxu1 %v14732_v54  ;;  %v14805_v53 = vld [vmem:[#allocation2 + $0xc88] ss:$20 sps:$4 sm:$0xff]   ;;  %v14810_v54 = vld [vmem:[#allocation2 + $0xcac] ss:$20 sps:$4 sm:$0xff]  }
  0x5d   : > { %2435 = vmatprep.subr.bf16.mxu0 %v14733_v56  ;;  %2607 = vmatprep.subr.bf16.mxu1 %v14735_v57  ;;  %v14808_v56 = vld [vmem:[#allocation2 + $0xca8] ss:$20 sps:$4 sm:$0xff]   ;;  %v14811_v57 = vld [vmem:[#allocation2 + $0xcb0] ss:$20 sps:$4 sm:$0xff]  }
  0x60   : > { %2436 = vmatpush1.bf16.msra.mxu0 %v14737_v59  ;;  %2608 = vmatpush1.bf16.msra.mxu1 %v14738_v61  ;;  %v14816_v59 = vld [vmem:[#allocation2 + $0xcd4] ss:$20 sps:$4 sm:$0xff]   ;;  %v14819_v61 = vld [vmem:[#allocation2 + $0xcdc] ss:$20 sps:$4 sm:$0xff]  }
  0x61   : > { %2437 = vmatprep.subr.bf16.mxu0 %v14739_v62  ;;  %2609 = vmatprep.subr.bf16.mxu1 %v14741_v63  ;;  %v14814_v62 = vld [vmem:[#allocation2 + $0xcd0] ss:$20 sps:$4 sm:$0xff]   ;;  %v14817_v63 = vld [vmem:[#allocation2 + $0xcd8] ss:$20 sps:$4 sm:$0xff]  }
  0x64   : > { %2438 = vmatpush1.bf16.msra.mxu0 %v14743_v0  ;;  %2610 = vmatpush1.bf16.msra.mxu1 %v14744_v2  ;;  %v14822_v0 = vld [vmem:[#allocation2 + $0xcfc] ss:$20 sps:$4 sm:$0xff]   ;;  %v14825_v2 = vld [vmem:[#allocation2 + $0xd04] ss:$20 sps:$4 sm:$0xff]  }
  0x65   : > { %2439 = vmatprep.subr.bf16.mxu0 %v14745_v3  ;;  %2611 = vmatprep.subr.bf16.mxu1 %v14747_v4  ;;  %v14820_v3 = vld [vmem:[#allocation2 + $0xcf8] ss:$20 sps:$4 sm:$0xff]   ;;  %v14823_v4 = vld [vmem:[#allocation2 + $0xd00] ss:$20 sps:$4 sm:$0xff]  }
  0x68   : > { %2440 = vmatpush1.bf16.msra.mxu0 %v14749_v5  ;;  %2612 = vmatpush1.bf16.msra.mxu1 %v14750_v8  ;;  %v14828_v5 = vld [vmem:[#allocation2 + $0xd24] ss:$20 sps:$4 sm:$0xff]   ;;  %v14826_v8 = vld [vmem:[#allocation2 + $0xd20] ss:$20 sps:$4 sm:$0xff]  }
  0x69   : > { %2452 = vmatprep.subr.bf16.mxu0 %v14755_v9  ;;  %2624 = vmatprep.subr.bf16.mxu1 %v14758_v10  ;;  %v14829_v9 = vld [vmem:[#allocation2 + $0xd28] ss:$20 sps:$4 sm:$0xff]   ;;  %v14834_v10 = vld [vmem:[#allocation2 + $0xd4c] ss:$20 sps:$4 sm:$0xff]  }
  0x6b   : > { %2442 = vmatmul.mubr.bf16.vlgmr.msra.gmra.mrb[0].mxu0 %v16794_v12  ;;  %2614 = vmatmul.mubr.bf16.vlgmr.msra.gmra.mrb[0].mxu1 %v16794_v12 }
  0x6c   : > { %2453 = vmatpush1.bf16.msra.mxu0 %v14753_v11  ;;  %2625 = vmatpush1.bf16.msra.mxu1 %v14756_v13  ;;  %v14837_v11 = vld [vmem:[#allocation2 + $0xd54] ss:$20 sps:$4 sm:$0xff]  }
  0x6d   : > { %2454 = vmatprep.subr.bf16.mxu0 %v14762_v14  ;;  %2626 = vmatprep.subr.bf16.mxu1 %v14765_v15  ;;  %v14832_v13 = vld [vmem:[#allocation2 + $0xd48] ss:$20 sps:$4 sm:$0xff]   ;;  %v14835_v15 = vld [vmem:[#allocation2 + $0xd50] ss:$20 sps:$4 sm:$0xff]  }
  0x6e   : > { %2484 = vmatprep.mubr.bf16.mxu0 %v16807_v49  ;;  %2656 = vmatprep.mubr.bf16.mxu1 %v16807_v49  ;;  %v16812_v14 = vld [vmem:[%s16770_s6 + $0x8] ss:$28 sps:$4 sm:$0x7f]  }
  0x70   : > { %2455 = vmatpush1.bf16.msra.mxu0 %v14760_v16  ;;  %2627 = vmatpush1.bf16.msra.mxu1 %v14763_v17  ;;  %v14840_v16 = vld [vmem:[#allocation2 + $0xd74] ss:$20 sps:$4 sm:$0xff]   ;;  %v14843_v17 = vld [vmem:[#allocation2 + $0xd7c] ss:$20 sps:$4 sm:$0xff]  }
  0x71   : > { %2456 = vmatprep.subr.bf16.mxu0 %v14768_v18  ;;  %2628 = vmatprep.subr.bf16.mxu1 %v14771_v19  ;;  %v14838_v18 = vld [vmem:[#allocation2 + $0xd70] ss:$20 sps:$4 sm:$0xff]   ;;  %v914_v19 = vshll.u32 %v16812_v14, 16 }
  0x74   : > { %2457 = vmatpush1.bf16.msra.mxu0 %v14766_v20  ;;  %2629 = vmatpush1.bf16.msra.mxu1 %v14769_v21  ;;  %v14841_v20 = vld [vmem:[#allocation2 + $0xd78] ss:$20 sps:$4 sm:$0xff]   ;;  %v14846_v21 = vld [vmem:[#allocation2 + $0xd9c] ss:$20 sps:$4 sm:$0xff]  }
  0x75   : > { %2458 = vmatprep.subr.bf16.mxu0 %v14774_v22  ;;  %2630 = vmatprep.subr.bf16.mxu1 %v14777_v23  ;;  %v14849_v22 = vld [vmem:[#allocation2 + $0xda4] ss:$20 sps:$4 sm:$0xff]  }
  0x76   : > { %v14844_v23 = vld [vmem:[#allocation2 + $0xd98] ss:$20 sps:$4 sm:$0xff]  }
  0x78   : > { %2459 = vmatpush1.bf16.msra.mxu0 %v14772_v24  ;;  %2631 = vmatpush1.bf16.msra.mxu1 %v14775_v25  ;;  %v912_v24 = vshrl.u32 %v16812_v14, 16  ;;  %v916_v25 = vrot.slane %v914_v19, 1  ;;  %v16033_v14 = vld [vmem:[#allocation2 + $0x1f40] ss:$20 sps:$4 sm:$0xff]  }
  0x79   : > { %2460 = vmatprep.subr.bf16.mxu0 %v14780_v26  ;;  %2632 = vmatprep.subr.bf16.mxu1 %v14783_v27  ;;  %v14847_v26 = vld [vmem:[#allocation2 + $0xda0] ss:$20 sps:$4 sm:$0xff]   ;;  %v14855_v27 = vld [vmem:[#allocation2 + $0xdc4] ss:$20 sps:$4 sm:$0xff]  }
  0x7c   : > { %2461 = vmatpush1.bf16.msra.mxu0 %v14778_v28  ;;  %2633 = vmatpush1.bf16.msra.mxu1 %v14781_v29  ;;  %v14858_v28 = vld [vmem:[#allocation2 + $0xdcc] ss:$20 sps:$4 sm:$0xff]  }
  0x7d   : > { %2462 = vmatprep.subr.bf16.mxu0 %v14786_v30  ;;  %2634 = vmatprep.subr.bf16.mxu1 %v14789_v31  ;;  %v14853_v29 = vld [vmem:[#allocation2 + $0xdc0] ss:$20 sps:$4 sm:$0xff]   ;;  %v16820_v30 = vor.u32 %v916_v25, %v912_v24  ;;  %v14856_v31 = vld [vmem:[#allocation2 + $0xdc8] ss:$20 sps:$4 sm:$0xff]  }
  0x7e   : > { %v14918_v25 = vld [vmem:[#allocation2 + $0xf5c] ss:$20 sps:$4 sm:$0xff]  }
  0x80   : > { %2463 = vmatpush1.bf16.msra.mxu0 %v14784_v32  ;;  %2635 = vmatpush1.bf16.msra.mxu1 %v14787_v33  ;;  %v14861_v32 = vld [vmem:[#allocation2 + $0xdec] ss:$20 sps:$4 sm:$0xff]   ;;  %v14864_v33 = vld [vmem:[#allocation2 + $0xdf4] ss:$20 sps:$4 sm:$0xff]  }
  0x81   : > { %2464 = vmatprep.subr.bf16.mxu0 %v14792_v34  ;;  %2636 = vmatprep.subr.bf16.mxu1 %v14795_v35  ;;  %v14859_v34 = vld [vmem:[#allocation2 + $0xde8] ss:$20 sps:$4 sm:$0xff]   ;;  %v14862_v35 = vld [vmem:[#allocation2 + $0xdf0] ss:$20 sps:$4 sm:$0xff]  }
  0x84   : > { %2465 = vmatpush1.bf16.msra.mxu0 %v14790_v36  ;;  %2637 = vmatpush1.bf16.msra.mxu1 %v14793_v37  ;;  %v14867_v36 = vld [vmem:[#allocation2 + $0xe14] ss:$20 sps:$4 sm:$0xff]   ;;  %v14870_v37 = vld [vmem:[#allocation2 + $0xe1c] ss:$20 sps:$4 sm:$0xff]  }
  0x85   : > { %2466 = vmatprep.subr.bf16.mxu0 %v14798_v39  ;;  %2638 = vmatprep.subr.bf16.mxu1 %v14801_v40  ;;  %v16825_v39 = vld [vmem:[%s16770_s6 + $0x14] ss:$28 sps:$4 sm:$0x7f]  }
  0x86   : > { %v14865_v40 = vld [vmem:[#allocation2 + $0xe10] ss:$20 sps:$4 sm:$0xff]  }
  0x88   : > { %2467 = vmatpush1.bf16.msra.mxu0 %v14796_v43  ;;  %2639 = vmatpush1.bf16.msra.mxu1 %v14799_v44  ;;  %v14868_v43 = vld [vmem:[#allocation2 + $0xe18] ss:$20 sps:$4 sm:$0xff]   ;;  %v933_v44 = vshrl.u32 %v16825_v39, 16 }
  0x89   : > { %2468 = vmatprep.subr.bf16.mxu0 %v14804_v45  ;;  %2640 = vmatprep.subr.bf16.mxu1 %v14807_v48  ;;  %v935_v45 = vshll.u32 %v16825_v39, 16  ;;  %v14876_v48 = vld [vmem:[#allocation2 + $0xe44] ss:$20 sps:$4 sm:$0xff]   ;;  %v16039_v39 = vld [vmem:[#allocation2 + $0x1f68] ss:$20 sps:$4 sm:$0xff]  }
  0x8c   : > { %2469 = vmatpush1.bf16.msra.mxu0 %v14802_v50  ;;  %2641 = vmatpush1.bf16.msra.mxu1 %v14805_v53  ;;  %v937_v50 = vrot.slane %v935_v45, 1  ;;  %v14871_v53 = vld [vmem:[#allocation2 + $0xe38] ss:$20 sps:$4 sm:$0xff]  }
  0x8d   : > { %2470 = vmatprep.subr.bf16.mxu0 %v14810_v54  ;;  %2642 = vmatprep.subr.bf16.mxu1 %v14813_v55  ;;  %v14874_v54 = vld [vmem:[#allocation2 + $0xe40] ss:$20 sps:$4 sm:$0xff]  }
  0x8e   : > { %v16833_v55 = vor.u32 %v937_v50, %v933_v44  ;;  %v14939_v50 = vld [vmem:[#allocation2 + $0xff4] ss:$20 sps:$4 sm:$0xff]  }
  0x90   : > { %2471 = vmatpush1.bf16.msra.mxu0 %v14808_v56  ;;  %2643 = vmatpush1.bf16.msra.mxu1 %v14811_v57  ;;  %v14879_v56 = vld [vmem:[#allocation2 + $0xe64] ss:$20 sps:$4 sm:$0xff]   ;;  %v14882_v57 = vld [vmem:[#allocation2 + $0xe6c] ss:$20 sps:$4 sm:$0xff]  }
  0x91   : > { %2472 = vmatprep.subr.bf16.mxu0 %v14816_v59  ;;  %2644 = vmatprep.subr.bf16.mxu1 %v14819_v61  ;;  %v14877_v59 = vld [vmem:[#allocation2 + $0xe60] ss:$20 sps:$4 sm:$0xff]   ;;  %v14880_v61 = vld [vmem:[#allocation2 + $0xe68] ss:$20 sps:$4 sm:$0xff]  }
  0x94   : > { %2473 = vmatpush1.bf16.msra.mxu0 %v14814_v62  ;;  %2645 = vmatpush1.bf16.msra.mxu1 %v14817_v63  ;;  %v14885_v62 = vld [vmem:[#allocation2 + $0xe8c] ss:$20 sps:$4 sm:$0xff]   ;;  %v14888_v63 = vld [vmem:[#allocation2 + $0xe94] ss:$20 sps:$4 sm:$0xff]  }
  0x95   : > { %2474 = vmatprep.subr.bf16.mxu0 %v14822_v0  ;;  %2646 = vmatprep.subr.bf16.mxu1 %v14825_v2  ;;  %v14883_v0 = vld [vmem:[#allocation2 + $0xe88] ss:$20 sps:$4 sm:$0xff]   ;;  %v14886_v2 = vld [vmem:[#allocation2 + $0xe90] ss:$20 sps:$4 sm:$0xff]  }
  0x98   : > { %2475 = vmatpush1.bf16.msra.mxu0 %v14820_v3  ;;  %2647 = vmatpush1.bf16.msra.mxu1 %v14823_v4  ;;  %v14891_v3 = vld [vmem:[#allocation2 + $0xeb4] ss:$20 sps:$4 sm:$0xff]   ;;  %v14894_v4 = vld [vmem:[#allocation2 + $0xebc] ss:$20 sps:$4 sm:$0xff]  }
  0x99   : > { %2476 = vmatprep.subr.bf16.mxu0 %v14828_v5  ;;  %2648 = vmatprep.subr.bf16.mxu1 %v14831_v7  ;;  %v14889_v5 = vld [vmem:[#allocation2 + $0xeb0] ss:$20 sps:$4 sm:$0xff]   ;;  %v14892_v7 = vld [vmem:[#allocation2 + $0xeb8] ss:$20 sps:$4 sm:$0xff]  }
  0x9c   : > { %2477 = vmatpush1.bf16.msra.mxu0 %v14826_v8  ;;  %2649 = vmatpush1.bf16.msra.mxu1 %v14829_v9  ;;  %v14897_v8 = vld [vmem:[#allocation2 + $0xedc] ss:$20 sps:$4 sm:$0xff]   ;;  %v14900_v9 = vld [vmem:[#allocation2 + $0xee4] ss:$20 sps:$4 sm:$0xff]  }
  0x9d   : > { %2478 = vmatprep.subr.bf16.mxu0 %v14834_v10  ;;  %2650 = vmatprep.subr.bf16.mxu1 %v14837_v11  ;;  %v14895_v10 = vld [vmem:[#allocation2 + $0xed8] ss:$20 sps:$4 sm:$0xff]   ;;  %v14898_v11 = vld [vmem:[#allocation2 + $0xee0] ss:$20 sps:$4 sm:$0xff]  }
  0xa0   : > { %2479 = vmatpush1.bf16.msra.mxu0 %v14832_v13  ;;  %2651 = vmatpush1.bf16.msra.mxu1 %v14835_v15  ;;  %v14903_v13 = vld [vmem:[#allocation2 + $0xf04] ss:$20 sps:$4 sm:$0xff]   ;;  %v14906_v15 = vld [vmem:[#allocation2 + $0xf0c] ss:$20 sps:$4 sm:$0xff]  }
  0xa1   : > { %2480 = vmatprep.subr.bf16.mxu0 %v14840_v16  ;;  %2652 = vmatprep.subr.bf16.mxu1 %v14843_v17  ;;  %v14901_v16 = vld [vmem:[#allocation2 + $0xf00] ss:$20 sps:$4 sm:$0xff]   ;;  %v14904_v17 = vld [vmem:[#allocation2 + $0xf08] ss:$20 sps:$4 sm:$0xff]  }
  0xa4   : > { %2481 = vmatpush1.bf16.msra.mxu0 %v14838_v18  ;;  %2653 = vmatpush1.bf16.msra.mxu1 %v14841_v20  ;;  %v14909_v18 = vld [vmem:[#allocation2 + $0xf2c] ss:$20 sps:$4 sm:$0xff]   ;;  %v14912_v20 = vld [vmem:[#allocation2 + $0xf34] ss:$20 sps:$4 sm:$0xff]  }
  0xa5   : > { %2482 = vmatprep.subr.bf16.mxu0 %v14846_v21  ;;  %2654 = vmatprep.subr.bf16.mxu1 %v14849_v22  ;;  %v14907_v21 = vld [vmem:[#allocation2 + $0xf28] ss:$20 sps:$4 sm:$0xff]   ;;  %v14910_v22 = vld [vmem:[#allocation2 + $0xf30] ss:$20 sps:$4 sm:$0xff]  }
  0xa8   : > { %2483 = vmatpush1.bf16.msra.mxu0 %v14844_v23  ;;  %2655 = vmatpush1.bf16.msra.mxu1 %v14847_v26  ;;  %v14915_v23 = vld [vmem:[#allocation2 + $0xf54] ss:$20 sps:$4 sm:$0xff]   ;;  %v14913_v26 = vld [vmem:[#allocation2 + $0xf50] ss:$20 sps:$4 sm:$0xff]  }
  0xa9   : > { %2495 = vmatprep.subr.bf16.mxu0 %v14855_v27  ;;  %2667 = vmatprep.subr.bf16.mxu1 %v14858_v28  ;;  %v14916_v27 = vld [vmem:[#allocation2 + $0xf58] ss:$20 sps:$4 sm:$0xff]   ;;  %v14921_v28 = vld [vmem:[#allocation2 + $0xf7c] ss:$20 sps:$4 sm:$0xff]  }
  0xab   : > { %2485 = vmatmul.mubr.bf16.vlgmr.msra.gmra.mrb[0].mxu0 %v16820_v30  ;;  %2657 = vmatmul.mubr.bf16.vlgmr.msra.gmra.mrb[0].mxu1 %v16820_v30 }
  0xac   : > { %2496 = vmatpush1.bf16.msra.mxu0 %v14853_v29  ;;  %2668 = vmatpush1.bf16.msra.mxu1 %v14856_v31  ;;  %v14924_v29 = vld [vmem:[#allocation2 + $0xf84] ss:$20 sps:$4 sm:$0xff]  }
  0xad   : > { %2497 = vmatprep.subr.bf16.mxu0 %v14861_v32  ;;  %2669 = vmatprep.subr.bf16.mxu1 %v14864_v33  ;;  %v14919_v31 = vld [vmem:[#allocation2 + $0xf78] ss:$20 sps:$4 sm:$0xff]   ;;  %v14922_v32 = vld [vmem:[#allocation2 + $0xf80] ss:$20 sps:$4 sm:$0xff]  }
  0xae   : > { %2527 = vmatprep.mubr.bf16.mxu0 %v16833_v55  ;;  %2699 = vmatprep.mubr.bf16.mxu1 %v16833_v55  ;;  %v14927_v33 = vld [vmem:[#allocation2 + $0xfa4] ss:$20 sps:$4 sm:$0xff]  }
  0xb0   : > { %2498 = vmatpush1.bf16.msra.mxu0 %v14859_v34  ;;  %2670 = vmatpush1.bf16.msra.mxu1 %v14862_v35  ;;  %v14930_v34 = vld [vmem:[#allocation2 + $0xfac] ss:$20 sps:$4 sm:$0xff]  }
  0xb1   : > { %2499 = vmatprep.subr.bf16.mxu0 %v14867_v36  ;;  %2671 = vmatprep.subr.bf16.mxu1 %v14870_v37  ;;  %v14925_v35 = vld [vmem:[#allocation2 + $0xfa0] ss:$20 sps:$4 sm:$0xff]   ;;  %v14928_v36 = vld [vmem:[#allocation2 + $0xfa8] ss:$20 sps:$4 sm:$0xff]  }
  0xb2   : > { %v14933_v37 = vld [vmem:[#allocation2 + $0xfcc] ss:$20 sps:$4 sm:$0xff]  }
  0xb4   : > { %2500 = vmatpush1.bf16.msra.mxu0 %v14865_v40  ;;  %2672 = vmatpush1.bf16.msra.mxu1 %v14868_v43  ;;  %v14936_v40 = vld [vmem:[#allocation2 + $0xfd4] ss:$20 sps:$4 sm:$0xff]   ;;  %v16838_v43 = vld [vmem:[%s16770_s6 + $0x10] ss:$28 sps:$4 sm:$0x7f]  }
  0xb5   : > { %2501 = vmatprep.subr.bf16.mxu0 %v14873_v46  ;;  %2673 = vmatprep.subr.bf16.mxu1 %v14876_v48  ;;  %v14931_v46 = vld [vmem:[#allocation2 + $0xfc8] ss:$20 sps:$4 sm:$0xff]   ;;  %v14934_v48 = vld [vmem:[#allocation2 + $0xfd0] ss:$20 sps:$4 sm:$0xff]  }
  0xb8   : > { %2502 = vmatpush1.bf16.msra.mxu0 %v14871_v53  ;;  %2674 = vmatpush1.bf16.msra.mxu1 %v14874_v54  ;;  %v14942_v53 = vld [vmem:[#allocation2 + $0xffc] ss:$20 sps:$4 sm:$0xff]  }
  0xb9   : > { %2503 = vmatprep.subr.bf16.mxu0 %v14879_v56  ;;  %2675 = vmatprep.subr.bf16.mxu1 %v14882_v57  ;;  %v14937_v54 = vld [vmem:[#allocation2 + $0xff0] ss:$20 sps:$4 sm:$0xff]   ;;  %v14940_v56 = vld [vmem:[#allocation2 + $0xff8] ss:$20 sps:$4 sm:$0xff]   ;;  %v928_v57 = vshll.u32 %v16838_v43, 16 }
  0xbc   : > { %2504 = vmatpush1.bf16.msra.mxu0 %v14877_v59  ;;  %2676 = vmatpush1.bf16.msra.mxu1 %v14880_v61  ;;  %v14945_v59 = vld [vmem:[#allocation2 + $0x101c] ss:$20 sps:$4 sm:$0xff]   ;;  %v14948_v61 = vld [vmem:[#allocation2 + $0x1024] ss:$20 sps:$4 sm:$0xff]  }
  0xbd   : > { %2505 = vmatprep.subr.bf16.mxu0 %v14885_v62  ;;  %2677 = vmatprep.subr.bf16.mxu1 %v14888_v63  ;;  %v14943_v62 = vld [vmem:[#allocation2 + $0x1018] ss:$20 sps:$4 sm:$0xff]   ;;  %v14946_v63 = vld [vmem:[#allocation2 + $0x1020] ss:$20 sps:$4 sm:$0xff]  }
  0xc0   : > { %2506 = vmatpush1.bf16.msra.mxu0 %v14883_v0  ;;  %2678 = vmatpush1.bf16.msra.mxu1 %v14886_v2  ;;  %v926_v0 = vshrl.u32 %v16838_v43, 16  ;;  %v930_v2 = vrot.slane %v928_v57, 1  ;;  %v16137_v43 = vld [vmem:[#allocation2 + $0x21ec] ss:$20 sps:$4 sm:$0xff]  }
  0xc1   : > { %2507 = vmatprep.subr.bf16.mxu0 %v14891_v3  ;;  %2679 = vmatprep.subr.bf16.mxu1 %v14894_v4  ;;  %v14954_v3 = vld [vmem:[#allocation2 + $0x1044] ss:$20 sps:$4 sm:$0xff]   ;;  %v14957_v4 = vld [vmem:[#allocation2 + $0x104c] ss:$20 sps:$4 sm:$0xff]  }
  0xc4   : > { %2508 = vmatpush1.bf16.msra.mxu0 %v14889_v5  ;;  %2680 = vmatpush1.bf16.msra.mxu1 %v14892_v7  ;;  %v14952_v5 = vld [vmem:[#allocation2 + $0x1040] ss:$20 sps:$4 sm:$0xff]   ;;  %v14955_v7 = vld [vmem:[#allocation2 + $0x1048] ss:$20 sps:$4 sm:$0xff]  }
  0xc5   : > { %2509 = vmatprep.subr.bf16.mxu0 %v14897_v8  ;;  %2681 = vmatprep.subr.bf16.mxu1 %v14900_v9  ;;  %v16846_v8 = vor.u32 %v930_v2, %v926_v0  ;;  %v14960_v9 = vld [vmem:[#allocation2 + $0x106c] ss:$20 sps:$4 sm:$0xff]  }
  0xc8   : > { %2510 = vmatpush1.bf16.msra.mxu0 %v14895_v10  ;;  %2682 = vmatpush1.bf16.msra.mxu1 %v14898_v11  ;;  %v14963_v10 = vld [vmem:[#allocation2 + $0x1074] ss:$20 sps:$4 sm:$0xff]  }
  0xc9   : > { %2511 = vmatprep.subr.bf16.mxu0 %v14903_v13  ;;  %2683 = vmatprep.subr.bf16.mxu1 %v14906_v15  ;;  %v14958_v11 = vld [vmem:[#allocation2 + $0x1068] ss:$20 sps:$4 sm:$0xff]   ;;  %v14961_v13 = vld [vmem:[#allocation2 + $0x1070] ss:$20 sps:$4 sm:$0xff]  }
  0xca   : > { %v14966_v15 = vld [vmem:[#allocation2 + $0x1094] ss:$20 sps:$4 sm:$0xff]  }
  0xcc   : > { %2512 = vmatpush1.bf16.msra.mxu0 %v14901_v16  ;;  %2684 = vmatpush1.bf16.msra.mxu1 %v14904_v17  ;;  %v14969_v16 = vld [vmem:[#allocation2 + $0x109c] ss:$20 sps:$4 sm:$0xff]  }
  0xcd   : > { %2513 = vmatprep.subr.bf16.mxu0 %v14909_v18  ;;  %2685 = vmatprep.subr.bf16.mxu1 %v14912_v20  ;;  %v14964_v17 = vld [vmem:[#allocation2 + $0x1090] ss:$20 sps:$4 sm:$0xff]   ;;  %v16691_v18 = vmov 0   ;;  %v14967_v20 = vld [vmem:[#allocation2 + $0x1098] ss:$20 sps:$4 sm:$0xff]  }
  0xd0   : > { %2514 = vmatpush1.bf16.msra.mxu0 %v14907_v21  ;;  %2686 = vmatpush1.bf16.msra.mxu1 %v14910_v22  ;;  %v14972_v21 = vld [vmem:[#allocation2 + $0x10bc] ss:$20 sps:$4 sm:$0xff]   ;;  %v14975_v22 = vld [vmem:[#allocation2 + $0x10c4] ss:$20 sps:$4 sm:$0xff]  }
  0xd1   : > { %2515 = vmatprep.subr.bf16.mxu0 %v14915_v23  ;;  %2687 = vmatprep.subr.bf16.mxu1 %v14918_v25  ;;  %v14970_v23 = vld [vmem:[#allocation2 + $0x10b8] ss:$20 sps:$4 sm:$0xff]   ;;  %v14973_v25 = vld [vmem:[#allocation2 + $0x10c0] ss:$20 sps:$4 sm:$0xff]  }
  0xd4   : > { %2516 = vmatpush1.bf16.msra.mxu0 %v14913_v26  ;;  %2688 = vmatpush1.bf16.msra.mxu1 %v14916_v27  ;;  %v14978_v26 = vld [vmem:[#allocation2 + $0x10e4] ss:$20 sps:$4 sm:$0xff]   ;;  %v14981_v27 = vld [vmem:[#allocation2 + $0x10ec] ss:$20 sps:$4 sm:$0xff]  }
  0xd5   : > { %2517 = vmatprep.subr.bf16.mxu0 %v14921_v28  ;;  %2689 = vmatprep.subr.bf16.mxu1 %v14924_v29  ;;  %v14976_v28 = vld [vmem:[#allocation2 + $0x10e0] ss:$20 sps:$4 sm:$0xff]   ;;  %v14979_v29 = vld [vmem:[#allocation2 + $0x10e8] ss:$20 sps:$4 sm:$0xff]  }
  0xd8   : > { %2518 = vmatpush1.bf16.msra.mxu0 %v14919_v31  ;;  %2690 = vmatpush1.bf16.msra.mxu1 %v14922_v32  ;;  %v14984_v31 = vld [vmem:[#allocation2 + $0x110c] ss:$20 sps:$4 sm:$0xff]   ;;  %v14987_v32 = vld [vmem:[#allocation2 + $0x1114] ss:$20 sps:$4 sm:$0xff]  }
  0xd9   : > { %2519 = vmatprep.subr.bf16.mxu0 %v14927_v33  ;;  %2691 = vmatprep.subr.bf16.mxu1 %v14930_v34  ;;  %v16853_v33 = vld [vmem:[%s16770_s6 + $0x18] ss:$28 sps:$4 sm:$0x7f]   ;;  %v14982_v34 = vld [vmem:[#allocation2 + $0x1108] ss:$20 sps:$4 sm:$0xff]  }
  0xdc   : > { %2520 = vmatpush1.bf16.msra.mxu0 %v14925_v35  ;;  %2692 = vmatpush1.bf16.msra.mxu1 %v14928_v36  ;;  %v14985_v35 = vld [vmem:[#allocation2 + $0x1110] ss:$20 sps:$4 sm:$0xff]   ;;  %v14990_v36 = vld [vmem:[#allocation2 + $0x1134] ss:$20 sps:$4 sm:$0xff]  }
  0xdd   : > { %2521 = vmatprep.subr.bf16.mxu0 %v14933_v37  ;;  %2693 = vmatprep.subr.bf16.mxu1 %v14936_v40  ;;  %v14993_v37 = vld [vmem:[#allocation2 + $0x113c] ss:$20 sps:$4 sm:$0xff]  }
  0xde   : > { %v14988_v40 = vld [vmem:[#allocation2 + $0x1130] ss:$20 sps:$4 sm:$0xff]  }
  0xe0   : > { %2522 = vmatpush1.bf16.msra.mxu0 %v14931_v46  ;;  %2694 = vmatpush1.bf16.msra.mxu1 %v14934_v48  ;;  %v14991_v46 = vld [vmem:[#allocation2 + $0x1138] ss:$20 sps:$4 sm:$0xff]   ;;  %v942_v48 = vshll.u32 %v16853_v33, 16 }
  0xe1   : > { %2523 = vmatprep.subr.bf16.mxu0 %v14939_v50  ;;  %2695 = vmatprep.subr.bf16.mxu1 %v14942_v53  ;;  %v14996_v50 = vld [vmem:[#allocation2 + $0x115c] ss:$20 sps:$4 sm:$0xff]   ;;  %v14999_v53 = vld [vmem:[#allocation2 + $0x1164] ss:$20 sps:$4 sm:$0xff]  }
  0xe4   : > { %2524 = vmatpush1.bf16.msra.mxu0 %v14937_v54  ;;  %2696 = vmatpush1.bf16.msra.mxu1 %v14940_v56  ;;  %v14994_v54 = vld [vmem:[#allocation2 + $0x1158] ss:$20 sps:$4 sm:$0xff]   ;;  %v14997_v56 = vld [vmem:[#allocation2 + $0x1160] ss:$20 sps:$4 sm:$0xff]  }
  0xe5   : > { %2525 = vmatprep.subr.bf16.mxu0 %v14945_v59  ;;  %2697 = vmatprep.subr.bf16.mxu1 %v14948_v61  ;;  %v940_v59 = vshrl.u32 %v16853_v33, 16  ;;  %v944_v61 = vrot.slane %v942_v48, 1  ;;  %v16179_v33 = vld [vmem:[#allocation2 + $0x1a50] ss:$20 sps:$4 sm:$0xff]  }
  0xe7   : > { %v16861_v2 = vor.u32 %v944_v61, %v940_v59  ;;  %v15036_v61 = vld [vmem:[#allocation2 + $0xf38] ss:$20 sps:$4 sm:$0xff]  }
  0xe8   : > { %2526 = vmatpush1.bf16.msra.mxu0 %v14943_v62  ;;  %2698 = vmatpush1.bf16.msra.mxu1 %v14946_v63  ;;  %v15000_v62 = vld [vmem:[#allocation2 + $0xa10] ss:$20 sps:$4 sm:$0xff]  }
  0xe9   : > { %2538 = vmatprep.subr.bf16.mxu0 %v14954_v3  ;;  %2710 = vmatprep.subr.bf16.mxu1 %v14957_v4  ;;  %v15001_v63 = vld [vmem:[#allocation2 + $0xc90] ss:$20 sps:$4 sm:$0xff]  }
  0xea   : > { %v15003_v3 = vld [vmem:[#allocation2 + $0x8d0] ss:$20 sps:$4 sm:$0xff]  }
  0xeb   : > { %2528 = vmatmul.mubr.bf16.vlgmr.msra.gmra.mrb[0].mxu0 %v16846_v8  ;;  %2700 = vmatmul.mubr.bf16.vlgmr.msra.gmra.mrb[0].mxu1 %v16846_v8  ;;  %v15004_v4 = vld [vmem:[#allocation2 + $0xb50] ss:$20 sps:$4 sm:$0xff]  }
  0xec   : > { %2539 = vmatpush1.bf16.msra.mxu0 %v14952_v5  ;;  %2711 = vmatpush1.bf16.msra.mxu1 %v14955_v7  ;;  %v15005_v5 = vld [vmem:[#allocation2 + $0xa38] ss:$20 sps:$4 sm:$0xff]  }
  0xed   : > { %2540 = vmatprep.subr.bf16.mxu0 %v14960_v9  ;;  %2712 = vmatprep.subr.bf16.mxu1 %v14963_v10  ;;  %v15006_v7 = vld [vmem:[#allocation2 + $0xcb8] ss:$20 sps:$4 sm:$0xff]  }
  0xee   : > { %2570 = vmatprep.mubr.bf16.mxu0 %v16691_v18  ;;  %2742 = vmatprep.mubr.bf16.mxu1 %v16691_v18  ;;  %v15007_v9 = vld [vmem:[#allocation2 + $0x8f8] ss:$20 sps:$4 sm:$0xff]  }
  0xef   : > { %v15008_v10 = vld [vmem:[#allocation2 + $0xb78] ss:$20 sps:$4 sm:$0xff]  }
  0xf0   : > { %2541 = vmatpush1.bf16.msra.mxu0 %v14958_v11  ;;  %2713 = vmatpush1.bf16.msra.mxu1 %v14961_v13  ;;  %v15009_v11 = vld [vmem:[#allocation2 + $0xa60] ss:$20 sps:$4 sm:$0xff]  }
  0xf1   : > { %2542 = vmatprep.subr.bf16.mxu0 %v14966_v15  ;;  %2714 = vmatprep.subr.bf16.mxu1 %v14969_v16  ;;  %v15010_v13 = vld [vmem:[#allocation2 + $0xce0] ss:$20 sps:$4 sm:$0xff]  }
  0xf2   : > { %v15011_v15 = vld [vmem:[#allocation2 + $0x920] ss:$20 sps:$4 sm:$0xff]  }
  0xf3   : > { %v15012_v16 = vld [vmem:[#allocation2 + $0xba0] ss:$20 sps:$4 sm:$0xff]  }
  0xf4   : > { %2543 = vmatpush1.bf16.msra.mxu0 %v14964_v17  ;;  %2715 = vmatpush1.bf16.msra.mxu1 %v14967_v20  ;;  %v15013_v17 = vld [vmem:[#allocation2 + $0xa88] ss:$20 sps:$4 sm:$0xff]  }
  0xf5   : > { %2544 = vmatprep.subr.bf16.mxu0 %v14972_v21  ;;  %2716 = vmatprep.subr.bf16.mxu1 %v14975_v22  ;;  %v15014_v20 = vld [vmem:[#allocation2 + $0xd08] ss:$20 sps:$4 sm:$0xff]  }
  0xf6   : > { %v15015_v21 = vld [vmem:[#allocation2 + $0x948] ss:$20 sps:$4 sm:$0xff]  }
  0xf7   : > { %v15016_v22 = vld [vmem:[#allocation2 + $0xbc8] ss:$20 sps:$4 sm:$0xff]  }
  0xf8   : > { %2545 = vmatpush1.bf16.msra.mxu0 %v14970_v23  ;;  %2717 = vmatpush1.bf16.msra.mxu1 %v14973_v25  ;;  %v15017_v23 = vld [vmem:[#allocation2 + $0xab0] ss:$20 sps:$4 sm:$0xff]  }
  0xf9   : > { %2546 = vmatprep.subr.bf16.mxu0 %v14978_v26  ;;  %2718 = vmatprep.subr.bf16.mxu1 %v14981_v27  ;;  %v15018_v25 = vld [vmem:[#allocation2 + $0xd30] ss:$20 sps:$4 sm:$0xff]   ;;  %v15022_v27 = vld [vmem:[#allocation2 + $0xd58] ss:$20 sps:$4 sm:$0xff]  }
  0xfa   : > { %v15019_v26 = vld [vmem:[#allocation2 + $0x970] ss:$20 sps:$4 sm:$0xff]  }
  0xfc   : > { %2547 = vmatpush1.bf16.msra.mxu0 %v14976_v28  ;;  %2719 = vmatpush1.bf16.msra.mxu1 %v14979_v29  ;;  %v15023_v28 = vld [vmem:[#allocation2 + $0x998] ss:$20 sps:$4 sm:$0xff]  }
  0xfd   : > { %2548 = vmatprep.subr.bf16.mxu0 %v14984_v31  ;;  %2720 = vmatprep.subr.bf16.mxu1 %v14987_v32  ;;  %v15024_v29 = vld [vmem:[#allocation2 + $0xc18] ss:$20 sps:$4 sm:$0xff]   ;;  %v15025_v31 = vld [vmem:[#allocation2 + $0xb00] ss:$20 sps:$4 sm:$0xff]  }
  0xfe   : > { %v15026_v32 = vld [vmem:[#allocation2 + $0xd80] ss:$20 sps:$4 sm:$0xff]  }
 0x100   : > { %2549 = vmatpush1.bf16.msra.mxu0 %v14982_v34  ;;  %2721 = vmatpush1.bf16.msra.mxu1 %v14985_v35  ;;  %v15027_v34 = vld [vmem:[#allocation2 + $0x9c0] ss:$20 sps:$4 sm:$0xff]  }
 0x101   : > { %2550 = vmatprep.subr.bf16.mxu0 %v14990_v36  ;;  %2722 = vmatprep.subr.bf16.mxu1 %v14993_v37  ;;  %v15028_v35 = vld [vmem:[#allocation2 + $0xc40] ss:$20 sps:$4 sm:$0xff]   ;;  %v15029_v36 = vld [vmem:[#allocation2 + $0xb28] ss:$20 sps:$4 sm:$0xff]  }
 0x102   : > { %v15030_v37 = vld [vmem:[#allocation2 + $0xda8] ss:$20 sps:$4 sm:$0xff]  }
 0x104   : > { %2551 = vmatpush1.bf16.msra.mxu0 %v14988_v40  ;;  %2723 = vmatpush1.bf16.msra.mxu1 %v14991_v46  ;;  %v15031_v40 = vld [vmem:[#allocation2 + $0x9e8] ss:$20 sps:$4 sm:$0xff]  }
 0x105   : > { %2552 = vmatprep.subr.bf16.mxu0 %v14996_v50  ;;  %2724 = vmatprep.subr.bf16.mxu1 %v14999_v53  ;;  %v15032_v46 = vld [vmem:[#allocation2 + $0xc68] ss:$20 sps:$4 sm:$0xff]   ;;  %v15033_v50 = vld [vmem:[#allocation2 + $0xf10] ss:$20 sps:$4 sm:$0xff]  }
 0x106   : > { %v15034_v53 = vld [vmem:[#allocation2 + $0xdd0] ss:$20 sps:$4 sm:$0xff]  }
 0x108   : > { %2553 = vmatpush1.bf16.msra.mxu0 %v14994_v54  ;;  %2725 = vmatpush1.bf16.msra.mxu1 %v14997_v56  ;;  %v15035_v54 = vld [vmem:[#allocation2 + $0x1050] ss:$20 sps:$4 sm:$0xff]   ;;  %v16692_v56 = vmov 0.0  }
 0x109   : > { %13917 = vmatprep.subr.bf16.mxu0 %v15000_v62  ;;  %13939 = vmatprep.subr.bf16.mxu1 %v15001_v63  ;;  %v15037_v62 = vld [vmem:[#allocation2 + $0xdf8] ss:$20 sps:$4 sm:$0xff]  }
 0x10a   : > { %v15038_v63 = vld [vmem:[#allocation2 + $0x1078] ss:$20 sps:$4 sm:$0xff]  }
 0x10b   : > { %2571 = vmatmul.mubr.bf16.vlgmr.msra.gmra.mrb[0].mxu0 %v16861_v2  ;;  %2743 = vmatmul.mubr.bf16.vlgmr.msra.gmra.mrb[0].mxu1 %v16861_v2 }
 0x10c   : > { %13918 = vmatpush3.bf16.msra.mxu0 %v15003_v3  ;;  %13940 = vmatpush3.bf16.msra.mxu1 %v15004_v4  ;;  %v15039_v3 = vld [vmem:[#allocation2 + $0xf60] ss:$20 sps:$4 sm:$0xff]  }
 0x10d   : > { %13919 = vmatprep.subr.bf16.mxu0 %v15005_v5  ;;  %13941 = vmatprep.subr.bf16.mxu1 %v15006_v7  ;;  %v15040_v4 = vld [vmem:[#allocation2 + $0xe20] ss:$20 sps:$4 sm:$0xff]   ;;  %v15043_v5 = vld [vmem:[#allocation2 + $0xe48] ss:$20 sps:$4 sm:$0xff]  }
 0x10e   : > { %2785 = vmatprep.mubr.bf16.mxu0 %v16781_v58  ;;  %2826 = vmatprep.mubr.bf16.mxu1 %v16807_v49  ;;  %v15020_v58 = vld [vmem:[#allocation2 + $0xbf0] ss:$20 sps:$4 sm:$0xff]   ;;  %v15021_v49 = vld [vmem:[#allocation2 + $0xad8] ss:$20 sps:$4 sm:$0xff]   ;;  %v15044_v7 = vld [vmem:[#allocation2 + $0x10c8] ss:$20 sps:$4 sm:$0xff]  }
 0x110   : > { %13920 = vmatpush3.bf16.msra.mxu0 %v15007_v9  ;;  %13942 = vmatpush3.bf16.msra.mxu1 %v15008_v10  ;;  %v15046_v9 = vld [vmem:[#allocation2 + $0xe70] ss:$20 sps:$4 sm:$0xff]  }
 0x111   : > { %13921 = vmatprep.subr.bf16.mxu0 %v15009_v11  ;;  %13943 = vmatprep.subr.bf16.mxu1 %v15010_v13  ;;  %v15047_v10 = vld [vmem:[#allocation2 + $0x10f0] ss:$20 sps:$4 sm:$0xff]   ;;  %v15048_v11 = vld [vmem:[#allocation2 + $0xfd8] ss:$20 sps:$4 sm:$0xff]  }
 0x112   : > { %v15049_v13 = vld [vmem:[#allocation2 + $0xe98] ss:$20 sps:$4 sm:$0xff]  }
 0x114   : > { %13922 = vmatpush3.bf16.msra.mxu0 %v15011_v15  ;;  %13944 = vmatpush3.bf16.msra.mxu1 %v15012_v16  ;;  %v15050_v15 = vld [vmem:[#allocation2 + $0x1118] ss:$20 sps:$4 sm:$0xff]   ;;  %v15051_v16 = vld [vmem:[#allocation2 + $0x1000] ss:$20 sps:$4 sm:$0xff]  }
 0x115   : > { %13923 = vmatprep.subr.bf16.mxu0 %v15013_v17  ;;  %13945 = vmatprep.subr.bf16.mxu1 %v15014_v20  ;;  %v15052_v17 = vld [vmem:[#allocation2 + $0xec0] ss:$20 sps:$4 sm:$0xff]  }
 0x116   : > { %v15053_v20 = vld [vmem:[#allocation2 + $0x1140] ss:$20 sps:$4 sm:$0xff]  }
 0x118   : > { %13924 = vmatpush3.bf16.msra.mxu0 %v15015_v21  ;;  %13946 = vmatpush3.bf16.msra.mxu1 %v15016_v22  ;;  %v15054_v21 = vld [vmem:[#allocation2 + $0x1028] ss:$20 sps:$4 sm:$0xff]  }
 0x119   : > { %13925 = vmatprep.subr.bf16.mxu0 %v15017_v23  ;;  %13947 = vmatprep.subr.bf16.mxu1 %v15018_v25  ;;  %v15055_v22 = vld [vmem:[#allocation2 + $0xee8] ss:$20 sps:$4 sm:$0xff]   ;;  %v15059_v25 = vld [vmem:[#allocation2 + $0x4] ss:$20 sps:$4 sm:$0xff]  }
 0x11a   : > { %v15056_v23 = vld [vmem:[#allocation2 + $0x1168] ss:$20 sps:$4 sm:$0xff]  }
 0x11c   : > { %13926 = vmatpush3.bf16.msra.mxu0 %v15019_v26  ;;  %13948 = vmatpush3.bf16.msra.mxu1 %v15020_v58  ;;  %v15062_v26 = vld [vmem:[#allocation2 + $0xc] ss:$20 sps:$4 sm:$0xff]  }
 0x11d   : > { %13927 = vmatprep.subr.bf16.mxu0 %v15021_v49  ;;  %13949 = vmatprep.subr.bf16.mxu1 %v15022_v27  ;;  %v15057_v58 = vld [vmem:[#allocation2] ss:$20 sps:$4 sm:$0xff]   ;;  %v15060_v49 = vld [vmem:[#allocation2 + $0x8] ss:$20 sps:$4 sm:$0xff]  }
 0x11e   : > { %v15065_v27 = vld [vmem:[#allocation2 + $0x2c] ss:$20 sps:$4 sm:$0xff]  }
 0x120   : > { %13928 = vmatpush3.bf16.msra.mxu0 %v15023_v28  ;;  %13950 = vmatpush3.bf16.msra.mxu1 %v15024_v29  ;;  %v15068_v28 = vld [vmem:[#allocation2 + $0x34] ss:$20 sps:$4 sm:$0xff]  }
 0x121   : > { %13929 = vmatprep.subr.bf16.mxu0 %v15025_v31  ;;  %13951 = vmatprep.subr.bf16.mxu1 %v15026_v32  ;;  %v15063_v29 = vld [vmem:[#allocation2 + $0x28] ss:$20 sps:$4 sm:$0xff]   ;;  %v15066_v31 = vld [vmem:[#allocation2 + $0x30] ss:$20 sps:$4 sm:$0xff]  }
 0x122   : > { %v15071_v32 = vld [vmem:[#allocation2 + $0x54] ss:$20 sps:$4 sm:$0xff]  }
 0x124   : > { %13930 = vmatpush3.bf16.msra.mxu0 %v15027_v34  ;;  %13952 = vmatpush3.bf16.msra.mxu1 %v15028_v35  ;;  %v15074_v34 = vld [vmem:[#allocation2 + $0x5c] ss:$20 sps:$4 sm:$0xff]   ;;  %v16625_v35 = vld [vmem:[%s16770_s6 + $0x4] ss:$28 sps:$4 sm:$0x7f]  }
 0x125   : > { %13931 = vmatprep.subr.bf16.mxu0 %v15029_v36  ;;  %13953 = vmatprep.subr.bf16.mxu1 %v15030_v37  ;;  %v15069_v36 = vld [vmem:[#allocation2 + $0x50] ss:$20 sps:$4 sm:$0xff]   ;;  %v15072_v37 = vld [vmem:[#allocation2 + $0x58] ss:$20 sps:$4 sm:$0xff]  }
 0x128   : > { %13932 = vmatpush3.bf16.msra.mxu0 %v15031_v40  ;;  %13954 = vmatpush3.bf16.msra.mxu1 %v15032_v46  ;;  %v15077_v40 = vld [vmem:[#allocation2 + $0x7c] ss:$20 sps:$4 sm:$0xff]   ;;  %v15078_v46 = vld [vmem:[#allocation2 + $0x80] ss:$20 sps:$4 sm:$0xff]  }
 0x129   : > { %13961 = vmatprep.subr.bf16.mxu0 %v15033_v50  ;;  %14298 = vmatprep.subr.bf16.mxu1 %v16692_v56  ;;  %v15083_v50 = vld [vmem:[#allocation2 + $0xa4] ss:$20 sps:$4 sm:$0xff]  }
 0x12b   : > { %2786 = vmatmul.mubr.bf16.vlgmr.msra.gmra.mrb[4].mxu0 %v16794_v12  ;;  %2827 = vmatmul.mubr.bf16.vlgmr.msra.gmra.mrb[4].mxu1 %v16820_v30  ;;  %v15041_v12 = vld [vmem:[#allocation2 + $0x10a0] ss:$20 sps:$4 sm:$0xff]   ;;  %v15042_v30 = vld [vmem:[#allocation2 + $0xf88] ss:$20 sps:$4 sm:$0xff]  }
 0x12c   : > { %13962 = vmatpush3.bf16.msra.mxu0 %v15034_v53  ;;  %14299 = vmatpush3.bf16.msra.mxu1 %v15035_v54  ;;  %v15086_v53 = vld [vmem:[#allocation2 + $0xac] ss:$20 sps:$4 sm:$0xff]  }
 0x12d   : > { %13963 = vmatprep.subr.bf16.mxu0 %v15036_v61  ;;  %14300 = vmatprep.subr.bf16.mxu1 %v16692_v56  ;;  %v15081_v54 = vld [vmem:[#allocation2 + $0xa0] ss:$20 sps:$4 sm:$0xff]   ;;  %v15084_v61 = vld [vmem:[#allocation2 + $0xa8] ss:$20 sps:$4 sm:$0xff]  }
 0x12e   : > { %2867 = vmatprep.mubr.bf16.mxu0 %v16833_v55  ;;  %14314 = vmatprep.mubr.msk.bf16.mxu1 %vm16693_vm0, %v16692_v56  ;;  %v15045_v55 = vld [vmem:[#allocation2 + $0xfb0] ss:$20 sps:$4 sm:$0xff]  }
 0x130   : > { %13964 = vmatpush3.bf16.msra.mxu0 %v15037_v62  ;;  %14301 = vmatpush3.bf16.msra.mxu1 %v15038_v63  ;;  %v15089_v62 = vld [vmem:[#allocation2 + $0xcc] ss:$20 sps:$4 sm:$0xff]   ;;  %v15092_v63 = vld [vmem:[#allocation2 + $0xd4] ss:$20 sps:$4 sm:$0xff]  }
 0x131   : > { %13965 = vmatprep.subr.bf16.mxu0 %v15039_v3  ;;  %14302 = vmatprep.subr.bf16.mxu1 %v16692_v56  ;;  %v15087_v3 = vld [vmem:[#allocation2 + $0xc8] ss:$20 sps:$4 sm:$0xff]  }
 0x134   : > { %13966 = vmatpush3.bf16.msra.mxu0 %v15040_v4  ;;  %14303 = vmatpush3.bf16.msra.mxu1 %v15041_v12  ;;  %v15090_v4 = vld [vmem:[#allocation2 + $0xd0] ss:$20 sps:$4 sm:$0xff]   ;;  %v15095_v12 = vld [vmem:[#allocation2 + $0xf4] ss:$20 sps:$4 sm:$0xff]  }
 0x135   : > { %13967 = vmatprep.subr.bf16.mxu0 %v15042_v30  ;;  %14304 = vmatprep.subr.bf16.mxu1 %v16692_v56  ;;  %v15098_v30 = vld [vmem:[#allocation2 + $0xfc] ss:$20 sps:$4 sm:$0xff]  }
 0x138   : > { %13968 = vmatpush3.bf16.msra.mxu0 %v15043_v5  ;;  %14305 = vmatpush3.bf16.msra.mxu1 %v15044_v7  ;;  %v15093_v5 = vld [vmem:[#allocation2 + $0xf0] ss:$20 sps:$4 sm:$0xff]   ;;  %v15096_v7 = vld [vmem:[#allocation2 + $0xf8] ss:$20 sps:$4 sm:$0xff]  }
 0x139   : > { %13969 = vmatprep.subr.bf16.mxu0 %v15045_v55  ;;  %14306 = vmatprep.subr.bf16.mxu1 %v16692_v56  ;;  %v15101_v55 = vld [vmem:[#allocation2 + $0x11c] ss:$20 sps:$4 sm:$0xff]  }
 0x13c   : > { %13970 = vmatpush3.bf16.msra.mxu0 %v15046_v9  ;;  %14307 = vmatpush3.bf16.msra.mxu1 %v15047_v10  ;;  %v15104_v9 = vld [vmem:[#allocation2 + $0x124] ss:$20 sps:$4 sm:$0xff]  }
 0x13d   : > { %13971 = vmatprep.subr.bf16.mxu0 %v15048_v11  ;;  %14308 = vmatprep.subr.bf16.mxu1 %v16692_v56  ;;  %v15099_v10 = vld [vmem:[#allocation2 + $0x118] ss:$20 sps:$4 sm:$0xff]   ;;  %v15102_v11 = vld [vmem:[#allocation2 + $0x120] ss:$20 sps:$4 sm:$0xff]  }
 0x140   : > { %13972 = vmatpush3.bf16.msra.mxu0 %v15049_v13  ;;  %14309 = vmatpush3.bf16.msra.mxu1 %v15050_v15  ;;  %v15107_v13 = vld [vmem:[#allocation2 + $0x144] ss:$20 sps:$4 sm:$0xff]   ;;  %v15110_v15 = vld [vmem:[#allocation2 + $0x14c] ss:$20 sps:$4 sm:$0xff]  }
 0x141   : > { %13973 = vmatprep.subr.bf16.mxu0 %v15051_v16  ;;  %14310 = vmatprep.subr.bf16.mxu1 %v16692_v56  ;;  %v15105_v16 = vld [vmem:[#allocation2 + $0x140] ss:$20 sps:$4 sm:$0xff]  }
 0x144   : > { %13974 = vmatpush3.bf16.msra.mxu0 %v15052_v17  ;;  %14311 = vmatpush3.bf16.msra.mxu1 %v15053_v20  ;;  %v15108_v17 = vld [vmem:[#allocation2 + $0x148] ss:$20 sps:$4 sm:$0xff]   ;;  %v15113_v20 = vld [vmem:[#allocation2 + $0x16c] ss:$20 sps:$4 sm:$0xff]  }
 0x145   : > { %13975 = vmatprep.subr.bf16.mxu0 %v15054_v21  ;;  %14312 = vmatprep.subr.bf16.mxu1 %v16692_v56  ;;  %v15116_v21 = vld [vmem:[#allocation2 + $0x174] ss:$20 sps:$4 sm:$0xff]  }
 0x148   : > { %13976 = vmatpush3.bf16.msra.mxu0 %v15055_v22  ;;  %14313 = vmatpush3.bf16.msra.mxu1 %v15056_v23  ;;  %v15111_v22 = vld [vmem:[#allocation2 + $0x168] ss:$20 sps:$4 sm:$0xff]   ;;  %v15114_v23 = vld [vmem:[#allocation2 + $0x170] ss:$20 sps:$4 sm:$0xff]  }
 0x149   : > { %4380 = vmatprep.subr.bf16.mxu0 %v15059_v25  ;;  %4552 = vmatprep.subr.bf16.mxu1 %v15062_v26  ;;  %v15119_v25 = vld [vmem:[#allocation2 + $0x194] ss:$20 sps:$4 sm:$0xff]   ;;  %v15122_v26 = vld [vmem:[#allocation2 + $0x19c] ss:$20 sps:$4 sm:$0xff]  }
 0x14b   : > { %2868 = vmatmul.mubr.bf16.vlgmr.msra.gmra.mrb[8].mxu0 %v16846_v8  ;;  %14315 = vmatmul.mubr.bf16.vlgmr.msra.gmra.mrb[8].mxu1 %v16861_v2  ;;  %v15080_v8 = vld [vmem:[#allocation2 + $0x84] ss:$20 sps:$4 sm:$0xff]  }
 0x14c   : > { %4381 = vmatpush1.bf16.msra.mxu0 %v15057_v58  ;;  %4553 = vmatpush1.bf16.msra.mxu1 %v15060_v49  ;;  %v15075_v2 = vld [vmem:[#allocation2 + $0x78] ss:$20 sps:$4 sm:$0xff]   ;;  %v15117_v58 = vld [vmem:[#allocation2 + $0x190] ss:$20 sps:$4 sm:$0xff]  }
 0x14d   : > { %4382 = vmatprep.subr.bf16.mxu0 %v15065_v27  ;;  %4554 = vmatprep.subr.bf16.mxu1 %v15068_v28  ;;  %v15120_v49 = vld [vmem:[#allocation2 + $0x198] ss:$20 sps:$4 sm:$0xff]   ;;  %v15125_v27 = vld [vmem:[#allocation2 + $0x1bc] ss:$20 sps:$4 sm:$0xff]  }
 0x14e   : > { %4412 = vmatprep.mubr.bf16.mxu0 %v16625_v35  ;;  %4584 = vmatprep.mubr.bf16.mxu1 %v16625_v35  ;;  %v15128_v28 = vld [vmem:[#allocation2 + $0x1c4] ss:$20 sps:$4 sm:$0xff]   ;;  %v15129_v35 = vld [vmem:[#allocation2 + $0x1e0] ss:$20 sps:$4 sm:$0xff]  }
 0x150   : > { %4383 = vmatpush1.bf16.msra.mxu0 %v15063_v29  ;;  %4555 = vmatpush1.bf16.msra.mxu1 %v15066_v31  ;;  %v15123_v29 = vld [vmem:[#allocation2 + $0x1b8] ss:$20 sps:$4 sm:$0xff]   ;;  %v15126_v31 = vld [vmem:[#allocation2 + $0x1c0] ss:$20 sps:$4 sm:$0xff]  }
 0x151   : > { %4384 = vmatprep.subr.bf16.mxu0 %v15071_v32  ;;  %4556 = vmatprep.subr.bf16.mxu1 %v15074_v34  ;;  %v15131_v32 = vld [vmem:[#allocation2 + $0x1e4] ss:$20 sps:$4 sm:$0xff]   ;;  %v15134_v34 = vld [vmem:[#allocation2 + $0x1ec] ss:$20 sps:$4 sm:$0xff]  }
 0x154   : > { %4385 = vmatpush1.bf16.msra.mxu0 %v15069_v36  ;;  %4557 = vmatpush1.bf16.msra.mxu1 %v15072_v37  ;;  %v15132_v36 = vld [vmem:[#allocation2 + $0x1e8] ss:$20 sps:$4 sm:$0xff]   ;;  %v15137_v37 = vld [vmem:[#allocation2 + $0x20c] ss:$20 sps:$4 sm:$0xff]  }
 0x155   : > { %4386 = vmatprep.subr.bf16.mxu0 %v15077_v40  ;;  %4558 = vmatprep.subr.bf16.mxu1 %v15080_v8  ;;  %v15140_v40 = vld [vmem:[#allocation2 + $0x214] ss:$20 sps:$4 sm:$0xff]  }
 0x156   : > { %v15135_v8 = vld [vmem:[#allocation2 + $0x208] ss:$20 sps:$4 sm:$0xff]  }
 0x158   : > { %4387 = vmatpush1.bf16.msra.mxu0 %v15075_v2  ;;  %4559 = vmatpush1.bf16.msra.mxu1 %v15078_v46  ;;  %v15138_v2 = vld [vmem:[#allocation2 + $0x210] ss:$20 sps:$4 sm:$0xff]   ;;  %v15143_v46 = vld [vmem:[#allocation2 + $0x234] ss:$20 sps:$4 sm:$0xff]  }
 0x159   : > { %4388 = vmatprep.subr.bf16.mxu0 %v15083_v50  ;;  %4560 = vmatprep.subr.bf16.mxu1 %v15086_v53  ;;  %v15146_v50 = vld [vmem:[#allocation2 + $0x23c] ss:$20 sps:$4 sm:$0xff]  }
 0x15a   : > { %v15141_v53 = vld [vmem:[#allocation2 + $0x230] ss:$20 sps:$4 sm:$0xff]  }
 0x15c   : > { %4389 = vmatpush1.bf16.msra.mxu0 %v15081_v54  ;;  %4561 = vmatpush1.bf16.msra.mxu1 %v15084_v61  ;;  %v15144_v54 = vld [vmem:[#allocation2 + $0x238] ss:$20 sps:$4 sm:$0xff]   ;;  %v15149_v61 = vld [vmem:[#allocation2 + $0x25c] ss:$20 sps:$4 sm:$0xff]  }
 0x15d   : > { %4390 = vmatprep.subr.bf16.mxu0 %v15089_v62  ;;  %4562 = vmatprep.subr.bf16.mxu1 %v15092_v63  ;;  %v15152_v62 = vld [vmem:[#allocation2 + $0x264] ss:$20 sps:$4 sm:$0xff]  }
 0x15e   : > { %v15147_v63 = vld [vmem:[#allocation2 + $0x258] ss:$20 sps:$4 sm:$0xff]  }
 0x160   : > { %4391 = vmatpush1.bf16.msra.mxu0 %v15087_v3  ;;  %4563 = vmatpush1.bf16.msra.mxu1 %v15090_v4  ;;  %v15150_v3 = vld [vmem:[#allocation2 + $0x260] ss:$20 sps:$4 sm:$0xff]   ;;  %v15155_v4 = vld [vmem:[#allocation2 + $0x284] ss:$20 sps:$4 sm:$0xff]  }
 0x161   : > { %4392 = vmatprep.subr.bf16.mxu0 %v15095_v12  ;;  %4564 = vmatprep.subr.bf16.mxu1 %v15098_v30  ;;  %v15158_v12 = vld [vmem:[#allocation2 + $0x28c] ss:$20 sps:$4 sm:$0xff]  }
 0x162   : > { %v15153_v30 = vld [vmem:[#allocation2 + $0x280] ss:$20 sps:$4 sm:$0xff]  }
 0x164   : > { %4393 = vmatpush1.bf16.msra.mxu0 %v15093_v5  ;;  %4565 = vmatpush1.bf16.msra.mxu1 %v15096_v7  ;;  %v15156_v5 = vld [vmem:[#allocation2 + $0x288] ss:$20 sps:$4 sm:$0xff]   ;;  %v15161_v7 = vld [vmem:[#allocation2 + $0x2ac] ss:$20 sps:$4 sm:$0xff]  }
 0x165   : > { %4394 = vmatprep.subr.bf16.mxu0 %v15101_v55  ;;  %4566 = vmatprep.subr.bf16.mxu1 %v15104_v9  ;;  %v15164_v55 = vld [vmem:[#allocation2 + $0x2b4] ss:$20 sps:$4 sm:$0xff]   ;;  %v16626_v9 = vld [vmem:[%s16770_s6] ss:$28 sps:$4 sm:$0x7f]  }
 0x168   : > { %4395 = vmatpush1.bf16.msra.mxu0 %v15099_v10  ;;  %4567 = vmatpush1.bf16.msra.mxu1 %v15102_v11  ;;  %v15159_v10 = vld [vmem:[#allocation2 + $0x2a8] ss:$20 sps:$4 sm:$0xff]   ;;  %v15162_v11 = vld [vmem:[#allocation2 + $0x2b0] ss:$20 sps:$4 sm:$0xff]  }
 0x169   : > { %4396 = vmatprep.subr.bf16.mxu0 %v15107_v13  ;;  %4568 = vmatprep.subr.bf16.mxu1 %v15110_v15  ;;  %v15167_v13 = vld [vmem:[#allocation2 + $0x2d4] ss:$20 sps:$4 sm:$0xff]   ;;  %v15170_v15 = vld [vmem:[#allocation2 + $0x2dc] ss:$20 sps:$4 sm:$0xff]  }
 0x16c   : > { %4397 = vmatpush1.bf16.msra.mxu0 %v15105_v16  ;;  %4569 = vmatpush1.bf16.msra.mxu1 %v15108_v17  ;;  %v16627_v16 = vld [vmem:[%s16770_s6 + $0xc] ss:$28 sps:$4 sm:$0x7f]   ;;  %v15165_v17 = vld [vmem:[#allocation2 + $0x2d0] ss:$20 sps:$4 sm:$0xff]  }
 0x16d   : > { %4398 = vmatprep.subr.bf16.mxu0 %v15113_v20  ;;  %4570 = vmatprep.subr.bf16.mxu1 %v15116_v21  ;;  %v15168_v20 = vld [vmem:[#allocation2 + $0x2d8] ss:$20 sps:$4 sm:$0xff]   ;;  %v15173_v21 = vld [vmem:[#allocation2 + $0x2fc] ss:$20 sps:$4 sm:$0xff]  }
 0x170   : > { %4399 = vmatpush1.bf16.msra.mxu0 %v15111_v22  ;;  %4571 = vmatpush1.bf16.msra.mxu1 %v15114_v23  ;;  %v15176_v22 = vld [vmem:[#allocation2 + $0x304] ss:$20 sps:$4 sm:$0xff]  }
 0x171   : > { %4400 = vmatprep.subr.bf16.mxu0 %v15119_v25  ;;  %4572 = vmatprep.subr.bf16.mxu1 %v15122_v26  ;;  %v15171_v23 = vld [vmem:[#allocation2 + $0x2f8] ss:$20 sps:$4 sm:$0xff]   ;;  %v15174_v25 = vld [vmem:[#allocation2 + $0x300] ss:$20 sps:$4 sm:$0xff]  }
 0x172   : > { %v15179_v26 = vld [vmem:[#allocation2 + $0x324] ss:$20 sps:$4 sm:$0xff]  }
 0x174   : > { %4401 = vmatpush1.bf16.msra.mxu0 %v15117_v58  ;;  %4573 = vmatpush1.bf16.msra.mxu1 %v15120_v49  ;;  %v15182_v58 = vld [vmem:[#allocation2 + $0x32c] ss:$20 sps:$4 sm:$0xff]  }
 0x175   : > { %4402 = vmatprep.subr.bf16.mxu0 %v15125_v27  ;;  %4574 = vmatprep.subr.bf16.mxu1 %v15128_v28  ;;  %v15177_v49 = vld [vmem:[#allocation2 + $0x320] ss:$20 sps:$4 sm:$0xff]   ;;  %v15180_v27 = vld [vmem:[#allocation2 + $0x328] ss:$20 sps:$4 sm:$0xff]  }
 0x176   : > { %v15185_v28 = vld [vmem:[#allocation2 + $0x34c] ss:$20 sps:$4 sm:$0xff]  }
 0x178   : > { %4403 = vmatpush1.bf16.msra.mxu0 %v15123_v29  ;;  %4575 = vmatpush1.bf16.msra.mxu1 %v15126_v31  ;;  %v15188_v29 = vld [vmem:[#allocation2 + $0x354] ss:$20 sps:$4 sm:$0xff]  }
 0x179   : > { %4404 = vmatprep.subr.bf16.mxu0 %v15131_v32  ;;  %4576 = vmatprep.subr.bf16.mxu1 %v15134_v34  ;;  %v15183_v31 = vld [vmem:[#allocation2 + $0x348] ss:$20 sps:$4 sm:$0xff]   ;;  %v15186_v32 = vld [vmem:[#allocation2 + $0x350] ss:$20 sps:$4 sm:$0xff]  }
 0x17a   : > { %v15191_v34 = vld [vmem:[#allocation2 + $0x374] ss:$20 sps:$4 sm:$0xff]  }
 0x17c   : > { %4405 = vmatpush1.bf16.msra.mxu0 %v15129_v35  ;;  %4577 = vmatpush1.bf16.msra.mxu1 %v15132_v36  ;;  %v15194_v35 = vld [vmem:[#allocation2 + $0x37c] ss:$20 sps:$4 sm:$0xff]  }
 0x17d   : > { %4406 = vmatprep.subr.bf16.mxu0 %v15137_v37  ;;  %4578 = vmatprep.subr.bf16.mxu1 %v15140_v40  ;;  %v15189_v36 = vld [vmem:[#allocation2 + $0x370] ss:$20 sps:$4 sm:$0xff]   ;;  %v15192_v37 = vld [vmem:[#allocation2 + $0x378] ss:$20 sps:$4 sm:$0xff]  }
 0x17e   : > { %v15197_v40 = vld [vmem:[#allocation2 + $0x39c] ss:$20 sps:$4 sm:$0xff]  }
 0x180   : > { %4407 = vmatpush1.bf16.msra.mxu0 %v15135_v8  ;;  %4579 = vmatpush1.bf16.msra.mxu1 %v15138_v2  ;;  %v15200_v8 = vld [vmem:[#allocation2 + $0x3a4] ss:$20 sps:$4 sm:$0xff]  }
 0x181   : > { %4408 = vmatprep.subr.bf16.mxu0 %v15143_v46  ;;  %4580 = vmatprep.subr.bf16.mxu1 %v15146_v50  ;;  %v15195_v2 = vld [vmem:[#allocation2 + $0x398] ss:$20 sps:$4 sm:$0xff]   ;;  %v15198_v46 = vld [vmem:[#allocation2 + $0x3a0] ss:$20 sps:$4 sm:$0xff]  }
 0x182   : > { %v15203_v50 = vld [vmem:[#allocation2 + $0x3c4] ss:$20 sps:$4 sm:$0xff]  }
 0x184   : > { %4409 = vmatpush1.bf16.msra.mxu0 %v15141_v53  ;;  %4581 = vmatpush1.bf16.msra.mxu1 %v15144_v54  ;;  %v15206_v53 = vld [vmem:[#allocation2 + $0x3cc] ss:$20 sps:$4 sm:$0xff]  }
 0x185   : > { %4410 = vmatprep.subr.bf16.mxu0 %v15149_v61  ;;  %4582 = vmatprep.subr.bf16.mxu1 %v15152_v62  ;;  %v15201_v54 = vld [vmem:[#allocation2 + $0x3c0] ss:$20 sps:$4 sm:$0xff]   ;;  %v15204_v61 = vld [vmem:[#allocation2 + $0x3c8] ss:$20 sps:$4 sm:$0xff]  }
 0x186   : > { %v15209_v62 = vld [vmem:[#allocation2 + $0x3ec] ss:$20 sps:$4 sm:$0xff]  }
 0x188   : > { %4411 = vmatpush1.bf16.msra.mxu0 %v15147_v63  ;;  %4583 = vmatpush1.bf16.msra.mxu1 %v15150_v3  ;;  %v15212_v63 = vld [vmem:[#allocation2 + $0x3f4] ss:$20 sps:$4 sm:$0xff]  }
 0x189   : > { %4423 = vmatprep.subr.bf16.mxu0 %v15155_v4  ;;  %4595 = vmatprep.subr.bf16.mxu1 %v15158_v12  ;;  %v15207_v3 = vld [vmem:[#allocation2 + $0x3e8] ss:$20 sps:$4 sm:$0xff]   ;;  %v15210_v4 = vld [vmem:[#allocation2 + $0x3f0] ss:$20 sps:$4 sm:$0xff]  }
 0x18a   : > { %v15215_v12 = vld [vmem:[#allocation2 + $0x414] ss:$20 sps:$4 sm:$0xff]  }
 0x18b   : > { %4413 = vmatmul.mubr.bf16.vlgmr.msra.gmra.mrb[0].mxu0 %v16626_v9  ;;  %4585 = vmatmul.mubr.bf16.vlgmr.msra.gmra.mrb[0].mxu1 %v16626_v9  ;;  %v15224_v9 = vld [vmem:[#allocation2 + $0x444] ss:$20 sps:$4 sm:$0xff]  }
 0x18c   : > { %4424 = vmatpush1.bf16.msra.mxu0 %v15153_v30  ;;  %4596 = vmatpush1.bf16.msra.mxu1 %v15156_v5  ;;  %v15218_v30 = vld [vmem:[#allocation2 + $0x41c] ss:$20 sps:$4 sm:$0xff]  }
 0x18d   : > { %4425 = vmatprep.subr.bf16.mxu0 %v15161_v7  ;;  %4597 = vmatprep.subr.bf16.mxu1 %v15164_v55  ;;  %v15213_v5 = vld [vmem:[#allocation2 + $0x410] ss:$20 sps:$4 sm:$0xff]   ;;  %v15216_v7 = vld [vmem:[#allocation2 + $0x418] ss:$20 sps:$4 sm:$0xff]  }
 0x18e   : > { %4455 = vmatprep.mubr.bf16.mxu0 %v16627_v16  ;;  %4627 = vmatprep.mubr.bf16.mxu1 %v16627_v16  ;;  %v15221_v55 = vld [vmem:[#allocation2 + $0x43c] ss:$20 sps:$4 sm:$0xff]   ;;  %v15225_v16 = vld [vmem:[#allocation2 + $0x460] ss:$20 sps:$4 sm:$0xff]  }
 0x190   : > { %4426 = vmatpush1.bf16.msra.mxu0 %v15159_v10  ;;  %4598 = vmatpush1.bf16.msra.mxu1 %v15162_v11  ;;  %v15219_v10 = vld [vmem:[#allocation2 + $0x438] ss:$20 sps:$4 sm:$0xff]   ;;  %v15222_v11 = vld [vmem:[#allocation2 + $0x440] ss:$20 sps:$4 sm:$0xff]  }
 0x191   : > { %4427 = vmatprep.subr.bf16.mxu0 %v15167_v13  ;;  %4599 = vmatprep.subr.bf16.mxu1 %v15170_v15  ;;  %v15227_v13 = vld [vmem:[#allocation2 + $0x464] ss:$20 sps:$4 sm:$0xff]   ;;  %v15230_v15 = vld [vmem:[#allocation2 + $0x46c] ss:$20 sps:$4 sm:$0xff]  }
 0x194   : > { %4428 = vmatpush1.bf16.msra.mxu0 %v15165_v17  ;;  %4600 = vmatpush1.bf16.msra.mxu1 %v15168_v20  ;;  %v15228_v17 = vld [vmem:[#allocation2 + $0x468] ss:$20 sps:$4 sm:$0xff]   ;;  %v15233_v20 = vld [vmem:[#allocation2 + $0x48c] ss:$20 sps:$4 sm:$0xff]  }
 0x195   : > { %4429 = vmatprep.subr.bf16.mxu0 %v15173_v21  ;;  %4601 = vmatprep.subr.bf16.mxu1 %v15176_v22  ;;  %v15236_v21 = vld [vmem:[#allocation2 + $0x494] ss:$20 sps:$4 sm:$0xff]  }
 0x196   : > { %v15231_v22 = vld [vmem:[#allocation2 + $0x488] ss:$20 sps:$4 sm:$0xff]  }
 0x198   : > { %4430 = vmatpush1.bf16.msra.mxu0 %v15171_v23  ;;  %4602 = vmatpush1.bf16.msra.mxu1 %v15174_v25  ;;  %v15234_v23 = vld [vmem:[#allocation2 + $0x490] ss:$20 sps:$4 sm:$0xff]   ;;  %v15239_v25 = vld [vmem:[#allocation2 + $0x4b4] ss:$20 sps:$4 sm:$0xff]  }
 0x199   : > { %4431 = vmatprep.subr.bf16.mxu0 %v15179_v26  ;;  %4603 = vmatprep.subr.bf16.mxu1 %v15182_v58  ;;  %v15242_v26 = vld [vmem:[#allocation2 + $0x4bc] ss:$20 sps:$4 sm:$0xff]  }
 0x19a   : > { %v15237_v58 = vld [vmem:[#allocation2 + $0x4b0] ss:$20 sps:$4 sm:$0xff]  }
 0x19c   : > { %4432 = vmatpush1.bf16.msra.mxu0 %v15177_v49  ;;  %4604 = vmatpush1.bf16.msra.mxu1 %v15180_v27  ;;  %v15240_v49 = vld [vmem:[#allocation2 + $0x4b8] ss:$20 sps:$4 sm:$0xff]   ;;  %v15245_v27 = vld [vmem:[#allocation2 + $0x4dc] ss:$20 sps:$4 sm:$0xff]  }
 0x19d   : > { %4433 = vmatprep.subr.bf16.mxu0 %v15185_v28  ;;  %4605 = vmatprep.subr.bf16.mxu1 %v15188_v29  ;;  %v15248_v28 = vld [vmem:[#allocation2 + $0x4e4] ss:$20 sps:$4 sm:$0xff]  }
 0x19e   : > { %v15243_v29 = vld [vmem:[#allocation2 + $0x4d8] ss:$20 sps:$4 sm:$0xff]  }
 0x1a0   : > { %4434 = vmatpush1.bf16.msra.mxu0 %v15183_v31  ;;  %4606 = vmatpush1.bf16.msra.mxu1 %v15186_v32  ;;  %v15246_v31 = vld [vmem:[#allocation2 + $0x4e0] ss:$20 sps:$4 sm:$0xff]   ;;  %v15251_v32 = vld [vmem:[#allocation2 + $0x504] ss:$20 sps:$4 sm:$0xff]  }
 0x1a1   : > { %4435 = vmatprep.subr.bf16.mxu0 %v15191_v34  ;;  %4607 = vmatprep.subr.bf16.mxu1 %v15194_v35  ;;  %v15254_v34 = vld [vmem:[#allocation2 + $0x50c] ss:$20 sps:$4 sm:$0xff]  }
 0x1a2   : > { %v15249_v35 = vld [vmem:[#allocation2 + $0x500] ss:$20 sps:$4 sm:$0xff]  }
 0x1a4   : > { %4436 = vmatpush1.bf16.msra.mxu0 %v15189_v36  ;;  %4608 = vmatpush1.bf16.msra.mxu1 %v15192_v37  ;;  %v15252_v36 = vld [vmem:[#allocation2 + $0x508] ss:$20 sps:$4 sm:$0xff]   ;;  %v15257_v37 = vld [vmem:[#allocation2 + $0x52c] ss:$20 sps:$4 sm:$0xff]  }
 0x1a5   : > { %4437 = vmatprep.subr.bf16.mxu0 %v15197_v40  ;;  %4609 = vmatprep.subr.bf16.mxu1 %v15200_v8  ;;  %v15260_v40 = vld [vmem:[#allocation2 + $0x534] ss:$20 sps:$4 sm:$0xff]  }
 0x1a6   : > { %v15255_v8 = vld [vmem:[#allocation2 + $0x528] ss:$20 sps:$4 sm:$0xff]  }
 0x1a8   : > { %4438 = vmatpush1.bf16.msra.mxu0 %v15195_v2  ;;  %4610 = vmatpush1.bf16.msra.mxu1 %v15198_v46  ;;  %v15258_v2 = vld [vmem:[#allocation2 + $0x530] ss:$20 sps:$4 sm:$0xff]  }
 0x1a9   : > { %4439 = vmatprep.subr.bf16.mxu0 %v15203_v50  ;;  %4611 = vmatprep.subr.bf16.mxu1 %v15206_v53  ;;  %v16628_v46 = vld [vmem:[%s16770_s6 + $0x8] ss:$28 sps:$4 sm:$0x7f]   ;;  %v15266_v53 = vld [vmem:[#allocation2 + $0x55c] ss:$20 sps:$4 sm:$0xff]  }
 0x1aa   : > { %v15263_v50 = vld [vmem:[#allocation2 + $0x554] ss:$20 sps:$4 sm:$0xff]  }
 0x1ac   : > { %4440 = vmatpush1.bf16.msra.mxu0 %v15201_v54  ;;  %4612 = vmatpush1.bf16.msra.mxu1 %v15204_v61  ;;  %v15261_v54 = vld [vmem:[#allocation2 + $0x550] ss:$20 sps:$4 sm:$0xff]   ;;  %v15264_v61 = vld [vmem:[#allocation2 + $0x558] ss:$20 sps:$4 sm:$0xff]  }
 0x1ad   : > { %4441 = vmatprep.subr.bf16.mxu0 %v15209_v62  ;;  %4613 = vmatprep.subr.bf16.mxu1 %v15212_v63  ;;  %v16629_v62 = vld [vmem:[%s16770_s6 + $0x14] ss:$28 sps:$4 sm:$0x7f]  }
 0x1ae   : > { %v15269_v63 = vld [vmem:[#allocation2 + $0x57c] ss:$20 sps:$4 sm:$0xff]  }
 0x1b0   : > { %4442 = vmatpush1.bf16.msra.mxu0 %v15207_v3  ;;  %4614 = vmatpush1.bf16.msra.mxu1 %v15210_v4  ;;  %v15272_v3 = vld [vmem:[#allocation2 + $0x584] ss:$20 sps:$4 sm:$0xff]  }
 0x1b1   : > { %4443 = vmatprep.subr.bf16.mxu0 %v15215_v12  ;;  %4615 = vmatprep.subr.bf16.mxu1 %v15218_v30  ;;  %v15267_v4 = vld [vmem:[#allocation2 + $0x578] ss:$20 sps:$4 sm:$0xff]   ;;  %v15270_v12 = vld [vmem:[#allocation2 + $0x580] ss:$20 sps:$4 sm:$0xff]  }
 0x1b2   : > { %v15275_v30 = vld [vmem:[#allocation2 + $0x5a4] ss:$20 sps:$4 sm:$0xff]  }
 0x1b4   : > { %4444 = vmatpush1.bf16.msra.mxu0 %v15213_v5  ;;  %4616 = vmatpush1.bf16.msra.mxu1 %v15216_v7  ;;  %v15278_v5 = vld [vmem:[#allocation2 + $0x5ac] ss:$20 sps:$4 sm:$0xff]  }
 0x1b5   : > { %4445 = vmatprep.subr.bf16.mxu0 %v15221_v55  ;;  %4617 = vmatprep.subr.bf16.mxu1 %v15224_v9  ;;  %v15273_v7 = vld [vmem:[#allocation2 + $0x5a0] ss:$20 sps:$4 sm:$0xff]   ;;  %v15276_v55 = vld [vmem:[#allocation2 + $0x5a8] ss:$20 sps:$4 sm:$0xff]  }
 0x1b6   : > { %v15281_v9 = vld [vmem:[#allocation2 + $0x5cc] ss:$20 sps:$4 sm:$0xff]  }
 0x1b8   : > { %4446 = vmatpush1.bf16.msra.mxu0 %v15219_v10  ;;  %4618 = vmatpush1.bf16.msra.mxu1 %v15222_v11  ;;  %v15284_v10 = vld [vmem:[#allocation2 + $0x5d4] ss:$20 sps:$4 sm:$0xff]  }
 0x1b9   : > { %4447 = vmatprep.subr.bf16.mxu0 %v15227_v13  ;;  %4619 = vmatprep.subr.bf16.mxu1 %v15230_v15  ;;  %v15279_v11 = vld [vmem:[#allocation2 + $0x5c8] ss:$20 sps:$4 sm:$0xff]   ;;  %v15282_v13 = vld [vmem:[#allocation2 + $0x5d0] ss:$20 sps:$4 sm:$0xff]  }
 0x1ba   : > { %v15287_v15 = vld [vmem:[#allocation2 + $0x5f4] ss:$20 sps:$4 sm:$0xff]  }
 0x1bc   : > { %4448 = vmatpush1.bf16.msra.mxu0 %v15225_v16  ;;  %4620 = vmatpush1.bf16.msra.mxu1 %v15228_v17  ;;  %v15290_v16 = vld [vmem:[#allocation2 + $0x5fc] ss:$20 sps:$4 sm:$0xff]  }
 0x1bd   : > { %4449 = vmatprep.subr.bf16.mxu0 %v15233_v20  ;;  %4621 = vmatprep.subr.bf16.mxu1 %v15236_v21  ;;  %v15285_v17 = vld [vmem:[#allocation2 + $0x5f0] ss:$20 sps:$4 sm:$0xff]   ;;  %v15288_v20 = vld [vmem:[#allocation2 + $0x5f8] ss:$20 sps:$4 sm:$0xff]  }
 0x1be   : > { %v15293_v21 = vld [vmem:[#allocation2 + $0x61c] ss:$20 sps:$4 sm:$0xff]  }
 0x1c0   : > { %4450 = vmatpush1.bf16.msra.mxu0 %v15231_v22  ;;  %4622 = vmatpush1.bf16.msra.mxu1 %v15234_v23  ;;  %v15296_v22 = vld [vmem:[#allocation2 + $0x624] ss:$20 sps:$4 sm:$0xff]  }
 0x1c1   : > { %4451 = vmatprep.subr.bf16.mxu0 %v15239_v25  ;;  %4623 = vmatprep.subr.bf16.mxu1 %v15242_v26  ;;  %v15291_v23 = vld [vmem:[#allocation2 + $0x618] ss:$20 sps:$4 sm:$0xff]   ;;  %v15294_v25 = vld [vmem:[#allocation2 + $0x620] ss:$20 sps:$4 sm:$0xff]  }
 0x1c2   : > { %v15299_v26 = vld [vmem:[#allocation2 + $0x644] ss:$20 sps:$4 sm:$0xff]  }
 0x1c4   : > { %4452 = vmatpush1.bf16.msra.mxu0 %v15237_v58  ;;  %4624 = vmatpush1.bf16.msra.mxu1 %v15240_v49  ;;  %v15302_v58 = vld [vmem:[#allocation2 + $0x64c] ss:$20 sps:$4 sm:$0xff]  }
 0x1c5   : > { %4453 = vmatprep.subr.bf16.mxu0 %v15245_v27  ;;  %4625 = vmatprep.subr.bf16.mxu1 %v15248_v28  ;;  %v15297_v49 = vld [vmem:[#allocation2 + $0x640] ss:$20 sps:$4 sm:$0xff]   ;;  %v15300_v27 = vld [vmem:[#allocation2 + $0x648] ss:$20 sps:$4 sm:$0xff]  }
 0x1c6   : > { %v15305_v28 = vld [vmem:[#allocation2 + $0x66c] ss:$20 sps:$4 sm:$0xff]  }
 0x1c8   : > { %4454 = vmatpush1.bf16.msra.mxu0 %v15243_v29  ;;  %4626 = vmatpush1.bf16.msra.mxu1 %v15246_v31  ;;  %v15308_v29 = vld [vmem:[#allocation2 + $0x674] ss:$20 sps:$4 sm:$0xff]  }
 0x1c9   : > { %4466 = vmatprep.subr.bf16.mxu0 %v15251_v32  ;;  %4638 = vmatprep.subr.bf16.mxu1 %v15254_v34  ;;  %v15303_v31 = vld [vmem:[#allocation2 + $0x668] ss:$20 sps:$4 sm:$0xff]   ;;  %v15306_v32 = vld [vmem:[#allocation2 + $0x670] ss:$20 sps:$4 sm:$0xff]  }
 0x1ca   : > { %v15311_v34 = vld [vmem:[#allocation2 + $0x694] ss:$20 sps:$4 sm:$0xff]  }
 0x1cb   : > { %4456 = vmatmul.mubr.bf16.vlgmr.msra.gmra.mrb[0].mxu0 %v16628_v46  ;;  %4628 = vmatmul.mubr.bf16.vlgmr.msra.gmra.mrb[0].mxu1 %v16628_v46  ;;  %v15318_v46 = vld [vmem:[#allocation2 + $0x6c0] ss:$20 sps:$4 sm:$0xff]  }
 0x1cc   : > { %4467 = vmatpush1.bf16.msra.mxu0 %v15249_v35  ;;  %4639 = vmatpush1.bf16.msra.mxu1 %v15252_v36  ;;  %v15314_v35 = vld [vmem:[#allocation2 + $0x69c] ss:$20 sps:$4 sm:$0xff]  }
 0x1cd   : > { %4468 = vmatprep.subr.bf16.mxu0 %v15257_v37  ;;  %4640 = vmatprep.subr.bf16.mxu1 %v15260_v40  ;;  %v15309_v36 = vld [vmem:[#allocation2 + $0x690] ss:$20 sps:$4 sm:$0xff]   ;;  %v15312_v37 = vld [vmem:[#allocation2 + $0x698] ss:$20 sps:$4 sm:$0xff]  }
 0x1ce   : > { %4498 = vmatprep.mubr.bf16.mxu0 %v16629_v62  ;;  %4670 = vmatprep.mubr.bf16.mxu1 %v16629_v62  ;;  %v15317_v40 = vld [vmem:[#allocation2 + $0x6bc] ss:$20 sps:$4 sm:$0xff]   ;;  %v15329_v62 = vld [vmem:[#allocation2 + $0x70c] ss:$20 sps:$4 sm:$0xff]  }
 0x1d0   : > { %4469 = vmatpush1.bf16.msra.mxu0 %v15255_v8  ;;  %4641 = vmatpush1.bf16.msra.mxu1 %v15258_v2  ;;  %v15320_v8 = vld [vmem:[#allocation2 + $0x6c4] ss:$20 sps:$4 sm:$0xff]  }
 0x1d1   : > { %4470 = vmatprep.subr.bf16.mxu0 %v15263_v50  ;;  %4642 = vmatprep.subr.bf16.mxu1 %v15266_v53  ;;  %v15315_v2 = vld [vmem:[#allocation2 + $0x6b8] ss:$20 sps:$4 sm:$0xff]  }
 0x1d2   : > { %v15323_v50 = vld [vmem:[#allocation2 + $0x6e4] ss:$20 sps:$4 sm:$0xff]   ;;  %v15326_v53 = vld [vmem:[#allocation2 + $0x6ec] ss:$20 sps:$4 sm:$0xff]  }
 0x1d4   : > { %4471 = vmatpush1.bf16.msra.mxu0 %v15261_v54  ;;  %4643 = vmatpush1.bf16.msra.mxu1 %v15264_v61  ;;  %v15321_v54 = vld [vmem:[#allocation2 + $0x6e0] ss:$20 sps:$4 sm:$0xff]   ;;  %v15324_v61 = vld [vmem:[#allocation2 + $0x6e8] ss:$20 sps:$4 sm:$0xff]  }
 0x1d5   : > { %4472 = vmatprep.subr.bf16.mxu0 %v15269_v63  ;;  %4644 = vmatprep.subr.bf16.mxu1 %v15272_v3  ;;  %v15332_v63 = vld [vmem:[#allocation2 + $0x714] ss:$20 sps:$4 sm:$0xff]  }
 0x1d6   : > { %v15327_v3 = vld [vmem:[#allocation2 + $0x708] ss:$20 sps:$4 sm:$0xff]  }
 0x1d8   : > { %4473 = vmatpush1.bf16.msra.mxu0 %v15267_v4  ;;  %4645 = vmatpush1.bf16.msra.mxu1 %v15270_v12  ;;  %v15330_v4 = vld [vmem:[#allocation2 + $0x710] ss:$20 sps:$4 sm:$0xff]   ;;  %v15335_v12 = vld [vmem:[#allocation2 + $0x734] ss:$20 sps:$4 sm:$0xff]  }
 0x1d9   : > { %4474 = vmatprep.subr.bf16.mxu0 %v15275_v30  ;;  %4646 = vmatprep.subr.bf16.mxu1 %v15278_v5  ;;  %v15338_v30 = vld [vmem:[#allocation2 + $0x73c] ss:$20 sps:$4 sm:$0xff]  }
 0x1dc   : > { %4475 = vmatpush1.bf16.msra.mxu0 %v15273_v7  ;;  %4647 = vmatpush1.bf16.msra.mxu1 %v15276_v55 }
 0x1dd   : > { %4476 = vmatprep.subr.bf16.mxu0 %v15281_v9  ;;  %4648 = vmatprep.subr.bf16.mxu1 %v15284_v10 }
 0x1e0   : > { %4477 = vmatpush1.bf16.msra.mxu0 %v15279_v11  ;;  %4649 = vmatpush1.bf16.msra.mxu1 %v15282_v13 }
 0x1e1   : > { %4478 = vmatprep.subr.bf16.mxu0 %v15287_v15  ;;  %4650 = vmatprep.subr.bf16.mxu1 %v15290_v16  ;;  %v15333_v16 = vld [vmem:[#allocation2 + $0x730] ss:$20 sps:$4 sm:$0xff]  }
 0x1e4   : > { %4479 = vmatpush1.bf16.msra.mxu0 %v15285_v17  ;;  %4651 = vmatpush1.bf16.msra.mxu1 %v15288_v20  ;;  %v15336_v17 = vld [vmem:[#allocation2 + $0x738] ss:$20 sps:$4 sm:$0xff]  }
 0x1e5   : > { %4480 = vmatprep.subr.bf16.mxu0 %v15293_v21  ;;  %4652 = vmatprep.subr.bf16.mxu1 %v15296_v22  ;;  %v15341_v22 = vld [vmem:[#allocation2 + $0x75c] ss:$20 sps:$4 sm:$0xff]  }
 0x1e8   : > { %4481 = vmatpush1.bf16.msra.mxu0 %v15291_v23  ;;  %4653 = vmatpush1.bf16.msra.mxu1 %v15294_v25  ;;  %v15344_v23 = vld [vmem:[#allocation2 + $0x764] ss:$20 sps:$4 sm:$0xff]  }
 0x1e9   : > { %4482 = vmatprep.subr.bf16.mxu0 %v15299_v26  ;;  %4654 = vmatprep.subr.bf16.mxu1 %v15302_v58 }
 0x1ec   : > { %4483 = vmatpush1.bf16.msra.mxu0 %v15297_v49  ;;  %4655 = vmatpush1.bf16.msra.mxu1 %v15300_v27  ;;  %v15339_v27 = vld [vmem:[#allocation2 + $0x758] ss:$20 sps:$4 sm:$0xff]  }
 0x1ed   : > { %4484 = vmatprep.subr.bf16.mxu0 %v15305_v28  ;;  %4656 = vmatprep.subr.bf16.mxu1 %v15308_v29  ;;  %v15342_v28 = vld [vmem:[#allocation2 + $0x760] ss:$20 sps:$4 sm:$0xff]   ;;  %v15347_v29 = vld [vmem:[#allocation2 + $0x784] ss:$20 sps:$4 sm:$0xff]  }
 0x1f0   : > { %4485 = vmatpush1.bf16.msra.mxu0 %v15303_v31  ;;  %4657 = vmatpush1.bf16.msra.mxu1 %v15306_v32  ;;  %v15350_v31 = vld [vmem:[#allocation2 + $0x78c] ss:$20 sps:$4 sm:$0xff]  }
 0x1f1   : > { %4486 = vmatprep.subr.bf16.mxu0 %v15311_v34  ;;  %4658 = vmatprep.subr.bf16.mxu1 %v15314_v35  ;;  %v15345_v32 = vld [vmem:[#allocation2 + $0x780] ss:$20 sps:$4 sm:$0xff]   ;;  %v15348_v34 = vld [vmem:[#allocation2 + $0x788] ss:$20 sps:$4 sm:$0xff]  }
 0x1f2   : > { %v15353_v35 = vld [vmem:[#allocation2 + $0x7ac] ss:$20 sps:$4 sm:$0xff]  }
 0x1f4   : > { %4487 = vmatpush1.bf16.msra.mxu0 %v15309_v36  ;;  %4659 = vmatpush1.bf16.msra.mxu1 %v15312_v37  ;;  %v15356_v36 = vld [vmem:[#allocation2 + $0x7b4] ss:$20 sps:$4 sm:$0xff]   ;;  %v16892_v37 = vld [vmem:[%s16770_s6 + $0x10] ss:$28 sps:$4 sm:$0x7f]  }
 0x1f5   : > { %4488 = vmatprep.subr.bf16.mxu0 %v15317_v40  ;;  %4660 = vmatprep.subr.bf16.mxu1 %v15320_v8  ;;  %v15351_v40 = vld [vmem:[#allocation2 + $0x7a8] ss:$20 sps:$4 sm:$0xff]   ;;  %v15354_v8 = vld [vmem:[#allocation2 + $0x7b0] ss:$20 sps:$4 sm:$0xff]  }
 0x1f8   : > { %4489 = vmatpush1.bf16.msra.mxu0 %v15315_v2  ;;  %4661 = vmatpush1.bf16.msra.mxu1 %v15318_v46  ;;  %v15359_v2 = vld [vmem:[#allocation2 + $0x7d4] ss:$20 sps:$4 sm:$0xff]   ;;  %v15362_v46 = vld [vmem:[#allocation2 + $0x7dc] ss:$20 sps:$4 sm:$0xff]  }
 0x1f9   : > { %4490 = vmatprep.subr.bf16.mxu0 %v15323_v50  ;;  %4662 = vmatprep.subr.bf16.mxu1 %v15326_v53  ;;  %v15357_v50 = vld [vmem:[#allocation2 + $0x7d0] ss:$20 sps:$4 sm:$0xff]   ;;  %v15360_v53 = vld [vmem:[#allocation2 + $0x7d8] ss:$20 sps:$4 sm:$0xff]  }
 0x1fc   : > { %4491 = vmatpush1.bf16.msra.mxu0 %v15321_v54  ;;  %4663 = vmatpush1.bf16.msra.mxu1 %v15324_v61  ;;  %v15365_v54 = vld [vmem:[#allocation2 + $0x7fc] ss:$20 sps:$4 sm:$0xff]   ;;  %v15368_v61 = vld [vmem:[#allocation2 + $0x804] ss:$20 sps:$4 sm:$0xff]  }
 0x1fd   : > { %4492 = vmatprep.subr.bf16.mxu0 %v15329_v62  ;;  %4664 = vmatprep.subr.bf16.mxu1 %v15332_v63  ;;  %v15363_v62 = vld [vmem:[#allocation2 + $0x7f8] ss:$20 sps:$4 sm:$0xff]   ;;  %v15366_v63 = vld [vmem:[#allocation2 + $0x800] ss:$20 sps:$4 sm:$0xff]  }
 0x1fe   : > { %v13933_v5 = vpop.f32.mrb[4].mxu0  ;;  %v13955_v7 = vpop.f32.mrb[4].mxu1 }
 0x1ff   : > { %v13934_v55 = vpop.f32.mrb[5].mxu0  ;;  %v13956_v9 = vpop.f32.mrb[5].mxu1 }
 0x200   : > { %v13935_v10 = vadd.f32 %v13934_v55, %v13933_v5  ;;  %v13957_v11 = vadd.f32 %v13956_v9, %v13955_v7  ;;  %v13936_v13 = vpop.f32.mrb[6].mxu0  ;;  %v13958_v15 = vpop.f32.mrb[6].mxu1  ;;  %4493 = vmatpush1.bf16.msra.mxu0 %v15327_v3  ;;  %4665 = vmatpush1.bf16.msra.mxu1 %v15330_v4  ;;  %v15371_v3 = vld [vmem:[#allocation2 + $0x824] ss:$20 sps:$4 sm:$0xff]   ;;  %v15374_v4 = vld [vmem:[#allocation2 + $0x82c] ss:$20 sps:$4 sm:$0xff]  }
 0x201   : > { %v13937_v20 = vpop.f32.mrb[7].mxu0  ;;  %v13959_v21 = vpop.f32.mrb[7].mxu1  ;;  %4494 = vmatprep.subr.bf16.mxu0 %v15335_v12  ;;  %4666 = vmatprep.subr.bf16.mxu1 %v15338_v30  ;;  %v15369_v12 = vld [vmem:[#allocation2 + $0x820] ss:$20 sps:$4 sm:$0xff]   ;;  %v15372_v30 = vld [vmem:[#allocation2 + $0x828] ss:$20 sps:$4 sm:$0xff]  }
 0x202   : > { %v16887_v25 = vadd.f32 %v13957_v11, %v13935_v10  ;;  %v13938_v26 = vadd.f32 %v13937_v20, %v13936_v13  ;;  %v13960_v58 = vadd.f32 %v13959_v21, %v13958_v15  ;;  %v15377_v5 = vld [vmem:[#allocation2 + $0x84c] ss:$20 sps:$4 sm:$0xff]   ;;  %v15380_v7 = vld [vmem:[#allocation2 + $0x854] ss:$20 sps:$4 sm:$0xff]   ;;  %v15378_v9 = vld [vmem:[#allocation2 + $0x850] ss:$20 sps:$4 sm:$0xff]  }
 0x203   : > { %v15375_v55 = vld [vmem:[#allocation2 + $0x848] ss:$20 sps:$4 sm:$0xff]   ;;  %v15381_v20 = vld [vmem:[#allocation2 + $0x870] ss:$20 sps:$4 sm:$0xff]   ;;  %v15384_v21 = vld [vmem:[#allocation2 + $0x878] ss:$20 sps:$4 sm:$0xff]  }
 0x204   : > { %v16889_v49 = vadd.f32 %v13960_v58, %v13938_v26  ;;  %4495 = vmatpush1.bf16.msra.mxu0 %v15333_v16  ;;  %4667 = vmatpush1.bf16.msra.mxu1 %v15336_v17  ;;  %v15383_v10 = vld [vmem:[#allocation2 + $0x874] ss:$20 sps:$4 sm:$0xff]   ;;  %v15386_v11 = vld [vmem:[#allocation2 + $0x87c] ss:$20 sps:$4 sm:$0xff]   ;;  %v15392_v26 = vld [vmem:[#allocation2 + $0x8a4] ss:$20 sps:$4 sm:$0xff]  }
 0x205   : > { %4496 = vmatprep.subr.bf16.mxu0 %v15341_v22  ;;  %4668 = vmatprep.subr.bf16.mxu1 %v15344_v23  ;;  %v15389_v23 = vld [vmem:[#allocation2 + $0x89c] ss:$20 sps:$4 sm:$0xff]  }
 0x208   : > { %4497 = vmatpush1.bf16.msra.mxu0 %v15339_v27  ;;  %4669 = vmatpush1.bf16.msra.mxu1 %v15342_v28 }
 0x209   : > { %4509 = vmatprep.subr.bf16.mxu0 %v15347_v29  ;;  %4681 = vmatprep.subr.bf16.mxu1 %v15350_v31  ;;  %v15387_v29 = vld [vmem:[#allocation2 + $0x898] ss:$20 sps:$4 sm:$0xff]   ;;  %v15390_v31 = vld [vmem:[#allocation2 + $0x8a0] ss:$20 sps:$4 sm:$0xff]  }
 0x20b   : > { %4499 = vmatmul.mubr.bf16.vlgmr.msra.gmra.mrb[0].mxu0 %v16892_v37  ;;  %4671 = vmatmul.mubr.bf16.vlgmr.msra.gmra.mrb[0].mxu1 %v16892_v37 }
 0x20c   : > { %4510 = vmatpush1.bf16.msra.mxu0 %v15345_v32  ;;  %4682 = vmatpush1.bf16.msra.mxu1 %v15348_v34  ;;  %v15393_v32 = vld [vmem:[#allocation2 + $0x150] ss:$20 sps:$4 sm:$0xff]  }
 0x20d   : > { %4511 = vmatprep.subr.bf16.mxu0 %v15353_v35  ;;  %4683 = vmatprep.subr.bf16.mxu1 %v15356_v36  ;;  %v15394_v34 = vld [vmem:[#allocation2 + $0x3d0] ss:$20 sps:$4 sm:$0xff]  }
 0x20e   : > { %4541 = vmatprep.mubr.bf16.mxu0 %v16691_v18  ;;  %4713 = vmatprep.mubr.bf16.mxu1 %v16691_v18  ;;  %v15395_v35 = vld [vmem:[#allocation2 + $0x10] ss:$20 sps:$4 sm:$0xff]  }
 0x20f   : > { %v15396_v36 = vld [vmem:[#allocation2 + $0x290] ss:$20 sps:$4 sm:$0xff]  }
 0x210   : > { %4512 = vmatpush1.bf16.msra.mxu0 %v15351_v40  ;;  %4684 = vmatpush1.bf16.msra.mxu1 %v15354_v8  ;;  %v16905_v40 = vld [vmem:[%s16770_s6 + $0x18] ss:$28 sps:$4 sm:$0x7f]  }
 0x211   : > { %4513 = vmatprep.subr.bf16.mxu0 %v15359_v2  ;;  %4685 = vmatprep.subr.bf16.mxu1 %v15362_v46  ;;  %v15399_v8 = vld [vmem:[#allocation2 + $0x38] ss:$20 sps:$4 sm:$0xff]   ;;  %v15401_v46 = vld [vmem:[#allocation2 + $0x1a0] ss:$20 sps:$4 sm:$0xff]  }
 0x212   : > { %v15400_v2 = vld [vmem:[#allocation2 + $0x2b8] ss:$20 sps:$4 sm:$0xff]  }
 0x214   : > { %4514 = vmatpush1.bf16.msra.mxu0 %v15357_v50  ;;  %4686 = vmatpush1.bf16.msra.mxu1 %v15360_v53  ;;  %v15402_v50 = vld [vmem:[#allocation2 + $0x420] ss:$20 sps:$4 sm:$0xff]  }
 0x215   : > { %4515 = vmatprep.subr.bf16.mxu0 %v15365_v54  ;;  %4687 = vmatprep.subr.bf16.mxu1 %v15368_v61  ;;  %v16910_v53 = vld [vmem:[%s16770_s6 + $0x4] ss:$28 sps:$4 sm:$0x7f]   ;;  %v16914_v54 = vld [vmem:[%s16770_s6 + $0xc] ss:$28 sps:$4 sm:$0x7f]  }
 0x216   : > { %v15403_v61 = vld [vmem:[#allocation2 + $0x60] ss:$20 sps:$4 sm:$0xff]  }
 0x218   : > { %4516 = vmatpush1.bf16.msra.mxu0 %v15363_v62  ;;  %4688 = vmatpush1.bf16.msra.mxu1 %v15366_v63  ;;  %v15404_v62 = vld [vmem:[#allocation2 + $0x2e0] ss:$20 sps:$4 sm:$0xff]   ;;  %v15405_v63 = vld [vmem:[#allocation2 + $0x1c8] ss:$20 sps:$4 sm:$0xff]  }
 0x219   : > { %4517 = vmatprep.subr.bf16.mxu0 %v15371_v3  ;;  %4689 = vmatprep.subr.bf16.mxu1 %v15374_v4  ;;  %v15406_v3 = vld [vmem:[#allocation2 + $0x448] ss:$20 sps:$4 sm:$0xff]  }
 0x21a   : > { %v15407_v4 = vld [vmem:[#allocation2 + $0x88] ss:$20 sps:$4 sm:$0xff]  }
 0x21c   : > { %4518 = vmatpush1.bf16.msra.mxu0 %v15369_v12  ;;  %4690 = vmatpush1.bf16.msra.mxu1 %v15372_v30  ;;  %v15408_v12 = vld [vmem:[#allocation2 + $0x308] ss:$20 sps:$4 sm:$0xff]   ;;  %v15409_v30 = vld [vmem:[#allocation2 + $0x1f0] ss:$20 sps:$4 sm:$0xff]  }
 0x21d   : > { %4519 = vmatprep.subr.bf16.mxu0 %v15377_v5  ;;  %4691 = vmatprep.subr.bf16.mxu1 %v15380_v7  ;;  %v15410_v5 = vld [vmem:[#allocation2 + $0x470] ss:$20 sps:$4 sm:$0xff]  }
 0x21e   : > { %v13977_v13 = vpop.f32.mrb[8].mxu0  ;;  %v15411_v7 = vld [vmem:[#allocation2 + $0xb0] ss:$20 sps:$4 sm:$0xff]  }
 0x21f   : > { %v13978_v15 = vpop.f32.mrb[9].mxu0 }
 0x220   : > { %v13979_v16 = vadd.f32 %v13978_v15, %v13977_v13  ;;  %v13980_v17 = vpop.f32.mrb[10].mxu0  ;;  %4520 = vmatpush1.bf16.msra.mxu0 %v15375_v55  ;;  %4692 = vmatpush1.bf16.msra.mxu1 %v15378_v9  ;;  %v15412_v55 = vld [vmem:[#allocation2 + $0x330] ss:$20 sps:$4 sm:$0xff]   ;;  %v15413_v9 = vld [vmem:[#allocation2 + $0x218] ss:$20 sps:$4 sm:$0xff]  }
 0x221   : > { %v13981_v22 = vpop.f32.mrb[11].mxu0  ;;  %4521 = vmatprep.subr.bf16.mxu0 %v15383_v10  ;;  %4693 = vmatprep.subr.bf16.mxu1 %v15386_v11  ;;  %v15414_v10 = vld [vmem:[#allocation2 + $0x498] ss:$20 sps:$4 sm:$0xff]   ;;  %v15417_v15 = vld [vmem:[#allocation2 + $0x240] ss:$20 sps:$4 sm:$0xff]  }
 0x222   : > { %v16899_v58 = vadd.f32 %v13979_v16, %v16887_v25  ;;  %v13982_v27 = vadd.f32 %v13981_v22, %v13980_v17  ;;  %v15397_v25 = vld [vmem:[#allocation2 + $0x178] ss:$20 sps:$4 sm:$0xff]   ;;  %v15418_v16 = vld [vmem:[#allocation2 + $0x4c0] ss:$20 sps:$4 sm:$0xff]   ;;  %v15422_v22 = vld [vmem:[#allocation2 + $0x4e8] ss:$20 sps:$4 sm:$0xff]  }
 0x223   : > { %v15415_v11 = vld [vmem:[#allocation2 + $0xd8] ss:$20 sps:$4 sm:$0xff]   ;;  %v15419_v17 = vld [vmem:[#allocation2 + $0x100] ss:$20 sps:$4 sm:$0xff]  }
 0x224   : > { %v16902_v28 = vadd.f32 %v13982_v27, %v16889_v49  ;;  %4522 = vmatpush1.bf16.msra.mxu0 %v15381_v20  ;;  %4694 = vmatpush1.bf16.msra.mxu1 %v15384_v21  ;;  %v15398_v49 = vld [vmem:[#allocation2 + $0x3f8] ss:$20 sps:$4 sm:$0xff]   ;;  %v15420_v20 = vld [vmem:[#allocation2 + $0x380] ss:$20 sps:$4 sm:$0xff]   ;;  %v15421_v21 = vld [vmem:[#allocation2 + $0x268] ss:$20 sps:$4 sm:$0xff]  }
 0x225   : > { %4523 = vmatprep.subr.bf16.mxu0 %v15389_v23  ;;  %4695 = vmatprep.subr.bf16.mxu1 %v15392_v26  ;;  %v15416_v13 = vld [vmem:[#allocation2 + $0x358] ss:$20 sps:$4 sm:$0xff]   ;;  %v15423_v23 = vld [vmem:[#allocation2 + $0x128] ss:$20 sps:$4 sm:$0xff]   ;;  %v15425_v27 = vld [vmem:[#allocation2 + $0x650] ss:$20 sps:$4 sm:$0xff]  }
 0x226   : > { %v15424_v26 = vld [vmem:[#allocation2 + $0x3a8] ss:$20 sps:$4 sm:$0xff]  }
 0x228   : > { %4524 = vmatpush1.bf16.msra.mxu0 %v15387_v29  ;;  %4696 = vmatpush1.bf16.msra.mxu1 %v15390_v31  ;;  %v15426_v29 = vld [vmem:[#allocation2 + $0x510] ss:$20 sps:$4 sm:$0xff]  }
 0x229   : > { %13992 = vmatprep.subr.bf16.mxu0 %v15393_v32  ;;  %14014 = vmatprep.subr.bf16.mxu1 %v15394_v34  ;;  %v15427_v31 = vld [vmem:[#allocation2 + $0x790] ss:$20 sps:$4 sm:$0xff]   ;;  %v15428_v32 = vld [vmem:[#allocation2 + $0x678] ss:$20 sps:$4 sm:$0xff]  }
 0x22a   : > { %v16919_v34 = vld [vmem:[%s16770_s6] ss:$28 sps:$4 sm:$0x7f]  }
 0x22b   : > { %4542 = vmatmul.mubr.bf16.vlgmr.msra.gmra.mrb[0].mxu0 %v16905_v40  ;;  %4714 = vmatmul.mubr.bf16.vlgmr.msra.gmra.mrb[0].mxu1 %v16905_v40 }
 0x22c   : > { %13993 = vmatpush3.bf16.msra.mxu0 %v15395_v35  ;;  %14015 = vmatpush3.bf16.msra.mxu1 %v15396_v36  ;;  %v16635_v35 = vld [vmem:[%s16770_s6 + $0x8] ss:$28 sps:$4 sm:$0x7f]   ;;  %v15429_v36 = vld [vmem:[#allocation2 + $0x538] ss:$20 sps:$4 sm:$0xff]  }
 0x22d   : > { %13994 = vmatprep.subr.bf16.mxu0 %v15397_v25  ;;  %14016 = vmatprep.subr.bf16.mxu1 %v15398_v49  ;;  %v15430_v25 = vld [vmem:[#allocation2 + $0x7b8] ss:$20 sps:$4 sm:$0xff]   ;;  %v15431_v49 = vld [vmem:[#allocation2 + $0x6a0] ss:$20 sps:$4 sm:$0xff]  }
 0x22e   : > { %4756 = vmatprep.mubr.bf16.mxu0 %v16910_v53  ;;  %4797 = vmatprep.mubr.bf16.mxu1 %v16914_v54 }
 0x230   : > { %13995 = vmatpush3.bf16.msra.mxu0 %v15399_v8  ;;  %14017 = vmatpush3.bf16.msra.mxu1 %v15400_v2  ;;  %v16636_v8 = vld [vmem:[%s16770_s6 + $0x14] ss:$28 sps:$4 sm:$0x7f]  }
 0x231   : > { %13996 = vmatprep.subr.bf16.mxu0 %v15401_v46  ;;  %14018 = vmatprep.subr.bf16.mxu1 %v15402_v50  ;;  %v15432_v2 = vld [vmem:[#allocation2 + $0x560] ss:$20 sps:$4 sm:$0xff]   ;;  %v15434_v50 = vld [vmem:[#allocation2 + $0x6c8] ss:$20 sps:$4 sm:$0xff]  }
 0x232   : > { %v15433_v46 = vld [vmem:[#allocation2 + $0x7e0] ss:$20 sps:$4 sm:$0xff]  }
 0x234   : > { %13997 = vmatpush3.bf16.msra.mxu0 %v15403_v61  ;;  %14019 = vmatpush3.bf16.msra.mxu1 %v15404_v62  ;;  %v15435_v61 = vld [vmem:[#allocation2 + $0x588] ss:$20 sps:$4 sm:$0xff]  }
 0x235   : > { %13998 = vmatprep.subr.bf16.mxu0 %v15405_v63  ;;  %14020 = vmatprep.subr.bf16.mxu1 %v15406_v3  ;;  %v15436_v62 = vld [vmem:[#allocation2 + $0x808] ss:$20 sps:$4 sm:$0xff]   ;;  %v15437_v63 = vld [vmem:[#allocation2 + $0x6f0] ss:$20 sps:$4 sm:$0xff]  }
 0x236   : > { %v15438_v3 = vld [vmem:[#allocation2 + $0x5b0] ss:$20 sps:$4 sm:$0xff]  }
 0x238   : > { %13999 = vmatpush3.bf16.msra.mxu0 %v15407_v4  ;;  %14021 = vmatpush3.bf16.msra.mxu1 %v15408_v12  ;;  %v15439_v4 = vld [vmem:[#allocation2 + $0x830] ss:$20 sps:$4 sm:$0xff]   ;;  %v15440_v12 = vld [vmem:[#allocation2 + $0x718] ss:$20 sps:$4 sm:$0xff]  }
 0x239   : > { %14000 = vmatprep.subr.bf16.mxu0 %v15409_v30  ;;  %14022 = vmatprep.subr.bf16.mxu1 %v15410_v5  ;;  %v15441_v30 = vld [vmem:[#allocation2 + $0x5d8] ss:$20 sps:$4 sm:$0xff]  }
 0x23a   : > { %v15442_v5 = vld [vmem:[#allocation2 + $0x858] ss:$20 sps:$4 sm:$0xff]  }
 0x23c   : > { %14001 = vmatpush3.bf16.msra.mxu0 %v15411_v7  ;;  %14023 = vmatpush3.bf16.msra.mxu1 %v15412_v55  ;;  %v15443_v7 = vld [vmem:[#allocation2 + $0x740] ss:$20 sps:$4 sm:$0xff]  }
 0x23d   : > { %14002 = vmatprep.subr.bf16.mxu0 %v15413_v9  ;;  %14024 = vmatprep.subr.bf16.mxu1 %v15414_v10  ;;  %v15444_v55 = vld [vmem:[#allocation2 + $0x600] ss:$20 sps:$4 sm:$0xff]   ;;  %v15446_v10 = vld [vmem:[#allocation2 + $0x768] ss:$20 sps:$4 sm:$0xff]  }
 0x23e   : > { %v15445_v9 = vld [vmem:[#allocation2 + $0x880] ss:$20 sps:$4 sm:$0xff]  }
 0x240   : > { %14003 = vmatpush3.bf16.msra.mxu0 %v15415_v11  ;;  %14025 = vmatpush3.bf16.msra.mxu1 %v15416_v13  ;;  %v15447_v11 = vld [vmem:[#allocation2 + $0x628] ss:$20 sps:$4 sm:$0xff]  }
 0x241   : > { %14004 = vmatprep.subr.bf16.mxu0 %v15417_v15  ;;  %14026 = vmatprep.subr.bf16.mxu1 %v15418_v16  ;;  %v15448_v13 = vld [vmem:[#allocation2 + $0x8a8] ss:$20 sps:$4 sm:$0xff]   ;;  %v15451_v15 = vld [vmem:[#allocation2 + $0x1184] ss:$20 sps:$4 sm:$0xff]   ;;  %v15454_v16 = vld [vmem:[#allocation2 + $0x118c] ss:$20 sps:$4 sm:$0xff]  }
 0x244   : > { %14005 = vmatpush3.bf16.msra.mxu0 %v15419_v17  ;;  %14027 = vmatpush3.bf16.msra.mxu1 %v15420_v20  ;;  %v15449_v17 = vld [vmem:[#allocation2 + $0x1180] ss:$20 sps:$4 sm:$0xff]   ;;  %v15452_v20 = vld [vmem:[#allocation2 + $0x1188] ss:$20 sps:$4 sm:$0xff]  }
 0x245   : > { %14006 = vmatprep.subr.bf16.mxu0 %v15421_v21  ;;  %14028 = vmatprep.subr.bf16.mxu1 %v15422_v22  ;;  %v15457_v21 = vld [vmem:[#allocation2 + $0x11ac] ss:$20 sps:$4 sm:$0xff]   ;;  %v15460_v22 = vld [vmem:[#allocation2 + $0x11b4] ss:$20 sps:$4 sm:$0xff]  }
 0x248   : > { %14007 = vmatpush3.bf16.msra.mxu0 %v15423_v23  ;;  %14029 = vmatpush3.bf16.msra.mxu1 %v15424_v26  ;;  %v16934_v23 = vrot.slane %v16910_v53, 1  ;;  %v15455_v26 = vld [vmem:[#allocation2 + $0x11a8] ss:$20 sps:$4 sm:$0xff]   ;;  %v15461_v53 = vld [vmem:[#allocation2 + $0x11d0] ss:$20 sps:$4 sm:$0xff]  }
 0x249   : > { %14036 = vmatprep.subr.bf16.mxu0 %v15425_v27  ;;  %14318 = vmatprep.subr.bf16.mxu1 %v16692_v56  ;;  %v15458_v27 = vld [vmem:[#allocation2 + $0x11b0] ss:$20 sps:$4 sm:$0xff]  }
 0x24b   : > { %4757 = vmatmul.mubr.bf16.vlgmr.msra.gmra.mrb[12].mxu0 %v16919_v34  ;;  %4798 = vmatmul.mubr.bf16.vlgmr.msra.gmra.mrb[12].mxu1 %v16635_v35  ;;  %v15467_v35 = vld [vmem:[#allocation2 + $0x11f8] ss:$20 sps:$4 sm:$0xff]  }
 0x24c   : > { %14037 = vmatpush3.bf16.msra.mxu0 %v15426_v29  ;;  %14319 = vmatpush3.bf16.msra.mxu1 %v15427_v31  ;;  %v15463_v29 = vld [vmem:[#allocation2 + $0x11d4] ss:$20 sps:$4 sm:$0xff]   ;;  %v15466_v31 = vld [vmem:[#allocation2 + $0x11dc] ss:$20 sps:$4 sm:$0xff]  }
 0x24d   : > { %14038 = vmatprep.subr.bf16.mxu0 %v15428_v32  ;;  %14320 = vmatprep.subr.bf16.mxu1 %v16692_v56  ;;  %v15464_v32 = vld [vmem:[#allocation2 + $0x11d8] ss:$20 sps:$4 sm:$0xff]  }
 0x24e   : > { %4838 = vmatprep.mubr.bf16.mxu0 %v16636_v8  ;;  %14334 = vmatprep.mubr.msk.bf16.mxu1 %vm16693_vm0, %v16692_v56  ;;  %v15473_v8 = vld [vmem:[#allocation2 + $0x1220] ss:$20 sps:$4 sm:$0xff]  }
 0x250   : > { %14039 = vmatpush3.bf16.msra.mxu0 %v15429_v36  ;;  %14321 = vmatpush3.bf16.msra.mxu1 %v15430_v25  ;;  %v15470_v36 = vld [vmem:[#allocation2 + $0x1200] ss:$20 sps:$4 sm:$0xff]   ;;  %v15475_v25 = vld [vmem:[#allocation2 + $0x1224] ss:$20 sps:$4 sm:$0xff]  }
 0x251   : > { %14040 = vmatprep.subr.bf16.mxu0 %v15431_v49  ;;  %14322 = vmatprep.subr.bf16.mxu1 %v16692_v56  ;;  %v15478_v49 = vld [vmem:[#allocation2 + $0x122c] ss:$20 sps:$4 sm:$0xff]  }
 0x254   : > { %14041 = vmatpush3.bf16.msra.mxu0 %v15432_v2  ;;  %14323 = vmatpush3.bf16.msra.mxu1 %v15433_v46  ;;  %v15476_v2 = vld [vmem:[#allocation2 + $0x1228] ss:$20 sps:$4 sm:$0xff]   ;;  %v15481_v46 = vld [vmem:[#allocation2 + $0x124c] ss:$20 sps:$4 sm:$0xff]  }
 0x255   : > { %14042 = vmatprep.subr.bf16.mxu0 %v15434_v50  ;;  %14324 = vmatprep.subr.bf16.mxu1 %v16692_v56  ;;  %v15484_v50 = vld [vmem:[#allocation2 + $0x1254] ss:$20 sps:$4 sm:$0xff]  }
 0x258   : > { %14043 = vmatpush3.bf16.msra.mxu0 %v15435_v61  ;;  %14325 = vmatpush3.bf16.msra.mxu1 %v15436_v62  ;;  %v15479_v61 = vld [vmem:[#allocation2 + $0x1248] ss:$20 sps:$4 sm:$0xff]   ;;  %v15482_v62 = vld [vmem:[#allocation2 + $0x1250] ss:$20 sps:$4 sm:$0xff]  }
 0x259   : > { %14044 = vmatprep.subr.bf16.mxu0 %v15437_v63  ;;  %14326 = vmatprep.subr.bf16.mxu1 %v16692_v56  ;;  %v15487_v63 = vld [vmem:[#allocation2 + $0x1274] ss:$20 sps:$4 sm:$0xff]  }
 0x25c   : > { %14045 = vmatpush3.bf16.msra.mxu0 %v15438_v3  ;;  %14327 = vmatpush3.bf16.msra.mxu1 %v15439_v4  ;;  %v15490_v3 = vld [vmem:[#allocation2 + $0x127c] ss:$20 sps:$4 sm:$0xff]  }
 0x25d   : > { %14046 = vmatprep.subr.bf16.mxu0 %v15440_v12  ;;  %14328 = vmatprep.subr.bf16.mxu1 %v16692_v56  ;;  %v15485_v4 = vld [vmem:[#allocation2 + $0x1270] ss:$20 sps:$4 sm:$0xff]   ;;  %v15488_v12 = vld [vmem:[#allocation2 + $0x1278] ss:$20 sps:$4 sm:$0xff]  }
 0x260   : > { %14047 = vmatpush3.bf16.msra.mxu0 %v15441_v30  ;;  %14329 = vmatpush3.bf16.msra.mxu1 %v15442_v5  ;;  %v15493_v30 = vld [vmem:[#allocation2 + $0x129c] ss:$20 sps:$4 sm:$0xff]   ;;  %v15496_v5 = vld [vmem:[#allocation2 + $0x12a4] ss:$20 sps:$4 sm:$0xff]  }
 0x261   : > { %14048 = vmatprep.subr.bf16.mxu0 %v15443_v7  ;;  %14330 = vmatprep.subr.bf16.mxu1 %v16692_v56  ;;  %v15491_v7 = vld [vmem:[#allocation2 + $0x1298] ss:$20 sps:$4 sm:$0xff]  }
 0x264   : > { %14049 = vmatpush3.bf16.msra.mxu0 %v15444_v55  ;;  %14331 = vmatpush3.bf16.msra.mxu1 %v15445_v9  ;;  %v15494_v55 = vld [vmem:[#allocation2 + $0x12a0] ss:$20 sps:$4 sm:$0xff]   ;;  %v15499_v9 = vld [vmem:[#allocation2 + $0x12c4] ss:$20 sps:$4 sm:$0xff]  }
 0x265   : > { %14050 = vmatprep.subr.bf16.mxu0 %v15446_v10  ;;  %14332 = vmatprep.subr.bf16.mxu1 %v16692_v56  ;;  %v15502_v10 = vld [vmem:[#allocation2 + $0x12cc] ss:$20 sps:$4 sm:$0xff]  }
 0x268   : > { %14051 = vmatpush3.bf16.msra.mxu0 %v15447_v11  ;;  %14333 = vmatpush3.bf16.msra.mxu1 %v15448_v13  ;;  %v15497_v11 = vld [vmem:[#allocation2 + $0x12c0] ss:$20 sps:$4 sm:$0xff]   ;;  %v15500_v13 = vld [vmem:[#allocation2 + $0x12c8] ss:$20 sps:$4 sm:$0xff]  }
 0x269   : > { %6695 = vmatprep.subr.bf16.mxu0 %v15451_v15  ;;  %6867 = vmatprep.subr.bf16.mxu1 %v15454_v16  ;;  %v15505_v15 = vld [vmem:[#allocation2 + $0x12ec] ss:$20 sps:$4 sm:$0xff]   ;;  %v15508_v16 = vld [vmem:[#allocation2 + $0x12f4] ss:$20 sps:$4 sm:$0xff]  }
 0x26b   : > { %4839 = vmatmul.mubr.bf16.vlgmr.msra.gmra.mrb[16].mxu0 %v16892_v37  ;;  %14335 = vmatmul.mubr.bf16.vlgmr.msra.gmra.mrb[8].mxu1 %v16905_v40  ;;  %v15469_v37 = vld [vmem:[#allocation2 + $0x11fc] ss:$20 sps:$4 sm:$0xff]   ;;  %v15472_v40 = vld [vmem:[#allocation2 + $0x1204] ss:$20 sps:$4 sm:$0xff]  }
 0x26c   : > { %6696 = vmatpush1.bf16.msra.mxu0 %v15449_v17  ;;  %6868 = vmatpush1.bf16.msra.mxu1 %v15452_v20  ;;  %v15503_v17 = vld [vmem:[#allocation2 + $0x12e8] ss:$20 sps:$4 sm:$0xff]   ;;  %v15506_v20 = vld [vmem:[#allocation2 + $0x12f0] ss:$20 sps:$4 sm:$0xff]  }
 0x26d   : > { %6697 = vmatprep.subr.bf16.mxu0 %v15457_v21  ;;  %6869 = vmatprep.subr.bf16.mxu1 %v15460_v22  ;;  %v15511_v21 = vld [vmem:[#allocation2 + $0x1314] ss:$20 sps:$4 sm:$0xff]   ;;  %v15514_v22 = vld [vmem:[#allocation2 + $0x131c] ss:$20 sps:$4 sm:$0xff]  }
 0x26e   : > { %6727 = vmatprep.mubr.bf16.mxu0 %v16934_v23  ;;  %6899 = vmatprep.mubr.bf16.mxu1 %v16934_v23 }
 0x270   : > { %6698 = vmatpush1.bf16.msra.mxu0 %v15455_v26  ;;  %6870 = vmatpush1.bf16.msra.mxu1 %v15458_v27  ;;  %v15509_v26 = vld [vmem:[#allocation2 + $0x1310] ss:$20 sps:$4 sm:$0xff]   ;;  %v15512_v27 = vld [vmem:[#allocation2 + $0x1318] ss:$20 sps:$4 sm:$0xff]  }
 0x271   : > { %6699 = vmatprep.subr.bf16.mxu0 %v15463_v29  ;;  %6871 = vmatprep.subr.bf16.mxu1 %v15466_v31  ;;  %v15517_v29 = vld [vmem:[#allocation2 + $0x133c] ss:$20 sps:$4 sm:$0xff]   ;;  %v15520_v31 = vld [vmem:[#allocation2 + $0x1344] ss:$20 sps:$4 sm:$0xff]  }
 0x274   : > { %6700 = vmatpush1.bf16.msra.mxu0 %v15461_v53  ;;  %6872 = vmatpush1.bf16.msra.mxu1 %v15464_v32  ;;  %v15515_v53 = vld [vmem:[#allocation2 + $0x1338] ss:$20 sps:$4 sm:$0xff]   ;;  %v15518_v32 = vld [vmem:[#allocation2 + $0x1340] ss:$20 sps:$4 sm:$0xff]  }
 0x275   : > { %6701 = vmatprep.subr.bf16.mxu0 %v15469_v37  ;;  %6873 = vmatprep.subr.bf16.mxu1 %v15472_v40  ;;  %v15523_v37 = vld [vmem:[#allocation2 + $0x1364] ss:$20 sps:$4 sm:$0xff]   ;;  %v15526_v40 = vld [vmem:[#allocation2 + $0x136c] ss:$20 sps:$4 sm:$0xff]  }
 0x278   : > { %6702 = vmatpush1.bf16.msra.mxu0 %v15467_v35  ;;  %6874 = vmatpush1.bf16.msra.mxu1 %v15470_v36  ;;  %v15521_v35 = vld [vmem:[#allocation2 + $0x1360] ss:$20 sps:$4 sm:$0xff]   ;;  %v15524_v36 = vld [vmem:[#allocation2 + $0x1368] ss:$20 sps:$4 sm:$0xff]  }
 0x279   : > { %6703 = vmatprep.subr.bf16.mxu0 %v15475_v25  ;;  %6875 = vmatprep.subr.bf16.mxu1 %v15478_v49  ;;  %v15529_v25 = vld [vmem:[#allocation2 + $0x138c] ss:$20 sps:$4 sm:$0xff]   ;;  %v15532_v49 = vld [vmem:[#allocation2 + $0x1394] ss:$20 sps:$4 sm:$0xff]  }
 0x27c   : > { %6704 = vmatpush1.bf16.msra.mxu0 %v15473_v8  ;;  %6876 = vmatpush1.bf16.msra.mxu1 %v15476_v2  ;;  %v15527_v8 = vld [vmem:[#allocation2 + $0x1388] ss:$20 sps:$4 sm:$0xff]   ;;  %v15530_v2 = vld [vmem:[#allocation2 + $0x1390] ss:$20 sps:$4 sm:$0xff]  }
 0x27d   : > { %6705 = vmatprep.subr.bf16.mxu0 %v15481_v46  ;;  %6877 = vmatprep.subr.bf16.mxu1 %v15484_v50  ;;  %v15535_v46 = vld [vmem:[#allocation2 + $0x13b4] ss:$20 sps:$4 sm:$0xff]   ;;  %v15538_v50 = vld [vmem:[#allocation2 + $0x13bc] ss:$20 sps:$4 sm:$0xff]  }
 0x280   : > { %6706 = vmatpush1.bf16.msra.mxu0 %v15479_v61  ;;  %6878 = vmatpush1.bf16.msra.mxu1 %v15482_v62  ;;  %v15533_v61 = vld [vmem:[#allocation2 + $0x13b0] ss:$20 sps:$4 sm:$0xff]   ;;  %v15536_v62 = vld [vmem:[#allocation2 + $0x13b8] ss:$20 sps:$4 sm:$0xff]  }
 0x281   : > { %6707 = vmatprep.subr.bf16.mxu0 %v15487_v63  ;;  %6879 = vmatprep.subr.bf16.mxu1 %v15490_v3  ;;  %v15541_v63 = vld [vmem:[#allocation2 + $0x13dc] ss:$20 sps:$4 sm:$0xff]   ;;  %v15544_v3 = vld [vmem:[#allocation2 + $0x13e4] ss:$20 sps:$4 sm:$0xff]  }
 0x284   : > { %6708 = vmatpush1.bf16.msra.mxu0 %v15485_v4  ;;  %6880 = vmatpush1.bf16.msra.mxu1 %v15488_v12  ;;  %v15539_v4 = vld [vmem:[#allocation2 + $0x13d8] ss:$20 sps:$4 sm:$0xff]   ;;  %v15542_v12 = vld [vmem:[#allocation2 + $0x13e0] ss:$20 sps:$4 sm:$0xff]  }
 0x285   : > { %6709 = vmatprep.subr.bf16.mxu0 %v15493_v30  ;;  %6881 = vmatprep.subr.bf16.mxu1 %v15496_v5  ;;  %v15547_v30 = vld [vmem:[#allocation2 + $0x1404] ss:$20 sps:$4 sm:$0xff]   ;;  %v15550_v5 = vld [vmem:[#allocation2 + $0x140c] ss:$20 sps:$4 sm:$0xff]  }
 0x288   : > { %6710 = vmatpush1.bf16.msra.mxu0 %v15491_v7  ;;  %6882 = vmatpush1.bf16.msra.mxu1 %v15494_v55  ;;  %v16941_v7 = vrot.slane %v16919_v34, 1  ;;  %v15545_v55 = vld [vmem:[#allocation2 + $0x1400] ss:$20 sps:$4 sm:$0xff]   ;;  %v15554_v34 = vld [vmem:[#allocation2 + $0x1430] ss:$20 sps:$4 sm:$0xff]  }
 0x289   : > { %6711 = vmatprep.subr.bf16.mxu0 %v15499_v9  ;;  %6883 = vmatprep.subr.bf16.mxu1 %v15502_v10  ;;  %v15548_v9 = vld [vmem:[#allocation2 + $0x1408] ss:$20 sps:$4 sm:$0xff]   ;;  %v15553_v10 = vld [vmem:[#allocation2 + $0x142c] ss:$20 sps:$4 sm:$0xff]  }
 0x28c   : > { %6712 = vmatpush1.bf16.msra.mxu0 %v15497_v11  ;;  %6884 = vmatpush1.bf16.msra.mxu1 %v15500_v13  ;;  %v15556_v11 = vld [vmem:[#allocation2 + $0x1434] ss:$20 sps:$4 sm:$0xff]   ;;  %v16944_v13 = vrot.slane %v16914_v54, 1  ;;  %v15557_v54 = vld [vmem:[#allocation2 + $0x1450] ss:$20 sps:$4 sm:$0xff]  }
 0x28d   : > { %6713 = vmatprep.subr.bf16.mxu0 %v15505_v15  ;;  %6885 = vmatprep.subr.bf16.mxu1 %v15508_v16  ;;  %v15551_v15 = vld [vmem:[#allocation2 + $0x1428] ss:$20 sps:$4 sm:$0xff]  }
 0x28e   : > { %v15559_v16 = vld [vmem:[#allocation2 + $0x1454] ss:$20 sps:$4 sm:$0xff]  }
 0x290   : > { %6714 = vmatpush1.bf16.msra.mxu0 %v15503_v17  ;;  %6886 = vmatpush1.bf16.msra.mxu1 %v15506_v20  ;;  %v15562_v17 = vld [vmem:[#allocation2 + $0x145c] ss:$20 sps:$4 sm:$0xff]   ;;  %v15560_v20 = vld [vmem:[#allocation2 + $0x1458] ss:$20 sps:$4 sm:$0xff]  }
 0x291   : > { %6715 = vmatprep.subr.bf16.mxu0 %v15511_v21  ;;  %6887 = vmatprep.subr.bf16.mxu1 %v15514_v22  ;;  %v15565_v21 = vld [vmem:[#allocation2 + $0x147c] ss:$20 sps:$4 sm:$0xff]   ;;  %v15568_v22 = vld [vmem:[#allocation2 + $0x1484] ss:$20 sps:$4 sm:$0xff]  }
 0x294   : > { %6716 = vmatpush1.bf16.msra.mxu0 %v15509_v26  ;;  %6888 = vmatpush1.bf16.msra.mxu1 %v15512_v27  ;;  %v15563_v26 = vld [vmem:[#allocation2 + $0x1478] ss:$20 sps:$4 sm:$0xff]   ;;  %v15566_v27 = vld [vmem:[#allocation2 + $0x1480] ss:$20 sps:$4 sm:$0xff]  }
 0x295   : > { %6717 = vmatprep.subr.bf16.mxu0 %v15517_v29  ;;  %6889 = vmatprep.subr.bf16.mxu1 %v15520_v31  ;;  %v15571_v29 = vld [vmem:[#allocation2 + $0x14a4] ss:$20 sps:$4 sm:$0xff]   ;;  %v15574_v31 = vld [vmem:[#allocation2 + $0x14ac] ss:$20 sps:$4 sm:$0xff]  }
 0x298   : > { %6718 = vmatpush1.bf16.msra.mxu0 %v15515_v53  ;;  %6890 = vmatpush1.bf16.msra.mxu1 %v15518_v32  ;;  %v15569_v53 = vld [vmem:[#allocation2 + $0x14a0] ss:$20 sps:$4 sm:$0xff]   ;;  %v15572_v32 = vld [vmem:[#allocation2 + $0x14a8] ss:$20 sps:$4 sm:$0xff]  }
 0x299   : > { %6719 = vmatprep.subr.bf16.mxu0 %v15523_v37  ;;  %6891 = vmatprep.subr.bf16.mxu1 %v15526_v40  ;;  %v15577_v37 = vld [vmem:[#allocation2 + $0x14cc] ss:$20 sps:$4 sm:$0xff]   ;;  %v15580_v40 = vld [vmem:[#allocation2 + $0x14d4] ss:$20 sps:$4 sm:$0xff]  }
 0x29c   : > { %6720 = vmatpush1.bf16.msra.mxu0 %v15521_v35  ;;  %6892 = vmatpush1.bf16.msra.mxu1 %v15524_v36  ;;  %v15575_v35 = vld [vmem:[#allocation2 + $0x14c8] ss:$20 sps:$4 sm:$0xff]   ;;  %v15578_v36 = vld [vmem:[#allocation2 + $0x14d0] ss:$20 sps:$4 sm:$0xff]  }
 0x29d   : > { %6721 = vmatprep.subr.bf16.mxu0 %v15529_v25  ;;  %6893 = vmatprep.subr.bf16.mxu1 %v15532_v49  ;;  %v15583_v25 = vld [vmem:[#allocation2 + $0x14f4] ss:$20 sps:$4 sm:$0xff]   ;;  %v15586_v49 = vld [vmem:[#allocation2 + $0x14fc] ss:$20 sps:$4 sm:$0xff]  }
 0x2a0   : > { %6722 = vmatpush1.bf16.msra.mxu0 %v15527_v8  ;;  %6894 = vmatpush1.bf16.msra.mxu1 %v15530_v2  ;;  %v15581_v8 = vld [vmem:[#allocation2 + $0x14f0] ss:$20 sps:$4 sm:$0xff]   ;;  %v15584_v2 = vld [vmem:[#allocation2 + $0x14f8] ss:$20 sps:$4 sm:$0xff]  }
 0x2a1   : > { %6723 = vmatprep.subr.bf16.mxu0 %v15535_v46  ;;  %6895 = vmatprep.subr.bf16.mxu1 %v15538_v50  ;;  %v15589_v46 = vld [vmem:[#allocation2 + $0x151c] ss:$20 sps:$4 sm:$0xff]   ;;  %v15592_v50 = vld [vmem:[#allocation2 + $0x1524] ss:$20 sps:$4 sm:$0xff]  }
 0x2a4   : > { %6724 = vmatpush1.bf16.msra.mxu0 %v15533_v61  ;;  %6896 = vmatpush1.bf16.msra.mxu1 %v15536_v62  ;;  %v15587_v61 = vld [vmem:[#allocation2 + $0x1518] ss:$20 sps:$4 sm:$0xff]   ;;  %v15590_v62 = vld [vmem:[#allocation2 + $0x1520] ss:$20 sps:$4 sm:$0xff]  }
 0x2a5   : > { %6725 = vmatprep.subr.bf16.mxu0 %v15541_v63  ;;  %6897 = vmatprep.subr.bf16.mxu1 %v15544_v3  ;;  %v15595_v63 = vld [vmem:[#allocation2 + $0x1544] ss:$20 sps:$4 sm:$0xff]   ;;  %v15598_v3 = vld [vmem:[#allocation2 + $0x154c] ss:$20 sps:$4 sm:$0xff]  }
 0x2a8   : > { %6726 = vmatpush1.bf16.msra.mxu0 %v15539_v4  ;;  %6898 = vmatpush1.bf16.msra.mxu1 %v15542_v12  ;;  %v15593_v4 = vld [vmem:[#allocation2 + $0x1540] ss:$20 sps:$4 sm:$0xff]   ;;  %v15596_v12 = vld [vmem:[#allocation2 + $0x1548] ss:$20 sps:$4 sm:$0xff]  }
 0x2a9   : > { %6738 = vmatprep.subr.bf16.mxu0 %v15547_v30  ;;  %6910 = vmatprep.subr.bf16.mxu1 %v15550_v5  ;;  %v15601_v30 = vld [vmem:[#allocation2 + $0x156c] ss:$20 sps:$4 sm:$0xff]   ;;  %v15604_v5 = vld [vmem:[#allocation2 + $0x1574] ss:$20 sps:$4 sm:$0xff]  }
 0x2ab   : > { %6728 = vmatmul.mubr.bf16.vlgmr.msra.gmra.mrb[0].mxu0 %v16941_v7  ;;  %6900 = vmatmul.mubr.bf16.vlgmr.msra.gmra.mrb[0].mxu1 %v16941_v7 }
 0x2ac   : > { %6739 = vmatpush1.bf16.msra.mxu0 %v15545_v55  ;;  %6911 = vmatpush1.bf16.msra.mxu1 %v15548_v9  ;;  %v15599_v55 = vld [vmem:[#allocation2 + $0x1568] ss:$20 sps:$4 sm:$0xff]   ;;  %v15602_v9 = vld [vmem:[#allocation2 + $0x1570] ss:$20 sps:$4 sm:$0xff]  }
 0x2ad   : > { %6740 = vmatprep.subr.bf16.mxu0 %v15553_v10  ;;  %6912 = vmatprep.subr.bf16.mxu1 %v15556_v11  ;;  %v15607_v10 = vld [vmem:[#allocation2 + $0x1594] ss:$20 sps:$4 sm:$0xff]   ;;  %v15610_v11 = vld [vmem:[#allocation2 + $0x159c] ss:$20 sps:$4 sm:$0xff]  }
 0x2ae   : > { %6770 = vmatprep.mubr.bf16.mxu0 %v16944_v13  ;;  %6942 = vmatprep.mubr.bf16.mxu1 %v16944_v13 }
 0x2b0   : > { %6741 = vmatpush1.bf16.msra.mxu0 %v15551_v15  ;;  %6913 = vmatpush1.bf16.msra.mxu1 %v15554_v34  ;;  %v15605_v15 = vld [vmem:[#allocation2 + $0x1590] ss:$20 sps:$4 sm:$0xff]   ;;  %v15608_v34 = vld [vmem:[#allocation2 + $0x1598] ss:$20 sps:$4 sm:$0xff]  }
 0x2b1   : > { %6742 = vmatprep.subr.bf16.mxu0 %v15559_v16  ;;  %6914 = vmatprep.subr.bf16.mxu1 %v15562_v17  ;;  %v15613_v16 = vld [vmem:[#allocation2 + $0x15bc] ss:$20 sps:$4 sm:$0xff]   ;;  %v15616_v17 = vld [vmem:[#allocation2 + $0x15c4] ss:$20 sps:$4 sm:$0xff]  }
 0x2b4   : > { %6743 = vmatpush1.bf16.msra.mxu0 %v15557_v54  ;;  %6915 = vmatpush1.bf16.msra.mxu1 %v15560_v20  ;;  %v15611_v54 = vld [vmem:[#allocation2 + $0x15b8] ss:$20 sps:$4 sm:$0xff]   ;;  %v15614_v20 = vld [vmem:[#allocation2 + $0x15c0] ss:$20 sps:$4 sm:$0xff]  }
 0x2b5   : > { %6744 = vmatprep.subr.bf16.mxu0 %v15565_v21  ;;  %6916 = vmatprep.subr.bf16.mxu1 %v15568_v22  ;;  %v15619_v21 = vld [vmem:[#allocation2 + $0x15e4] ss:$20 sps:$4 sm:$0xff]   ;;  %v15622_v22 = vld [vmem:[#allocation2 + $0x15ec] ss:$20 sps:$4 sm:$0xff]  }
 0x2b8   : > { %6745 = vmatpush1.bf16.msra.mxu0 %v15563_v26  ;;  %6917 = vmatpush1.bf16.msra.mxu1 %v15566_v27  ;;  %v15617_v26 = vld [vmem:[#allocation2 + $0x15e0] ss:$20 sps:$4 sm:$0xff]   ;;  %v15620_v27 = vld [vmem:[#allocation2 + $0x15e8] ss:$20 sps:$4 sm:$0xff]  }
 0x2b9   : > { %6746 = vmatprep.subr.bf16.mxu0 %v15571_v29  ;;  %6918 = vmatprep.subr.bf16.mxu1 %v15574_v31  ;;  %v15625_v29 = vld [vmem:[#allocation2 + $0x160c] ss:$20 sps:$4 sm:$0xff]   ;;  %v15628_v31 = vld [vmem:[#allocation2 + $0x1614] ss:$20 sps:$4 sm:$0xff]  }
 0x2bc   : > { %6747 = vmatpush1.bf16.msra.mxu0 %v15569_v53  ;;  %6919 = vmatpush1.bf16.msra.mxu1 %v15572_v32  ;;  %v15623_v53 = vld [vmem:[#allocation2 + $0x1608] ss:$20 sps:$4 sm:$0xff]   ;;  %v15626_v32 = vld [vmem:[#allocation2 + $0x1610] ss:$20 sps:$4 sm:$0xff]  }
 0x2bd   : > { %6748 = vmatprep.subr.bf16.mxu0 %v15577_v37  ;;  %6920 = vmatprep.subr.bf16.mxu1 %v15580_v40  ;;  %v15631_v37 = vld [vmem:[#allocation2 + $0x1634] ss:$20 sps:$4 sm:$0xff]   ;;  %v15634_v40 = vld [vmem:[#allocation2 + $0x163c] ss:$20 sps:$4 sm:$0xff]  }
 0x2c0   : > { %6749 = vmatpush1.bf16.msra.mxu0 %v15575_v35  ;;  %6921 = vmatpush1.bf16.msra.mxu1 %v15578_v36  ;;  %v15629_v35 = vld [vmem:[#allocation2 + $0x1630] ss:$20 sps:$4 sm:$0xff]   ;;  %v15632_v36 = vld [vmem:[#allocation2 + $0x1638] ss:$20 sps:$4 sm:$0xff]  }
 0x2c1   : > { %6750 = vmatprep.subr.bf16.mxu0 %v15583_v25  ;;  %6922 = vmatprep.subr.bf16.mxu1 %v15586_v49  ;;  %v15637_v25 = vld [vmem:[#allocation2 + $0x165c] ss:$20 sps:$4 sm:$0xff]   ;;  %v15640_v49 = vld [vmem:[#allocation2 + $0x1664] ss:$20 sps:$4 sm:$0xff]  }
 0x2c4   : > { %6751 = vmatpush1.bf16.msra.mxu0 %v15581_v8  ;;  %6923 = vmatpush1.bf16.msra.mxu1 %v15584_v2  ;;  %v15635_v8 = vld [vmem:[#allocation2 + $0x1658] ss:$20 sps:$4 sm:$0xff]   ;;  %v15638_v2 = vld [vmem:[#allocation2 + $0x1660] ss:$20 sps:$4 sm:$0xff]  }
 0x2c5   : > { %6752 = vmatprep.subr.bf16.mxu0 %v15589_v46  ;;  %6924 = vmatprep.subr.bf16.mxu1 %v15592_v50  ;;  %v15643_v46 = vld [vmem:[#allocation2 + $0x1684] ss:$20 sps:$4 sm:$0xff]   ;;  %v15646_v50 = vld [vmem:[#allocation2 + $0x168c] ss:$20 sps:$4 sm:$0xff]  }
 0x2c8   : > { %6753 = vmatpush1.bf16.msra.mxu0 %v15587_v61  ;;  %6925 = vmatpush1.bf16.msra.mxu1 %v15590_v62  ;;  %v15641_v61 = vld [vmem:[#allocation2 + $0x1680] ss:$20 sps:$4 sm:$0xff]   ;;  %v15644_v62 = vld [vmem:[#allocation2 + $0x1688] ss:$20 sps:$4 sm:$0xff]  }
 0x2c9   : > { %6754 = vmatprep.subr.bf16.mxu0 %v15595_v63  ;;  %6926 = vmatprep.subr.bf16.mxu1 %v15598_v3  ;;  %v16637_v63 = vld [vmem:[%s16770_s6 + $0x8] ss:$28 sps:$4 sm:$0x7f]  }
 0x2ca   : > { %v16951_v3 = vrot.slane %v16637_v63, 1  ;;  %v15697_v63 = vld [vmem:[#allocation2 + $0x17ec] ss:$20 sps:$4 sm:$0xff]  }
 0x2cc   : > { %6755 = vmatpush1.bf16.msra.mxu0 %v15593_v4  ;;  %6927 = vmatpush1.bf16.msra.mxu1 %v15596_v12  ;;  %v15649_v4 = vld [vmem:[#allocation2 + $0x16ac] ss:$20 sps:$4 sm:$0xff]   ;;  %v15652_v12 = vld [vmem:[#allocation2 + $0x16b4] ss:$20 sps:$4 sm:$0xff]  }
 0x2cd   : > { %6756 = vmatprep.subr.bf16.mxu0 %v15601_v30  ;;  %6928 = vmatprep.subr.bf16.mxu1 %v15604_v5  ;;  %v15647_v30 = vld [vmem:[#allocation2 + $0x16a8] ss:$20 sps:$4 sm:$0xff]   ;;  %v15650_v5 = vld [vmem:[#allocation2 + $0x16b0] ss:$20 sps:$4 sm:$0xff]  }
 0x2d0   : > { %6757 = vmatpush1.bf16.msra.mxu0 %v15599_v55  ;;  %6929 = vmatpush1.bf16.msra.mxu1 %v15602_v9  ;;  %v16638_v55 = vld [vmem:[%s16770_s6 + $0x14] ss:$28 sps:$4 sm:$0x7f]  }
 0x2d1   : > { %6758 = vmatprep.subr.bf16.mxu0 %v15607_v10  ;;  %6930 = vmatprep.subr.bf16.mxu1 %v15610_v11  ;;  %v16954_v9 = vrot.slane %v16638_v55, 1  ;;  %v15655_v10 = vld [vmem:[#allocation2 + $0x16d4] ss:$20 sps:$4 sm:$0xff]   ;;  %v15658_v11 = vld [vmem:[#allocation2 + $0x16dc] ss:$20 sps:$4 sm:$0xff]  }
 0x2d2   : > { %v15706_v55 = vld [vmem:[#allocation2 + $0x181c] ss:$20 sps:$4 sm:$0xff]  }
 0x2d4   : > { %6759 = vmatpush1.bf16.msra.mxu0 %v15605_v15  ;;  %6931 = vmatpush1.bf16.msra.mxu1 %v15608_v34  ;;  %v15653_v15 = vld [vmem:[#allocation2 + $0x16d0] ss:$20 sps:$4 sm:$0xff]   ;;  %v15656_v34 = vld [vmem:[#allocation2 + $0x16d8] ss:$20 sps:$4 sm:$0xff]  }
 0x2d5   : > { %6760 = vmatprep.subr.bf16.mxu0 %v15613_v16  ;;  %6932 = vmatprep.subr.bf16.mxu1 %v15616_v17  ;;  %v15661_v16 = vld [vmem:[#allocation2 + $0x16fc] ss:$20 sps:$4 sm:$0xff]   ;;  %v15664_v17 = vld [vmem:[#allocation2 + $0x1704] ss:$20 sps:$4 sm:$0xff]  }
 0x2d8   : > { %6761 = vmatpush1.bf16.msra.mxu0 %v15611_v54  ;;  %6933 = vmatpush1.bf16.msra.mxu1 %v15614_v20  ;;  %v15659_v54 = vld [vmem:[#allocation2 + $0x16f8] ss:$20 sps:$4 sm:$0xff]   ;;  %v15662_v20 = vld [vmem:[#allocation2 + $0x1700] ss:$20 sps:$4 sm:$0xff]  }
 0x2d9   : > { %6762 = vmatprep.subr.bf16.mxu0 %v15619_v21  ;;  %6934 = vmatprep.subr.bf16.mxu1 %v15622_v22  ;;  %v15667_v21 = vld [vmem:[#allocation2 + $0x1724] ss:$20 sps:$4 sm:$0xff]   ;;  %v15670_v22 = vld [vmem:[#allocation2 + $0x172c] ss:$20 sps:$4 sm:$0xff]  }
 0x2dc   : > { %6763 = vmatpush1.bf16.msra.mxu0 %v15617_v26  ;;  %6935 = vmatpush1.bf16.msra.mxu1 %v15620_v27  ;;  %v15665_v26 = vld [vmem:[#allocation2 + $0x1720] ss:$20 sps:$4 sm:$0xff]   ;;  %v15668_v27 = vld [vmem:[#allocation2 + $0x1728] ss:$20 sps:$4 sm:$0xff]  }
 0x2dd   : > { %6764 = vmatprep.subr.bf16.mxu0 %v15625_v29  ;;  %6936 = vmatprep.subr.bf16.mxu1 %v15628_v31  ;;  %v15673_v29 = vld [vmem:[#allocation2 + $0x174c] ss:$20 sps:$4 sm:$0xff]   ;;  %v15676_v31 = vld [vmem:[#allocation2 + $0x1754] ss:$20 sps:$4 sm:$0xff]  }
 0x2e0   : > { %6765 = vmatpush1.bf16.msra.mxu0 %v15623_v53  ;;  %6937 = vmatpush1.bf16.msra.mxu1 %v15626_v32  ;;  %v15671_v53 = vld [vmem:[#allocation2 + $0x1748] ss:$20 sps:$4 sm:$0xff]   ;;  %v15674_v32 = vld [vmem:[#allocation2 + $0x1750] ss:$20 sps:$4 sm:$0xff]  }
 0x2e1   : > { %6766 = vmatprep.subr.bf16.mxu0 %v15631_v37  ;;  %6938 = vmatprep.subr.bf16.mxu1 %v15634_v40  ;;  %v15679_v37 = vld [vmem:[#allocation2 + $0x1774] ss:$20 sps:$4 sm:$0xff]   ;;  %v15682_v40 = vld [vmem:[#allocation2 + $0x177c] ss:$20 sps:$4 sm:$0xff]  }
 0x2e4   : > { %6767 = vmatpush1.bf16.msra.mxu0 %v15629_v35  ;;  %6939 = vmatpush1.bf16.msra.mxu1 %v15632_v36  ;;  %v15677_v35 = vld [vmem:[#allocation2 + $0x1770] ss:$20 sps:$4 sm:$0xff]   ;;  %v15680_v36 = vld [vmem:[#allocation2 + $0x1778] ss:$20 sps:$4 sm:$0xff]  }
 0x2e5   : > { %6768 = vmatprep.subr.bf16.mxu0 %v15637_v25  ;;  %6940 = vmatprep.subr.bf16.mxu1 %v15640_v49  ;;  %v15685_v25 = vld [vmem:[#allocation2 + $0x179c] ss:$20 sps:$4 sm:$0xff]   ;;  %v15688_v49 = vld [vmem:[#allocation2 + $0x17a4] ss:$20 sps:$4 sm:$0xff]  }
 0x2e8   : > { %6769 = vmatpush1.bf16.msra.mxu0 %v15635_v8  ;;  %6941 = vmatpush1.bf16.msra.mxu1 %v15638_v2  ;;  %v15683_v8 = vld [vmem:[#allocation2 + $0x1798] ss:$20 sps:$4 sm:$0xff]   ;;  %v15686_v2 = vld [vmem:[#allocation2 + $0x17a0] ss:$20 sps:$4 sm:$0xff]  }
 0x2e9   : > { %6781 = vmatprep.subr.bf16.mxu0 %v15643_v46  ;;  %6953 = vmatprep.subr.bf16.mxu1 %v15646_v50  ;;  %v15691_v46 = vld [vmem:[#allocation2 + $0x17c4] ss:$20 sps:$4 sm:$0xff]   ;;  %v15694_v50 = vld [vmem:[#allocation2 + $0x17cc] ss:$20 sps:$4 sm:$0xff]  }
 0x2eb   : > { %6771 = vmatmul.mubr.bf16.vlgmr.msra.gmra.mrb[0].mxu0 %v16951_v3  ;;  %6943 = vmatmul.mubr.bf16.vlgmr.msra.gmra.mrb[0].mxu1 %v16951_v3 }
 0x2ec   : > { %6782 = vmatpush1.bf16.msra.mxu0 %v15641_v61  ;;  %6954 = vmatpush1.bf16.msra.mxu1 %v15644_v62  ;;  %v15689_v61 = vld [vmem:[#allocation2 + $0x17c0] ss:$20 sps:$4 sm:$0xff]   ;;  %v15692_v62 = vld [vmem:[#allocation2 + $0x17c8] ss:$20 sps:$4 sm:$0xff]  }
 0x2ed   : > { %6783 = vmatprep.subr.bf16.mxu0 %v15649_v4  ;;  %6955 = vmatprep.subr.bf16.mxu1 %v15652_v12  ;;  %v15700_v4 = vld [vmem:[#allocation2 + $0x17f4] ss:$20 sps:$4 sm:$0xff]  }
 0x2ee   : > { %6813 = vmatprep.mubr.bf16.mxu0 %v16954_v9  ;;  %6985 = vmatprep.mubr.bf16.mxu1 %v16954_v9  ;;  %v15695_v12 = vld [vmem:[#allocation2 + $0x17e8] ss:$20 sps:$4 sm:$0xff]  }
 0x2f0   : > { %6784 = vmatpush1.bf16.msra.mxu0 %v15647_v30  ;;  %6956 = vmatpush1.bf16.msra.mxu1 %v15650_v5  ;;  %v15698_v30 = vld [vmem:[#allocation2 + $0x17f0] ss:$20 sps:$4 sm:$0xff]   ;;  %v15703_v5 = vld [vmem:[#allocation2 + $0x1814] ss:$20 sps:$4 sm:$0xff]  }
 0x2f1   : > { %6785 = vmatprep.subr.bf16.mxu0 %v15655_v10  ;;  %6957 = vmatprep.subr.bf16.mxu1 %v15658_v11  ;;  %v15701_v10 = vld [vmem:[#allocation2 + $0x1810] ss:$20 sps:$4 sm:$0xff]   ;;  %v15704_v11 = vld [vmem:[#allocation2 + $0x1818] ss:$20 sps:$4 sm:$0xff]  }
 0x2f4   : > { %6786 = vmatpush1.bf16.msra.mxu0 %v15653_v15  ;;  %6958 = vmatpush1.bf16.msra.mxu1 %v15656_v34  ;;  %v15709_v15 = vld [vmem:[#allocation2 + $0x183c] ss:$20 sps:$4 sm:$0xff]   ;;  %v15712_v34 = vld [vmem:[#allocation2 + $0x1844] ss:$20 sps:$4 sm:$0xff]  }
 0x2f5   : > { %6787 = vmatprep.subr.bf16.mxu0 %v15661_v16  ;;  %6959 = vmatprep.subr.bf16.mxu1 %v15664_v17  ;;  %v15707_v16 = vld [vmem:[#allocation2 + $0x1838] ss:$20 sps:$4 sm:$0xff]   ;;  %v15710_v17 = vld [vmem:[#allocation2 + $0x1840] ss:$20 sps:$4 sm:$0xff]  }
 0x2f8   : > { %6788 = vmatpush1.bf16.msra.mxu0 %v15659_v54  ;;  %6960 = vmatpush1.bf16.msra.mxu1 %v15662_v20  ;;  %v15715_v54 = vld [vmem:[#allocation2 + $0x1864] ss:$20 sps:$4 sm:$0xff]   ;;  %v15718_v20 = vld [vmem:[#allocation2 + $0x186c] ss:$20 sps:$4 sm:$0xff]  }
 0x2f9   : > { %6789 = vmatprep.subr.bf16.mxu0 %v15667_v21  ;;  %6961 = vmatprep.subr.bf16.mxu1 %v15670_v22  ;;  %v15713_v21 = vld [vmem:[#allocation2 + $0x1860] ss:$20 sps:$4 sm:$0xff]   ;;  %v15716_v22 = vld [vmem:[#allocation2 + $0x1868] ss:$20 sps:$4 sm:$0xff]  }
 0x2fc   : > { %6790 = vmatpush1.bf16.msra.mxu0 %v15665_v26  ;;  %6962 = vmatpush1.bf16.msra.mxu1 %v15668_v27  ;;  %v15721_v26 = vld [vmem:[#allocation2 + $0x188c] ss:$20 sps:$4 sm:$0xff]   ;;  %v15724_v27 = vld [vmem:[#allocation2 + $0x1894] ss:$20 sps:$4 sm:$0xff]  }
 0x2fd   : > { %6791 = vmatprep.subr.bf16.mxu0 %v15673_v29  ;;  %6963 = vmatprep.subr.bf16.mxu1 %v15676_v31  ;;  %v15719_v29 = vld [vmem:[#allocation2 + $0x1888] ss:$20 sps:$4 sm:$0xff]   ;;  %v15722_v31 = vld [vmem:[#allocation2 + $0x1890] ss:$20 sps:$4 sm:$0xff]  }
 0x300   : > { %6792 = vmatpush1.bf16.msra.mxu0 %v15671_v53  ;;  %6964 = vmatpush1.bf16.msra.mxu1 %v15674_v32  ;;  %v15727_v53 = vld [vmem:[#allocation2 + $0x18b4] ss:$20 sps:$4 sm:$0xff]   ;;  %v15730_v32 = vld [vmem:[#allocation2 + $0x18bc] ss:$20 sps:$4 sm:$0xff]  }
 0x301   : > { %6793 = vmatprep.subr.bf16.mxu0 %v15679_v37  ;;  %6965 = vmatprep.subr.bf16.mxu1 %v15682_v40 }
 0x304   : > { %6794 = vmatpush1.bf16.msra.mxu0 %v15677_v35  ;;  %6966 = vmatpush1.bf16.msra.mxu1 %v15680_v36 }
 0x305   : > { %6795 = vmatprep.subr.bf16.mxu0 %v15685_v25  ;;  %6967 = vmatprep.subr.bf16.mxu1 %v15688_v49 }
 0x308   : > { %6796 = vmatpush1.bf16.msra.mxu0 %v15683_v8  ;;  %6968 = vmatpush1.bf16.msra.mxu1 %v15686_v2 }
 0x309   : > { %6797 = vmatprep.subr.bf16.mxu0 %v15691_v46  ;;  %6969 = vmatprep.subr.bf16.mxu1 %v15694_v50  ;;  %v15725_v46 = vld [vmem:[#allocation2 + $0x18b0] ss:$20 sps:$4 sm:$0xff]   ;;  %v15728_v50 = vld [vmem:[#allocation2 + $0x18b8] ss:$20 sps:$4 sm:$0xff]  }
 0x30c   : > { %6798 = vmatpush1.bf16.msra.mxu0 %v15689_v61  ;;  %6970 = vmatpush1.bf16.msra.mxu1 %v15692_v62 }
 0x30d   : > { %6799 = vmatprep.subr.bf16.mxu0 %v15697_v63  ;;  %6971 = vmatprep.subr.bf16.mxu1 %v15700_v4  ;;  %v15733_v63 = vld [vmem:[#allocation2 + $0x18dc] ss:$20 sps:$4 sm:$0xff]   ;;  %v15736_v4 = vld [vmem:[#allocation2 + $0x18e4] ss:$20 sps:$4 sm:$0xff]  }
 0x310   : > { %6800 = vmatpush1.bf16.msra.mxu0 %v15695_v12  ;;  %6972 = vmatpush1.bf16.msra.mxu1 %v15698_v30 }
 0x311   : > { %6801 = vmatprep.subr.bf16.mxu0 %v15703_v5  ;;  %6973 = vmatprep.subr.bf16.mxu1 %v15706_v55 }
 0x314   : > { %6802 = vmatpush1.bf16.msra.mxu0 %v15701_v10  ;;  %6974 = vmatpush1.bf16.msra.mxu1 %v15704_v11  ;;  %v15731_v11 = vld [vmem:[#allocation2 + $0x18d8] ss:$20 sps:$4 sm:$0xff]  }
 0x315   : > { %6803 = vmatprep.subr.bf16.mxu0 %v15709_v15  ;;  %6975 = vmatprep.subr.bf16.mxu1 %v15712_v34  ;;  %v15734_v15 = vld [vmem:[#allocation2 + $0x18e0] ss:$20 sps:$4 sm:$0xff]   ;;  %v15739_v34 = vld [vmem:[#allocation2 + $0x1904] ss:$20 sps:$4 sm:$0xff]  }
 0x318   : > { %6804 = vmatpush1.bf16.msra.mxu0 %v15707_v16  ;;  %6976 = vmatpush1.bf16.msra.mxu1 %v15710_v17  ;;  %v15742_v16 = vld [vmem:[#allocation2 + $0x190c] ss:$20 sps:$4 sm:$0xff]  }
 0x319   : > { %6805 = vmatprep.subr.bf16.mxu0 %v15715_v54  ;;  %6977 = vmatprep.subr.bf16.mxu1 %v15718_v20  ;;  %v16639_v54 = vld [vmem:[%s16770_s6 + $0x10] ss:$28 sps:$4 sm:$0x7f]  }
 0x31a   : > { %v16967_v20 = vrot.slane %v16639_v54, 1  ;;  %v15784_v54 = vld [vmem:[#allocation2 + $0x1a24] ss:$20 sps:$4 sm:$0xff]  }
 0x31c   : > { %6806 = vmatpush1.bf16.msra.mxu0 %v15713_v21  ;;  %6978 = vmatpush1.bf16.msra.mxu1 %v15716_v22  ;;  %v15740_v21 = vld [vmem:[#allocation2 + $0x1908] ss:$20 sps:$4 sm:$0xff]  }
 0x31d   : > { %6807 = vmatprep.subr.bf16.mxu0 %v15721_v26  ;;  %6979 = vmatprep.subr.bf16.mxu1 %v15724_v27  ;;  %v15748_v22 = vld [vmem:[#allocation2 + $0x1934] ss:$20 sps:$4 sm:$0xff]   ;;  %v15746_v27 = vld [vmem:[#allocation2 + $0x1930] ss:$20 sps:$4 sm:$0xff]  }
 0x31e   : > { %v14008_v37 = vpop.f32.mrb[12].mxu0  ;;  %v14030_v40 = vpop.f32.mrb[12].mxu1  ;;  %v15743_v26 = vld [vmem:[#allocation2 + $0x1928] ss:$20 sps:$4 sm:$0xff]  }
 0x31f   : > { %v14009_v35 = vpop.f32.mrb[13].mxu0  ;;  %v14031_v36 = vpop.f32.mrb[13].mxu1 }
 0x320   : > { %v14010_v25 = vadd.f32 %v14009_v35, %v14008_v37  ;;  %v14011_v49 = vpop.f32.mrb[14].mxu0  ;;  %6808 = vmatpush1.bf16.msra.mxu0 %v15719_v29  ;;  %6980 = vmatpush1.bf16.msra.mxu1 %v15722_v31  ;;  %v14032_v8 = vadd.f32 %v14031_v36, %v14030_v40  ;;  %v14033_v2 = vpop.f32.mrb[14].mxu1  ;;  %v15751_v29 = vld [vmem:[#allocation2 + $0x1954] ss:$20 sps:$4 sm:$0xff]   ;;  %v15754_v31 = vld [vmem:[#allocation2 + $0x195c] ss:$20 sps:$4 sm:$0xff]  }
 0x321   : > { %v14012_v61 = vpop.f32.mrb[15].mxu0  ;;  %v14034_v62 = vpop.f32.mrb[15].mxu1  ;;  %6809 = vmatprep.subr.bf16.mxu0 %v15727_v53  ;;  %6981 = vmatprep.subr.bf16.mxu1 %v15730_v32  ;;  %v15749_v53 = vld [vmem:[#allocation2 + $0x1950] ss:$20 sps:$4 sm:$0xff]   ;;  %v15752_v32 = vld [vmem:[#allocation2 + $0x1958] ss:$20 sps:$4 sm:$0xff]  }
 0x322   : > { %v14444_v12 = vadd.f32 %v14010_v25, %v16899_v58  ;;  %v14013_v30 = vadd.f32 %v14012_v61, %v14011_v49  ;;  %v14035_v5 = vadd.f32 %v14034_v62, %v14033_v2  ;;  %v15737_v58 = vld [vmem:[#allocation2 + $0x1900] ss:$20 sps:$4 sm:$0xff]   ;;  %v15757_v37 = vld [vmem:[#allocation2 + $0x197c] ss:$20 sps:$4 sm:$0xff]   ;;  %v15760_v40 = vld [vmem:[#allocation2 + $0x1984] ss:$20 sps:$4 sm:$0xff]  }
 0x323   : > { %v15755_v35 = vld [vmem:[#allocation2 + $0x1978] ss:$20 sps:$4 sm:$0xff]   ;;  %v15758_v36 = vld [vmem:[#allocation2 + $0x1980] ss:$20 sps:$4 sm:$0xff]   ;;  %v15764_v2 = vld [vmem:[#allocation2 + $0x19a8] ss:$20 sps:$4 sm:$0xff]  }
 0x324   : > { %v14451_v55 = vadd.f32 %v14013_v30, %v16902_v28  ;;  %v16962_v10 = vadd.f32 %v14444_v12, %v14032_v8  ;;  %6810 = vmatpush1.bf16.msra.mxu0 %v15725_v46  ;;  %6982 = vmatpush1.bf16.msra.mxu1 %v15728_v50  ;;  %v15745_v28 = vld [vmem:[#allocation2 + $0x192c] ss:$20 sps:$4 sm:$0xff]   ;;  %v15763_v25 = vld [vmem:[#allocation2 + $0x19a4] ss:$20 sps:$4 sm:$0xff]   ;;  %v15772_v50 = vld [vmem:[#allocation2 + $0x19d4] ss:$20 sps:$4 sm:$0xff]  }
 0x325   : > { %6811 = vmatprep.subr.bf16.mxu0 %v15733_v63  ;;  %6983 = vmatprep.subr.bf16.mxu1 %v15736_v4  ;;  %v15766_v49 = vld [vmem:[#allocation2 + $0x19ac] ss:$20 sps:$4 sm:$0xff]   ;;  %v15767_v61 = vld [vmem:[#allocation2 + $0x19c8] ss:$20 sps:$4 sm:$0xff]   ;;  %v15770_v62 = vld [vmem:[#allocation2 + $0x19d0] ss:$20 sps:$4 sm:$0xff]  }
 0x326   : > { %v16964_v17 = vadd.f32 %v14451_v55, %v14035_v5  ;;  %v15761_v8 = vld [vmem:[#allocation2 + $0x19a0] ss:$20 sps:$4 sm:$0xff]   ;;  %v15778_v4 = vld [vmem:[#allocation2 + $0x19fc] ss:$20 sps:$4 sm:$0xff]  }
 0x327   : > { %v15769_v46 = vld [vmem:[#allocation2 + $0x19cc] ss:$20 sps:$4 sm:$0xff]   ;;  %v15775_v63 = vld [vmem:[#allocation2 + $0x19f4] ss:$20 sps:$4 sm:$0xff]  }
 0x328   : > { %6812 = vmatpush1.bf16.msra.mxu0 %v15731_v11  ;;  %6984 = vmatpush1.bf16.msra.mxu1 %v15734_v15  ;;  %v15773_v11 = vld [vmem:[#allocation2 + $0x19f0] ss:$20 sps:$4 sm:$0xff]   ;;  %v15776_v15 = vld [vmem:[#allocation2 + $0x19f8] ss:$20 sps:$4 sm:$0xff]  }
 0x329   : > { %6824 = vmatprep.subr.bf16.mxu0 %v15739_v34  ;;  %6996 = vmatprep.subr.bf16.mxu1 %v15742_v16  ;;  %v15781_v16 = vld [vmem:[#allocation2 + $0x1a1c] ss:$20 sps:$4 sm:$0xff]  }
 0x32b   : > { %6814 = vmatmul.mubr.bf16.vlgmr.msra.gmra.mrb[0].mxu0 %v16967_v20  ;;  %6986 = vmatmul.mubr.bf16.vlgmr.msra.gmra.mrb[0].mxu1 %v16967_v20 }
 0x32c   : > { %6825 = vmatpush1.bf16.msra.mxu0 %v15737_v58  ;;  %6997 = vmatpush1.bf16.msra.mxu1 %v15740_v21 }
 0x32d   : > { %6826 = vmatprep.subr.bf16.mxu0 %v15745_v28  ;;  %6998 = vmatprep.subr.bf16.mxu1 %v15748_v22  ;;  %v15779_v22 = vld [vmem:[#allocation2 + $0x1a18] ss:$20 sps:$4 sm:$0xff]  }
 0x32e   : > { %6856 = vmatprep.mubr.bf16.mxu0 %v16691_v18  ;;  %7028 = vmatprep.mubr.bf16.mxu1 %v16691_v18 }
 0x330   : > { %6827 = vmatpush1.bf16.msra.mxu0 %v15743_v26  ;;  %6999 = vmatpush1.bf16.msra.mxu1 %v15746_v27  ;;  %v15782_v26 = vld [vmem:[#allocation2 + $0x1a20] ss:$20 sps:$4 sm:$0xff]   ;;  %v15785_v27 = vld [vmem:[#allocation2 + $0x12d0] ss:$20 sps:$4 sm:$0xff]  }
 0x331   : > { %6828 = vmatprep.subr.bf16.mxu0 %v15751_v29  ;;  %7000 = vmatprep.subr.bf16.mxu1 %v15754_v31  ;;  %v15786_v29 = vld [vmem:[#allocation2 + $0x1550] ss:$20 sps:$4 sm:$0xff]   ;;  %v16640_v31 = vld [vmem:[%s16770_s6 + $0x18] ss:$28 sps:$4 sm:$0x7f]  }
 0x334   : > { %6829 = vmatpush1.bf16.msra.mxu0 %v15749_v53  ;;  %7001 = vmatpush1.bf16.msra.mxu1 %v15752_v32  ;;  %v16980_v53 = vrot.slane %v16640_v31, 1  ;;  %v15787_v32 = vld [vmem:[#allocation2 + $0x1190] ss:$20 sps:$4 sm:$0xff]   ;;  %v15820_v31 = vld [vmem:[#allocation2 + $0x17f8] ss:$20 sps:$4 sm:$0xff]  }
 0x335   : > { %6830 = vmatprep.subr.bf16.mxu0 %v15757_v37  ;;  %7002 = vmatprep.subr.bf16.mxu1 %v15760_v40  ;;  %v15789_v37 = vld [vmem:[#allocation2 + $0x12f8] ss:$20 sps:$4 sm:$0xff]  }
 0x336   : > { %v15791_v40 = vld [vmem:[#allocation2 + $0x11b8] ss:$20 sps:$4 sm:$0xff]  }
 0x338   : > { %6831 = vmatpush1.bf16.msra.mxu0 %v15755_v35  ;;  %7003 = vmatpush1.bf16.msra.mxu1 %v15758_v36  ;;  %v15792_v35 = vld [vmem:[#allocation2 + $0x1438] ss:$20 sps:$4 sm:$0xff]   ;;  %v15793_v36 = vld [vmem:[#allocation2 + $0x1320] ss:$20 sps:$4 sm:$0xff]  }
 0x339   : > { %6832 = vmatprep.subr.bf16.mxu0 %v15763_v25  ;;  %7004 = vmatprep.subr.bf16.mxu1 %v15766_v49  ;;  %v15794_v25 = vld [vmem:[#allocation2 + $0x15a0] ss:$20 sps:$4 sm:$0xff]  }
 0x33a   : > { %v15795_v49 = vld [vmem:[#allocation2 + $0x11e0] ss:$20 sps:$4 sm:$0xff]  }
 0x33c   : > { %6833 = vmatpush1.bf16.msra.mxu0 %v15761_v8  ;;  %7005 = vmatpush1.bf16.msra.mxu1 %v15764_v2  ;;  %v15796_v8 = vld [vmem:[#allocation2 + $0x1460] ss:$20 sps:$4 sm:$0xff]   ;;  %v15797_v2 = vld [vmem:[#allocation2 + $0x1348] ss:$20 sps:$4 sm:$0xff]  }
 0x33d   : > { %6834 = vmatprep.subr.bf16.mxu0 %v15769_v46  ;;  %7006 = vmatprep.subr.bf16.mxu1 %v15772_v50  ;;  %v15798_v46 = vld [vmem:[#allocation2 + $0x15c8] ss:$20 sps:$4 sm:$0xff]  }
 0x33e   : > { %v14052_v12 = vpop.f32.mrb[16].mxu0  ;;  %v15799_v50 = vld [vmem:[#allocation2 + $0x1208] ss:$20 sps:$4 sm:$0xff]  }
 0x33f   : > { %v14053_v30 = vpop.f32.mrb[17].mxu0 }
 0x340   : > { %v14054_v5 = vadd.f32 %v14053_v30, %v14052_v12  ;;  %v14055_v55 = vpop.f32.mrb[18].mxu0  ;;  %6835 = vmatpush1.bf16.msra.mxu0 %v15767_v61  ;;  %7007 = vmatpush1.bf16.msra.mxu1 %v15770_v62  ;;  %v15800_v61 = vld [vmem:[#allocation2 + $0x1488] ss:$20 sps:$4 sm:$0xff]   ;;  %v15801_v62 = vld [vmem:[#allocation2 + $0x1370] ss:$20 sps:$4 sm:$0xff]  }
 0x341   : > { %v14056_v34 = vpop.f32.mrb[19].mxu0  ;;  %6836 = vmatprep.subr.bf16.mxu0 %v15775_v63  ;;  %7008 = vmatprep.subr.bf16.mxu1 %v15778_v4  ;;  %v15802_v63 = vld [vmem:[#allocation2 + $0x15f0] ss:$20 sps:$4 sm:$0xff]   ;;  %v15805_v4 = vld [vmem:[#allocation2 + $0x1398] ss:$20 sps:$4 sm:$0xff]  }
 0x342   : > { %v16974_v58 = vadd.f32 %v16962_v10, %v14054_v5  ;;  %v14057_v21 = vadd.f32 %v14056_v34, %v14055_v55  ;;  %v15788_v10 = vld [vmem:[#allocation2 + $0x1410] ss:$20 sps:$4 sm:$0xff]   ;;  %v15806_v12 = vld [vmem:[#allocation2 + $0x1618] ss:$20 sps:$4 sm:$0xff]   ;;  %v15809_v55 = vld [vmem:[#allocation2 + $0x13c0] ss:$20 sps:$4 sm:$0xff]  }
 0x343   : > { %v15807_v30 = vld [vmem:[#allocation2 + $0x1258] ss:$20 sps:$4 sm:$0xff]   ;;  %v15812_v34 = vld [vmem:[#allocation2 + $0x1500] ss:$20 sps:$4 sm:$0xff]  }
 0x344   : > { %v16977_v28 = vadd.f32 %v16964_v17, %v14057_v21  ;;  %6837 = vmatpush1.bf16.msra.mxu0 %v15773_v11  ;;  %7009 = vmatpush1.bf16.msra.mxu1 %v15776_v15  ;;  %v15790_v17 = vld [vmem:[#allocation2 + $0x1578] ss:$20 sps:$4 sm:$0xff]   ;;  %v15810_v11 = vld [vmem:[#allocation2 + $0x1640] ss:$20 sps:$4 sm:$0xff]   ;;  %v15815_v21 = vld [vmem:[#allocation2 + $0x12a8] ss:$20 sps:$4 sm:$0xff]  }
 0x345   : > { %6838 = vmatprep.subr.bf16.mxu0 %v15781_v16  ;;  %7010 = vmatprep.subr.bf16.mxu1 %v15784_v54  ;;  %v15808_v5 = vld [vmem:[#allocation2 + $0x14d8] ss:$20 sps:$4 sm:$0xff]   ;;  %v15811_v15 = vld [vmem:[#allocation2 + $0x1280] ss:$20 sps:$4 sm:$0xff]   ;;  %v15813_v16 = vld [vmem:[#allocation2 + $0x13e8] ss:$20 sps:$4 sm:$0xff]  }
 0x346   : > { %v15814_v54 = vld [vmem:[#allocation2 + $0x1668] ss:$20 sps:$4 sm:$0xff]  }
 0x348   : > { %6839 = vmatpush1.bf16.msra.mxu0 %v15779_v22  ;;  %7011 = vmatpush1.bf16.msra.mxu1 %v15782_v26  ;;  %v15816_v22 = vld [vmem:[#allocation2 + $0x1528] ss:$20 sps:$4 sm:$0xff]   ;;  %v15817_v26 = vld [vmem:[#allocation2 + $0x17d0] ss:$20 sps:$4 sm:$0xff]  }
 0x349   : > { %14067 = vmatprep.subr.bf16.mxu0 %v15785_v27  ;;  %14089 = vmatprep.subr.bf16.mxu1 %v15786_v29  ;;  %v15818_v27 = vld [vmem:[#allocation2 + $0x1690] ss:$20 sps:$4 sm:$0xff]  }
 0x34a   : > { %v15819_v29 = vld [vmem:[#allocation2 + $0x1910] ss:$20 sps:$4 sm:$0xff]  }
 0x34b   : > { %6857 = vmatmul.mubr.bf16.vlgmr.msra.gmra.mrb[0].mxu0 %v16980_v53  ;;  %7029 = vmatmul.mubr.bf16.vlgmr.msra.gmra.mrb[0].mxu1 %v16980_v53 }
 0x34c   : > { %14068 = vmatpush3.bf16.msra.mxu0 %v15787_v32  ;;  %14090 = vmatpush3.bf16.msra.mxu1 %v15788_v10  ;;  %v15821_v32 = vld [vmem:[#allocation2 + $0x16b8] ss:$20 sps:$4 sm:$0xff]  }
 0x34d   : > { %14069 = vmatprep.subr.bf16.mxu0 %v15789_v37  ;;  %14091 = vmatprep.subr.bf16.mxu1 %v15790_v17  ;;  %v15822_v10 = vld [vmem:[#allocation2 + $0x1938] ss:$20 sps:$4 sm:$0xff]   ;;  %v15823_v37 = vld [vmem:[#allocation2 + $0x1820] ss:$20 sps:$4 sm:$0xff]  }
 0x34e   : > { %7071 = vmatprep.mubr.bf16.mxu0 %v16934_v23  ;;  %7112 = vmatprep.mubr.bf16.mxu1 %v16944_v13  ;;  %v15803_v23 = vld [vmem:[#allocation2 + $0x1230] ss:$20 sps:$4 sm:$0xff]   ;;  %v15824_v17 = vld [vmem:[#allocation2 + $0x16e0] ss:$20 sps:$4 sm:$0xff]  }
 0x34f   : > { %v15804_v13 = vld [vmem:[#allocation2 + $0x14b0] ss:$20 sps:$4 sm:$0xff]  }
 0x350   : > { %14070 = vmatpush3.bf16.msra.mxu0 %v15791_v40  ;;  %14092 = vmatpush3.bf16.msra.mxu1 %v15792_v35  ;;  %v15825_v40 = vld [vmem:[#allocation2 + $0x1960] ss:$20 sps:$4 sm:$0xff]   ;;  %v15828_v35 = vld [vmem:[#allocation2 + $0x1988] ss:$20 sps:$4 sm:$0xff]  }
 0x351   : > { %14071 = vmatprep.subr.bf16.mxu0 %v15793_v36  ;;  %14093 = vmatprep.subr.bf16.mxu1 %v15794_v25  ;;  %v15829_v36 = vld [vmem:[#allocation2 + $0x1870] ss:$20 sps:$4 sm:$0xff]  }
 0x352   : > { %v15831_v25 = vld [vmem:[#allocation2 + $0x19b0] ss:$20 sps:$4 sm:$0xff]  }
 0x354   : > { %14072 = vmatpush3.bf16.msra.mxu0 %v15795_v49  ;;  %14094 = vmatpush3.bf16.msra.mxu1 %v15796_v8  ;;  %v15832_v49 = vld [vmem:[#allocation2 + $0x1898] ss:$20 sps:$4 sm:$0xff]  }
 0x355   : > { %14073 = vmatprep.subr.bf16.mxu0 %v15797_v2  ;;  %14095 = vmatprep.subr.bf16.mxu1 %v15798_v46  ;;  %v15833_v8 = vld [vmem:[#allocation2 + $0x1758] ss:$20 sps:$4 sm:$0xff]   ;;  %v15835_v46 = vld [vmem:[#allocation2 + $0x18c0] ss:$20 sps:$4 sm:$0xff]  }
 0x356   : > { %v15834_v2 = vld [vmem:[#allocation2 + $0x19d8] ss:$20 sps:$4 sm:$0xff]  }
 0x358   : > { %14074 = vmatpush3.bf16.msra.mxu0 %v15799_v50  ;;  %14096 = vmatpush3.bf16.msra.mxu1 %v15800_v61  ;;  %v15836_v50 = vld [vmem:[#allocation2 + $0x1780] ss:$20 sps:$4 sm:$0xff]  }
 0x359   : > { %14075 = vmatprep.subr.bf16.mxu0 %v15801_v62  ;;  %14097 = vmatprep.subr.bf16.mxu1 %v15802_v63  ;;  %v15837_v61 = vld [vmem:[#allocation2 + $0x1a00] ss:$20 sps:$4 sm:$0xff]   ;;  %v15838_v62 = vld [vmem:[#allocation2 + $0x18e8] ss:$20 sps:$4 sm:$0xff]  }
 0x35a   : > { %v15839_v63 = vld [vmem:[#allocation2 + $0x17a8] ss:$20 sps:$4 sm:$0xff]  }
 0x35c   : > { %14076 = vmatpush3.bf16.msra.mxu0 %v15803_v23  ;;  %14098 = vmatpush3.bf16.msra.mxu1 %v15804_v13  ;;  %v15840_v23 = vld [vmem:[#allocation2 + $0x1a28] ss:$20 sps:$4 sm:$0xff]   ;;  %v15843_v13 = vld [vmem:[#allocation2 + $0x1a44] ss:$20 sps:$4 sm:$0xff]  }
 0x35d   : > { %14077 = vmatprep.subr.bf16.mxu0 %v15805_v4  ;;  %14099 = vmatprep.subr.bf16.mxu1 %v15806_v12  ;;  %v15846_v4 = vld [vmem:[#allocation2 + $0x1a4c] ss:$20 sps:$4 sm:$0xff]   ;;  %v7553_v12 = vrot.slane %v905_v51, 1  ;;  %v15847_v51 = vld [vmem:[#allocation2 + $0x1a68] ss:$20 sps:$4 sm:$0xff]  }
 0x360   : > { %14078 = vmatpush3.bf16.msra.mxu0 %v15807_v30  ;;  %14100 = vmatpush3.bf16.msra.mxu1 %v15808_v5  ;;  %v7554_v30 = vrot.slane %v907_v52, 2  ;;  %v15841_v5 = vld [vmem:[#allocation2 + $0x1a40] ss:$20 sps:$4 sm:$0xff]   ;;  %v15858_v52 = vld [vmem:[#allocation2 + $0x1a9c] ss:$20 sps:$4 sm:$0xff]  }
 0x361   : > { %14079 = vmatprep.subr.bf16.mxu0 %v15809_v55  ;;  %14101 = vmatprep.subr.bf16.mxu1 %v15810_v11  ;;  %v15844_v55 = vld [vmem:[#allocation2 + $0x1a48] ss:$20 sps:$4 sm:$0xff]   ;;  %v15849_v11 = vld [vmem:[#allocation2 + $0x1a6c] ss:$20 sps:$4 sm:$0xff]  }
 0x364   : > { %14080 = vmatpush3.bf16.msra.mxu0 %v15811_v15  ;;  %14102 = vmatpush3.bf16.msra.mxu1 %v15812_v34  ;;  %v15852_v15 = vld [vmem:[#allocation2 + $0x1a74] ss:$20 sps:$4 sm:$0xff]   ;;  %v17003_v34 = vor.u32 %v7554_v30, %v7553_v12  ;;  %v15906_v12 = vld [vmem:[#allocation2 + $0x1bdc] ss:$20 sps:$4 sm:$0xff]  }
 0x365   : > { %14081 = vmatprep.subr.bf16.mxu0 %v15813_v16  ;;  %14103 = vmatprep.subr.bf16.mxu1 %v15814_v54  ;;  %v15850_v16 = vld [vmem:[#allocation2 + $0x1a70] ss:$20 sps:$4 sm:$0xff]  }
 0x366   : > { %v15853_v54 = vld [vmem:[#allocation2 + $0x1a90] ss:$20 sps:$4 sm:$0xff]  }
 0x367   : > { %v15901_v30 = vld [vmem:[#allocation2 + $0x1bd0] ss:$20 sps:$4 sm:$0xff]  }
 0x368   : > { %14082 = vmatpush3.bf16.msra.mxu0 %v15815_v21  ;;  %14104 = vmatpush3.bf16.msra.mxu1 %v15816_v22  ;;  %v15856_v21 = vld [vmem:[#allocation2 + $0x1a98] ss:$20 sps:$4 sm:$0xff]  }
 0x369   : > { %14111 = vmatprep.subr.bf16.mxu0 %v15817_v26  ;;  %14338 = vmatprep.subr.bf16.mxu1 %v16692_v56  ;;  %v15859_v22 = vld [vmem:[#allocation2 + $0x1ab8] ss:$20 sps:$4 sm:$0xff]   ;;  %v15862_v26 = vld [vmem:[#allocation2 + $0x1ac0] ss:$20 sps:$4 sm:$0xff]  }
 0x36b   : > { %7072 = vmatmul.mubr.bf16.vlgmr.msra.gmra.mrb[20].mxu0 %v16941_v7  ;;  %7113 = vmatmul.mubr.bf16.vlgmr.msra.gmra.mrb[16].mxu1 %v16951_v3  ;;  %v15826_v7 = vld [vmem:[#allocation2 + $0x1848] ss:$20 sps:$4 sm:$0xff]  }
 0x36c   : > { %14112 = vmatpush3.bf16.msra.mxu0 %v15818_v27  ;;  %14339 = vmatpush3.bf16.msra.mxu1 %v15819_v29  ;;  %v15827_v3 = vld [vmem:[#allocation2 + $0x1708] ss:$20 sps:$4 sm:$0xff]   ;;  %v15867_v27 = vld [vmem:[#allocation2 + $0x1ae4] ss:$20 sps:$4 sm:$0xff]   ;;  %v15870_v29 = vld [vmem:[#allocation2 + $0x1aec] ss:$20 sps:$4 sm:$0xff]  }
 0x36d   : > { %14113 = vmatprep.subr.bf16.mxu0 %v15820_v31  ;;  %14340 = vmatprep.subr.bf16.mxu1 %v16692_v56  ;;  %v15865_v31 = vld [vmem:[#allocation2 + $0x1ae0] ss:$20 sps:$4 sm:$0xff]  }
 0x36e   : > { %7153 = vmatprep.mubr.bf16.mxu0 %v16954_v9  ;;  %14354 = vmatprep.mubr.msk.bf16.mxu1 %vm16693_vm0, %v16692_v56  ;;  %v15830_v9 = vld [vmem:[#allocation2 + $0x1730] ss:$20 sps:$4 sm:$0xff]  }
 0x370   : > { %14114 = vmatpush3.bf16.msra.mxu0 %v15821_v32  ;;  %14341 = vmatpush3.bf16.msra.mxu1 %v15822_v10  ;;  %v15868_v32 = vld [vmem:[#allocation2 + $0x1ae8] ss:$20 sps:$4 sm:$0xff]   ;;  %v15873_v10 = vld [vmem:[#allocation2 + $0x1b0c] ss:$20 sps:$4 sm:$0xff]  }
 0x371   : > { %14115 = vmatprep.subr.bf16.mxu0 %v15823_v37  ;;  %14342 = vmatprep.subr.bf16.mxu1 %v16692_v56  ;;  %v15876_v37 = vld [vmem:[#allocation2 + $0x1b14] ss:$20 sps:$4 sm:$0xff]  }
 0x374   : > { %14116 = vmatpush3.bf16.msra.mxu0 %v15824_v17  ;;  %14343 = vmatpush3.bf16.msra.mxu1 %v15825_v40  ;;  %v15871_v17 = vld [vmem:[#allocation2 + $0x1b08] ss:$20 sps:$4 sm:$0xff]   ;;  %v15874_v40 = vld [vmem:[#allocation2 + $0x1b10] ss:$20 sps:$4 sm:$0xff]  }
 0x375   : > { %14117 = vmatprep.subr.bf16.mxu0 %v15826_v7  ;;  %14344 = vmatprep.subr.bf16.mxu1 %v16692_v56  ;;  %v15879_v7 = vld [vmem:[#allocation2 + $0x1b34] ss:$20 sps:$4 sm:$0xff]  }
 0x378   : > { %14118 = vmatpush3.bf16.msra.mxu0 %v15827_v3  ;;  %14345 = vmatpush3.bf16.msra.mxu1 %v15828_v35  ;;  %v15882_v3 = vld [vmem:[#allocation2 + $0x1b3c] ss:$20 sps:$4 sm:$0xff]  }
 0x379   : > { %14119 = vmatprep.subr.bf16.mxu0 %v15829_v36  ;;  %14346 = vmatprep.subr.bf16.mxu1 %v16692_v56  ;;  %v15877_v35 = vld [vmem:[#allocation2 + $0x1b30] ss:$20 sps:$4 sm:$0xff]   ;;  %v15880_v36 = vld [vmem:[#allocation2 + $0x1b38] ss:$20 sps:$4 sm:$0xff]  }
 0x37c   : > { %14120 = vmatpush3.bf16.msra.mxu0 %v15830_v9  ;;  %14347 = vmatpush3.bf16.msra.mxu1 %v15831_v25  ;;  %v15885_v9 = vld [vmem:[#allocation2 + $0x1b5c] ss:$20 sps:$4 sm:$0xff]   ;;  %v15888_v25 = vld [vmem:[#allocation2 + $0x1b64] ss:$20 sps:$4 sm:$0xff]  }
 0x37d   : > { %14121 = vmatprep.subr.bf16.mxu0 %v15832_v49  ;;  %14348 = vmatprep.subr.bf16.mxu1 %v16692_v56  ;;  %v15883_v49 = vld [vmem:[#allocation2 + $0x1b58] ss:$20 sps:$4 sm:$0xff]  }
 0x380   : > { %14122 = vmatpush3.bf16.msra.mxu0 %v15833_v8  ;;  %14349 = vmatpush3.bf16.msra.mxu1 %v15834_v2  ;;  %v15886_v8 = vld [vmem:[#allocation2 + $0x1b60] ss:$20 sps:$4 sm:$0xff]   ;;  %v15891_v2 = vld [vmem:[#allocation2 + $0x1b84] ss:$20 sps:$4 sm:$0xff]  }
 0x381   : > { %14123 = vmatprep.subr.bf16.mxu0 %v15835_v46  ;;  %14350 = vmatprep.subr.bf16.mxu1 %v16692_v56  ;;  %v15894_v46 = vld [vmem:[#allocation2 + $0x1b8c] ss:$20 sps:$4 sm:$0xff]  }
 0x384   : > { %14124 = vmatpush3.bf16.msra.mxu0 %v15836_v50  ;;  %14351 = vmatpush3.bf16.msra.mxu1 %v15837_v61  ;;  %v15889_v50 = vld [vmem:[#allocation2 + $0x1b80] ss:$20 sps:$4 sm:$0xff]   ;;  %v15892_v61 = vld [vmem:[#allocation2 + $0x1b88] ss:$20 sps:$4 sm:$0xff]  }
 0x385   : > { %14125 = vmatprep.subr.bf16.mxu0 %v15838_v62  ;;  %14352 = vmatprep.subr.bf16.mxu1 %v16692_v56  ;;  %v15897_v62 = vld [vmem:[#allocation2 + $0x1bac] ss:$20 sps:$4 sm:$0xff]  }
 0x388   : > { %14126 = vmatpush3.bf16.msra.mxu0 %v15839_v63  ;;  %14353 = vmatpush3.bf16.msra.mxu1 %v15840_v23  ;;  %v15900_v63 = vld [vmem:[#allocation2 + $0x1bb4] ss:$20 sps:$4 sm:$0xff]  }
 0x389   : > { %9034 = vmatprep.subr.bf16.mxu0 %v15843_v13  ;;  %9206 = vmatprep.subr.bf16.mxu1 %v15846_v4  ;;  %v15895_v23 = vld [vmem:[#allocation2 + $0x1ba8] ss:$20 sps:$4 sm:$0xff]   ;;  %v15898_v13 = vld [vmem:[#allocation2 + $0x1bb0] ss:$20 sps:$4 sm:$0xff]  }
 0x38a   : > { %v15903_v4 = vld [vmem:[#allocation2 + $0x1bd4] ss:$20 sps:$4 sm:$0xff]  }
 0x38b   : > { %7154 = vmatmul.mubr.bf16.vlgmr.msra.gmra.mrb[24].mxu0 %v16967_v20  ;;  %14355 = vmatmul.mubr.bf16.vlgmr.msra.gmra.mrb[8].mxu1 %v16980_v53  ;;  %v15861_v20 = vld [vmem:[#allocation2 + $0x1abc] ss:$20 sps:$4 sm:$0xff]   ;;  %v15864_v53 = vld [vmem:[#allocation2 + $0x1ac4] ss:$20 sps:$4 sm:$0xff]  }
 0x38c   : > { %9035 = vmatpush1.bf16.msra.mxu0 %v15841_v5  ;;  %9207 = vmatpush1.bf16.msra.mxu1 %v15844_v55  ;;  %v15904_v5 = vld [vmem:[#allocation2 + $0x1bd8] ss:$20 sps:$4 sm:$0xff]   ;;  %v15909_v55 = vld [vmem:[#allocation2 + $0x1bfc] ss:$20 sps:$4 sm:$0xff]  }
 0x38d   : > { %9036 = vmatprep.subr.bf16.mxu0 %v15849_v11  ;;  %9208 = vmatprep.subr.bf16.mxu1 %v15852_v15  ;;  %v15912_v11 = vld [vmem:[#allocation2 + $0x1c04] ss:$20 sps:$4 sm:$0xff]  }
 0x38e   : > { %9066 = vmatprep.mubr.bf16.mxu0 %v17003_v34  ;;  %9238 = vmatprep.mubr.bf16.mxu1 %v17003_v34  ;;  %v15907_v15 = vld [vmem:[#allocation2 + $0x1bf8] ss:$20 sps:$4 sm:$0xff]  }
 0x390   : > { %9037 = vmatpush1.bf16.msra.mxu0 %v15847_v51  ;;  %9209 = vmatpush1.bf16.msra.mxu1 %v15850_v16  ;;  %v15910_v51 = vld [vmem:[#allocation2 + $0x1c00] ss:$20 sps:$4 sm:$0xff]   ;;  %v15915_v16 = vld [vmem:[#allocation2 + $0x1c24] ss:$20 sps:$4 sm:$0xff]  }
 0x391   : > { %9038 = vmatprep.subr.bf16.mxu0 %v15855_v47  ;;  %9210 = vmatprep.subr.bf16.mxu1 %v15858_v52  ;;  %v15918_v47 = vld [vmem:[#allocation2 + $0x1c2c] ss:$20 sps:$4 sm:$0xff]  }
 0x392   : > { %v15913_v52 = vld [vmem:[#allocation2 + $0x1c20] ss:$20 sps:$4 sm:$0xff]  }
 0x394   : > { %9039 = vmatpush1.bf16.msra.mxu0 %v15853_v54  ;;  %9211 = vmatpush1.bf16.msra.mxu1 %v15856_v21  ;;  %v15916_v54 = vld [vmem:[#allocation2 + $0x1c28] ss:$20 sps:$4 sm:$0xff]   ;;  %v15921_v21 = vld [vmem:[#allocation2 + $0x1c4c] ss:$20 sps:$4 sm:$0xff]  }
 0x395   : > { %9040 = vmatprep.subr.bf16.mxu0 %v15861_v20  ;;  %9212 = vmatprep.subr.bf16.mxu1 %v15864_v53  ;;  %v15924_v20 = vld [vmem:[#allocation2 + $0x1c54] ss:$20 sps:$4 sm:$0xff]  }
 0x396   : > { %v15919_v53 = vld [vmem:[#allocation2 + $0x1c48] ss:$20 sps:$4 sm:$0xff]  }
 0x398   : > { %9041 = vmatpush1.bf16.msra.mxu0 %v15859_v22  ;;  %9213 = vmatpush1.bf16.msra.mxu1 %v15862_v26  ;;  %v15922_v22 = vld [vmem:[#allocation2 + $0x1c50] ss:$20 sps:$4 sm:$0xff]   ;;  %v15927_v26 = vld [vmem:[#allocation2 + $0x1c74] ss:$20 sps:$4 sm:$0xff]  }
 0x399   : > { %9042 = vmatprep.subr.bf16.mxu0 %v15867_v27  ;;  %9214 = vmatprep.subr.bf16.mxu1 %v15870_v29  ;;  %v15930_v27 = vld [vmem:[#allocation2 + $0x1c7c] ss:$20 sps:$4 sm:$0xff]  }
 0x39a   : > { %v15925_v29 = vld [vmem:[#allocation2 + $0x1c70] ss:$20 sps:$4 sm:$0xff]  }
 0x39c   : > { %9043 = vmatpush1.bf16.msra.mxu0 %v15865_v31  ;;  %9215 = vmatpush1.bf16.msra.mxu1 %v15868_v32  ;;  %v15928_v31 = vld [vmem:[#allocation2 + $0x1c78] ss:$20 sps:$4 sm:$0xff]   ;;  %v15933_v32 = vld [vmem:[#allocation2 + $0x1c9c] ss:$20 sps:$4 sm:$0xff]  }
 0x39d   : > { %9044 = vmatprep.subr.bf16.mxu0 %v15873_v10  ;;  %9216 = vmatprep.subr.bf16.mxu1 %v15876_v37  ;;  %v15936_v10 = vld [vmem:[#allocation2 + $0x1ca4] ss:$20 sps:$4 sm:$0xff]   ;;  %v7550_v37 = vrot.slane %v898_v6, 1  ;;  %v15945_v6 = vld [vmem:[#allocation2 + $0x1cec] ss:$20 sps:$4 sm:$0xff]  }
 0x3a0   : > { %9045 = vmatpush1.bf16.msra.mxu0 %v15871_v17  ;;  %9217 = vmatpush1.bf16.msra.mxu1 %v15874_v40  ;;  %v7551_v17 = vrot.slane %v900_v1, 2  ;;  %v15931_v40 = vld [vmem:[#allocation2 + $0x1c98] ss:$20 sps:$4 sm:$0xff]   ;;  %v15940_v1 = vld [vmem:[#allocation2 + $0x1cc8] ss:$20 sps:$4 sm:$0xff]  }
 0x3a1   : > { %9046 = vmatprep.subr.bf16.mxu0 %v15879_v7  ;;  %9218 = vmatprep.subr.bf16.mxu1 %v15882_v3  ;;  %v15934_v7 = vld [vmem:[#allocation2 + $0x1ca0] ss:$20 sps:$4 sm:$0xff]   ;;  %v15939_v3 = vld [vmem:[#allocation2 + $0x1cc4] ss:$20 sps:$4 sm:$0xff]  }
 0x3a4   : > { %9047 = vmatpush1.bf16.msra.mxu0 %v15877_v35  ;;  %9219 = vmatpush1.bf16.msra.mxu1 %v15880_v36  ;;  %v15942_v35 = vld [vmem:[#allocation2 + $0x1ccc] ss:$20 sps:$4 sm:$0xff]   ;;  %v7559_v36 = vrot.slane %v919_v41, 1  ;;  %v15946_v41 = vld [vmem:[#allocation2 + $0x1cf0] ss:$20 sps:$4 sm:$0xff]  }
 0x3a5   : > { %9048 = vmatprep.subr.bf16.mxu0 %v15885_v9  ;;  %9220 = vmatprep.subr.bf16.mxu1 %v15888_v25  ;;  %v7560_v9 = vrot.slane %v921_v42, 2  ;;  %v17017_v25 = vor.u32 %v7551_v17, %v7550_v37  ;;  %v15951_v42 = vld [vmem:[#allocation2 + $0x1d14] ss:$20 sps:$4 sm:$0xff]   ;;  %v15994_v37 = vld [vmem:[#allocation2 + $0x1e30] ss:$20 sps:$4 sm:$0xff]  }
 0x3a6   : > { %v15999_v17 = vld [vmem:[#allocation2 + $0x1e54] ss:$20 sps:$4 sm:$0xff]  }
 0x3a8   : > { %9049 = vmatpush1.bf16.msra.mxu0 %v15883_v49  ;;  %9221 = vmatpush1.bf16.msra.mxu1 %v15886_v8  ;;  %v15948_v49 = vld [vmem:[#allocation2 + $0x1cf4] ss:$20 sps:$4 sm:$0xff]   ;;  %v17019_v8 = vor.u32 %v7560_v9, %v7559_v36  ;;  %v16008_v36 = vld [vmem:[#allocation2 + $0x1e84] ss:$20 sps:$4 sm:$0xff]  }
 0x3a9   : > { %9050 = vmatprep.subr.bf16.mxu0 %v15891_v2  ;;  %9222 = vmatprep.subr.bf16.mxu1 %v15894_v46  ;;  %v15954_v2 = vld [vmem:[#allocation2 + $0x1d1c] ss:$20 sps:$4 sm:$0xff]   ;;  %v16003_v9 = vld [vmem:[#allocation2 + $0x1e78] ss:$20 sps:$4 sm:$0xff]  }
 0x3aa   : > { %v15949_v46 = vld [vmem:[#allocation2 + $0x1d10] ss:$20 sps:$4 sm:$0xff]  }
 0x3ac   : > { %9051 = vmatpush1.bf16.msra.mxu0 %v15889_v50  ;;  %9223 = vmatpush1.bf16.msra.mxu1 %v15892_v61  ;;  %v15952_v50 = vld [vmem:[#allocation2 + $0x1d18] ss:$20 sps:$4 sm:$0xff]   ;;  %v15957_v61 = vld [vmem:[#allocation2 + $0x1d3c] ss:$20 sps:$4 sm:$0xff]  }
 0x3ad   : > { %9052 = vmatprep.subr.bf16.mxu0 %v15897_v62  ;;  %9224 = vmatprep.subr.bf16.mxu1 %v15900_v63  ;;  %v15960_v62 = vld [vmem:[#allocation2 + $0x1d44] ss:$20 sps:$4 sm:$0xff]  }
 0x3ae   : > { %v15955_v63 = vld [vmem:[#allocation2 + $0x1d38] ss:$20 sps:$4 sm:$0xff]  }
 0x3b0   : > { %9053 = vmatpush1.bf16.msra.mxu0 %v15895_v23  ;;  %9225 = vmatpush1.bf16.msra.mxu1 %v15898_v13  ;;  %v15958_v23 = vld [vmem:[#allocation2 + $0x1d40] ss:$20 sps:$4 sm:$0xff]   ;;  %v15963_v13 = vld [vmem:[#allocation2 + $0x1d64] ss:$20 sps:$4 sm:$0xff]  }
 0x3b1   : > { %9054 = vmatprep.subr.bf16.mxu0 %v15903_v4  ;;  %9226 = vmatprep.subr.bf16.mxu1 %v15906_v12  ;;  %v15966_v4 = vld [vmem:[#allocation2 + $0x1d6c] ss:$20 sps:$4 sm:$0xff]  }
 0x3b2   : > { %v15961_v12 = vld [vmem:[#allocation2 + $0x1d60] ss:$20 sps:$4 sm:$0xff]  }
 0x3b4   : > { %9055 = vmatpush1.bf16.msra.mxu0 %v15901_v30  ;;  %9227 = vmatpush1.bf16.msra.mxu1 %v15904_v5  ;;  %v15964_v30 = vld [vmem:[#allocation2 + $0x1d68] ss:$20 sps:$4 sm:$0xff]   ;;  %v15969_v5 = vld [vmem:[#allocation2 + $0x1d8c] ss:$20 sps:$4 sm:$0xff]  }
 0x3b5   : > { %9056 = vmatprep.subr.bf16.mxu0 %v15909_v55  ;;  %9228 = vmatprep.subr.bf16.mxu1 %v15912_v11  ;;  %v15972_v55 = vld [vmem:[#allocation2 + $0x1d94] ss:$20 sps:$4 sm:$0xff]  }
 0x3b6   : > { %v15967_v11 = vld [vmem:[#allocation2 + $0x1d88] ss:$20 sps:$4 sm:$0xff]  }
 0x3b8   : > { %9057 = vmatpush1.bf16.msra.mxu0 %v15907_v15  ;;  %9229 = vmatpush1.bf16.msra.mxu1 %v15910_v51  ;;  %v15970_v15 = vld [vmem:[#allocation2 + $0x1d90] ss:$20 sps:$4 sm:$0xff]   ;;  %v15975_v51 = vld [vmem:[#allocation2 + $0x1db4] ss:$20 sps:$4 sm:$0xff]  }
 0x3b9   : > { %9058 = vmatprep.subr.bf16.mxu0 %v15915_v16  ;;  %9230 = vmatprep.subr.bf16.mxu1 %v15918_v47  ;;  %v15978_v16 = vld [vmem:[#allocation2 + $0x1dbc] ss:$20 sps:$4 sm:$0xff]  }
 0x3ba   : > { %v15973_v47 = vld [vmem:[#allocation2 + $0x1db0] ss:$20 sps:$4 sm:$0xff]  }
 0x3bc   : > { %9059 = vmatpush1.bf16.msra.mxu0 %v15913_v52  ;;  %9231 = vmatpush1.bf16.msra.mxu1 %v15916_v54  ;;  %v15976_v52 = vld [vmem:[#allocation2 + $0x1db8] ss:$20 sps:$4 sm:$0xff]   ;;  %v15981_v54 = vld [vmem:[#allocation2 + $0x1ddc] ss:$20 sps:$4 sm:$0xff]  }
 0x3bd   : > { %9060 = vmatprep.subr.bf16.mxu0 %v15921_v21  ;;  %9232 = vmatprep.subr.bf16.mxu1 %v15924_v20  ;;  %v15984_v21 = vld [vmem:[#allocation2 + $0x1de4] ss:$20 sps:$4 sm:$0xff]  }
 0x3be   : > { %v15979_v20 = vld [vmem:[#allocation2 + $0x1dd8] ss:$20 sps:$4 sm:$0xff]  }
 0x3c0   : > { %9061 = vmatpush1.bf16.msra.mxu0 %v15919_v53  ;;  %9233 = vmatpush1.bf16.msra.mxu1 %v15922_v22  ;;  %v15982_v53 = vld [vmem:[#allocation2 + $0x1de0] ss:$20 sps:$4 sm:$0xff]   ;;  %v15987_v22 = vld [vmem:[#allocation2 + $0x1e04] ss:$20 sps:$4 sm:$0xff]  }
 0x3c1   : > { %9062 = vmatprep.subr.bf16.mxu0 %v15927_v26  ;;  %9234 = vmatprep.subr.bf16.mxu1 %v15930_v27  ;;  %v15990_v26 = vld [vmem:[#allocation2 + $0x1e0c] ss:$20 sps:$4 sm:$0xff]  }
 0x3c2   : > { %v15985_v27 = vld [vmem:[#allocation2 + $0x1e00] ss:$20 sps:$4 sm:$0xff]  }
 0x3c4   : > { %9063 = vmatpush1.bf16.msra.mxu0 %v15925_v29  ;;  %9235 = vmatpush1.bf16.msra.mxu1 %v15928_v31  ;;  %v15988_v29 = vld [vmem:[#allocation2 + $0x1e08] ss:$20 sps:$4 sm:$0xff]   ;;  %v15993_v31 = vld [vmem:[#allocation2 + $0x1e2c] ss:$20 sps:$4 sm:$0xff]  }
 0x3c5   : > { %9064 = vmatprep.subr.bf16.mxu0 %v15933_v32  ;;  %9236 = vmatprep.subr.bf16.mxu1 %v15936_v10  ;;  %v15996_v32 = vld [vmem:[#allocation2 + $0x1e34] ss:$20 sps:$4 sm:$0xff]  }
 0x3c6   : > { %v15991_v10 = vld [vmem:[#allocation2 + $0x1e28] ss:$20 sps:$4 sm:$0xff]  }
 0x3c8   : > { %9065 = vmatpush1.bf16.msra.mxu0 %v15931_v40  ;;  %9237 = vmatpush1.bf16.msra.mxu1 %v15934_v7  ;;  %v16002_v40 = vld [vmem:[#allocation2 + $0x1e5c] ss:$20 sps:$4 sm:$0xff]  }
 0x3c9   : > { %9077 = vmatprep.subr.bf16.mxu0 %v15939_v3  ;;  %9249 = vmatprep.subr.bf16.mxu1 %v15942_v35  ;;  %v15997_v7 = vld [vmem:[#allocation2 + $0x1e50] ss:$20 sps:$4 sm:$0xff]   ;;  %v16000_v3 = vld [vmem:[#allocation2 + $0x1e58] ss:$20 sps:$4 sm:$0xff]  }
 0x3ca   : > { %v16005_v35 = vld [vmem:[#allocation2 + $0x1e7c] ss:$20 sps:$4 sm:$0xff]  }
 0x3cb   : > { %9067 = vmatmul.mubr.bf16.vlgmr.msra.gmra.mrb[0].mxu0 %v17017_v25  ;;  %9239 = vmatmul.mubr.bf16.vlgmr.msra.gmra.mrb[0].mxu1 %v17017_v25 }
 0x3cc   : > { %9078 = vmatpush1.bf16.msra.mxu0 %v15937_v60  ;;  %9250 = vmatpush1.bf16.msra.mxu1 %v15940_v1  ;;  %v16006_v60 = vld [vmem:[#allocation2 + $0x1e80] ss:$20 sps:$4 sm:$0xff]   ;;  %v16011_v1 = vld [vmem:[#allocation2 + $0x1ea4] ss:$20 sps:$4 sm:$0xff]  }
 0x3cd   : > { %9079 = vmatprep.subr.bf16.mxu0 %v15945_v6  ;;  %9251 = vmatprep.subr.bf16.mxu1 %v15948_v49  ;;  %v16014_v6 = vld [vmem:[#allocation2 + $0x1eac] ss:$20 sps:$4 sm:$0xff]  }
 0x3ce   : > { %9109 = vmatprep.mubr.bf16.mxu0 %v17019_v8  ;;  %9281 = vmatprep.mubr.bf16.mxu1 %v17019_v8  ;;  %v16009_v49 = vld [vmem:[#allocation2 + $0x1ea0] ss:$20 sps:$4 sm:$0xff]  }
 0x3d0   : > { %9080 = vmatpush1.bf16.msra.mxu0 %v15943_v38  ;;  %9252 = vmatpush1.bf16.msra.mxu1 %v15946_v41  ;;  %v16012_v38 = vld [vmem:[#allocation2 + $0x1ea8] ss:$20 sps:$4 sm:$0xff]   ;;  %v16017_v41 = vld [vmem:[#allocation2 + $0x1ecc] ss:$20 sps:$4 sm:$0xff]  }
 0x3d1   : > { %9081 = vmatprep.subr.bf16.mxu0 %v15951_v42  ;;  %9253 = vmatprep.subr.bf16.mxu1 %v15954_v2  ;;  %v16020_v42 = vld [vmem:[#allocation2 + $0x1ed4] ss:$20 sps:$4 sm:$0xff]  }
 0x3d2   : > { %v16015_v2 = vld [vmem:[#allocation2 + $0x1ec8] ss:$20 sps:$4 sm:$0xff]  }
 0x3d4   : > { %9082 = vmatpush1.bf16.msra.mxu0 %v15949_v46  ;;  %9254 = vmatpush1.bf16.msra.mxu1 %v15952_v50  ;;  %v16018_v46 = vld [vmem:[#allocation2 + $0x1ed0] ss:$20 sps:$4 sm:$0xff]   ;;  %v16023_v50 = vld [vmem:[#allocation2 + $0x1ef4] ss:$20 sps:$4 sm:$0xff]  }
 0x3d5   : > { %9083 = vmatprep.subr.bf16.mxu0 %v15957_v61  ;;  %9255 = vmatprep.subr.bf16.mxu1 %v15960_v62  ;;  %v16026_v61 = vld [vmem:[#allocation2 + $0x1efc] ss:$20 sps:$4 sm:$0xff]  }
 0x3d6   : > { %v16021_v62 = vld [vmem:[#allocation2 + $0x1ef0] ss:$20 sps:$4 sm:$0xff]  }
 0x3d8   : > { %9084 = vmatpush1.bf16.msra.mxu0 %v15955_v63  ;;  %9256 = vmatpush1.bf16.msra.mxu1 %v15958_v23  ;;  %v16024_v63 = vld [vmem:[#allocation2 + $0x1ef8] ss:$20 sps:$4 sm:$0xff]   ;;  %v16029_v23 = vld [vmem:[#allocation2 + $0x1f1c] ss:$20 sps:$4 sm:$0xff]  }
 0x3d9   : > { %9085 = vmatprep.subr.bf16.mxu0 %v15963_v13  ;;  %9257 = vmatprep.subr.bf16.mxu1 %v15966_v4  ;;  %v16032_v13 = vld [vmem:[#allocation2 + $0x1f24] ss:$20 sps:$4 sm:$0xff]   ;;  %v7556_v4 = vrot.slane %v912_v24, 1  ;;  %v16041_v24 = vld [vmem:[#allocation2 + $0x1f6c] ss:$20 sps:$4 sm:$0xff]  }
 0x3dc   : > { %9086 = vmatpush1.bf16.msra.mxu0 %v15961_v12  ;;  %9258 = vmatpush1.bf16.msra.mxu1 %v15964_v30  ;;  %v7557_v12 = vrot.slane %v914_v19, 2  ;;  %v16027_v30 = vld [vmem:[#allocation2 + $0x1f18] ss:$20 sps:$4 sm:$0xff]   ;;  %v16036_v19 = vld [vmem:[#allocation2 + $0x1f48] ss:$20 sps:$4 sm:$0xff]  }
 0x3dd   : > { %9087 = vmatprep.subr.bf16.mxu0 %v15969_v5  ;;  %9259 = vmatprep.subr.bf16.mxu1 %v15972_v55  ;;  %v16030_v5 = vld [vmem:[#allocation2 + $0x1f20] ss:$20 sps:$4 sm:$0xff]   ;;  %v16035_v55 = vld [vmem:[#allocation2 + $0x1f44] ss:$20 sps:$4 sm:$0xff]  }
 0x3e0   : > { %9088 = vmatpush1.bf16.msra.mxu0 %v15967_v11  ;;  %9260 = vmatpush1.bf16.msra.mxu1 %v15970_v15  ;;  %v16038_v11 = vld [vmem:[#allocation2 + $0x1f4c] ss:$20 sps:$4 sm:$0xff]   ;;  %v7565_v15 = vrot.slane %v933_v44, 1  ;;  %v16042_v44 = vld [vmem:[#allocation2 + $0x1f70] ss:$20 sps:$4 sm:$0xff]  }
 0x3e1   : > { %9089 = vmatprep.subr.bf16.mxu0 %v15975_v51  ;;  %9261 = vmatprep.subr.bf16.mxu1 %v15978_v16  ;;  %v7566_v51 = vrot.slane %v935_v45, 2  ;;  %v17033_v16 = vor.u32 %v7557_v12, %v7556_v4  ;;  %v16047_v45 = vld [vmem:[#allocation2 + $0x1f94] ss:$20 sps:$4 sm:$0xff]   ;;  %v16096_v4 = vld [vmem:[#allocation2 + $0x20d8] ss:$20 sps:$4 sm:$0xff]  }
 0x3e2   : > { %v16101_v12 = vld [vmem:[#allocation2 + $0x20fc] ss:$20 sps:$4 sm:$0xff]  }
 0x3e4   : > { %9090 = vmatpush1.bf16.msra.mxu0 %v15973_v47  ;;  %9262 = vmatpush1.bf16.msra.mxu1 %v15976_v52  ;;  %v16044_v47 = vld [vmem:[#allocation2 + $0x1f74] ss:$20 sps:$4 sm:$0xff]   ;;  %v17035_v52 = vor.u32 %v7566_v51, %v7565_v15  ;;  %v16110_v15 = vld [vmem:[#allocation2 + $0x212c] ss:$20 sps:$4 sm:$0xff]  }
 0x3e5   : > { %9091 = vmatprep.subr.bf16.mxu0 %v15981_v54  ;;  %9263 = vmatprep.subr.bf16.mxu1 %v15984_v21  ;;  %v16050_v54 = vld [vmem:[#allocation2 + $0x1f9c] ss:$20 sps:$4 sm:$0xff]   ;;  %v16105_v51 = vld [vmem:[#allocation2 + $0x2120] ss:$20 sps:$4 sm:$0xff]  }
 0x3e6   : > { %v16045_v21 = vld [vmem:[#allocation2 + $0x1f90] ss:$20 sps:$4 sm:$0xff]  }
 0x3e8   : > { %9092 = vmatpush1.bf16.msra.mxu0 %v15979_v20  ;;  %9264 = vmatpush1.bf16.msra.mxu1 %v15982_v53  ;;  %v16048_v20 = vld [vmem:[#allocation2 + $0x1f98] ss:$20 sps:$4 sm:$0xff]   ;;  %v16053_v53 = vld [vmem:[#allocation2 + $0x1fbc] ss:$20 sps:$4 sm:$0xff]  }
 0x3e9   : > { %9093 = vmatprep.subr.bf16.mxu0 %v15987_v22  ;;  %9265 = vmatprep.subr.bf16.mxu1 %v15990_v26  ;;  %v16056_v22 = vld [vmem:[#allocation2 + $0x1fc4] ss:$20 sps:$4 sm:$0xff]  }
 0x3ea   : > { %v16051_v26 = vld [vmem:[#allocation2 + $0x1fb8] ss:$20 sps:$4 sm:$0xff]  }
 0x3ec   : > { %9094 = vmatpush1.bf16.msra.mxu0 %v15985_v27  ;;  %9266 = vmatpush1.bf16.msra.mxu1 %v15988_v29  ;;  %v16054_v27 = vld [vmem:[#allocation2 + $0x1fc0] ss:$20 sps:$4 sm:$0xff]   ;;  %v16059_v29 = vld [vmem:[#allocation2 + $0x1fe4] ss:$20 sps:$4 sm:$0xff]  }
 0x3ed   : > { %9095 = vmatprep.subr.bf16.mxu0 %v15993_v31  ;;  %9267 = vmatprep.subr.bf16.mxu1 %v15996_v32  ;;  %v16062_v31 = vld [vmem:[#allocation2 + $0x1fec] ss:$20 sps:$4 sm:$0xff]  }
 0x3ee   : > { %v16057_v32 = vld [vmem:[#allocation2 + $0x1fe0] ss:$20 sps:$4 sm:$0xff]  }
 0x3f0   : > { %9096 = vmatpush1.bf16.msra.mxu0 %v15991_v10  ;;  %9268 = vmatpush1.bf16.msra.mxu1 %v15994_v37  ;;  %v16060_v10 = vld [vmem:[#allocation2 + $0x1fe8] ss:$20 sps:$4 sm:$0xff]   ;;  %v16065_v37 = vld [vmem:[#allocation2 + $0x200c] ss:$20 sps:$4 sm:$0xff]  }
 0x3f1   : > { %9097 = vmatprep.subr.bf16.mxu0 %v15999_v17  ;;  %9269 = vmatprep.subr.bf16.mxu1 %v16002_v40  ;;  %v16068_v17 = vld [vmem:[#allocation2 + $0x2014] ss:$20 sps:$4 sm:$0xff]  }
 0x3f2   : > { %v16063_v40 = vld [vmem:[#allocation2 + $0x2008] ss:$20 sps:$4 sm:$0xff]  }
 0x3f4   : > { %9098 = vmatpush1.bf16.msra.mxu0 %v15997_v7  ;;  %9270 = vmatpush1.bf16.msra.mxu1 %v16000_v3  ;;  %v16066_v7 = vld [vmem:[#allocation2 + $0x2010] ss:$20 sps:$4 sm:$0xff]   ;;  %v16071_v3 = vld [vmem:[#allocation2 + $0x2034] ss:$20 sps:$4 sm:$0xff]  }
 0x3f5   : > { %9099 = vmatprep.subr.bf16.mxu0 %v16005_v35  ;;  %9271 = vmatprep.subr.bf16.mxu1 %v16008_v36  ;;  %v16074_v35 = vld [vmem:[#allocation2 + $0x203c] ss:$20 sps:$4 sm:$0xff]  }
 0x3f6   : > { %v16069_v36 = vld [vmem:[#allocation2 + $0x2030] ss:$20 sps:$4 sm:$0xff]  }
 0x3f8   : > { %9100 = vmatpush1.bf16.msra.mxu0 %v16003_v9  ;;  %9272 = vmatpush1.bf16.msra.mxu1 %v16006_v60  ;;  %v16072_v9 = vld [vmem:[#allocation2 + $0x2038] ss:$20 sps:$4 sm:$0xff]   ;;  %v16077_v60 = vld [vmem:[#allocation2 + $0x205c] ss:$20 sps:$4 sm:$0xff]  }
 0x3f9   : > { %9101 = vmatprep.subr.bf16.mxu0 %v16011_v1  ;;  %9273 = vmatprep.subr.bf16.mxu1 %v16014_v6  ;;  %v16080_v1 = vld [vmem:[#allocation2 + $0x2064] ss:$20 sps:$4 sm:$0xff]  }
 0x3fa   : > { %v16075_v6 = vld [vmem:[#allocation2 + $0x2058] ss:$20 sps:$4 sm:$0xff]  }
 0x3fc   : > { %9102 = vmatpush1.bf16.msra.mxu0 %v16009_v49  ;;  %9274 = vmatpush1.bf16.msra.mxu1 %v16012_v38  ;;  %v16078_v49 = vld [vmem:[#allocation2 + $0x2060] ss:$20 sps:$4 sm:$0xff]   ;;  %v16083_v38 = vld [vmem:[#allocation2 + $0x2084] ss:$20 sps:$4 sm:$0xff]  }
 0x3fd   : > { %9103 = vmatprep.subr.bf16.mxu0 %v16017_v41  ;;  %9275 = vmatprep.subr.bf16.mxu1 %v16020_v42  ;;  %v16086_v41 = vld [vmem:[#allocation2 + $0x208c] ss:$20 sps:$4 sm:$0xff]  }
 0x3fe   : > { %v16081_v42 = vld [vmem:[#allocation2 + $0x2080] ss:$20 sps:$4 sm:$0xff]  }
 0x400   : > { %9104 = vmatpush1.bf16.msra.mxu0 %v16015_v2  ;;  %9276 = vmatpush1.bf16.msra.mxu1 %v16018_v46  ;;  %v16084_v2 = vld [vmem:[#allocation2 + $0x2088] ss:$20 sps:$4 sm:$0xff]   ;;  %v16089_v46 = vld [vmem:[#allocation2 + $0x20ac] ss:$20 sps:$4 sm:$0xff]  }
 0x401   : > { %9105 = vmatprep.subr.bf16.mxu0 %v16023_v50  ;;  %9277 = vmatprep.subr.bf16.mxu1 %v16026_v61  ;;  %v16092_v50 = vld [vmem:[#allocation2 + $0x20b4] ss:$20 sps:$4 sm:$0xff]  }
 0x402   : > { %v16087_v61 = vld [vmem:[#allocation2 + $0x20a8] ss:$20 sps:$4 sm:$0xff]  }
 0x404   : > { %9106 = vmatpush1.bf16.msra.mxu0 %v16021_v62  ;;  %9278 = vmatpush1.bf16.msra.mxu1 %v16024_v63  ;;  %v16090_v62 = vld [vmem:[#allocation2 + $0x20b0] ss:$20 sps:$4 sm:$0xff]   ;;  %v16095_v63 = vld [vmem:[#allocation2 + $0x20d4] ss:$20 sps:$4 sm:$0xff]  }
 0x405   : > { %9107 = vmatprep.subr.bf16.mxu0 %v16029_v23  ;;  %9279 = vmatprep.subr.bf16.mxu1 %v16032_v13  ;;  %v16098_v23 = vld [vmem:[#allocation2 + $0x20dc] ss:$20 sps:$4 sm:$0xff]  }
 0x406   : > { %v16093_v13 = vld [vmem:[#allocation2 + $0x20d0] ss:$20 sps:$4 sm:$0xff]  }
 0x408   : > { %9108 = vmatpush1.bf16.msra.mxu0 %v16027_v30  ;;  %9280 = vmatpush1.bf16.msra.mxu1 %v16030_v5  ;;  %v16104_v30 = vld [vmem:[#allocation2 + $0x2104] ss:$20 sps:$4 sm:$0xff]  }
 0x409   : > { %9120 = vmatprep.subr.bf16.mxu0 %v16035_v55  ;;  %9292 = vmatprep.subr.bf16.mxu1 %v16038_v11  ;;  %v16099_v5 = vld [vmem:[#allocation2 + $0x20f8] ss:$20 sps:$4 sm:$0xff]   ;;  %v16102_v55 = vld [vmem:[#allocation2 + $0x2100] ss:$20 sps:$4 sm:$0xff]  }
 0x40a   : > { %v16107_v11 = vld [vmem:[#allocation2 + $0x2124] ss:$20 sps:$4 sm:$0xff]  }
 0x40b   : > { %9110 = vmatmul.mubr.bf16.vlgmr.msra.gmra.mrb[0].mxu0 %v17033_v16  ;;  %9282 = vmatmul.mubr.bf16.vlgmr.msra.gmra.mrb[0].mxu1 %v17033_v16 }
 0x40c   : > { %9121 = vmatpush1.bf16.msra.mxu0 %v16033_v14  ;;  %9293 = vmatpush1.bf16.msra.mxu1 %v16036_v19  ;;  %v16108_v14 = vld [vmem:[#allocation2 + $0x2128] ss:$20 sps:$4 sm:$0xff]   ;;  %v16113_v19 = vld [vmem:[#allocation2 + $0x214c] ss:$20 sps:$4 sm:$0xff]  }
 0x40d   : > { %9122 = vmatprep.subr.bf16.mxu0 %v16041_v24  ;;  %9294 = vmatprep.subr.bf16.mxu1 %v16044_v47  ;;  %v16116_v24 = vld [vmem:[#allocation2 + $0x2154] ss:$20 sps:$4 sm:$0xff]  }
 0x40e   : > { %9152 = vmatprep.mubr.bf16.mxu0 %v17035_v52  ;;  %9324 = vmatprep.mubr.bf16.mxu1 %v17035_v52  ;;  %v16111_v47 = vld [vmem:[#allocation2 + $0x2148] ss:$20 sps:$4 sm:$0xff]  }
 0x410   : > { %9123 = vmatpush1.bf16.msra.mxu0 %v16039_v39  ;;  %9295 = vmatpush1.bf16.msra.mxu1 %v16042_v44  ;;  %v16114_v39 = vld [vmem:[#allocation2 + $0x2150] ss:$20 sps:$4 sm:$0xff]   ;;  %v16119_v44 = vld [vmem:[#allocation2 + $0x2174] ss:$20 sps:$4 sm:$0xff]  }
 0x411   : > { %9124 = vmatprep.subr.bf16.mxu0 %v16047_v45  ;;  %9296 = vmatprep.subr.bf16.mxu1 %v16050_v54  ;;  %v16122_v45 = vld [vmem:[#allocation2 + $0x217c] ss:$20 sps:$4 sm:$0xff]  }
 0x414   : > { %9125 = vmatpush1.bf16.msra.mxu0 %v16045_v21  ;;  %9297 = vmatpush1.bf16.msra.mxu1 %v16048_v20 }
 0x415   : > { %9126 = vmatprep.subr.bf16.mxu0 %v16053_v53  ;;  %9298 = vmatprep.subr.bf16.mxu1 %v16056_v22 }
 0x418   : > { %9127 = vmatpush1.bf16.msra.mxu0 %v16051_v26  ;;  %9299 = vmatpush1.bf16.msra.mxu1 %v16054_v27 }
 0x419   : > { %9128 = vmatprep.subr.bf16.mxu0 %v16059_v29  ;;  %9300 = vmatprep.subr.bf16.mxu1 %v16062_v31  ;;  %v16117_v31 = vld [vmem:[#allocation2 + $0x2170] ss:$20 sps:$4 sm:$0xff]  }
 0x41c   : > { %9129 = vmatpush1.bf16.msra.mxu0 %v16057_v32  ;;  %9301 = vmatpush1.bf16.msra.mxu1 %v16060_v10  ;;  %v16120_v32 = vld [vmem:[#allocation2 + $0x2178] ss:$20 sps:$4 sm:$0xff]  }
 0x41d   : > { %9130 = vmatprep.subr.bf16.mxu0 %v16065_v37  ;;  %9302 = vmatprep.subr.bf16.mxu1 %v16068_v17  ;;  %v16125_v17 = vld [vmem:[#allocation2 + $0x219c] ss:$20 sps:$4 sm:$0xff]  }
 0x420   : > { %9131 = vmatpush1.bf16.msra.mxu0 %v16063_v40  ;;  %9303 = vmatpush1.bf16.msra.mxu1 %v16066_v7  ;;  %v16128_v40 = vld [vmem:[#allocation2 + $0x21a4] ss:$20 sps:$4 sm:$0xff]  }
 0x421   : > { %9132 = vmatprep.subr.bf16.mxu0 %v16071_v3  ;;  %9304 = vmatprep.subr.bf16.mxu1 %v16074_v35 }
 0x424   : > { %9133 = vmatpush1.bf16.msra.mxu0 %v16069_v36  ;;  %9305 = vmatpush1.bf16.msra.mxu1 %v16072_v9  ;;  %v7562_v36 = vrot.slane %v926_v0, 1  ;;  %v7563_v9 = vrot.slane %v928_v57, 2  ;;  %v16140_v57 = vld [vmem:[#allocation2 + $0x21f4] ss:$20 sps:$4 sm:$0xff]  }
 0x425   : > { %9134 = vmatprep.subr.bf16.mxu0 %v16077_v60  ;;  %9306 = vmatprep.subr.bf16.mxu1 %v16080_v1  ;;  %v16123_v1 = vld [vmem:[#allocation2 + $0x2198] ss:$20 sps:$4 sm:$0xff]   ;;  %v16135_v0 = vld [vmem:[#allocation2 + $0x21e8] ss:$20 sps:$4 sm:$0xff]  }
 0x428   : > { %9135 = vmatpush1.bf16.msra.mxu0 %v16075_v6  ;;  %9307 = vmatpush1.bf16.msra.mxu1 %v16078_v49  ;;  %v16126_v6 = vld [vmem:[#allocation2 + $0x21a0] ss:$20 sps:$4 sm:$0xff]   ;;  %v16131_v49 = vld [vmem:[#allocation2 + $0x21c4] ss:$20 sps:$4 sm:$0xff]  }
 0x429   : > { %9136 = vmatprep.subr.bf16.mxu0 %v16083_v38  ;;  %9308 = vmatprep.subr.bf16.mxu1 %v16086_v41  ;;  %v16134_v38 = vld [vmem:[#allocation2 + $0x21cc] ss:$20 sps:$4 sm:$0xff]   ;;  %v17049_v41 = vor.u32 %v7563_v9, %v7562_v36 }
 0x42a   : > { %v16182_v36 = vld [vmem:[#allocation2 + $0x1e38] ss:$20 sps:$4 sm:$0xff]  }
 0x42b   : > { %v16183_v9 = vld [vmem:[#allocation2 + $0x1a78] ss:$20 sps:$4 sm:$0xff]  }
 0x42c   : > { %9137 = vmatpush1.bf16.msra.mxu0 %v16081_v42  ;;  %9309 = vmatpush1.bf16.msra.mxu1 %v16084_v2  ;;  %v16129_v42 = vld [vmem:[#allocation2 + $0x21c0] ss:$20 sps:$4 sm:$0xff]   ;;  %v16132_v2 = vld [vmem:[#allocation2 + $0x21c8] ss:$20 sps:$4 sm:$0xff]  }
 0x42d   : > { %9138 = vmatprep.subr.bf16.mxu0 %v16089_v46  ;;  %9310 = vmatprep.subr.bf16.mxu1 %v16092_v50  ;;  %v16138_v46 = vld [vmem:[#allocation2 + $0x21f0] ss:$20 sps:$4 sm:$0xff]   ;;  %v16143_v50 = vld [vmem:[#allocation2 + $0x2214] ss:$20 sps:$4 sm:$0xff]  }
 0x430   : > { %9139 = vmatpush1.bf16.msra.mxu0 %v16087_v61  ;;  %9311 = vmatpush1.bf16.msra.mxu1 %v16090_v62  ;;  %v16146_v61 = vld [vmem:[#allocation2 + $0x221c] ss:$20 sps:$4 sm:$0xff]  }
 0x431   : > { %9140 = vmatprep.subr.bf16.mxu0 %v16095_v63  ;;  %9312 = vmatprep.subr.bf16.mxu1 %v16098_v23  ;;  %v16141_v62 = vld [vmem:[#allocation2 + $0x2210] ss:$20 sps:$4 sm:$0xff]   ;;  %v16144_v63 = vld [vmem:[#allocation2 + $0x2218] ss:$20 sps:$4 sm:$0xff]  }
 0x432   : > { %v16149_v23 = vld [vmem:[#allocation2 + $0x223c] ss:$20 sps:$4 sm:$0xff]  }
 0x434   : > { %9141 = vmatpush1.bf16.msra.mxu0 %v16093_v13  ;;  %9313 = vmatpush1.bf16.msra.mxu1 %v16096_v4  ;;  %v16152_v13 = vld [vmem:[#allocation2 + $0x2244] ss:$20 sps:$4 sm:$0xff]  }
 0x435   : > { %9142 = vmatprep.subr.bf16.mxu0 %v16101_v12  ;;  %9314 = vmatprep.subr.bf16.mxu1 %v16104_v30  ;;  %v16147_v4 = vld [vmem:[#allocation2 + $0x2238] ss:$20 sps:$4 sm:$0xff]   ;;  %v16150_v12 = vld [vmem:[#allocation2 + $0x2240] ss:$20 sps:$4 sm:$0xff]  }
 0x436   : > { %v16155_v30 = vld [vmem:[#allocation2 + $0x2264] ss:$20 sps:$4 sm:$0xff]  }
 0x438   : > { %9143 = vmatpush1.bf16.msra.mxu0 %v16099_v5  ;;  %9315 = vmatpush1.bf16.msra.mxu1 %v16102_v55  ;;  %v16158_v5 = vld [vmem:[#allocation2 + $0x226c] ss:$20 sps:$4 sm:$0xff]  }
 0x439   : > { %9144 = vmatprep.subr.bf16.mxu0 %v16107_v11  ;;  %9316 = vmatprep.subr.bf16.mxu1 %v16110_v15  ;;  %v16153_v55 = vld [vmem:[#allocation2 + $0x2260] ss:$20 sps:$4 sm:$0xff]   ;;  %v16156_v11 = vld [vmem:[#allocation2 + $0x2268] ss:$20 sps:$4 sm:$0xff]  }
 0x43a   : > { %v16161_v15 = vld [vmem:[#allocation2 + $0x228c] ss:$20 sps:$4 sm:$0xff]  }
 0x43c   : > { %9145 = vmatpush1.bf16.msra.mxu0 %v16105_v51  ;;  %9317 = vmatpush1.bf16.msra.mxu1 %v16108_v14  ;;  %v16164_v51 = vld [vmem:[#allocation2 + $0x2294] ss:$20 sps:$4 sm:$0xff]  }
 0x43d   : > { %9146 = vmatprep.subr.bf16.mxu0 %v16113_v19  ;;  %9318 = vmatprep.subr.bf16.mxu1 %v16116_v24  ;;  %v16159_v14 = vld [vmem:[#allocation2 + $0x2288] ss:$20 sps:$4 sm:$0xff]   ;;  %v16162_v19 = vld [vmem:[#allocation2 + $0x2290] ss:$20 sps:$4 sm:$0xff]  }
 0x43e   : > { %v14083_v54 = vpop.f32.mrb[20].mxu0  ;;  %v14105_v21 = vpop.f32.mrb[16].mxu1  ;;  %v16167_v24 = vld [vmem:[#allocation2 + $0x22b4] ss:$20 sps:$4 sm:$0xff]  }
 0x43f   : > { %v14084_v20 = vpop.f32.mrb[21].mxu0  ;;  %v14106_v53 = vpop.f32.mrb[17].mxu1 }
 0x440   : > { %v14085_v22 = vadd.f32 %v14084_v20, %v14083_v54  ;;  %v14107_v26 = vadd.f32 %v14106_v53, %v14105_v21  ;;  %v14086_v27 = vpop.f32.mrb[22].mxu0  ;;  %v14108_v29 = vpop.f32.mrb[18].mxu1  ;;  %9147 = vmatpush1.bf16.msra.mxu0 %v16111_v47  ;;  %9319 = vmatpush1.bf16.msra.mxu1 %v16114_v39  ;;  %v16170_v47 = vld [vmem:[#allocation2 + $0x22bc] ss:$20 sps:$4 sm:$0xff]   ;;  %v16168_v20 = vld [vmem:[#allocation2 + $0x22b8] ss:$20 sps:$4 sm:$0xff]  }
 0x441   : > { %v14087_v10 = vpop.f32.mrb[23].mxu0  ;;  %v14109_v37 = vpop.f32.mrb[19].mxu1  ;;  %9148 = vmatprep.subr.bf16.mxu0 %v16119_v44  ;;  %9320 = vmatprep.subr.bf16.mxu1 %v16122_v45  ;;  %v16165_v21 = vld [vmem:[#allocation2 + $0x22b0] ss:$20 sps:$4 sm:$0xff]  }
 0x442   : > { %v17041_v7 = vadd.f32 %v14107_v26, %v14085_v22  ;;  %v14088_v3 = vadd.f32 %v14087_v10, %v14086_v27  ;;  %v14110_v35 = vadd.f32 %v14109_v37, %v14108_v29  ;;  %v16173_v22 = vld [vmem:[#allocation2 + $0x22dc] ss:$20 sps:$4 sm:$0xff]   ;;  %v16176_v26 = vld [vmem:[#allocation2 + $0x22e4] ss:$20 sps:$4 sm:$0xff]  }
 0x444   : > { %v17047_v60 = vadd.f32 %v14110_v35, %v14088_v3  ;;  %9149 = vmatpush1.bf16.msra.mxu0 %v16117_v31  ;;  %9321 = vmatpush1.bf16.msra.mxu1 %v16120_v32  ;;  %v7568_v31 = vrot.slane %v940_v59, 1  ;;  %v7569_v32 = vrot.slane %v942_v48, 2  ;;  %v16177_v3 = vld [vmem:[#allocation2 + $0x1b90] ss:$20 sps:$4 sm:$0xff]  }
 0x445   : > { %9150 = vmatprep.subr.bf16.mxu0 %v16125_v17  ;;  %9322 = vmatprep.subr.bf16.mxu1 %v16128_v40  ;;  %v16171_v17 = vld [vmem:[#allocation2 + $0x22d8] ss:$20 sps:$4 sm:$0xff]   ;;  %v16174_v40 = vld [vmem:[#allocation2 + $0x22e0] ss:$20 sps:$4 sm:$0xff]   ;;  %v16180_v48 = vld [vmem:[#allocation2 + $0x1cd0] ss:$20 sps:$4 sm:$0xff]  }
 0x446   : > { %v17067_v59 = vor.u32 %v7569_v32, %v7568_v31  ;;  %v16230_v31 = vld [vmem:[#allocation2 + $0x21a8] ss:$20 sps:$4 sm:$0xff]  }
 0x447   : > { %v16231_v32 = vld [vmem:[#allocation2 + $0x2068] ss:$20 sps:$4 sm:$0xff]  }
 0x448   : > { %9151 = vmatpush1.bf16.msra.mxu0 %v16123_v1  ;;  %9323 = vmatpush1.bf16.msra.mxu1 %v16126_v6  ;;  %v16186_v1 = vld [vmem:[#allocation2 + $0x1e60] ss:$20 sps:$4 sm:$0xff]  }
 0x449   : > { %9163 = vmatprep.subr.bf16.mxu0 %v16131_v49  ;;  %9335 = vmatprep.subr.bf16.mxu1 %v16134_v38  ;;  %v16187_v6 = vld [vmem:[#allocation2 + $0x1aa0] ss:$20 sps:$4 sm:$0xff]   ;;  %v16189_v38 = vld [vmem:[#allocation2 + $0x1c08] ss:$20 sps:$4 sm:$0xff]  }
 0x44a   : > { %v16188_v49 = vld [vmem:[#allocation2 + $0x1d20] ss:$20 sps:$4 sm:$0xff]  }
 0x44b   : > { %9153 = vmatmul.mubr.bf16.vlgmr.msra.gmra.mrb[0].mxu0 %v17049_v41  ;;  %9325 = vmatmul.mubr.bf16.vlgmr.msra.gmra.mrb[0].mxu1 %v17049_v41 }
 0x44c   : > { %9164 = vmatpush1.bf16.msra.mxu0 %v16129_v42  ;;  %9336 = vmatpush1.bf16.msra.mxu1 %v16132_v2  ;;  %v16190_v42 = vld [vmem:[#allocation2 + $0x1e88] ss:$20 sps:$4 sm:$0xff]  }
 0x44d   : > { %9165 = vmatprep.subr.bf16.mxu0 %v16137_v43  ;;  %9337 = vmatprep.subr.bf16.mxu1 %v16140_v57  ;;  %v16191_v2 = vld [vmem:[#allocation2 + $0x1ac8] ss:$20 sps:$4 sm:$0xff]   ;;  %v16193_v57 = vld [vmem:[#allocation2 + $0x1c30] ss:$20 sps:$4 sm:$0xff]  }
 0x44e   : > { %9195 = vmatprep.mubr.bf16.mxu0 %v16691_v18  ;;  %9367 = vmatprep.mubr.bf16.mxu1 %v16691_v18  ;;  %v16192_v43 = vld [vmem:[#allocation2 + $0x1d48] ss:$20 sps:$4 sm:$0xff]  }
 0x450   : > { %9166 = vmatpush1.bf16.msra.mxu0 %v16135_v0  ;;  %9338 = vmatpush1.bf16.msra.mxu1 %v16138_v46  ;;  %v16194_v0 = vld [vmem:[#allocation2 + $0x1eb0] ss:$20 sps:$4 sm:$0xff]   ;;  %v16197_v46 = vld [vmem:[#allocation2 + $0x1c58] ss:$20 sps:$4 sm:$0xff]  }
 0x451   : > { %9167 = vmatprep.subr.bf16.mxu0 %v16143_v50  ;;  %9339 = vmatprep.subr.bf16.mxu1 %v16146_v61  ;;  %v16198_v50 = vld [vmem:[#allocation2 + $0x1ed8] ss:$20 sps:$4 sm:$0xff]  }
 0x452   : > { %v16199_v61 = vld [vmem:[#allocation2 + $0x1b18] ss:$20 sps:$4 sm:$0xff]  }
 0x454   : > { %9168 = vmatpush1.bf16.msra.mxu0 %v16141_v62  ;;  %9340 = vmatpush1.bf16.msra.mxu1 %v16144_v63  ;;  %v16200_v62 = vld [vmem:[#allocation2 + $0x1d98] ss:$20 sps:$4 sm:$0xff]   ;;  %v16201_v63 = vld [vmem:[#allocation2 + $0x1c80] ss:$20 sps:$4 sm:$0xff]  }
 0x455   : > { %9169 = vmatprep.subr.bf16.mxu0 %v16149_v23  ;;  %9341 = vmatprep.subr.bf16.mxu1 %v16152_v13  ;;  %v16202_v23 = vld [vmem:[#allocation2 + $0x1f00] ss:$20 sps:$4 sm:$0xff]  }
 0x456   : > { %v16203_v13 = vld [vmem:[#allocation2 + $0x1b40] ss:$20 sps:$4 sm:$0xff]  }
 0x458   : > { %9170 = vmatpush1.bf16.msra.mxu0 %v16147_v4  ;;  %9342 = vmatpush1.bf16.msra.mxu1 %v16150_v12  ;;  %v16204_v4 = vld [vmem:[#allocation2 + $0x1dc0] ss:$20 sps:$4 sm:$0xff]   ;;  %v16205_v12 = vld [vmem:[#allocation2 + $0x1ca8] ss:$20 sps:$4 sm:$0xff]  }
 0x459   : > { %9171 = vmatprep.subr.bf16.mxu0 %v16155_v30  ;;  %9343 = vmatprep.subr.bf16.mxu1 %v16158_v5  ;;  %v16206_v30 = vld [vmem:[#allocation2 + $0x1f28] ss:$20 sps:$4 sm:$0xff]  }
 0x45a   : > { %v16207_v5 = vld [vmem:[#allocation2 + $0x1b68] ss:$20 sps:$4 sm:$0xff]  }
 0x45c   : > { %9172 = vmatpush1.bf16.msra.mxu0 %v16153_v55  ;;  %9344 = vmatpush1.bf16.msra.mxu1 %v16156_v11  ;;  %v16208_v55 = vld [vmem:[#allocation2 + $0x1de8] ss:$20 sps:$4 sm:$0xff]   ;;  %v16209_v11 = vld [vmem:[#allocation2 + $0x2090] ss:$20 sps:$4 sm:$0xff]  }
 0x45d   : > { %9173 = vmatprep.subr.bf16.mxu0 %v16161_v15  ;;  %9345 = vmatprep.subr.bf16.mxu1 %v16164_v51  ;;  %v16210_v15 = vld [vmem:[#allocation2 + $0x1f50] ss:$20 sps:$4 sm:$0xff]  }
 0x45e   : > { %v14127_v39 = vpop.f32.mrb[24].mxu0  ;;  %v16211_v51 = vld [vmem:[#allocation2 + $0x21d0] ss:$20 sps:$4 sm:$0xff]  }
 0x45f   : > { %v14128_v44 = vpop.f32.mrb[25].mxu0 }
 0x460   : > { %v14129_v45 = vadd.f32 %v14128_v44, %v14127_v39  ;;  %v14130_v54 = vpop.f32.mrb[26].mxu0  ;;  %9174 = vmatpush1.bf16.msra.mxu0 %v16159_v14  ;;  %9346 = vmatpush1.bf16.msra.mxu1 %v16162_v19  ;;  %v16212_v14 = vld [vmem:[#allocation2 + $0x20b8] ss:$20 sps:$4 sm:$0xff]   ;;  %v16216_v39 = vld [vmem:[#allocation2 + $0x1fa0] ss:$20 sps:$4 sm:$0xff]  }
 0x461   : > { %v14131_v53 = vpop.f32.mrb[27].mxu0  ;;  %9175 = vmatprep.subr.bf16.mxu0 %v16167_v24  ;;  %9347 = vmatprep.subr.bf16.mxu1 %v16170_v47  ;;  %v16213_v19 = vld [vmem:[#allocation2 + $0x1f78] ss:$20 sps:$4 sm:$0xff]   ;;  %v16215_v47 = vld [vmem:[#allocation2 + $0x20e0] ss:$20 sps:$4 sm:$0xff]  }
 0x462   : > { %v7156_v27 = vadd.f32 %v14129_v45, %v17041_v7  ;;  %v14132_v29 = vadd.f32 %v14131_v53, %v14130_v54  ;;  %v16178_v7 = vld [vmem:[#allocation2 + $0x1e10] ss:$20 sps:$4 sm:$0xff]   ;;  %v16214_v24 = vld [vmem:[#allocation2 + $0x21f8] ss:$20 sps:$4 sm:$0xff]   ;;  %v16217_v44 = vld [vmem:[#allocation2 + $0x2220] ss:$20 sps:$4 sm:$0xff]  }
 0x463   : > { %v16220_v45 = vld [vmem:[#allocation2 + $0x2248] ss:$20 sps:$4 sm:$0xff]   ;;  %v16221_v54 = vld [vmem:[#allocation2 + $0x2130] ss:$20 sps:$4 sm:$0xff]   ;;  %v16225_v53 = vld [vmem:[#allocation2 + $0x2018] ss:$20 sps:$4 sm:$0xff]  }
 0x464   : > { %v17061_v10 = vadd.f32 %v16974_v58, %v7156_v27  ;;  %v7159_v37 = vadd.f32 %v14132_v29, %v17047_v60  ;;  %9176 = vmatpush1.bf16.msra.mxu0 %v16165_v21  ;;  %9348 = vmatpush1.bf16.msra.mxu1 %v16168_v20  ;;  %v16181_v58 = vld [vmem:[#allocation2 + $0x1bb8] ss:$20 sps:$4 sm:$0xff]   ;;  %v16223_v21 = vld [vmem:[#allocation2 + $0x2270] ss:$20 sps:$4 sm:$0xff]   ;;  %v16228_v27 = vld [vmem:[#allocation2 + $0x2040] ss:$20 sps:$4 sm:$0xff]  }
 0x465   : > { %9177 = vmatprep.subr.bf16.mxu0 %v16173_v22  ;;  %9349 = vmatprep.subr.bf16.mxu1 %v16176_v26  ;;  %v16184_v60 = vld [vmem:[#allocation2 + $0x1cf8] ss:$20 sps:$4 sm:$0xff]   ;;  %v16227_v26 = vld [vmem:[#allocation2 + $0x2180] ss:$20 sps:$4 sm:$0xff]  }
 0x466   : > { %v17065_v35 = vadd.f32 %v16977_v28, %v7159_v37  ;;  %v16185_v28 = vld [vmem:[#allocation2 + $0x1be0] ss:$20 sps:$4 sm:$0xff]   ;;  %v16224_v20 = vld [vmem:[#allocation2 + $0x2158] ss:$20 sps:$4 sm:$0xff]   ;;  %v16232_v37 = vld [vmem:[#allocation2 + $0x22e8] ss:$20 sps:$4 sm:$0xff]  }
 0x467   : > { %v16226_v22 = vld [vmem:[#allocation2 + $0x2298] ss:$20 sps:$4 sm:$0xff]   ;;  %v16229_v29 = vld [vmem:[#allocation2 + $0x22c0] ss:$20 sps:$4 sm:$0xff]  }
 0x468   : > { %9178 = vmatpush1.bf16.msra.mxu0 %v16171_v17  ;;  %9350 = vmatpush1.bf16.msra.mxu1 %v16174_v40  ;;  %v16235_v17 = vld [vmem:[#allocation2 + $0x2304] ss:$20 sps:$4 sm:$0xff]   ;;  %v16238_v40 = vld [vmem:[#allocation2 + $0x230c] ss:$20 sps:$4 sm:$0xff]  }
 0x469   : > { %14142 = vmatprep.subr.bf16.mxu0 %v16177_v3  ;;  %14164 = vmatprep.subr.bf16.mxu1 %v16178_v7  ;;  %v16233_v3 = vld [vmem:[#allocation2 + $0x2300] ss:$20 sps:$4 sm:$0xff]   ;;  %v16236_v7 = vld [vmem:[#allocation2 + $0x2308] ss:$20 sps:$4 sm:$0xff]  }
 0x46b   : > { %9196 = vmatmul.mubr.bf16.vlgmr.msra.gmra.mrb[0].mxu0 %v17067_v59  ;;  %9368 = vmatmul.mubr.bf16.vlgmr.msra.gmra.mrb[0].mxu1 %v17067_v59 }
 0x46c   : > { %14143 = vmatpush3.bf16.msra.mxu0 %v16179_v33  ;;  %14165 = vmatpush3.bf16.msra.mxu1 %v16180_v48  ;;  %v16241_v33 = vld [vmem:[#allocation2 + $0x232c] ss:$20 sps:$4 sm:$0xff]   ;;  %v16244_v48 = vld [vmem:[#allocation2 + $0x2334] ss:$20 sps:$4 sm:$0xff]  }
 0x46d   : > { %14144 = vmatprep.subr.bf16.mxu0 %v16181_v58  ;;  %14166 = vmatprep.subr.bf16.mxu1 %v16182_v36  ;;  %v16641_v58 = vld [vmem:[%s16770_s6 + $0x4] ss:$28 sps:$4 sm:$0x7f]  }
 0x46e   : > { %9410 = vmatprep.mubr.bf16.mxu0 %v17003_v34  ;;  %9451 = vmatprep.mubr.bf16.mxu1 %v17019_v8  ;;  %v16195_v34 = vld [vmem:[#allocation2 + $0x1af0] ss:$20 sps:$4 sm:$0xff]   ;;  %v17087_v36 = vrot.slane %v16641_v58, 2 }
 0x46f   : > { %v16196_v8 = vld [vmem:[#allocation2 + $0x1d70] ss:$20 sps:$4 sm:$0xff]  }
 0x470   : > { %14145 = vmatpush3.bf16.msra.mxu0 %v16183_v9  ;;  %14167 = vmatpush3.bf16.msra.mxu1 %v16184_v60  ;;  %v16239_v9 = vld [vmem:[#allocation2 + $0x2328] ss:$20 sps:$4 sm:$0xff]   ;;  %v16242_v60 = vld [vmem:[#allocation2 + $0x2330] ss:$20 sps:$4 sm:$0xff]  }
 0x471   : > { %14146 = vmatprep.subr.bf16.mxu0 %v16185_v28  ;;  %14168 = vmatprep.subr.bf16.mxu1 %v16186_v1  ;;  %v16247_v28 = vld [vmem:[#allocation2 + $0x2354] ss:$20 sps:$4 sm:$0xff]   ;;  %v16250_v1 = vld [vmem:[#allocation2 + $0x235c] ss:$20 sps:$4 sm:$0xff]   ;;  %v16331_v58 = vld [vmem:[#allocation2 + $0x2584] ss:$20 sps:$4 sm:$0xff]  }
 0x474   : > { %14147 = vmatpush3.bf16.msra.mxu0 %v16187_v6  ;;  %14169 = vmatpush3.bf16.msra.mxu1 %v16188_v49  ;;  %v16245_v6 = vld [vmem:[#allocation2 + $0x2350] ss:$20 sps:$4 sm:$0xff]   ;;  %v16248_v49 = vld [vmem:[#allocation2 + $0x2358] ss:$20 sps:$4 sm:$0xff]  }
 0x475   : > { %14148 = vmatprep.subr.bf16.mxu0 %v16189_v38  ;;  %14170 = vmatprep.subr.bf16.mxu1 %v16190_v42  ;;  %v16251_v38 = vld [vmem:[#allocation2 + $0x2378] ss:$20 sps:$4 sm:$0xff]   ;;  %v16254_v42 = vld [vmem:[#allocation2 + $0x2380] ss:$20 sps:$4 sm:$0xff]  }
 0x478   : > { %14149 = vmatpush3.bf16.msra.mxu0 %v16191_v2  ;;  %14171 = vmatpush3.bf16.msra.mxu1 %v16192_v43  ;;  %v16259_v2 = vld [vmem:[#allocation2 + $0x23a4] ss:$20 sps:$4 sm:$0xff]   ;;  %v16262_v43 = vld [vmem:[#allocation2 + $0x23ac] ss:$20 sps:$4 sm:$0xff]  }
 0x479   : > { %14150 = vmatprep.subr.bf16.mxu0 %v16193_v57  ;;  %14172 = vmatprep.subr.bf16.mxu1 %v16194_v0  ;;  %v16257_v57 = vld [vmem:[#allocation2 + $0x23a0] ss:$20 sps:$4 sm:$0xff]   ;;  %v16260_v0 = vld [vmem:[#allocation2 + $0x23a8] ss:$20 sps:$4 sm:$0xff]  }
 0x47c   : > { %14151 = vmatpush3.bf16.msra.mxu0 %v16195_v34  ;;  %14173 = vmatpush3.bf16.msra.mxu1 %v16196_v8  ;;  %v16265_v34 = vld [vmem:[#allocation2 + $0x23cc] ss:$20 sps:$4 sm:$0xff]   ;;  %v16268_v8 = vld [vmem:[#allocation2 + $0x23d4] ss:$20 sps:$4 sm:$0xff]  }
 0x47d   : > { %14152 = vmatprep.subr.bf16.mxu0 %v16197_v46  ;;  %14174 = vmatprep.subr.bf16.mxu1 %v16198_v50  ;;  %v16263_v46 = vld [vmem:[#allocation2 + $0x23c8] ss:$20 sps:$4 sm:$0xff]   ;;  %v16266_v50 = vld [vmem:[#allocation2 + $0x23d0] ss:$20 sps:$4 sm:$0xff]  }
 0x480   : > { %14153 = vmatpush3.bf16.msra.mxu0 %v16199_v61  ;;  %14175 = vmatpush3.bf16.msra.mxu1 %v16200_v62  ;;  %v16271_v61 = vld [vmem:[#allocation2 + $0x23f4] ss:$20 sps:$4 sm:$0xff]   ;;  %v16274_v62 = vld [vmem:[#allocation2 + $0x23fc] ss:$20 sps:$4 sm:$0xff]  }
 0x481   : > { %14154 = vmatprep.subr.bf16.mxu0 %v16201_v63  ;;  %14176 = vmatprep.subr.bf16.mxu1 %v16202_v23  ;;  %v16269_v63 = vld [vmem:[#allocation2 + $0x23f0] ss:$20 sps:$4 sm:$0xff]   ;;  %v16272_v23 = vld [vmem:[#allocation2 + $0x23f8] ss:$20 sps:$4 sm:$0xff]  }
 0x484   : > { %14155 = vmatpush3.bf16.msra.mxu0 %v16203_v13  ;;  %14177 = vmatpush3.bf16.msra.mxu1 %v16204_v4  ;;  %v16277_v13 = vld [vmem:[#allocation2 + $0x241c] ss:$20 sps:$4 sm:$0xff]   ;;  %v16280_v4 = vld [vmem:[#allocation2 + $0x2424] ss:$20 sps:$4 sm:$0xff]  }
 0x485   : > { %14156 = vmatprep.subr.bf16.mxu0 %v16205_v12  ;;  %14178 = vmatprep.subr.bf16.mxu1 %v16206_v30  ;;  %v16275_v12 = vld [vmem:[#allocation2 + $0x2418] ss:$20 sps:$4 sm:$0xff]   ;;  %v16278_v30 = vld [vmem:[#allocation2 + $0x2420] ss:$20 sps:$4 sm:$0xff]  }
 0x488   : > { %14157 = vmatpush3.bf16.msra.mxu0 %v16207_v5  ;;  %14179 = vmatpush3.bf16.msra.mxu1 %v16208_v55  ;;  %v16283_v5 = vld [vmem:[#allocation2 + $0x2444] ss:$20 sps:$4 sm:$0xff]   ;;  %v16286_v55 = vld [vmem:[#allocation2 + $0x244c] ss:$20 sps:$4 sm:$0xff]  }
 0x489   : > { %14186 = vmatprep.subr.bf16.mxu0 %v16209_v11  ;;  %14358 = vmatprep.subr.bf16.mxu1 %v16692_v56  ;;  %v16281_v11 = vld [vmem:[#allocation2 + $0x2440] ss:$20 sps:$4 sm:$0xff]  }
 0x48b   : > { %9411 = vmatmul.mubr.bf16.vlgmr.msra.gmra.mrb[28].mxu0 %v17017_v25  ;;  %9452 = vmatmul.mubr.bf16.vlgmr.msra.gmra.mrb[20].mxu1 %v17033_v16  ;;  %v16218_v25 = vld [vmem:[#allocation2 + $0x2108] ss:$20 sps:$4 sm:$0xff]  }
 0x48c   : > { %14187 = vmatpush3.bf16.msra.mxu0 %v16210_v15  ;;  %14359 = vmatpush3.bf16.msra.mxu1 %v16211_v51  ;;  %v16219_v16 = vld [vmem:[#allocation2 + $0x1fc8] ss:$20 sps:$4 sm:$0xff]   ;;  %v16289_v51 = vld [vmem:[#allocation2 + $0x246c] ss:$20 sps:$4 sm:$0xff]  }
 0x48d   : > { %14188 = vmatprep.subr.bf16.mxu0 %v16212_v14  ;;  %14360 = vmatprep.subr.bf16.mxu1 %v16692_v56  ;;  %v16284_v15 = vld [vmem:[#allocation2 + $0x2448] ss:$20 sps:$4 sm:$0xff]  }
 0x48e   : > { %9492 = vmatprep.mubr.bf16.mxu0 %v17035_v52  ;;  %14374 = vmatprep.mubr.msk.bf16.mxu1 %vm16693_vm0, %v16692_v56  ;;  %v16222_v52 = vld [vmem:[#allocation2 + $0x1ff0] ss:$20 sps:$4 sm:$0xff]   ;;  %v16292_v14 = vld [vmem:[#allocation2 + $0x2474] ss:$20 sps:$4 sm:$0xff]  }
 0x490   : > { %14189 = vmatpush3.bf16.msra.mxu0 %v16213_v19  ;;  %14361 = vmatpush3.bf16.msra.mxu1 %v16214_v24  ;;  %v16287_v19 = vld [vmem:[#allocation2 + $0x2468] ss:$20 sps:$4 sm:$0xff]   ;;  %v16290_v24 = vld [vmem:[#allocation2 + $0x2470] ss:$20 sps:$4 sm:$0xff]  }
 0x491   : > { %14190 = vmatprep.subr.bf16.mxu0 %v16215_v47  ;;  %14362 = vmatprep.subr.bf16.mxu1 %v16692_v56  ;;  %v16295_v47 = vld [vmem:[#allocation2 + $0x2494] ss:$20 sps:$4 sm:$0xff]  }
 0x494   : > { %14191 = vmatpush3.bf16.msra.mxu0 %v16216_v39  ;;  %14363 = vmatpush3.bf16.msra.mxu1 %v16217_v44  ;;  %v16298_v39 = vld [vmem:[#allocation2 + $0x249c] ss:$20 sps:$4 sm:$0xff]  }
 0x495   : > { %14192 = vmatprep.subr.bf16.mxu0 %v16218_v25  ;;  %14364 = vmatprep.subr.bf16.mxu1 %v16692_v56  ;;  %v16293_v44 = vld [vmem:[#allocation2 + $0x2490] ss:$20 sps:$4 sm:$0xff]   ;;  %v16296_v25 = vld [vmem:[#allocation2 + $0x2498] ss:$20 sps:$4 sm:$0xff]  }
 0x498   : > { %14193 = vmatpush3.bf16.msra.mxu0 %v16219_v16  ;;  %14365 = vmatpush3.bf16.msra.mxu1 %v16220_v45  ;;  %v16301_v16 = vld [vmem:[#allocation2 + $0x24bc] ss:$20 sps:$4 sm:$0xff]   ;;  %v16304_v45 = vld [vmem:[#allocation2 + $0x24c4] ss:$20 sps:$4 sm:$0xff]  }
 0x499   : > { %14194 = vmatprep.subr.bf16.mxu0 %v16221_v54  ;;  %14366 = vmatprep.subr.bf16.mxu1 %v16692_v56  ;;  %v16299_v54 = vld [vmem:[#allocation2 + $0x24b8] ss:$20 sps:$4 sm:$0xff]  }
 0x49c   : > { %14195 = vmatpush3.bf16.msra.mxu0 %v16222_v52  ;;  %14367 = vmatpush3.bf16.msra.mxu1 %v16223_v21  ;;  %v16302_v52 = vld [vmem:[#allocation2 + $0x24c0] ss:$20 sps:$4 sm:$0xff]   ;;  %v16307_v21 = vld [vmem:[#allocation2 + $0x24e4] ss:$20 sps:$4 sm:$0xff]  }
 0x49d   : > { %14196 = vmatprep.subr.bf16.mxu0 %v16224_v20  ;;  %14368 = vmatprep.subr.bf16.mxu1 %v16692_v56  ;;  %v16310_v20 = vld [vmem:[#allocation2 + $0x24ec] ss:$20 sps:$4 sm:$0xff]  }
 0x4a0   : > { %14197 = vmatpush3.bf16.msra.mxu0 %v16225_v53  ;;  %14369 = vmatpush3.bf16.msra.mxu1 %v16226_v22  ;;  %v16305_v53 = vld [vmem:[#allocation2 + $0x24e0] ss:$20 sps:$4 sm:$0xff]   ;;  %v16308_v22 = vld [vmem:[#allocation2 + $0x24e8] ss:$20 sps:$4 sm:$0xff]  }
 0x4a1   : > { %14198 = vmatprep.subr.bf16.mxu0 %v16227_v26  ;;  %14370 = vmatprep.subr.bf16.mxu1 %v16692_v56  ;;  %v16313_v26 = vld [vmem:[#allocation2 + $0x250c] ss:$20 sps:$4 sm:$0xff]  }
 0x4a4   : > { %14199 = vmatpush3.bf16.msra.mxu0 %v16228_v27  ;;  %14371 = vmatpush3.bf16.msra.mxu1 %v16229_v29  ;;  %v16316_v27 = vld [vmem:[#allocation2 + $0x2514] ss:$20 sps:$4 sm:$0xff]  }
 0x4a5   : > { %14200 = vmatprep.subr.bf16.mxu0 %v16230_v31  ;;  %14372 = vmatprep.subr.bf16.mxu1 %v16692_v56  ;;  %v16311_v29 = vld [vmem:[#allocation2 + $0x2508] ss:$20 sps:$4 sm:$0xff]   ;;  %v16314_v31 = vld [vmem:[#allocation2 + $0x2510] ss:$20 sps:$4 sm:$0xff]  }
 0x4a8   : > { %14201 = vmatpush3.bf16.msra.mxu0 %v16231_v32  ;;  %14373 = vmatpush3.bf16.msra.mxu1 %v16232_v37  ;;  %v16319_v32 = vld [vmem:[#allocation2 + $0x2534] ss:$20 sps:$4 sm:$0xff]   ;;  %v16322_v37 = vld [vmem:[#allocation2 + $0x253c] ss:$20 sps:$4 sm:$0xff]  }
 0x4a9   : > { %11359 = vmatprep.subr.bf16.mxu0 %v16235_v17  ;;  %11531 = vmatprep.subr.bf16.mxu1 %v16238_v40  ;;  %v16317_v17 = vld [vmem:[#allocation2 + $0x2530] ss:$20 sps:$4 sm:$0xff]   ;;  %v16320_v40 = vld [vmem:[#allocation2 + $0x2538] ss:$20 sps:$4 sm:$0xff]  }
 0x4ab   : > { %9493 = vmatmul.mubr.bf16.vlgmr.msra.gmra.mrb[32].mxu0 %v17049_v41  ;;  %14375 = vmatmul.mubr.bf16.vlgmr.msra.gmra.mrb[8].mxu1 %v17067_v59  ;;  %v16253_v41 = vld [vmem:[#allocation2 + $0x237c] ss:$20 sps:$4 sm:$0xff]   ;;  %v16256_v59 = vld [vmem:[#allocation2 + $0x2384] ss:$20 sps:$4 sm:$0xff]  }
 0x4ac   : > { %11360 = vmatpush1.bf16.msra.mxu0 %v16233_v3  ;;  %11532 = vmatpush1.bf16.msra.mxu1 %v16236_v7  ;;  %v16325_v3 = vld [vmem:[#allocation2 + $0x255c] ss:$20 sps:$4 sm:$0xff]   ;;  %v16328_v7 = vld [vmem:[#allocation2 + $0x2564] ss:$20 sps:$4 sm:$0xff]  }
 0x4ad   : > { %11361 = vmatprep.subr.bf16.mxu0 %v16241_v33  ;;  %11533 = vmatprep.subr.bf16.mxu1 %v16244_v48  ;;  %v16323_v33 = vld [vmem:[#allocation2 + $0x2558] ss:$20 sps:$4 sm:$0xff]   ;;  %v16326_v48 = vld [vmem:[#allocation2 + $0x2560] ss:$20 sps:$4 sm:$0xff]  }
 0x4ae   : > { %11391 = vmatprep.mubr.bf16.mxu0 %v17087_v36  ;;  %11563 = vmatprep.mubr.bf16.mxu1 %v17087_v36 }
 0x4b0   : > { %11362 = vmatpush1.bf16.msra.mxu0 %v16239_v9  ;;  %11534 = vmatpush1.bf16.msra.mxu1 %v16242_v60  ;;  %v16334_v9 = vld [vmem:[#allocation2 + $0x258c] ss:$20 sps:$4 sm:$0xff]  }
 0x4b1   : > { %11363 = vmatprep.subr.bf16.mxu0 %v16247_v28  ;;  %11535 = vmatprep.subr.bf16.mxu1 %v16250_v1  ;;  %v16642_v60 = vld [vmem:[%s16770_s6] ss:$28 sps:$4 sm:$0x7f]  }
 0x4b2   : > { %v17094_v28 = vrot.slane %v16642_v60, 2  ;;  %v16329_v1 = vld [vmem:[#allocation2 + $0x2580] ss:$20 sps:$4 sm:$0xff]   ;;  %v16418_v60 = vld [vmem:[#allocation2 + $0x27bc] ss:$20 sps:$4 sm:$0xff]  }
 0x4b4   : > { %11364 = vmatpush1.bf16.msra.mxu0 %v16245_v6  ;;  %11536 = vmatpush1.bf16.msra.mxu1 %v16248_v49  ;;  %v16332_v6 = vld [vmem:[#allocation2 + $0x2588] ss:$20 sps:$4 sm:$0xff]   ;;  %v16337_v49 = vld [vmem:[#allocation2 + $0x25ac] ss:$20 sps:$4 sm:$0xff]  }
 0x4b5   : > { %11365 = vmatprep.subr.bf16.mxu0 %v16253_v41  ;;  %11537 = vmatprep.subr.bf16.mxu1 %v16256_v59  ;;  %v16340_v41 = vld [vmem:[#allocation2 + $0x25b4] ss:$20 sps:$4 sm:$0xff]  }
 0x4b6   : > { %v16643_v59 = vld [vmem:[%s16770_s6 + $0xc] ss:$28 sps:$4 sm:$0x7f]  }
 0x4b8   : > { %11366 = vmatpush1.bf16.msra.mxu0 %v16251_v38  ;;  %11538 = vmatpush1.bf16.msra.mxu1 %v16254_v42  ;;  %v17097_v38 = vrot.slane %v16643_v59, 2  ;;  %v16335_v42 = vld [vmem:[#allocation2 + $0x25a8] ss:$20 sps:$4 sm:$0xff]   ;;  %v16419_v59 = vld [vmem:[#allocation2 + $0x27d8] ss:$20 sps:$4 sm:$0xff]  }
 0x4b9   : > { %11367 = vmatprep.subr.bf16.mxu0 %v16259_v2  ;;  %11539 = vmatprep.subr.bf16.mxu1 %v16262_v43  ;;  %v16338_v2 = vld [vmem:[#allocation2 + $0x25b0] ss:$20 sps:$4 sm:$0xff]   ;;  %v16343_v43 = vld [vmem:[#allocation2 + $0x25d4] ss:$20 sps:$4 sm:$0xff]  }
 0x4bc   : > { %11368 = vmatpush1.bf16.msra.mxu0 %v16257_v57  ;;  %11540 = vmatpush1.bf16.msra.mxu1 %v16260_v0  ;;  %v16346_v57 = vld [vmem:[#allocation2 + $0x25dc] ss:$20 sps:$4 sm:$0xff]  }
 0x4bd   : > { %11369 = vmatprep.subr.bf16.mxu0 %v16265_v34  ;;  %11541 = vmatprep.subr.bf16.mxu1 %v16268_v8  ;;  %v16341_v0 = vld [vmem:[#allocation2 + $0x25d0] ss:$20 sps:$4 sm:$0xff]   ;;  %v16344_v34 = vld [vmem:[#allocation2 + $0x25d8] ss:$20 sps:$4 sm:$0xff]  }
 0x4be   : > { %v16349_v8 = vld [vmem:[#allocation2 + $0x25fc] ss:$20 sps:$4 sm:$0xff]  }
 0x4c0   : > { %11370 = vmatpush1.bf16.msra.mxu0 %v16263_v46  ;;  %11542 = vmatpush1.bf16.msra.mxu1 %v16266_v50  ;;  %v16352_v46 = vld [vmem:[#allocation2 + $0x2604] ss:$20 sps:$4 sm:$0xff]  }
 0x4c1   : > { %11371 = vmatprep.subr.bf16.mxu0 %v16271_v61  ;;  %11543 = vmatprep.subr.bf16.mxu1 %v16274_v62  ;;  %v16347_v50 = vld [vmem:[#allocation2 + $0x25f8] ss:$20 sps:$4 sm:$0xff]   ;;  %v16350_v61 = vld [vmem:[#allocation2 + $0x2600] ss:$20 sps:$4 sm:$0xff]  }
 0x4c2   : > { %v16355_v62 = vld [vmem:[#allocation2 + $0x2624] ss:$20 sps:$4 sm:$0xff]  }
 0x4c4   : > { %11372 = vmatpush1.bf16.msra.mxu0 %v16269_v63  ;;  %11544 = vmatpush1.bf16.msra.mxu1 %v16272_v23  ;;  %v16358_v63 = vld [vmem:[#allocation2 + $0x262c] ss:$20 sps:$4 sm:$0xff]  }
 0x4c5   : > { %11373 = vmatprep.subr.bf16.mxu0 %v16277_v13  ;;  %11545 = vmatprep.subr.bf16.mxu1 %v16280_v4  ;;  %v16353_v23 = vld [vmem:[#allocation2 + $0x2620] ss:$20 sps:$4 sm:$0xff]   ;;  %v16356_v13 = vld [vmem:[#allocation2 + $0x2628] ss:$20 sps:$4 sm:$0xff]  }
 0x4c6   : > { %v16361_v4 = vld [vmem:[#allocation2 + $0x264c] ss:$20 sps:$4 sm:$0xff]  }
 0x4c8   : > { %11374 = vmatpush1.bf16.msra.mxu0 %v16275_v12  ;;  %11546 = vmatpush1.bf16.msra.mxu1 %v16278_v30  ;;  %v16364_v12 = vld [vmem:[#allocation2 + $0x2654] ss:$20 sps:$4 sm:$0xff]  }
 0x4c9   : > { %11375 = vmatprep.subr.bf16.mxu0 %v16283_v5  ;;  %11547 = vmatprep.subr.bf16.mxu1 %v16286_v55  ;;  %v16359_v30 = vld [vmem:[#allocation2 + $0x2648] ss:$20 sps:$4 sm:$0xff]   ;;  %v16362_v5 = vld [vmem:[#allocation2 + $0x2650] ss:$20 sps:$4 sm:$0xff]  }
 0x4ca   : > { %v16367_v55 = vld [vmem:[#allocation2 + $0x2674] ss:$20 sps:$4 sm:$0xff]  }
 0x4cc   : > { %11376 = vmatpush1.bf16.msra.mxu0 %v16281_v11  ;;  %11548 = vmatpush1.bf16.msra.mxu1 %v16284_v15  ;;  %v16370_v11 = vld [vmem:[#allocation2 + $0x267c] ss:$20 sps:$4 sm:$0xff]  }
 0x4cd   : > { %11377 = vmatprep.subr.bf16.mxu0 %v16289_v51  ;;  %11549 = vmatprep.subr.bf16.mxu1 %v16292_v14  ;;  %v16365_v15 = vld [vmem:[#allocation2 + $0x2670] ss:$20 sps:$4 sm:$0xff]   ;;  %v16368_v51 = vld [vmem:[#allocation2 + $0x2678] ss:$20 sps:$4 sm:$0xff]  }
 0x4ce   : > { %v16373_v14 = vld [vmem:[#allocation2 + $0x269c] ss:$20 sps:$4 sm:$0xff]  }
 0x4d0   : > { %11378 = vmatpush1.bf16.msra.mxu0 %v16287_v19  ;;  %11550 = vmatpush1.bf16.msra.mxu1 %v16290_v24  ;;  %v16376_v19 = vld [vmem:[#allocation2 + $0x26a4] ss:$20 sps:$4 sm:$0xff]  }
 0x4d1   : > { %11379 = vmatprep.subr.bf16.mxu0 %v16295_v47  ;;  %11551 = vmatprep.subr.bf16.mxu1 %v16298_v39  ;;  %v16371_v24 = vld [vmem:[#allocation2 + $0x2698] ss:$20 sps:$4 sm:$0xff]   ;;  %v16374_v47 = vld [vmem:[#allocation2 + $0x26a0] ss:$20 sps:$4 sm:$0xff]  }
 0x4d2   : > { %v16379_v39 = vld [vmem:[#allocation2 + $0x26c4] ss:$20 sps:$4 sm:$0xff]  }
 0x4d4   : > { %11380 = vmatpush1.bf16.msra.mxu0 %v16293_v44  ;;  %11552 = vmatpush1.bf16.msra.mxu1 %v16296_v25  ;;  %v16382_v44 = vld [vmem:[#allocation2 + $0x26cc] ss:$20 sps:$4 sm:$0xff]  }
 0x4d5   : > { %11381 = vmatprep.subr.bf16.mxu0 %v16301_v16  ;;  %11553 = vmatprep.subr.bf16.mxu1 %v16304_v45  ;;  %v16377_v25 = vld [vmem:[#allocation2 + $0x26c0] ss:$20 sps:$4 sm:$0xff]   ;;  %v16380_v16 = vld [vmem:[#allocation2 + $0x26c8] ss:$20 sps:$4 sm:$0xff]  }
 0x4d6   : > { %v16385_v45 = vld [vmem:[#allocation2 + $0x26ec] ss:$20 sps:$4 sm:$0xff]  }
 0x4d8   : > { %11382 = vmatpush1.bf16.msra.mxu0 %v16299_v54  ;;  %11554 = vmatpush1.bf16.msra.mxu1 %v16302_v52  ;;  %v16388_v54 = vld [vmem:[#allocation2 + $0x26f4] ss:$20 sps:$4 sm:$0xff]  }
 0x4d9   : > { %11383 = vmatprep.subr.bf16.mxu0 %v16307_v21  ;;  %11555 = vmatprep.subr.bf16.mxu1 %v16310_v20  ;;  %v16383_v52 = vld [vmem:[#allocation2 + $0x26e8] ss:$20 sps:$4 sm:$0xff]   ;;  %v16386_v21 = vld [vmem:[#allocation2 + $0x26f0] ss:$20 sps:$4 sm:$0xff]  }
 0x4da   : > { %v16391_v20 = vld [vmem:[#allocation2 + $0x2714] ss:$20 sps:$4 sm:$0xff]  }
 0x4dc   : > { %11384 = vmatpush1.bf16.msra.mxu0 %v16305_v53  ;;  %11556 = vmatpush1.bf16.msra.mxu1 %v16308_v22  ;;  %v16394_v53 = vld [vmem:[#allocation2 + $0x271c] ss:$20 sps:$4 sm:$0xff]  }
 0x4dd   : > { %11385 = vmatprep.subr.bf16.mxu0 %v16313_v26  ;;  %11557 = vmatprep.subr.bf16.mxu1 %v16316_v27  ;;  %v16389_v22 = vld [vmem:[#allocation2 + $0x2710] ss:$20 sps:$4 sm:$0xff]   ;;  %v16392_v26 = vld [vmem:[#allocation2 + $0x2718] ss:$20 sps:$4 sm:$0xff]  }
 0x4de   : > { %v16397_v27 = vld [vmem:[#allocation2 + $0x273c] ss:$20 sps:$4 sm:$0xff]  }
 0x4e0   : > { %11386 = vmatpush1.bf16.msra.mxu0 %v16311_v29  ;;  %11558 = vmatpush1.bf16.msra.mxu1 %v16314_v31  ;;  %v16400_v29 = vld [vmem:[#allocation2 + $0x2744] ss:$20 sps:$4 sm:$0xff]  }
 0x4e1   : > { %11387 = vmatprep.subr.bf16.mxu0 %v16319_v32  ;;  %11559 = vmatprep.subr.bf16.mxu1 %v16322_v37  ;;  %v16395_v31 = vld [vmem:[#allocation2 + $0x2738] ss:$20 sps:$4 sm:$0xff]   ;;  %v16398_v32 = vld [vmem:[#allocation2 + $0x2740] ss:$20 sps:$4 sm:$0xff]  }
 0x4e2   : > { %v16403_v37 = vld [vmem:[#allocation2 + $0x2764] ss:$20 sps:$4 sm:$0xff]  }
 0x4e4   : > { %11388 = vmatpush1.bf16.msra.mxu0 %v16317_v17  ;;  %11560 = vmatpush1.bf16.msra.mxu1 %v16320_v40  ;;  %v16406_v17 = vld [vmem:[#allocation2 + $0x276c] ss:$20 sps:$4 sm:$0xff]  }
 0x4e5   : > { %11389 = vmatprep.subr.bf16.mxu0 %v16325_v3  ;;  %11561 = vmatprep.subr.bf16.mxu1 %v16328_v7  ;;  %v16401_v40 = vld [vmem:[#allocation2 + $0x2760] ss:$20 sps:$4 sm:$0xff]   ;;  %v16404_v3 = vld [vmem:[#allocation2 + $0x2768] ss:$20 sps:$4 sm:$0xff]  }
 0x4e6   : > { %v16409_v7 = vld [vmem:[#allocation2 + $0x278c] ss:$20 sps:$4 sm:$0xff]  }
 0x4e8   : > { %11390 = vmatpush1.bf16.msra.mxu0 %v16323_v33  ;;  %11562 = vmatpush1.bf16.msra.mxu1 %v16326_v48  ;;  %v16412_v33 = vld [vmem:[#allocation2 + $0x2794] ss:$20 sps:$4 sm:$0xff]  }
 0x4e9   : > { %11402 = vmatprep.subr.bf16.mxu0 %v16331_v58  ;;  %11574 = vmatprep.subr.bf16.mxu1 %v16334_v9  ;;  %v16407_v48 = vld [vmem:[#allocation2 + $0x2788] ss:$20 sps:$4 sm:$0xff]   ;;  %v16410_v58 = vld [vmem:[#allocation2 + $0x2790] ss:$20 sps:$4 sm:$0xff]  }
 0x4ea   : > { %v16415_v9 = vld [vmem:[#allocation2 + $0x27b4] ss:$20 sps:$4 sm:$0xff]  }
 0x4eb   : > { %11392 = vmatmul.mubr.bf16.vlgmr.msra.gmra.mrb[0].mxu0 %v17094_v28  ;;  %11564 = vmatmul.mubr.bf16.vlgmr.msra.gmra.mrb[0].mxu1 %v17094_v28 }
 0x4ec   : > { %11403 = vmatpush1.bf16.msra.mxu0 %v16329_v1  ;;  %11575 = vmatpush1.bf16.msra.mxu1 %v16332_v6  ;;  %v16413_v1 = vld [vmem:[#allocation2 + $0x27b0] ss:$20 sps:$4 sm:$0xff]   ;;  %v16416_v6 = vld [vmem:[#allocation2 + $0x27b8] ss:$20 sps:$4 sm:$0xff]  }
 0x4ed   : > { %11404 = vmatprep.subr.bf16.mxu0 %v16337_v49  ;;  %11576 = vmatprep.subr.bf16.mxu1 %v16340_v41  ;;  %v16421_v49 = vld [vmem:[#allocation2 + $0x27dc] ss:$20 sps:$4 sm:$0xff]   ;;  %v16424_v41 = vld [vmem:[#allocation2 + $0x27e4] ss:$20 sps:$4 sm:$0xff]  }
 0x4ee   : > { %11434 = vmatprep.mubr.bf16.mxu0 %v17097_v38  ;;  %11606 = vmatprep.mubr.bf16.mxu1 %v17097_v38 }
 0x4f0   : > { %11405 = vmatpush1.bf16.msra.mxu0 %v16335_v42  ;;  %11577 = vmatpush1.bf16.msra.mxu1 %v16338_v2  ;;  %v16422_v42 = vld [vmem:[#allocation2 + $0x27e0] ss:$20 sps:$4 sm:$0xff]   ;;  %v16427_v2 = vld [vmem:[#allocation2 + $0x2804] ss:$20 sps:$4 sm:$0xff]  }
 0x4f1   : > { %11406 = vmatprep.subr.bf16.mxu0 %v16343_v43  ;;  %11578 = vmatprep.subr.bf16.mxu1 %v16346_v57  ;;  %v16430_v43 = vld [vmem:[#allocation2 + $0x280c] ss:$20 sps:$4 sm:$0xff]   ;;  %v16644_v57 = vld [vmem:[%s16770_s6 + $0x8] ss:$28 sps:$4 sm:$0x7f]  }
 0x4f4   : > { %11407 = vmatpush1.bf16.msra.mxu0 %v16341_v0  ;;  %11579 = vmatpush1.bf16.msra.mxu1 %v16344_v34  ;;  %v17104_v0 = vrot.slane %v16644_v57, 2  ;;  %v16425_v34 = vld [vmem:[#allocation2 + $0x2800] ss:$20 sps:$4 sm:$0xff]   ;;  %v16506_v57 = vld [vmem:[#allocation2 + $0x2a10] ss:$20 sps:$4 sm:$0xff]  }
 0x4f5   : > { %11408 = vmatprep.subr.bf16.mxu0 %v16349_v8  ;;  %11580 = vmatprep.subr.bf16.mxu1 %v16352_v46  ;;  %v16428_v8 = vld [vmem:[#allocation2 + $0x2808] ss:$20 sps:$4 sm:$0xff]   ;;  %v16433_v46 = vld [vmem:[#allocation2 + $0x282c] ss:$20 sps:$4 sm:$0xff]  }
 0x4f8   : > { %11409 = vmatpush1.bf16.msra.mxu0 %v16347_v50  ;;  %11581 = vmatpush1.bf16.msra.mxu1 %v16350_v61  ;;  %v16436_v50 = vld [vmem:[#allocation2 + $0x2834] ss:$20 sps:$4 sm:$0xff]  }
 0x4f9   : > { %11410 = vmatprep.subr.bf16.mxu0 %v16355_v62  ;;  %11582 = vmatprep.subr.bf16.mxu1 %v16358_v63  ;;  %v16645_v61 = vld [vmem:[%s16770_s6 + $0x14] ss:$28 sps:$4 sm:$0x7f]   ;;  %v16431_v63 = vld [vmem:[#allocation2 + $0x2828] ss:$20 sps:$4 sm:$0xff]  }
 0x4fa   : > { %v17107_v62 = vrot.slane %v16645_v61, 2 }
 0x4fc   : > { %11411 = vmatpush1.bf16.msra.mxu0 %v16353_v23  ;;  %11583 = vmatpush1.bf16.msra.mxu1 %v16356_v13  ;;  %v16434_v23 = vld [vmem:[#allocation2 + $0x2830] ss:$20 sps:$4 sm:$0xff]   ;;  %v16439_v13 = vld [vmem:[#allocation2 + $0x2854] ss:$20 sps:$4 sm:$0xff]  }
 0x4fd   : > { %11412 = vmatprep.subr.bf16.mxu0 %v16361_v4  ;;  %11584 = vmatprep.subr.bf16.mxu1 %v16364_v12  ;;  %v16442_v4 = vld [vmem:[#allocation2 + $0x285c] ss:$20 sps:$4 sm:$0xff]  }
 0x4fe   : > { %v16437_v12 = vld [vmem:[#allocation2 + $0x2850] ss:$20 sps:$4 sm:$0xff]  }
 0x500   : > { %11413 = vmatpush1.bf16.msra.mxu0 %v16359_v30  ;;  %11585 = vmatpush1.bf16.msra.mxu1 %v16362_v5  ;;  %v16440_v30 = vld [vmem:[#allocation2 + $0x2858] ss:$20 sps:$4 sm:$0xff]   ;;  %v16445_v5 = vld [vmem:[#allocation2 + $0x287c] ss:$20 sps:$4 sm:$0xff]  }
 0x501   : > { %11414 = vmatprep.subr.bf16.mxu0 %v16367_v55  ;;  %11586 = vmatprep.subr.bf16.mxu1 %v16370_v11  ;;  %v16448_v55 = vld [vmem:[#allocation2 + $0x2884] ss:$20 sps:$4 sm:$0xff]  }
 0x502   : > { %v16443_v11 = vld [vmem:[#allocation2 + $0x2878] ss:$20 sps:$4 sm:$0xff]  }
 0x504   : > { %11415 = vmatpush1.bf16.msra.mxu0 %v16365_v15  ;;  %11587 = vmatpush1.bf16.msra.mxu1 %v16368_v51  ;;  %v16446_v15 = vld [vmem:[#allocation2 + $0x2880] ss:$20 sps:$4 sm:$0xff]   ;;  %v16451_v51 = vld [vmem:[#allocation2 + $0x28a4] ss:$20 sps:$4 sm:$0xff]  }
 0x505   : > { %11416 = vmatprep.subr.bf16.mxu0 %v16373_v14  ;;  %11588 = vmatprep.subr.bf16.mxu1 %v16376_v19  ;;  %v16454_v14 = vld [vmem:[#allocation2 + $0x28ac] ss:$20 sps:$4 sm:$0xff]  }
 0x506   : > { %v16449_v19 = vld [vmem:[#allocation2 + $0x28a0] ss:$20 sps:$4 sm:$0xff]  }
 0x508   : > { %11417 = vmatpush1.bf16.msra.mxu0 %v16371_v24  ;;  %11589 = vmatpush1.bf16.msra.mxu1 %v16374_v47  ;;  %v16452_v24 = vld [vmem:[#allocation2 + $0x28a8] ss:$20 sps:$4 sm:$0xff]   ;;  %v16457_v47 = vld [vmem:[#allocation2 + $0x28cc] ss:$20 sps:$4 sm:$0xff]  }
 0x509   : > { %11418 = vmatprep.subr.bf16.mxu0 %v16379_v39  ;;  %11590 = vmatprep.subr.bf16.mxu1 %v16382_v44  ;;  %v16460_v39 = vld [vmem:[#allocation2 + $0x28d4] ss:$20 sps:$4 sm:$0xff]  }
 0x50a   : > { %v16455_v44 = vld [vmem:[#allocation2 + $0x28c8] ss:$20 sps:$4 sm:$0xff]  }
 0x50c   : > { %11419 = vmatpush1.bf16.msra.mxu0 %v16377_v25  ;;  %11591 = vmatpush1.bf16.msra.mxu1 %v16380_v16  ;;  %v16458_v25 = vld [vmem:[#allocation2 + $0x28d0] ss:$20 sps:$4 sm:$0xff]   ;;  %v16463_v16 = vld [vmem:[#allocation2 + $0x28f4] ss:$20 sps:$4 sm:$0xff]  }
 0x50d   : > { %11420 = vmatprep.subr.bf16.mxu0 %v16385_v45  ;;  %11592 = vmatprep.subr.bf16.mxu1 %v16388_v54  ;;  %v16466_v45 = vld [vmem:[#allocation2 + $0x28fc] ss:$20 sps:$4 sm:$0xff]  }
 0x50e   : > { %v16461_v54 = vld [vmem:[#allocation2 + $0x28f0] ss:$20 sps:$4 sm:$0xff]  }
 0x510   : > { %11421 = vmatpush1.bf16.msra.mxu0 %v16383_v52  ;;  %11593 = vmatpush1.bf16.msra.mxu1 %v16386_v21  ;;  %v16464_v52 = vld [vmem:[#allocation2 + $0x28f8] ss:$20 sps:$4 sm:$0xff]   ;;  %v16469_v21 = vld [vmem:[#allocation2 + $0x291c] ss:$20 sps:$4 sm:$0xff]  }
 0x511   : > { %11422 = vmatprep.subr.bf16.mxu0 %v16391_v20  ;;  %11594 = vmatprep.subr.bf16.mxu1 %v16394_v53  ;;  %v16472_v20 = vld [vmem:[#allocation2 + $0x2924] ss:$20 sps:$4 sm:$0xff]  }
 0x512   : > { %v16467_v53 = vld [vmem:[#allocation2 + $0x2918] ss:$20 sps:$4 sm:$0xff]  }
 0x514   : > { %11423 = vmatpush1.bf16.msra.mxu0 %v16389_v22  ;;  %11595 = vmatpush1.bf16.msra.mxu1 %v16392_v26  ;;  %v16470_v22 = vld [vmem:[#allocation2 + $0x2920] ss:$20 sps:$4 sm:$0xff]   ;;  %v16475_v26 = vld [vmem:[#allocation2 + $0x2944] ss:$20 sps:$4 sm:$0xff]  }
 0x515   : > { %11424 = vmatprep.subr.bf16.mxu0 %v16397_v27  ;;  %11596 = vmatprep.subr.bf16.mxu1 %v16400_v29  ;;  %v16478_v27 = vld [vmem:[#allocation2 + $0x294c] ss:$20 sps:$4 sm:$0xff]  }
 0x516   : > { %v16473_v29 = vld [vmem:[#allocation2 + $0x2940] ss:$20 sps:$4 sm:$0xff]  }
 0x518   : > { %11425 = vmatpush1.bf16.msra.mxu0 %v16395_v31  ;;  %11597 = vmatpush1.bf16.msra.mxu1 %v16398_v32  ;;  %v16476_v31 = vld [vmem:[#allocation2 + $0x2948] ss:$20 sps:$4 sm:$0xff]   ;;  %v16481_v32 = vld [vmem:[#allocation2 + $0x296c] ss:$20 sps:$4 sm:$0xff]  }
 0x519   : > { %11426 = vmatprep.subr.bf16.mxu0 %v16403_v37  ;;  %11598 = vmatprep.subr.bf16.mxu1 %v16406_v17  ;;  %v16484_v37 = vld [vmem:[#allocation2 + $0x2974] ss:$20 sps:$4 sm:$0xff]  }
 0x51a   : > { %v16479_v17 = vld [vmem:[#allocation2 + $0x2968] ss:$20 sps:$4 sm:$0xff]  }
 0x51c   : > { %11427 = vmatpush1.bf16.msra.mxu0 %v16401_v40  ;;  %11599 = vmatpush1.bf16.msra.mxu1 %v16404_v3  ;;  %v16482_v40 = vld [vmem:[#allocation2 + $0x2970] ss:$20 sps:$4 sm:$0xff]   ;;  %v16487_v3 = vld [vmem:[#allocation2 + $0x2994] ss:$20 sps:$4 sm:$0xff]  }
 0x51d   : > { %11428 = vmatprep.subr.bf16.mxu0 %v16409_v7  ;;  %11600 = vmatprep.subr.bf16.mxu1 %v16412_v33  ;;  %v16490_v7 = vld [vmem:[#allocation2 + $0x299c] ss:$20 sps:$4 sm:$0xff]  }
 0x51e   : > { %v16485_v33 = vld [vmem:[#allocation2 + $0x2990] ss:$20 sps:$4 sm:$0xff]  }
 0x520   : > { %11429 = vmatpush1.bf16.msra.mxu0 %v16407_v48  ;;  %11601 = vmatpush1.bf16.msra.mxu1 %v16410_v58  ;;  %v16488_v48 = vld [vmem:[#allocation2 + $0x2998] ss:$20 sps:$4 sm:$0xff]   ;;  %v16493_v58 = vld [vmem:[#allocation2 + $0x29bc] ss:$20 sps:$4 sm:$0xff]  }
 0x521   : > { %11430 = vmatprep.subr.bf16.mxu0 %v16415_v9  ;;  %11602 = vmatprep.subr.bf16.mxu1 %v16418_v60  ;;  %v16496_v9 = vld [vmem:[#allocation2 + $0x29c4] ss:$20 sps:$4 sm:$0xff]  }
 0x522   : > { %v16491_v60 = vld [vmem:[#allocation2 + $0x29b8] ss:$20 sps:$4 sm:$0xff]  }
 0x524   : > { %11431 = vmatpush1.bf16.msra.mxu0 %v16413_v1  ;;  %11603 = vmatpush1.bf16.msra.mxu1 %v16416_v6  ;;  %v16494_v1 = vld [vmem:[#allocation2 + $0x29c0] ss:$20 sps:$4 sm:$0xff]   ;;  %v16499_v6 = vld [vmem:[#allocation2 + $0x29e4] ss:$20 sps:$4 sm:$0xff]  }
 0x525   : > { %11432 = vmatprep.subr.bf16.mxu0 %v16421_v49  ;;  %11604 = vmatprep.subr.bf16.mxu1 %v16424_v41  ;;  %v16502_v49 = vld [vmem:[#allocation2 + $0x29ec] ss:$20 sps:$4 sm:$0xff]  }
 0x526   : > { %v16497_v41 = vld [vmem:[#allocation2 + $0x29e0] ss:$20 sps:$4 sm:$0xff]  }
 0x528   : > { %11433 = vmatpush1.bf16.msra.mxu0 %v16419_v59  ;;  %11605 = vmatpush1.bf16.msra.mxu1 %v16422_v42  ;;  %v16500_v59 = vld [vmem:[#allocation2 + $0x29e8] ss:$20 sps:$4 sm:$0xff]   ;;  %v16505_v42 = vld [vmem:[#allocation2 + $0x2a0c] ss:$20 sps:$4 sm:$0xff]  }
 0x529   : > { %11445 = vmatprep.subr.bf16.mxu0 %v16427_v2  ;;  %11617 = vmatprep.subr.bf16.mxu1 %v16430_v43  ;;  %v16508_v2 = vld [vmem:[#allocation2 + $0x2a14] ss:$20 sps:$4 sm:$0xff]  }
 0x52a   : > { %v16503_v43 = vld [vmem:[#allocation2 + $0x2a08] ss:$20 sps:$4 sm:$0xff]  }
 0x52b   : > { %11435 = vmatmul.mubr.bf16.vlgmr.msra.gmra.mrb[0].mxu0 %v17104_v0  ;;  %11607 = vmatmul.mubr.bf16.vlgmr.msra.gmra.mrb[0].mxu1 %v17104_v0 }
 0x52c   : > { %11446 = vmatpush1.bf16.msra.mxu0 %v16425_v34  ;;  %11618 = vmatpush1.bf16.msra.mxu1 %v16428_v8  ;;  %v16511_v34 = vld [vmem:[#allocation2 + $0x2a34] ss:$20 sps:$4 sm:$0xff]   ;;  %v16514_v8 = vld [vmem:[#allocation2 + $0x2a3c] ss:$20 sps:$4 sm:$0xff]  }
 0x52d   : > { %11447 = vmatprep.subr.bf16.mxu0 %v16433_v46  ;;  %11619 = vmatprep.subr.bf16.mxu1 %v16436_v50 }
 0x52e   : > { %11477 = vmatprep.mubr.bf16.mxu0 %v17107_v62  ;;  %11649 = vmatprep.mubr.bf16.mxu1 %v17107_v62 }
 0x530   : > { %11448 = vmatpush1.bf16.msra.mxu0 %v16431_v63  ;;  %11620 = vmatpush1.bf16.msra.mxu1 %v16434_v23 }
 0x531   : > { %11449 = vmatprep.subr.bf16.mxu0 %v16439_v13  ;;  %11621 = vmatprep.subr.bf16.mxu1 %v16442_v4 }
 0x534   : > { %11450 = vmatpush1.bf16.msra.mxu0 %v16437_v12  ;;  %11622 = vmatpush1.bf16.msra.mxu1 %v16440_v30  ;;  %v16509_v30 = vld [vmem:[#allocation2 + $0x2a30] ss:$20 sps:$4 sm:$0xff]  }
 0x535   : > { %11451 = vmatprep.subr.bf16.mxu0 %v16445_v5  ;;  %11623 = vmatprep.subr.bf16.mxu1 %v16448_v55  ;;  %v16512_v5 = vld [vmem:[#allocation2 + $0x2a38] ss:$20 sps:$4 sm:$0xff]  }
 0x538   : > { %11452 = vmatpush1.bf16.msra.mxu0 %v16443_v11  ;;  %11624 = vmatpush1.bf16.msra.mxu1 %v16446_v15  ;;  %v16517_v15 = vld [vmem:[#allocation2 + $0x2a5c] ss:$20 sps:$4 sm:$0xff]  }
 0x539   : > { %11453 = vmatprep.subr.bf16.mxu0 %v16451_v51  ;;  %11625 = vmatprep.subr.bf16.mxu1 %v16454_v14  ;;  %v16520_v51 = vld [vmem:[#allocation2 + $0x2a64] ss:$20 sps:$4 sm:$0xff]  }
 0x53c   : > { %11454 = vmatpush1.bf16.msra.mxu0 %v16449_v19  ;;  %11626 = vmatpush1.bf16.msra.mxu1 %v16452_v24 }
 0x53d   : > { %11455 = vmatprep.subr.bf16.mxu0 %v16457_v47  ;;  %11627 = vmatprep.subr.bf16.mxu1 %v16460_v39  ;;  %v16515_v39 = vld [vmem:[#allocation2 + $0x2a58] ss:$20 sps:$4 sm:$0xff]  }
 0x540   : > { %11456 = vmatpush1.bf16.msra.mxu0 %v16455_v44  ;;  %11628 = vmatpush1.bf16.msra.mxu1 %v16458_v25  ;;  %v16518_v44 = vld [vmem:[#allocation2 + $0x2a60] ss:$20 sps:$4 sm:$0xff]   ;;  %v16523_v25 = vld [vmem:[#allocation2 + $0x2a84] ss:$20 sps:$4 sm:$0xff]  }
 0x541   : > { %11457 = vmatprep.subr.bf16.mxu0 %v16463_v16  ;;  %11629 = vmatprep.subr.bf16.mxu1 %v16466_v45  ;;  %v16526_v16 = vld [vmem:[#allocation2 + $0x2a8c] ss:$20 sps:$4 sm:$0xff]  }
 0x542   : > { %v16646_v45 = vld [vmem:[%s16770_s6 + $0x10] ss:$28 sps:$4 sm:$0x7f]  }
 0x544   : > { %11458 = vmatpush1.bf16.msra.mxu0 %v16461_v54  ;;  %11630 = vmatpush1.bf16.msra.mxu1 %v16464_v52  ;;  %v17118_v54 = vrot.slane %v16646_v45, 2  ;;  %v16521_v52 = vld [vmem:[#allocation2 + $0x2a80] ss:$20 sps:$4 sm:$0xff]   ;;  %v16583_v45 = vld [vmem:[#allocation2 + $0x2388] ss:$20 sps:$4 sm:$0xff]  }
 0x545   : > { %11459 = vmatprep.subr.bf16.mxu0 %v16469_v21  ;;  %11631 = vmatprep.subr.bf16.mxu1 %v16472_v20  ;;  %v16524_v21 = vld [vmem:[#allocation2 + $0x2a88] ss:$20 sps:$4 sm:$0xff]   ;;  %v16529_v20 = vld [vmem:[#allocation2 + $0x2aac] ss:$20 sps:$4 sm:$0xff]  }
 0x548   : > { %11460 = vmatpush1.bf16.msra.mxu0 %v16467_v53  ;;  %11632 = vmatpush1.bf16.msra.mxu1 %v16470_v22  ;;  %v16532_v53 = vld [vmem:[#allocation2 + $0x2ab4] ss:$20 sps:$4 sm:$0xff]  }
 0x549   : > { %11461 = vmatprep.subr.bf16.mxu0 %v16475_v26  ;;  %11633 = vmatprep.subr.bf16.mxu1 %v16478_v27  ;;  %v16527_v22 = vld [vmem:[#allocation2 + $0x2aa8] ss:$20 sps:$4 sm:$0xff]   ;;  %v16530_v26 = vld [vmem:[#allocation2 + $0x2ab0] ss:$20 sps:$4 sm:$0xff]  }
 0x54a   : > { %v16535_v27 = vld [vmem:[#allocation2 + $0x2ad4] ss:$20 sps:$4 sm:$0xff]  }
 0x54c   : > { %11462 = vmatpush1.bf16.msra.mxu0 %v16473_v29  ;;  %11634 = vmatpush1.bf16.msra.mxu1 %v16476_v31  ;;  %v16538_v29 = vld [vmem:[#allocation2 + $0x2adc] ss:$20 sps:$4 sm:$0xff]  }
 0x54d   : > { %11463 = vmatprep.subr.bf16.mxu0 %v16481_v32  ;;  %11635 = vmatprep.subr.bf16.mxu1 %v16484_v37  ;;  %v16533_v31 = vld [vmem:[#allocation2 + $0x2ad0] ss:$20 sps:$4 sm:$0xff]   ;;  %v16536_v32 = vld [vmem:[#allocation2 + $0x2ad8] ss:$20 sps:$4 sm:$0xff]  }
 0x54e   : > { %v16541_v37 = vld [vmem:[#allocation2 + $0x2afc] ss:$20 sps:$4 sm:$0xff]  }
 0x550   : > { %11464 = vmatpush1.bf16.msra.mxu0 %v16479_v17  ;;  %11636 = vmatpush1.bf16.msra.mxu1 %v16482_v40  ;;  %v16544_v17 = vld [vmem:[#allocation2 + $0x2b04] ss:$20 sps:$4 sm:$0xff]  }
 0x551   : > { %11465 = vmatprep.subr.bf16.mxu0 %v16487_v3  ;;  %11637 = vmatprep.subr.bf16.mxu1 %v16490_v7  ;;  %v16539_v40 = vld [vmem:[#allocation2 + $0x2af8] ss:$20 sps:$4 sm:$0xff]   ;;  %v16542_v3 = vld [vmem:[#allocation2 + $0x2b00] ss:$20 sps:$4 sm:$0xff]  }
 0x552   : > { %v16547_v7 = vld [vmem:[#allocation2 + $0x2b24] ss:$20 sps:$4 sm:$0xff]  }
 0x554   : > { %11466 = vmatpush1.bf16.msra.mxu0 %v16485_v33  ;;  %11638 = vmatpush1.bf16.msra.mxu1 %v16488_v48  ;;  %v16550_v33 = vld [vmem:[#allocation2 + $0x2b2c] ss:$20 sps:$4 sm:$0xff]  }
 0x555   : > { %11467 = vmatprep.subr.bf16.mxu0 %v16493_v58  ;;  %11639 = vmatprep.subr.bf16.mxu1 %v16496_v9  ;;  %v16545_v48 = vld [vmem:[#allocation2 + $0x2b20] ss:$20 sps:$4 sm:$0xff]  }
 0x556   : > { %v16553_v58 = vld [vmem:[#allocation2 + $0x2b4c] ss:$20 sps:$4 sm:$0xff]   ;;  %v16556_v9 = vld [vmem:[#allocation2 + $0x2b54] ss:$20 sps:$4 sm:$0xff]  }
 0x558   : > { %11468 = vmatpush1.bf16.msra.mxu0 %v16491_v60  ;;  %11640 = vmatpush1.bf16.msra.mxu1 %v16494_v1  ;;  %v16551_v60 = vld [vmem:[#allocation2 + $0x2b48] ss:$20 sps:$4 sm:$0xff]   ;;  %v16554_v1 = vld [vmem:[#allocation2 + $0x2b50] ss:$20 sps:$4 sm:$0xff]  }
 0x559   : > { %11469 = vmatprep.subr.bf16.mxu0 %v16499_v6  ;;  %11641 = vmatprep.subr.bf16.mxu1 %v16502_v49  ;;  %v16559_v6 = vld [vmem:[#allocation2 + $0x2b74] ss:$20 sps:$4 sm:$0xff]   ;;  %v16562_v49 = vld [vmem:[#allocation2 + $0x2b7c] ss:$20 sps:$4 sm:$0xff]  }
 0x55c   : > { %11470 = vmatpush1.bf16.msra.mxu0 %v16497_v41  ;;  %11642 = vmatpush1.bf16.msra.mxu1 %v16500_v59 }
 0x55d   : > { %11471 = vmatprep.subr.bf16.mxu0 %v16505_v42  ;;  %11643 = vmatprep.subr.bf16.mxu1 %v16508_v2 }
 0x55e   : > { %v14158_v46 = vpop.f32.mrb[28].mxu0  ;;  %v14180_v50 = vpop.f32.mrb[20].mxu1 }
 0x55f   : > { %v14159_v61 = vpop.f32.mrb[29].mxu0  ;;  %v14181_v63 = vpop.f32.mrb[21].mxu1 }
 0x560   : > { %v14160_v23 = vadd.f32 %v14159_v61, %v14158_v46  ;;  %v14182_v13 = vadd.f32 %v14181_v63, %v14180_v50  ;;  %v14161_v4 = vpop.f32.mrb[30].mxu0  ;;  %v14183_v12 = vpop.f32.mrb[22].mxu1  ;;  %11472 = vmatpush1.bf16.msra.mxu0 %v16503_v43  ;;  %11644 = vmatpush1.bf16.msra.mxu1 %v16506_v57  ;;  %v16557_v43 = vld [vmem:[#allocation2 + $0x2b70] ss:$20 sps:$4 sm:$0xff]   ;;  %v16560_v57 = vld [vmem:[#allocation2 + $0x2b78] ss:$20 sps:$4 sm:$0xff]  }
 0x561   : > { %v14162_v55 = vpop.f32.mrb[31].mxu0  ;;  %v14184_v11 = vpop.f32.mrb[23].mxu1  ;;  %11473 = vmatprep.subr.bf16.mxu0 %v16511_v34  ;;  %11645 = vmatprep.subr.bf16.mxu1 %v16514_v8  ;;  %v16565_v8 = vld [vmem:[#allocation2 + $0x2b9c] ss:$20 sps:$4 sm:$0xff]   ;;  %v16568_v46 = vld [vmem:[#allocation2 + $0x2ba4] ss:$20 sps:$4 sm:$0xff]  }
 0x562   : > { %v17113_v14 = vadd.f32 %v14182_v13, %v14160_v23  ;;  %v14163_v19 = vadd.f32 %v14162_v55, %v14161_v4  ;;  %v14185_v24 = vadd.f32 %v14184_v11, %v14183_v12  ;;  %v16563_v13 = vld [vmem:[#allocation2 + $0x2b98] ss:$20 sps:$4 sm:$0xff]   ;;  %v16566_v4 = vld [vmem:[#allocation2 + $0x2ba0] ss:$20 sps:$4 sm:$0xff]   ;;  %v16569_v12 = vld [vmem:[#allocation2 + $0x2450] ss:$20 sps:$4 sm:$0xff]  }
 0x563   : > { %v16647_v55 = vld [vmem:[%s16770_s6 + $0x18] ss:$28 sps:$4 sm:$0x7f]  }
 0x564   : > { %v17115_v47 = vadd.f32 %v14185_v24, %v14163_v19  ;;  %11474 = vmatpush1.bf16.msra.mxu0 %v16509_v30  ;;  %11646 = vmatpush1.bf16.msra.mxu1 %v16512_v5  ;;  %v16570_v30 = vld [vmem:[#allocation2 + $0x26d0] ss:$20 sps:$4 sm:$0xff]   ;;  %v17133_v11 = vrot.slane %v16647_v55, 2  ;;  %v16575_v19 = vld [vmem:[#allocation2 + $0x2338] ss:$20 sps:$4 sm:$0xff]  }
 0x565   : > { %11475 = vmatprep.subr.bf16.mxu0 %v16517_v15  ;;  %11647 = vmatprep.subr.bf16.mxu1 %v16520_v51  ;;  %v16572_v15 = vld [vmem:[#allocation2 + $0x2590] ss:$20 sps:$4 sm:$0xff]   ;;  %v16573_v51 = vld [vmem:[#allocation2 + $0x2478] ss:$20 sps:$4 sm:$0xff]   ;;  %v16577_v24 = vld [vmem:[#allocation2 + $0x24a0] ss:$20 sps:$4 sm:$0xff]  }
 0x568   : > { %11476 = vmatpush1.bf16.msra.mxu0 %v16515_v39  ;;  %11648 = vmatpush1.bf16.msra.mxu1 %v16518_v44  ;;  %v16579_v39 = vld [vmem:[#allocation2 + $0x2360] ss:$20 sps:$4 sm:$0xff]  }
 0x569   : > { %11488 = vmatprep.subr.bf16.mxu0 %v16523_v25  ;;  %11660 = vmatprep.subr.bf16.mxu1 %v16526_v16  ;;  %v16580_v44 = vld [vmem:[#allocation2 + $0x25e0] ss:$20 sps:$4 sm:$0xff]   ;;  %v16581_v25 = vld [vmem:[#allocation2 + $0x24c8] ss:$20 sps:$4 sm:$0xff]  }
 0x56a   : > { %v16582_v16 = vld [vmem:[#allocation2 + $0x2748] ss:$20 sps:$4 sm:$0xff]  }
 0x56b   : > { %11478 = vmatmul.mubr.bf16.vlgmr.msra.gmra.mrb[0].mxu0 %v17118_v54  ;;  %11650 = vmatmul.mubr.bf16.vlgmr.msra.gmra.mrb[0].mxu1 %v17118_v54 }
 0x56c   : > { %11489 = vmatpush1.bf16.msra.mxu0 %v16521_v52  ;;  %11661 = vmatpush1.bf16.msra.mxu1 %v16524_v21  ;;  %v16584_v52 = vld [vmem:[#allocation2 + $0x2608] ss:$20 sps:$4 sm:$0xff]   ;;  %v16585_v21 = vld [vmem:[#allocation2 + $0x24f0] ss:$20 sps:$4 sm:$0xff]  }
 0x56d   : > { %11490 = vmatprep.subr.bf16.mxu0 %v16529_v20  ;;  %11662 = vmatprep.subr.bf16.mxu1 %v16532_v53  ;;  %v16586_v20 = vld [vmem:[#allocation2 + $0x2770] ss:$20 sps:$4 sm:$0xff]   ;;  %v16589_v53 = vld [vmem:[#allocation2 + $0x2518] ss:$20 sps:$4 sm:$0xff]  }
 0x56e   : > { %11520 = vmatprep.mubr.bf16.mxu0 %v16691_v18  ;;  %11692 = vmatprep.mubr.bf16.mxu1 %v16691_v18  ;;  %v16548_v18 = vld [vmem:[#allocation2 + $0x2b28] ss:$20 sps:$4 sm:$0xff]  }
 0x570   : > { %11491 = vmatpush1.bf16.msra.mxu0 %v16527_v22  ;;  %11663 = vmatpush1.bf16.msra.mxu1 %v16530_v26  ;;  %v16590_v22 = vld [vmem:[#allocation2 + $0x2798] ss:$20 sps:$4 sm:$0xff]  }
 0x571   : > { %11492 = vmatprep.subr.bf16.mxu0 %v16535_v27  ;;  %11664 = vmatprep.subr.bf16.mxu1 %v16538_v29  ;;  %v16591_v26 = vld [vmem:[#allocation2 + $0x23d8] ss:$20 sps:$4 sm:$0xff]   ;;  %v16593_v29 = vld [vmem:[#allocation2 + $0x2540] ss:$20 sps:$4 sm:$0xff]  }
 0x572   : > { %v16592_v27 = vld [vmem:[#allocation2 + $0x2658] ss:$20 sps:$4 sm:$0xff]  }
 0x574   : > { %11493 = vmatpush1.bf16.msra.mxu0 %v16533_v31  ;;  %11665 = vmatpush1.bf16.msra.mxu1 %v16536_v32  ;;  %v16594_v31 = vld [vmem:[#allocation2 + $0x27c0] ss:$20 sps:$4 sm:$0xff]  }
 0x575   : > { %11494 = vmatprep.subr.bf16.mxu0 %v16541_v37  ;;  %11666 = vmatprep.subr.bf16.mxu1 %v16544_v17  ;;  %v16595_v32 = vld [vmem:[#allocation2 + $0x2400] ss:$20 sps:$4 sm:$0xff]   ;;  %v16597_v17 = vld [vmem:[#allocation2 + $0x2568] ss:$20 sps:$4 sm:$0xff]  }
 0x576   : > { %v16596_v37 = vld [vmem:[#allocation2 + $0x2680] ss:$20 sps:$4 sm:$0xff]  }
 0x578   : > { %11495 = vmatpush1.bf16.msra.mxu0 %v16539_v40  ;;  %11667 = vmatpush1.bf16.msra.mxu1 %v16542_v3  ;;  %v16598_v40 = vld [vmem:[#allocation2 + $0x27e8] ss:$20 sps:$4 sm:$0xff]  }
 0x579   : > { %11496 = vmatprep.subr.bf16.mxu0 %v16547_v7  ;;  %11668 = vmatprep.subr.bf16.mxu1 %v16550_v33  ;;  %v16599_v3 = vld [vmem:[#allocation2 + $0x2428] ss:$20 sps:$4 sm:$0xff]   ;;  %v16601_v33 = vld [vmem:[#allocation2 + $0x2950] ss:$20 sps:$4 sm:$0xff]  }
 0x57a   : > { %v16600_v7 = vld [vmem:[#allocation2 + $0x26a8] ss:$20 sps:$4 sm:$0xff]  }
 0x57c   : > { %11497 = vmatpush1.bf16.msra.mxu0 %v16545_v48  ;;  %11669 = vmatpush1.bf16.msra.mxu1 %v16548_v18  ;;  %v16602_v48 = vld [vmem:[#allocation2 + $0x2810] ss:$20 sps:$4 sm:$0xff]  }
 0x57d   : > { %11498 = vmatprep.subr.bf16.mxu0 %v16553_v58  ;;  %11670 = vmatprep.subr.bf16.mxu1 %v16556_v9  ;;  %v16603_v18 = vld [vmem:[#allocation2 + $0x2a90] ss:$20 sps:$4 sm:$0xff]   ;;  %v16604_v58 = vld [vmem:[#allocation2 + $0x2978] ss:$20 sps:$4 sm:$0xff]  }
 0x57e   : > { %v14202_v41 = vpop.f32.mrb[32].mxu0  ;;  %v16605_v9 = vld [vmem:[#allocation2 + $0x2838] ss:$20 sps:$4 sm:$0xff]  }
 0x57f   : > { %v14203_v59 = vpop.f32.mrb[33].mxu0 }
 0x580   : > { %v14204_v42 = vadd.f32 %v14203_v59, %v14202_v41  ;;  %v14205_v2 = vpop.f32.mrb[34].mxu0  ;;  %11499 = vmatpush1.bf16.msra.mxu0 %v16551_v60  ;;  %11671 = vmatpush1.bf16.msra.mxu1 %v16554_v1  ;;  %v16606_v60 = vld [vmem:[#allocation2 + $0x2ab8] ss:$20 sps:$4 sm:$0xff]   ;;  %v16607_v1 = vld [vmem:[#allocation2 + $0x29a0] ss:$20 sps:$4 sm:$0xff]  }
 0x581   : > { %v14206_v34 = vpop.f32.mrb[35].mxu0  ;;  %11500 = vmatprep.subr.bf16.mxu0 %v16559_v6  ;;  %11672 = vmatprep.subr.bf16.mxu1 %v16562_v49  ;;  %v16608_v6 = vld [vmem:[#allocation2 + $0x2860] ss:$20 sps:$4 sm:$0xff]   ;;  %v16612_v41 = vld [vmem:[#allocation2 + $0x2b08] ss:$20 sps:$4 sm:$0xff]  }
 0x582   : > { %v9495_v50 = vadd.f32 %v14204_v42, %v17113_v14  ;;  %v14207_v61 = vadd.f32 %v14206_v34, %v14205_v2  ;;  %v16574_v14 = vld [vmem:[#allocation2 + $0x26f8] ss:$20 sps:$4 sm:$0xff]   ;;  %v16609_v49 = vld [vmem:[#allocation2 + $0x2ae0] ss:$20 sps:$4 sm:$0xff]   ;;  %v16613_v59 = vld [vmem:[#allocation2 + $0x29f0] ss:$20 sps:$4 sm:$0xff]  }
 0x583   : > { %v16615_v42 = vld [vmem:[#allocation2 + $0x2b30] ss:$20 sps:$4 sm:$0xff]   ;;  %v16616_v2 = vld [vmem:[#allocation2 + $0x2a18] ss:$20 sps:$4 sm:$0xff]   ;;  %v16619_v34 = vld [vmem:[#allocation2 + $0x2a40] ss:$20 sps:$4 sm:$0xff]  }
 0x584   : > { %v17126_v63 = vadd.f32 %v17061_v10, %v9495_v50  ;;  %v9498_v23 = vadd.f32 %v14207_v61, %v17115_v47  ;;  %11501 = vmatpush1.bf16.msra.mxu0 %v16557_v43  ;;  %11673 = vmatpush1.bf16.msra.mxu1 %v16560_v57  ;;  %v16571_v10 = vld [vmem:[#allocation2 + $0x2310] ss:$20 sps:$4 sm:$0xff]   ;;  %v16578_v47 = vld [vmem:[#allocation2 + $0x2720] ss:$20 sps:$4 sm:$0xff]   ;;  %v16617_v43 = vld [vmem:[#allocation2 + $0x28d8] ss:$20 sps:$4 sm:$0xff]  }
 0x585   : > { %11502 = vmatprep.subr.bf16.mxu0 %v16565_v8  ;;  %11674 = vmatprep.subr.bf16.mxu1 %v16568_v46  ;;  %v16618_v57 = vld [vmem:[#allocation2 + $0x2b58] ss:$20 sps:$4 sm:$0xff]   ;;  %v16620_v8 = vld [vmem:[#allocation2 + $0x2900] ss:$20 sps:$4 sm:$0xff]   ;;  %v16622_v50 = vld [vmem:[#allocation2 + $0x2a68] ss:$20 sps:$4 sm:$0xff]  }
 0x586   : > { %v17130_v5 = vadd.f32 %v17065_v35, %v9498_v23  ;;  %v16576_v35 = vld [vmem:[#allocation2 + $0x25b8] ss:$20 sps:$4 sm:$0xff]   ;;  %v16621_v46 = vld [vmem:[#allocation2 + $0x2b80] ss:$20 sps:$4 sm:$0xff]   ;;  %v16623_v61 = vld [vmem:[#allocation2 + $0x2928] ss:$20 sps:$4 sm:$0xff]  }
 0x587   : > { %v16624_v23 = vld [vmem:[#allocation2 + $0x2ba8] ss:$20 sps:$4 sm:$0xff]  }
 0x588   : > { %11503 = vmatpush1.bf16.msra.mxu0 %v16563_v13  ;;  %11675 = vmatpush1.bf16.msra.mxu1 %v16566_v4  ;;  %v11877_v13 = vlaneseq }
 0x589   : > { %14217 = vmatprep.subr.bf16.mxu0 %v16569_v12  ;;  %14239 = vmatprep.subr.bf16.mxu1 %v16570_v30 }
 0x58a   : > { %v17156_v4 = vshrl.u32 %v11877_v13, 7  ;;  %v11880_v55 = vand.u32 127, %v11877_v13 }
 0x58b   : > { %11521 = vmatmul.mubr.bf16.vlgmr.msra.gmra.mrb[0].mxu0 %v17133_v11  ;;  %11693 = vmatmul.mubr.bf16.vlgmr.msra.gmra.mrb[0].mxu1 %v17133_v11 }
 0x58c   : > { %14218 = vmatpush3.bf16.msra.mxu0 %v16571_v10  ;;  %14240 = vmatpush3.bf16.msra.mxu1 %v16572_v15  ;;  %v11881_v10 = vmul.u32 2, %v17156_v4 }
 0x58d   : > { %14219 = vmatprep.subr.bf16.mxu0 %v16573_v51  ;;  %14241 = vmatprep.subr.bf16.mxu1 %v16574_v14 }
 0x58e   : > { %11735 = vmatprep.mubr.bf16.mxu0 %v17087_v36  ;;  %11776 = vmatprep.mubr.bf16.mxu1 %v17097_v38  ;;  %v16587_v36 = vld [vmem:[#allocation2 + $0x23b0] ss:$20 sps:$4 sm:$0xff]   ;;  %vm11882_vm4 = vcmp.eq.s32.totalorder %v11880_v55, %v11881_v10 }
 0x58f   : > { %v16588_v38 = vld [vmem:[#allocation2 + $0x2630] ss:$20 sps:$4 sm:$0xff]  }
 0x590   : > { %14220 = vmatpush3.bf16.msra.mxu0 %v16575_v19  ;;  %14242 = vmatpush3.bf16.msra.mxu1 %v16576_v35 }
 0x591   : > { %14221 = vmatprep.subr.bf16.mxu0 %v16577_v24  ;;  %14243 = vmatprep.subr.bf16.mxu1 %v16578_v47  ;;  %v12367_v47 = vsub.s32 1, %v17156_v4 }
 0x594   : > { %14222 = vmatpush3.bf16.msra.mxu0 %v16579_v39  ;;  %14244 = vmatpush3.bf16.msra.mxu1 %v16580_v44 }
 0x595   : > { %14223 = vmatprep.subr.bf16.mxu0 %v16581_v25  ;;  %14245 = vmatprep.subr.bf16.mxu1 %v16582_v16  ;;  %v12117_v25 = vadd.s32 1, %v11881_v10  ;;  %v13893_v16 = vsel %vm11882_vm4, 1.0, %v16692_v56 }
 0x597   : > { %vm12118_vm6 = vcmp.eq.s32.totalorder %v11880_v55, %v12117_v25 }
 0x598   : > { %14224 = vmatpush3.bf16.msra.mxu0 %v16583_v45  ;;  %14246 = vmatpush3.bf16.msra.mxu1 %v16584_v52  ;;  %v16695_v45 = vmov 0.0|0.0   ;;  %v13902_v52 = vsel %vm12118_vm6, 1.0, %v16692_v56 }
 0x599   : > { %14225 = vmatprep.subr.bf16.mxu0 %v16585_v21  ;;  %14247 = vmatprep.subr.bf16.mxu1 %v16586_v20 }
 0x59c   : > { %14226 = vmatpush3.bf16.msra.mxu0 %v16587_v36  ;;  %14248 = vmatpush3.bf16.msra.mxu1 %v16588_v38 }
 0x59d   : > { %14227 = vmatprep.subr.bf16.mxu0 %v16589_v53  ;;  %14249 = vmatprep.subr.bf16.mxu1 %v16590_v22 }
 0x5a0   : > { %14228 = vmatpush3.bf16.msra.mxu0 %v16591_v26  ;;  %14250 = vmatpush3.bf16.msra.mxu1 %v16592_v27 }
 0x5a1   : > { %14229 = vmatprep.subr.bf16.mxu0 %v16593_v29  ;;  %14251 = vmatprep.subr.bf16.mxu1 %v16594_v31 }
 0x5a4   : > { %14230 = vmatpush3.bf16.msra.mxu0 %v16595_v32  ;;  %14252 = vmatpush3.bf16.msra.mxu1 %v16596_v37 }
 0x5a5   : > { %14231 = vmatprep.subr.bf16.mxu0 %v16597_v17  ;;  %14253 = vmatprep.subr.bf16.mxu1 %v16598_v40 }
 0x5a8   : > { %14232 = vmatpush3.bf16.msra.mxu0 %v16599_v3  ;;  %14254 = vmatpush3.bf16.msra.mxu1 %v16600_v7 }
 0x5a9   : > { %14261 = vmatprep.subr.bf16.mxu0 %v16601_v33  ;;  %14378 = vmatprep.subr.bf16.mxu1 %v16692_v56 }
 0x5ab   : > { %11736 = vmatmul.mubr.bf16.vlgmr.msra.gmra.mrb[36].mxu0 %v17094_v28  ;;  %11777 = vmatmul.mubr.bf16.vlgmr.msra.gmra.mrb[24].mxu1 %v17104_v0  ;;  %v16610_v28 = vld [vmem:[#allocation2 + $0x29c8] ss:$20 sps:$4 sm:$0xff]  }
 0x5ac   : > { %14262 = vmatpush3.bf16.msra.mxu0 %v16602_v48  ;;  %14379 = vmatpush3.bf16.msra.mxu1 %v16603_v18  ;;  %v16611_v0 = vld [vmem:[#allocation2 + $0x2888] ss:$20 sps:$4 sm:$0xff]  }
 0x5ad   : > { %14263 = vmatprep.subr.bf16.mxu0 %v16604_v58  ;;  %14380 = vmatprep.subr.bf16.mxu1 %v16692_v56 }
 0x5ae   : > { %11817 = vmatprep.mubr.bf16.mxu0 %v17107_v62  ;;  %14394 = vmatprep.mubr.msk.bf16.mxu1 %vm16693_vm0, %v16692_v56  ;;  %v16614_v62 = vld [vmem:[#allocation2 + $0x28b0] ss:$20 sps:$4 sm:$0xff]  }
 0x5b0   : > { %14264 = vmatpush3.bf16.msra.mxu0 %v16605_v9  ;;  %14381 = vmatpush3.bf16.msra.mxu1 %v16606_v60 }
 0x5b1   : > { %14265 = vmatprep.subr.bf16.mxu0 %v16607_v1  ;;  %14382 = vmatprep.subr.bf16.mxu1 %v16692_v56 }
 0x5b4   : > { %14266 = vmatpush3.bf16.msra.mxu0 %v16608_v6  ;;  %14383 = vmatpush3.bf16.msra.mxu1 %v16609_v49 }
 0x5b5   : > { %14267 = vmatprep.subr.bf16.mxu0 %v16610_v28  ;;  %14384 = vmatprep.subr.bf16.mxu1 %v16692_v56 }
 0x5b8   : > { %14268 = vmatpush3.bf16.msra.mxu0 %v16611_v0  ;;  %14385 = vmatpush3.bf16.msra.mxu1 %v16612_v41 }
 0x5b9   : > { %14269 = vmatprep.subr.bf16.mxu0 %v16613_v59  ;;  %14386 = vmatprep.subr.bf16.mxu1 %v16692_v56 }
 0x5bc   : > { %14270 = vmatpush3.bf16.msra.mxu0 %v16614_v62  ;;  %14387 = vmatpush3.bf16.msra.mxu1 %v16615_v42 }
 0x5bd   : > { %14271 = vmatprep.subr.bf16.mxu0 %v16616_v2  ;;  %14388 = vmatprep.subr.bf16.mxu1 %v16692_v56 }
 0x5c0   : > { %14272 = vmatpush3.bf16.msra.mxu0 %v16617_v43  ;;  %14389 = vmatpush3.bf16.msra.mxu1 %v16618_v57 }
 0x5c1   : > { %14273 = vmatprep.subr.bf16.mxu0 %v16619_v34  ;;  %14390 = vmatprep.subr.bf16.mxu1 %v16692_v56 }
 0x5c4   : > { %14274 = vmatpush3.bf16.msra.mxu0 %v16620_v8  ;;  %14391 = vmatpush3.bf16.msra.mxu1 %v16621_v46 }
 0x5c5   : > { %14275 = vmatprep.subr.bf16.mxu0 %v16622_v50  ;;  %14392 = vmatprep.subr.bf16.mxu1 %v16692_v56 }
 0x5c8   : > { %14276 = vmatpush3.bf16.msra.mxu0 %v16623_v61  ;;  %14393 = vmatpush3.bf16.msra.mxu1 %v16624_v23 }
 0x5cb   : > { %11818 = vmatmul.mubr.bf16.vlgmr.msra.gmra.mrb[40].mxu0 %v17118_v54  ;;  %14395 = vmatmul.mubr.bf16.vlgmr.msra.gmra.mrb[8].mxu1 %v17133_v11 }
 0x5cc   : > { %12040 = vmatprep.mubr.f32.mxu1 %v16692_v56  ;;  %11969 = vmatprep.mubr.f32.mxu0 %v16692_v56 }
 0x65e   : > { %v11522_v12 = vpop.f32.mrb[0].mxu0  ;;  %v11694_v30 = vpop.f32.mrb[0].mxu1 }
 0x65f   : > { %v11524_v15 = vpop.f32.mrb[1].mxu0  ;;  %v11696_v51 = vpop.f32.mrb[1].mxu1 }
 0x660   : > { %v11526_v14 = vpop.f32.mrb[2].mxu0  ;;  %v11698_v19 = vpop.f32.mrb[2].mxu1 }
 0x661   : > { %v14415_v54 = vpack.c.bf16 %v11526_v14, %v11522_v12  ;;  %v17159_v35 = vpack.c.bf16 %v11698_v19, %v11694_v30  ;;  %v11528_v11 = vpop.f32.mrb[3].mxu0  ;;  %v11700_v24 = vpop.f32.mrb[3].mxu1 }
 0x662   : > { %v14412_v39 = vpack.c.bf16 %v11528_v11, %v11524_v15  ;;  %v14418_v44 = vpack.c.bf16 %v11700_v24, %v11696_v51  ;;  %v12371_v15 = vsub.s32 2, %v17156_v4  ;;  %v12359_v51 = vld [vmem:[%s17226_s2] sm:$0x7]  ;;  %v12363_v24 = vsub.s32 0, %v17156_v4 }
 0x664   : > { %14414 = vmatprep.subr.msk.bf16.mxu0 %vm17161_vm3, %v14412_v39  ;;  %14420 = vmatprep.subr.msk.bf16.mxu1 %vm17161_vm3, %v14418_v44  ;;  %v12372_v14 = vrot.slane %v12359_v51, %v12371_v15 }
 0x665   : > { %14417 = vmatpush1.bf16.msk.msra.mxu0 %vm17161_vm3, %v14415_v54  ;;  %14423 = vmatpush1.bf16.msk.msra.mxu1 %vm17161_vm3, %v17159_v35 }
 0x666   : > { %14430 = vmatprep.subr.msk.bf16.mxu1 %vm17161_vm3, %v14412_v39  ;;  %14424 = vmatprep.subr.bf16.mxu0 %v16695_v45 }
 0x668   : > { %13899 = vmatmul.mubr.msk.f32.vlgmr.msra.gmra.mrb[28].mxu1 %vm11885_vm5, %v13893_v16  ;;  %13896 = vmatmul.mubr.msk.f32.vlgmr.msra.gmra.mrb[44].mxu0 %vm11885_vm5, %v13893_v16 }
 0x669   : > { %14433 = vmatpush1.bf16.msk.msra.mxu1 %vm17161_vm3, %v14415_v54  ;;  %12188 = vmatprep.mubr.f32.mxu1 %v16692_v56 }
 0x66a   : > { %14440 = vmatprep.subr.bf16.mxu1 %v16695_v45  ;;  %14402 = vmatprep.mubr.msk.f32.mxu0 %vm16693_vm0, %v16692_v56  ;;  %v12368_v45 = vrot.slane %v12359_v51, %v12367_v47 }
 0x66c   : > { %13905 = vmatmul.mubr.msk.f32.vlgmr.msra.gmra.mrb[30].mxu1 %vm11885_vm5, %v13902_v52 }
 0x66d   : > { %14409 = vmatprep.mubr.msk.f32.mxu1 %vm16693_vm0, %v16692_v56  ;;  %vm12401_vm0 = vmor %vm12400_vm15, %vm12397_vm14 }
 0x67e   : > { %v14233_v21 = vpop.f32.mrb[36].mxu0  ;;  %v14255_v20 = vpop.f32.mrb[24].mxu1 }
 0x67f   : > { %v14234_v36 = vpop.f32.mrb[37].mxu0  ;;  %v14256_v38 = vpop.f32.mrb[25].mxu1 }
 0x680   : > { %v14235_v53 = vadd.f32 %v14234_v36, %v14233_v21  ;;  %v14257_v22 = vadd.f32 %v14256_v38, %v14255_v20  ;;  %v14236_v26 = vpop.f32.mrb[38].mxu0  ;;  %v14258_v27 = vpop.f32.mrb[26].mxu1 }
 0x681   : > { %v14237_v29 = vpop.f32.mrb[39].mxu0  ;;  %v14259_v31 = vpop.f32.mrb[27].mxu1 }
 0x682   : > { %v11779_v32 = vadd.f32 %v14257_v22, %v14235_v53  ;;  %v14238_v37 = vadd.f32 %v14237_v29, %v14236_v26  ;;  %v14260_v17 = vadd.f32 %v14259_v31, %v14258_v27  ;;  %v12402_v29 = vld [vmem:[%s17211_s15] sm:$0x77] }
 0x684   : > { %v11782_v40 = vadd.f32 %v14260_v17, %v14238_v37 }
 0x69e   : > { %v14277_v3 = vpop.f32.mrb[40].mxu0  ;;  %v11860_v7 = vpop.f32.mrb[8].mxu1 }
 0x69f   : > { %v14278_v33 = vpop.f32.mrb[41].mxu0  ;;  %v14396_v48 = vpop.f32.mrb[9].mxu1 }
 0x6a0   : > { %v14279_v18 = vadd.f32 %v14278_v33, %v14277_v3  ;;  %v14280_v58 = vpop.f32.mrb[42].mxu0  ;;  %v11863_v9 = vpop.f32.mrb[10].mxu1 }
 0x6a1   : > { %v14281_v60 = vpop.f32.mrb[43].mxu0  ;;  %v14397_v1 = vpop.f32.mrb[11].mxu1 }
 0x6a2   : > { %v11820_v6 = vadd.f32 %v14279_v18, %v11779_v32  ;;  %v14282_v49 = vadd.f32 %v14281_v60, %v14280_v58 }
 0x6a4   : > { %v14449_v28 = vadd.f32 %v17126_v63, %v11820_v6  ;;  %v11823_v0 = vadd.f32 %v14282_v49, %v11782_v40 }
 0x6a6   : > { %v14450_v41 = vadd.f32 %v14449_v28, %v11860_v7  ;;  %v14456_v59 = vadd.f32 %v17130_v5, %v11823_v0 }
 0x6a8   : > { %v14457_v62 = vadd.f32 %v14456_v59, %v11863_v9 }
 0x6aa   : > { %v14425_v42 = vpack.c.bf16 %v14457_v62, %v14450_v41 }
 0x6ac   : > { %14427 = vmatpush3.bf16.msk.msra.mxu0 %vm17161_vm3, %v14425_v42  ;;  %14443 = vmatpush3.bf16.msk.msra.mxu1 %vm17161_vm3, %v14425_v42 }
 0x6ad   : > { %14436 = vmatprep.subr.msk.bf16.mxu0 %vm17161_vm3, %v14418_v44  ;;  %v12407_v44 = vld [vmem:[%s17211_s15 + $0x8] sm:$0x7] }
 0x6af   : > { %14403 = vmatmul.mubr.msk.f32.vlgmr.msra.gmra.mrb[46].mxu0 %vm11885_vm5, %v13893_v16  ;;  %14410 = vmatmul.mubr.msk.f32.vlgmr.msra.gmra.mrb[32].mxu1 %vm11885_vm5, %v13902_v52  ;;  %v12364_v16 = vrot.slane %v12359_v51, %v12363_v24 }
 0x6b0   : > { %14439 = vmatpush1.bf16.msk.msra.mxu0 %vm17161_vm3, %v17159_v35  ;;  %12259 = vmatprep.mubr.f32.mxu0 %v16692_v56 }
 0x6b3   : > { %13908 = vmatmul.mubr.msk.f32.vlgmr.msra.gmra.mrb[48].mxu0 %vm11885_vm5, %v13902_v52 }
 0x73b   : > { %v12042_v63 = vpop.f32.mrb[28].mxu1  ;;  %v11971_v5 = vpop.f32.mrb[44].mxu0 }
 0x73c   : > { %v12044_v2 = vpop.f32.mrb[29].mxu1  ;;  %v11973_v43 = vpop.f32.mrb[45].mxu0 }
 0x73f   : > { %v12190_v57 = vpop.f32.mrb[30].mxu1 }
 0x740   : > { %v12336_v34 = vmax.f32 %v11971_v5, %v12190_v57  ;;  %v12192_v8 = vpop.f32.mrb[31].mxu1 }
 0x741   : > { %v12337_v46 = vmax.f32 %v11973_v43, %v12192_v8 }
 0x782   : > { %v12113_v50 = vpop.f32.mrb[46].mxu0  ;;  %v12332_v61 = vpop.f32.mrb[32].mxu1 }
 0x783   : > { %v12340_v23 = vmax.f32 %v12113_v50, %v12332_v61  ;;  %v14404_v13 = vpop.f32.mrb[47].mxu0  ;;  %v14411_v12 = vpop.f32.mrb[33].mxu1 }
 0x785   : > { %12348 = vrot.lane.b32.xlu1 %v12340_v23, %s16696_s7 }
 0x786   : > { %v12261_v30 = vpop.f32.mrb[48].mxu0 }
 0x787   : > { %v12338_v56 = vmax.f32 %v12042_v63, %v12261_v30  ;;  %v12263_v55 = vpop.f32.mrb[49].mxu0 }
 0x788   : > { %v12339_v10 = vmax.f32 %v12044_v2, %v12263_v55 }
 0x789   : > { %12344 = vrot.lane.b32.xlu0 %v12338_v56, %s16696_s7 }
 0x78d   : > { %12346 = vrot.lane.b32.xlu0 %v12339_v10, %s16696_s7 }
 0x7f7   : > { %v12349_v19 = vpop.permute.xlu1 %12348 }
 0x7f8   : > { %v12358_v54 = vmax.f32 %v12338_v56, %v12349_v19 }
 0x7fa   : > { %v12378_v35 = vadd.f32 %v12372_v14, %v12358_v54 }
 0x7fb   : > { %v12345_v11 = vpop.permute.xlu0 %12344 }
 0x7fc   : > { %v12381_v39 = vmax.f32 %v12378_v35, 0.0 }
 0x7fe   : > { %v13916_v25 = vpack.c.bf16 %v12381_v39, %v12381_v39 }
 0x7ff   : > { %v12347_v52 = vpop.permute.xlu0 %12346 }
 0x800   : > { %v12408_v21 = vsel %vm12406_vm9, %v13916_v25, %v12407_v44  ;;  %v12351_v20 = vsel %vm12350_vm10, %v12345_v11, %v12347_v52  ;;  %v12352_v36 = vsel %vm12350_vm10, %v12347_v52, %v12349_v19 }
 0x801   : > { %12409 = vst [vmem:[%s17211_s15 + $0x8] sm:$0x7] %v12408_v21  ;;  %v12356_v38 = vmax.f32 %v12336_v34, %v12351_v20  ;;  %v12357_v4 = vmax.f32 %v12337_v46, %v12352_v36 }
 0x803   : > { %v12376_v53 = vadd.f32 %v12364_v16, %v12356_v38  ;;  %v12377_v22 = vadd.f32 %v12368_v45, %v12357_v4 }
 0x805   : > { %v12379_v26 = vmax.f32 %v12376_v53, 0.0  ;;  %v12380_v27 = vmax.f32 %v12377_v22, 0.0 }
 0x807   : > { %v13915_v31 = vpack.c.bf16 %v12380_v27, %v12379_v26 }
 0x809   : > { %v12403_v32 = vsel %vm12401_vm0, %v13915_v31, %v12402_v29 }
 0x80a   : > { %12404 = vst [vmem:[%s17211_s15] sm:$0x77] %v12403_v32 }
 0x80b PF: > { %s14_s12 = sadd.s32 1, %s16686_s12  }
 0x80c   : > { %p11_p3 = scmp.ge.s32.totalorder %s14_s12, 4  }
 0x80e   :  { %13 = sbr.rel (!%p11_p3) target bundleno = 1 (0x1), region = 71 }
 0x815   :  { %12431 = vsyncpa [#allocation3], 1 }
 0x816   :  { %12433 = vsyncpa [#allocation3 + $0x1], 1 }

</bundles_post_ra>
